<compile_context>
chip_gen: v5e
topology: v5e:2x2
jax: 0.10.0
libtpu: 0.0.40
codegen_flags: <defaults>
</compile_context>

<pallas_src>
import functools

import jax
import jax.numpy as jnp
from jax import lax
from jax.experimental import pallas as pl


# --------------------------------------------------------------------------- kernel
def _make_st_encoder_kernel(seq_len, batch, hidden, num_layers):
    L, B, H = seq_len, batch, hidden
    R = L * B  # time-major flat rows: row = t * B + b

    def kernel(*refs):
        (traj_ref, mask_ref, t_ref, a_ref, x_ref,
         gcn_w_ref, gcn_b_ref,
         wqkv_ref, w1_ref, b1_ref, w2_ref, b2_ref, gam_ref, bet_ref) = refs[0:14]
        lstm_refs = refs[14:14 + 3 * num_layers]
        w_om_ref, u_om_ref, out_ref = refs[14 + 3 * num_layers:]

        f32 = jnp.float32
        D = t_ref.shape[1]
        n_nodes = a_ref.shape[0]

        # ------------------ GCN: relu(A_norm @ (X @ W) + b) ------------------
        xw = jnp.dot(x_ref[...], gcn_w_ref[...], preferred_element_type=f32)
        node_emb = jnp.maximum(
            jnp.dot(a_ref[...], xw, preferred_element_type=f32) + gcn_b_ref[...], 0.0)
        # TODO(synk): GCN F.dropout is identity (inference semantics).

        # -------- gather node embedding per (time, batch) row --------
        # one-hot matmul gather: MXU-friendly, no dynamic indexing inside the kernel
        mask = mask_ref[...]                                          # (R, 1)
        node_ids = lax.broadcasted_iota(jnp.int32, (R, n_nodes), 1)
        onehot = (node_ids == traj_ref[...]).astype(f32)              # (R, N)
        s_rows = jnp.dot(onehot, node_emb, preferred_element_type=f32) * mask
        t_rows = t_ref[...]                                           # zero at padding

        # ------------------ Co_Att: 2-token attention per row ------------------
        temp = float(D) ** 0.5
        h2 = jnp.concatenate([s_rows, t_rows], axis=0)                # (2R, D)
        qkv = jnp.dot(h2, wqkv_ref[...], preferred_element_type=f32)  # (2R, 3D)
        q, k, v = qkv[:, 0:D], qkv[:, D:2 * D], qkv[:, 2 * D:3 * D]
        qs, qt = q[0:R], q[R:2 * R]
        ks, kt = k[0:R], k[R:2 * R]
        vs, vt = v[0:R], v[R:2 * R]

        a_ss = jnp.sum(qs * ks, axis=-1, keepdims=True) / temp
        a_st = jnp.sum(qs * kt, axis=-1, keepdims=True) / temp
        a_ts = jnp.sum(qt * ks, axis=-1, keepdims=True) / temp
        a_tt = jnp.sum(qt * kt, axis=-1, keepdims=True) / temp

        m_s = jnp.maximum(a_ss, a_st)
        e_ss, e_st = jnp.exp(a_ss - m_s), jnp.exp(a_st - m_s)
        h_s = (e_ss * vs + e_st * vt) * pl.reciprocal(e_ss + e_st, approx=True)

        m_t = jnp.maximum(a_ts, a_tt)
        e_ts, e_tt = jnp.exp(a_ts - m_t), jnp.exp(a_tt - m_t)
        h_t = (e_ts * vs + e_tt * vt) * pl.reciprocal(e_ts + e_tt, approx=True)

        h_att = jnp.concatenate([h_s, h_t], axis=0)                   # (2R, D)
        ffn = jnp.maximum(
            jnp.dot(h_att, w1_ref[...], preferred_element_type=f32) + b1_ref[...], 0.0)
        ffn = jnp.dot(ffn, w2_ref[...], preferred_element_type=f32) + b2_ref[...]
        # TODO(synk): Co_Att FFN Dropout(0.1) is identity (inference semantics).
        o = ffn + h_att
        mu = jnp.mean(o, axis=-1, keepdims=True)
        var = jnp.mean((o - mu) * (o - mu), axis=-1, keepdims=True)
        o = (o - mu) * lax.rsqrt(var + 1e-6) * gam_ref[...] + bet_ref[...]

        st = jnp.concatenate([o[0:R], o[R:2 * R]], axis=1)            # (R, 2D) time-major

        # ---------- fused bidirectional LSTM layer (packed semantics) ----------
        def bilstm_layer(x_rows, wih_ref_, whh_ref_, b_ref_):
            # hoisted input projection for ALL timesteps and BOTH directions:
            # (R, I) @ (I, 8H) = [x @ W_ih_fwd + b_fwd | x @ W_ih_bwd + b_bwd]
            xg = jnp.dot(x_rows, wih_ref_[...], preferred_element_type=f32) + b_ref_[...]
            whh = whh_ref_[...]                                       # block-diag (2H, 8H)
            h_f = jnp.zeros((B, H), f32)
            c_f = jnp.zeros((B, H), f32)
            h_b = jnp.zeros((B, H), f32)
            c_b = jnp.zeros((B, H), f32)
            out_f = [None] * L
            out_b = [None] * L

            def cell(gates, c_prev):                                  # PyTorch i,f,g,o order
                i_g = jax.nn.sigmoid(gates[:, 0 * H:1 * H])
                f_g = jax.nn.sigmoid(gates[:, 1 * H:2 * H])
                g_g = jnp.tanh(gates[:, 2 * H:3 * H])
                o_g = jax.nn.sigmoid(gates[:, 3 * H:4 * H])
                c_new = f_g * c_prev + i_g * g_g
                h_new = o_g * jnp.tanh(c_new)
                return h_new, c_new

            for s in range(L):             # statically unrolled: all slices are static
                tb = L - 1 - s             # bwd direction walks time in reverse
                m_f = mask[s * B:(s + 1) * B]
                m_b = mask[tb * B:(tb + 1) * B]
                h_cat = jnp.concatenate([h_f, h_b], axis=1)           # (B, 2H)
                gh = jnp.dot(h_cat, whh, preferred_element_type=f32)  # (B, 8H)
                g_f = xg[s * B:(s + 1) * B, 0:4 * H] + gh[:, 0:4 * H]
                g_b = xg[tb * B:(tb + 1) * B, 4 * H:8 * H] + gh[:, 4 * H:8 * H]
                hn_f, cn_f = cell(g_f, c_f)
                hn_b, cn_b = cell(g_b, c_b)
                # packed-sequence semantics: padded steps neither update state nor emit
                c_f = m_f * cn_f + (1.0 - m_f) * c_f
                h_f = m_f * hn_f + (1.0 - m_f) * h_f
                c_b = m_b * cn_b + (1.0 - m_b) * c_b
                h_b = m_b * hn_b + (1.0 - m_b) * h_b
                out_f[s] = m_f * hn_f
                out_b[tb] = m_b * hn_b

            rows = [jnp.concatenate([out_f[t], out_b[t]], axis=1) for t in range(L)]
            return jnp.concatenate(rows, axis=0)                      # (R, 2H) time-major

        seq = st
        for layer in range(num_layers):
            wih_r, whh_r, b_r = lstm_refs[3 * layer:3 * layer + 3]
            seq = bilstm_layer(seq, wih_r, whh_r, b_r)
            # TODO(synk): inter-layer LSTM dropout is identity (inference semantics).

        # ---------------- masked attention pooling over time ----------------
        u = jnp.tanh(jnp.dot(seq, w_om_ref[...], preferred_element_type=f32))  # (R, 2H)
        att = jnp.dot(u, u_om_ref[...], preferred_element_type=f32)            # (R, 1)
        att = jnp.where(mask == 0.0, -1e10, att)
        att_bl = jnp.concatenate(
            [att[t * B:(t + 1) * B, :] for t in range(L)], axis=1)    # (B, L)
        att_bl = att_bl - jnp.max(att_bl, axis=1, keepdims=True)
        e = jnp.exp(att_bl)
        score = e * pl.reciprocal(jnp.sum(e, axis=1, keepdims=True), approx=True)
        pooled = jnp.zeros((B, 2 * H), f32)
        for t in range(L):
            pooled = pooled + score[:, t:t + 1] * seq[t * B:(t + 1) * B, :]
        out_ref[...] = pooled                                         # single (B, 2H) store

    return kernel


# --------------------------------------------------------------------------- wrapper
def st_encoder_forward(a_norm, x_feat, traj_idx, t_input, lengths, mask, params):
    del lengths  # sequence lengths are fully encoded by `mask`
    b, l = traj_idx.shape
    d = t_input.shape[2]
    h = params["w_omega"].shape[0] // 2
    num_layers = len(params["lstm"])

    # Time-major flat rows (row = t*B + b): the kernel then only takes static slices.
    traj_tm = jnp.transpose(traj_idx, (1, 0)).reshape(l * b, 1).astype(jnp.int32)
    mask_tm = jnp.transpose(mask, (1, 0)).reshape(l * b, 1).astype(jnp.float32)
    t_tm = jnp.transpose(t_input, (1, 0, 2)).reshape(l * b, d).astype(jnp.float32)

    ca = params["co_att"]
    args = [traj_tm, mask_tm, t_tm, a_norm, x_feat,
            params["gcn_w"], params["gcn_b"],
            ca["wqkv"], ca["w1"], ca["b1"], ca["w2"], ca["b2"], ca["gamma"], ca["beta"]]
    for lp in params["lstm"]:
        args += [lp["wih"], lp["whh"], lp["b"]]
    args += [params["w_omega"], params["u_omega"]]

    kernel = _make_st_encoder_kernel(l, b, h, num_layers)
    return pl.pallas_call(
        kernel,
        out_shape=jax.ShapeDtypeStruct((b, 2 * h), jnp.float32),
    )(*args)


def _fuse_bilstm_layer_params(per_dir, hidden):
    """Fuse fwd/bwd LSTM weights: W_ih column-stacked (I, 8H); W_hh block-diag (2H, 8H)."""
    wih = jnp.concatenate([per_dir["fwd"]["w_ih"], per_dir["bwd"]["w_ih"]], axis=1)
    whh = jnp.zeros((2 * hidden, 8 * hidden), jnp.float32)
    whh = whh.at[0:hidden, 0:4 * hidden].set(per_dir["fwd"]["w_hh"])
    whh = whh.at[hidden:2 * hidden, 4 * hidden:8 * hidden].set(per_dir["bwd"]["w_hh"])
    b = jnp.concatenate([per_dir["fwd"]["b"], per_dir["bwd"]["b"]], axis=1)
    return {"wih": wih, "whh": whh, "b": b}


# --------------------------------------------------------------------------- main
if __name__ == "__main__":
    B, L = 2, 8            # batch, max sequence length
    N = 16                 # graph nodes
    F_SZ = 8               # feature_size
    D = 32                 # date2vec_size == embedding_size (Co_Att stacking requires equality)
    H = 32                 # hidden_size
    NUM_LAYERS = 2

    key = jax.random.PRNGKey(0)
    keys = iter(jax.random.split(key, 64))
    nxt = lambda: next(keys)
    uni = lambda shape: jax.random.uniform(nxt(), shape, minval=-0.1, maxval=0.1,
                                           dtype=jnp.float32)

    # ---- sequence data
    lengths = jnp.array([8, 6], dtype=jnp.int32)
    mask = (jnp.arange(L)[None, :] < lengths[:, None]).astype(jnp.float32)   # (B, L)
    traj_idx = jax.random.randint(nxt(), (B, L), 0, N)
    traj_idx = jnp.where(mask.astype(bool), traj_idx, 0)
    time_raw = jax.random.normal(nxt(), (B, L, D), dtype=jnp.float32)
    t_input = time_raw * mask[:, :, None]                                    # zero-padded time embeddings

    # ---- graph: ring + self loops, symmetric GCN normalization (glue setup)
    x_feat = jax.random.normal(nxt(), (N, F_SZ), dtype=jnp.float32)
    adj = jnp.eye(N, dtype=jnp.float32)
    src = jnp.arange(N)
    adj = adj.at[src, (src + 1) % N].set(1.0)
    adj = adj.at[(src + 1) % N, src].set(1.0)
    dinv = 1.0 / jnp.sqrt(jnp.sum(adj, axis=1))
    a_norm = adj * dinv[:, None] * dinv[None, :]

    # ---- parameters (synthetic init; all Linear weights stored pre-transposed: y = x @ W_T)
    wq, wk, wv = uni((D, D)), uni((D, D)), uni((D, D))
    params = {
        "gcn_w": uni((F_SZ, D)),
        "gcn_b": uni((1, D)),
        "co_att": {
            "wqkv": jnp.concatenate([wq, wk, wv], axis=1),   # stacked Q/K/V projection (D, 3D)
            "w1": uni((D, D // 2)), "b1": uni((1, D // 2)),
            "w2": uni((D // 2, D)), "b2": uni((1, D)),
            "gamma": jnp.ones((1, D), jnp.float32),
            "beta": jnp.zeros((1, D), jnp.float32),
        },
        "lstm": [],
        "w_omega": uni((2 * H, 2 * H)),
        "u_omega": uni((2 * H, 1)),
    }
    for layer in range(NUM_LAYERS):
        in_sz = (D + D) if layer == 0 else 2 * H
        per_dir = {d: {"w_ih": uni((in_sz, 4 * H)),
                       "w_hh": uni((H, 4 * H)),
                       "b": uni((1, 4 * H))}     # b_ih + b_hh folded together
                   for d in ("fwd", "bwd")}
        params["lstm"].append(_fuse_bilstm_layer_params(per_dir, H))

    fwd = jax.jit(functools.partial(st_encoder_forward, params=params))
    out = fwd(a_norm, x_feat, traj_idx, t_input, lengths, mask)
    out = jax.block_until_ready(out)

    assert out.shape == (B, 2 * H), out.shape
    assert jnp.all(jnp.isfinite(out))
    print("KERNEL_OK")
</pallas_src>

<mosaic_0001>
module attributes {stable_mosaic.version = 11 : i64} {
  func.func @kernel(%arg0: memref<16x1xi32, #tpu.memory_space<vmem>>, %arg1: memref<16x1xf32, #tpu.memory_space<vmem>>, %arg2: memref<16x32xf32, #tpu.memory_space<vmem>>, %arg3: memref<16x16xf32, #tpu.memory_space<vmem>>, %arg4: memref<16x8xf32, #tpu.memory_space<vmem>>, %arg5: memref<8x32xf32, #tpu.memory_space<vmem>>, %arg6: memref<1x32xf32, #tpu.memory_space<vmem>>, %arg7: memref<32x96xf32, #tpu.memory_space<vmem>>, %arg8: memref<32x16xf32, #tpu.memory_space<vmem>>, %arg9: memref<1x16xf32, #tpu.memory_space<vmem>>, %arg10: memref<16x32xf32, #tpu.memory_space<vmem>>, %arg11: memref<1x32xf32, #tpu.memory_space<vmem>>, %arg12: memref<1x32xf32, #tpu.memory_space<vmem>>, %arg13: memref<1x32xf32, #tpu.memory_space<vmem>>, %arg14: memref<64x256xf32, #tpu.memory_space<vmem>>, %arg15: memref<64x256xf32, #tpu.memory_space<vmem>>, %arg16: memref<1x256xf32, #tpu.memory_space<vmem>>, %arg17: memref<64x256xf32, #tpu.memory_space<vmem>>, %arg18: memref<64x256xf32, #tpu.memory_space<vmem>>, %arg19: memref<1x256xf32, #tpu.memory_space<vmem>>, %arg20: memref<64x64xf32, #tpu.memory_space<vmem>>, %arg21: memref<64x1xf32, #tpu.memory_space<vmem>>, %arg22: memref<2x64xf32, #tpu.memory_space<vmem>>) attributes {dimension_semantics = [], scalar_prefetch = 0 : i64, scratch_operands = 0 : i64, tpu.core_type = #tpu.core_type<tc>} {
    %c0 = arith.constant 0 : index
    %c0_0 = arith.constant 0 : index
    %0 = vector.load %arg4[%c0, %c0_0] : memref<16x8xf32, #tpu.memory_space<vmem>>, vector<16x8xf32>
    %c0_1 = arith.constant 0 : index
    %c0_2 = arith.constant 0 : index
    %1 = vector.load %arg5[%c0_1, %c0_2] : memref<8x32xf32, #tpu.memory_space<vmem>>, vector<8x32xf32>
    %cst = arith.constant dense<0.000000e+00> : vector<16x32xf32>
    %2 = tpu.matmul %0, %1, %cst {dimension_numbers = #tpu.dot_dimension_numbers<[1], [0], [0], [1], [0, 0, 1, 1], [], []>} : vector<16x8xf32>, vector<8x32xf32>, vector<16x32xf32> -> vector<16x32xf32>
    %c0_3 = arith.constant 0 : index
    %c0_4 = arith.constant 0 : index
    %3 = vector.load %arg3[%c0_3, %c0_4] : memref<16x16xf32, #tpu.memory_space<vmem>>, vector<16x16xf32>
    %cst_5 = arith.constant dense<0.000000e+00> : vector<16x32xf32>
    %4 = tpu.matmul %3, %2, %cst_5 {dimension_numbers = #tpu.dot_dimension_numbers<[1], [0], [0], [1], [0, 0, 1, 1], [], []>} : vector<16x16xf32>, vector<16x32xf32>, vector<16x32xf32> -> vector<16x32xf32>
    %c0_6 = arith.constant 0 : index
    %c0_7 = arith.constant 0 : index
    %5 = vector.load %arg6[%c0_6, %c0_7] : memref<1x32xf32, #tpu.memory_space<vmem>>, vector<1x32xf32>
    %6 = vector.broadcast %5 : vector<1x32xf32> to vector<16x32xf32>
    %7 = arith.addf %4, %6 : vector<16x32xf32>
    %cst_8 = arith.constant 0.000000e+00 : f32
    %8 = vector.broadcast %cst_8 : f32 to vector<16x32xf32>
    %9 = arith.maximumf %7, %8 : vector<16x32xf32>
    %c0_9 = arith.constant 0 : index
    %c0_10 = arith.constant 0 : index
    %10 = vector.load %arg1[%c0_9, %c0_10] : memref<16x1xf32, #tpu.memory_space<vmem>>, vector<16x1xf32>
    %11 = tpu.iota {dimensions = array<i32: 1>} : vector<16x16xi32>
    %c0_11 = arith.constant 0 : index
    %c0_12 = arith.constant 0 : index
    %12 = vector.load %arg0[%c0_11, %c0_12] : memref<16x1xi32, #tpu.memory_space<vmem>>, vector<16x1xi32>
    %13 = vector.broadcast %12 : vector<16x1xi32> to vector<16x16xi32>
    %14 = arith.cmpi eq, %11, %13 : vector<16x16xi32>
    %15 = arith.extui %14 : vector<16x16xi1> to vector<16x16xi32>
    %16 = arith.sitofp %15 : vector<16x16xi32> to vector<16x16xf32>
    %cst_13 = arith.constant dense<0.000000e+00> : vector<16x32xf32>
    %17 = tpu.matmul %16, %9, %cst_13 {dimension_numbers = #tpu.dot_dimension_numbers<[1], [0], [0], [1], [0, 0, 1, 1], [], []>} : vector<16x16xf32>, vector<16x32xf32>, vector<16x32xf32> -> vector<16x32xf32>
    %18 = vector.broadcast %10 : vector<16x1xf32> to vector<16x32xf32>
    %19 = arith.mulf %17, %18 : vector<16x32xf32>
    %c0_14 = arith.constant 0 : index
    %c0_15 = arith.constant 0 : index
    %20 = vector.load %arg2[%c0_14, %c0_15] : memref<16x32xf32, #tpu.memory_space<vmem>>, vector<16x32xf32>
    %21 = tpu.concatenate %19, %20 in 0 : vector<16x32xf32>, vector<16x32xf32> -> vector<32x32xf32>
    %c0_16 = arith.constant 0 : index
    %c0_17 = arith.constant 0 : index
    %22 = vector.load %arg7[%c0_16, %c0_17] : memref<32x96xf32, #tpu.memory_space<vmem>>, vector<32x96xf32>
    %cst_18 = arith.constant dense<0.000000e+00> : vector<32x96xf32>
    %23 = tpu.matmul %21, %22, %cst_18 {dimension_numbers = #tpu.dot_dimension_numbers<[1], [0], [0], [1], [0, 0, 1, 1], [], []>} : vector<32x32xf32>, vector<32x96xf32>, vector<32x96xf32> -> vector<32x96xf32>
    %24 = vector.extract_strided_slice %23 {offsets = [0, 0], sizes = [32, 32], strides = [1, 1]} : vector<32x96xf32> to vector<32x32xf32>
    %25 = vector.extract_strided_slice %23 {offsets = [0, 32], sizes = [32, 32], strides = [1, 1]} : vector<32x96xf32> to vector<32x32xf32>
    %26 = vector.extract_strided_slice %23 {offsets = [0, 64], sizes = [32, 32], strides = [1, 1]} : vector<32x96xf32> to vector<32x32xf32>
    %27 = vector.extract_strided_slice %24 {offsets = [0, 0], sizes = [16, 32], strides = [1, 1]} : vector<32x32xf32> to vector<16x32xf32>
    %28 = vector.extract_strided_slice %24 {offsets = [16, 0], sizes = [16, 32], strides = [1, 1]} : vector<32x32xf32> to vector<16x32xf32>
    %29 = vector.extract_strided_slice %25 {offsets = [0, 0], sizes = [16, 32], strides = [1, 1]} : vector<32x32xf32> to vector<16x32xf32>
    %30 = vector.extract_strided_slice %25 {offsets = [16, 0], sizes = [16, 32], strides = [1, 1]} : vector<32x32xf32> to vector<16x32xf32>
    %31 = vector.extract_strided_slice %26 {offsets = [0, 0], sizes = [16, 32], strides = [1, 1]} : vector<32x32xf32> to vector<16x32xf32>
    %32 = vector.extract_strided_slice %26 {offsets = [16, 0], sizes = [16, 32], strides = [1, 1]} : vector<32x32xf32> to vector<16x32xf32>
    %33 = arith.mulf %27, %29 : vector<16x32xf32>
    %cst_19 = arith.constant dense<0.000000e+00> : vector<16xf32>
    %34 = vector.multi_reduction <add>, %33, %cst_19 [1] : vector<16x32xf32> to vector<16xf32>
    %35 = vector.shape_cast %34 : vector<16xf32> to vector<16x1xf32>
    %cst_20 = arith.constant 5.65685415 : f32
    %36 = vector.broadcast %cst_20 : f32 to vector<16x1xf32>
    %37 = arith.divf %35, %36 : vector<16x1xf32>
    %38 = arith.mulf %27, %30 : vector<16x32xf32>
    %cst_21 = arith.constant dense<0.000000e+00> : vector<16xf32>
    %39 = vector.multi_reduction <add>, %38, %cst_21 [1] : vector<16x32xf32> to vector<16xf32>
    %40 = vector.shape_cast %39 : vector<16xf32> to vector<16x1xf32>
    %cst_22 = arith.constant 5.65685415 : f32
    %41 = vector.broadcast %cst_22 : f32 to vector<16x1xf32>
    %42 = arith.divf %40, %41 : vector<16x1xf32>
    %43 = arith.mulf %28, %29 : vector<16x32xf32>
    %cst_23 = arith.constant dense<0.000000e+00> : vector<16xf32>
    %44 = vector.multi_reduction <add>, %43, %cst_23 [1] : vector<16x32xf32> to vector<16xf32>
    %45 = vector.shape_cast %44 : vector<16xf32> to vector<16x1xf32>
    %cst_24 = arith.constant 5.65685415 : f32
    %46 = vector.broadcast %cst_24 : f32 to vector<16x1xf32>
    %47 = arith.divf %45, %46 : vector<16x1xf32>
    %48 = arith.mulf %28, %30 : vector<16x32xf32>
    %cst_25 = arith.constant dense<0.000000e+00> : vector<16xf32>
    %49 = vector.multi_reduction <add>, %48, %cst_25 [1] : vector<16x32xf32> to vector<16xf32>
    %50 = vector.shape_cast %49 : vector<16xf32> to vector<16x1xf32>
    %cst_26 = arith.constant 5.65685415 : f32
    %51 = vector.broadcast %cst_26 : f32 to vector<16x1xf32>
    %52 = arith.divf %50, %51 : vector<16x1xf32>
    %53 = arith.maximumf %37, %42 : vector<16x1xf32>
    %54 = arith.subf %37, %53 : vector<16x1xf32>
    %55 = math.exp %54 : vector<16x1xf32>
    %56 = arith.subf %42, %53 : vector<16x1xf32>
    %57 = math.exp %56 : vector<16x1xf32>
    %58 = vector.broadcast %55 : vector<16x1xf32> to vector<16x32xf32>
    %59 = arith.mulf %58, %31 : vector<16x32xf32>
    %60 = vector.broadcast %57 : vector<16x1xf32> to vector<16x32xf32>
    %61 = arith.mulf %60, %32 : vector<16x32xf32>
    %62 = arith.addf %59, %61 : vector<16x32xf32>
    %63 = arith.addf %55, %57 : vector<16x1xf32>
    %64 = tpu.reciprocal %63 {approx = true} : vector<16x1xf32> -> vector<16x1xf32>
    %65 = vector.broadcast %64 : vector<16x1xf32> to vector<16x32xf32>
    %66 = arith.mulf %62, %65 : vector<16x32xf32>
    %67 = arith.maximumf %47, %52 : vector<16x1xf32>
    %68 = arith.subf %47, %67 : vector<16x1xf32>
    %69 = math.exp %68 : vector<16x1xf32>
    %70 = arith.subf %52, %67 : vector<16x1xf32>
    %71 = math.exp %70 : vector<16x1xf32>
    %72 = vector.broadcast %69 : vector<16x1xf32> to vector<16x32xf32>
    %73 = arith.mulf %72, %31 : vector<16x32xf32>
    %74 = vector.broadcast %71 : vector<16x1xf32> to vector<16x32xf32>
    %75 = arith.mulf %74, %32 : vector<16x32xf32>
    %76 = arith.addf %73, %75 : vector<16x32xf32>
    %77 = arith.addf %69, %71 : vector<16x1xf32>
    %78 = tpu.reciprocal %77 {approx = true} : vector<16x1xf32> -> vector<16x1xf32>
    %79 = vector.broadcast %78 : vector<16x1xf32> to vector<16x32xf32>
    %80 = arith.mulf %76, %79 : vector<16x32xf32>
    %81 = tpu.concatenate %66, %80 in 0 : vector<16x32xf32>, vector<16x32xf32> -> vector<32x32xf32>
    %c0_27 = arith.constant 0 : index
    %c0_28 = arith.constant 0 : index
    %82 = vector.load %arg8[%c0_27, %c0_28] : memref<32x16xf32, #tpu.memory_space<vmem>>, vector<32x16xf32>
    %cst_29 = arith.constant dense<0.000000e+00> : vector<32x16xf32>
    %83 = tpu.matmul %81, %82, %cst_29 {dimension_numbers = #tpu.dot_dimension_numbers<[1], [0], [0], [1], [0, 0, 1, 1], [], []>} : vector<32x32xf32>, vector<32x16xf32>, vector<32x16xf32> -> vector<32x16xf32>
    %c0_30 = arith.constant 0 : index
    %c0_31 = arith.constant 0 : index
    %84 = vector.load %arg9[%c0_30, %c0_31] : memref<1x16xf32, #tpu.memory_space<vmem>>, vector<1x16xf32>
    %85 = vector.broadcast %84 : vector<1x16xf32> to vector<32x16xf32>
    %86 = arith.addf %83, %85 : vector<32x16xf32>
    %cst_32 = arith.constant 0.000000e+00 : f32
    %87 = vector.broadcast %cst_32 : f32 to vector<32x16xf32>
    %88 = arith.maximumf %86, %87 : vector<32x16xf32>
    %c0_33 = arith.constant 0 : index
    %c0_34 = arith.constant 0 : index
    %89 = vector.load %arg10[%c0_33, %c0_34] : memref<16x32xf32, #tpu.memory_space<vmem>>, vector<16x32xf32>
    %cst_35 = arith.constant dense<0.000000e+00> : vector<32x32xf32>
    %90 = tpu.matmul %88, %89, %cst_35 {dimension_numbers = #tpu.dot_dimension_numbers<[1], [0], [0], [1], [0, 0, 1, 1], [], []>} : vector<32x16xf32>, vector<16x32xf32>, vector<32x32xf32> -> vector<32x32xf32>
    %c0_36 = arith.constant 0 : index
    %c0_37 = arith.constant 0 : index
    %91 = vector.load %arg11[%c0_36, %c0_37] : memref<1x32xf32, #tpu.memory_space<vmem>>, vector<1x32xf32>
    %92 = vector.broadcast %91 : vector<1x32xf32> to vector<32x32xf32>
    %93 = arith.addf %90, %92 : vector<32x32xf32>
    %94 = arith.addf %93, %81 : vector<32x32xf32>
    %cst_38 = arith.constant dense<0.000000e+00> : vector<32xf32>
    %95 = vector.multi_reduction <add>, %94, %cst_38 [1] : vector<32x32xf32> to vector<32xf32>
    %96 = vector.shape_cast %95 : vector<32xf32> to vector<32x1xf32>
    %cst_39 = arith.constant 3.200000e+01 : f32
    %97 = vector.broadcast %cst_39 : f32 to vector<32x1xf32>
    %98 = arith.divf %96, %97 : vector<32x1xf32>
    %99 = vector.broadcast %98 : vector<32x1xf32> to vector<32x32xf32>
    %100 = arith.subf %94, %99 : vector<32x32xf32>
    %101 = vector.broadcast %98 : vector<32x1xf32> to vector<32x32xf32>
    %102 = arith.subf %94, %101 : vector<32x32xf32>
    %103 = arith.mulf %100, %102 : vector<32x32xf32>
    %cst_40 = arith.constant dense<0.000000e+00> : vector<32xf32>
    %104 = vector.multi_reduction <add>, %103, %cst_40 [1] : vector<32x32xf32> to vector<32xf32>
    %105 = vector.shape_cast %104 : vector<32xf32> to vector<32x1xf32>
    %cst_41 = arith.constant 3.200000e+01 : f32
    %106 = vector.broadcast %cst_41 : f32 to vector<32x1xf32>
    %107 = arith.divf %105, %106 : vector<32x1xf32>
    %108 = vector.broadcast %98 : vector<32x1xf32> to vector<32x32xf32>
    %109 = arith.subf %94, %108 : vector<32x32xf32>
    %cst_42 = arith.constant 9.99999997E-7 : f32
    %110 = vector.broadcast %cst_42 : f32 to vector<32x1xf32>
    %111 = arith.addf %107, %110 : vector<32x1xf32>
    %112 = math.rsqrt %111 : vector<32x1xf32>
    %113 = vector.broadcast %112 : vector<32x1xf32> to vector<32x32xf32>
    %114 = arith.mulf %109, %113 : vector<32x32xf32>
    %c0_43 = arith.constant 0 : index
    %c0_44 = arith.constant 0 : index
    %115 = vector.load %arg12[%c0_43, %c0_44] : memref<1x32xf32, #tpu.memory_space<vmem>>, vector<1x32xf32>
    %116 = vector.broadcast %115 : vector<1x32xf32> to vector<32x32xf32>
    %117 = arith.mulf %114, %116 : vector<32x32xf32>
    %c0_45 = arith.constant 0 : index
    %c0_46 = arith.constant 0 : index
    %118 = vector.load %arg13[%c0_45, %c0_46] : memref<1x32xf32, #tpu.memory_space<vmem>>, vector<1x32xf32>
    %119 = vector.broadcast %118 : vector<1x32xf32> to vector<32x32xf32>
    %120 = arith.addf %117, %119 : vector<32x32xf32>
    %121 = vector.extract_strided_slice %120 {offsets = [0, 0], sizes = [16, 32], strides = [1, 1]} : vector<32x32xf32> to vector<16x32xf32>
    %122 = vector.extract_strided_slice %120 {offsets = [16, 0], sizes = [16, 32], strides = [1, 1]} : vector<32x32xf32> to vector<16x32xf32>
    %123 = tpu.concatenate %121, %122 in 1 : vector<16x32xf32>, vector<16x32xf32> -> vector<16x64xf32>
    %c0_47 = arith.constant 0 : index
    %c0_48 = arith.constant 0 : index
    %124 = vector.load %arg14[%c0_47, %c0_48] : memref<64x256xf32, #tpu.memory_space<vmem>>, vector<64x256xf32>
    %cst_49 = arith.constant dense<0.000000e+00> : vector<16x256xf32>
    %125 = tpu.matmul %123, %124, %cst_49 {dimension_numbers = #tpu.dot_dimension_numbers<[1], [0], [0], [1], [0, 0, 1, 1], [], []>} : vector<16x64xf32>, vector<64x256xf32>, vector<16x256xf32> -> vector<16x256xf32>
    %c0_50 = arith.constant 0 : index
    %c0_51 = arith.constant 0 : index
    %126 = vector.load %arg16[%c0_50, %c0_51] : memref<1x256xf32, #tpu.memory_space<vmem>>, vector<1x256xf32>
    %127 = vector.broadcast %126 : vector<1x256xf32> to vector<16x256xf32>
    %128 = arith.addf %125, %127 : vector<16x256xf32>
    %c0_52 = arith.constant 0 : index
    %c0_53 = arith.constant 0 : index
    %129 = vector.load %arg15[%c0_52, %c0_53] : memref<64x256xf32, #tpu.memory_space<vmem>>, vector<64x256xf32>
    %cst_54 = arith.constant 0.000000e+00 : f32
    %130 = vector.broadcast %cst_54 : f32 to vector<2x32xf32>
    %cst_55 = arith.constant 0.000000e+00 : f32
    %131 = vector.broadcast %cst_55 : f32 to vector<2x32xf32>
    %cst_56 = arith.constant 0.000000e+00 : f32
    %132 = vector.broadcast %cst_56 : f32 to vector<2x32xf32>
    %cst_57 = arith.constant 0.000000e+00 : f32
    %133 = vector.broadcast %cst_57 : f32 to vector<2x32xf32>
    %134 = vector.extract_strided_slice %10 {offsets = [0, 0], sizes = [2, 1], strides = [1, 1]} : vector<16x1xf32> to vector<2x1xf32>
    %135 = vector.extract_strided_slice %10 {offsets = [14, 0], sizes = [2, 1], strides = [1, 1]} : vector<16x1xf32> to vector<2x1xf32>
    %136 = tpu.concatenate %130, %132 in 1 : vector<2x32xf32>, vector<2x32xf32> -> vector<2x64xf32>
    %cst_58 = arith.constant dense<0.000000e+00> : vector<2x256xf32>
    %137 = tpu.matmul %136, %129, %cst_58 {dimension_numbers = #tpu.dot_dimension_numbers<[1], [0], [0], [1], [0, 0, 1, 1], [], []>} : vector<2x64xf32>, vector<64x256xf32>, vector<2x256xf32> -> vector<2x256xf32>
    %138 = vector.extract_strided_slice %128 {offsets = [0, 0], sizes = [2, 128], strides = [1, 1]} : vector<16x256xf32> to vector<2x128xf32>
    %139 = vector.extract_strided_slice %137 {offsets = [0, 0], sizes = [2, 128], strides = [1, 1]} : vector<2x256xf32> to vector<2x128xf32>
    %140 = arith.addf %138, %139 : vector<2x128xf32>
    %141 = vector.extract_strided_slice %128 {offsets = [14, 128], sizes = [2, 128], strides = [1, 1]} : vector<16x256xf32> to vector<2x128xf32>
    %142 = vector.extract_strided_slice %137 {offsets = [0, 128], sizes = [2, 128], strides = [1, 1]} : vector<2x256xf32> to vector<2x128xf32>
    %143 = arith.addf %141, %142 : vector<2x128xf32>
    %144 = vector.extract_strided_slice %140 {offsets = [0, 0], sizes = [2, 32], strides = [1, 1]} : vector<2x128xf32> to vector<2x32xf32>
    %145 = arith.negf %144 : vector<2x32xf32>
    %146 = math.exp %145 : vector<2x32xf32>
    %cst_59 = arith.constant 1.000000e+00 : f32
    %147 = vector.broadcast %cst_59 : f32 to vector<2x32xf32>
    %148 = arith.addf %147, %146 : vector<2x32xf32>
    %149 = arith.divf %147, %148 : vector<2x32xf32>
    %150 = vector.extract_strided_slice %140 {offsets = [0, 32], sizes = [2, 32], strides = [1, 1]} : vector<2x128xf32> to vector<2x32xf32>
    %151 = arith.negf %150 : vector<2x32xf32>
    %152 = math.exp %151 : vector<2x32xf32>
    %cst_60 = arith.constant 1.000000e+00 : f32
    %153 = vector.broadcast %cst_60 : f32 to vector<2x32xf32>
    %154 = arith.addf %153, %152 : vector<2x32xf32>
    %155 = arith.divf %153, %154 : vector<2x32xf32>
    %156 = vector.extract_strided_slice %140 {offsets = [0, 64], sizes = [2, 32], strides = [1, 1]} : vector<2x128xf32> to vector<2x32xf32>
    %157 = math.tanh %156 : vector<2x32xf32>
    %158 = vector.extract_strided_slice %140 {offsets = [0, 96], sizes = [2, 32], strides = [1, 1]} : vector<2x128xf32> to vector<2x32xf32>
    %159 = arith.negf %158 : vector<2x32xf32>
    %160 = math.exp %159 : vector<2x32xf32>
    %cst_61 = arith.constant 1.000000e+00 : f32
    %161 = vector.broadcast %cst_61 : f32 to vector<2x32xf32>
    %162 = arith.addf %161, %160 : vector<2x32xf32>
    %163 = arith.divf %161, %162 : vector<2x32xf32>
    %164 = arith.mulf %155, %131 : vector<2x32xf32>
    %165 = arith.mulf %149, %157 : vector<2x32xf32>
    %166 = arith.addf %164, %165 : vector<2x32xf32>
    %167 = math.tanh %166 : vector<2x32xf32>
    %168 = arith.mulf %163, %167 : vector<2x32xf32>
    %169 = vector.extract_strided_slice %143 {offsets = [0, 0], sizes = [2, 32], strides = [1, 1]} : vector<2x128xf32> to vector<2x32xf32>
    %170 = arith.negf %169 : vector<2x32xf32>
    %171 = math.exp %170 : vector<2x32xf32>
    %cst_62 = arith.constant 1.000000e+00 : f32
    %172 = vector.broadcast %cst_62 : f32 to vector<2x32xf32>
    %173 = arith.addf %172, %171 : vector<2x32xf32>
    %174 = arith.divf %172, %173 : vector<2x32xf32>
    %175 = vector.extract_strided_slice %143 {offsets = [0, 32], sizes = [2, 32], strides = [1, 1]} : vector<2x128xf32> to vector<2x32xf32>
    %176 = arith.negf %175 : vector<2x32xf32>
    %177 = math.exp %176 : vector<2x32xf32>
    %cst_63 = arith.constant 1.000000e+00 : f32
    %178 = vector.broadcast %cst_63 : f32 to vector<2x32xf32>
    %179 = arith.addf %178, %177 : vector<2x32xf32>
    %180 = arith.divf %178, %179 : vector<2x32xf32>
    %181 = vector.extract_strided_slice %143 {offsets = [0, 64], sizes = [2, 32], strides = [1, 1]} : vector<2x128xf32> to vector<2x32xf32>
    %182 = math.tanh %181 : vector<2x32xf32>
    %183 = vector.extract_strided_slice %143 {offsets = [0, 96], sizes = [2, 32], strides = [1, 1]} : vector<2x128xf32> to vector<2x32xf32>
    %184 = arith.negf %183 : vector<2x32xf32>
    %185 = math.exp %184 : vector<2x32xf32>
    %cst_64 = arith.constant 1.000000e+00 : f32
    %186 = vector.broadcast %cst_64 : f32 to vector<2x32xf32>
    %187 = arith.addf %186, %185 : vector<2x32xf32>
    %188 = arith.divf %186, %187 : vector<2x32xf32>
    %189 = arith.mulf %180, %133 : vector<2x32xf32>
    %190 = arith.mulf %174, %182 : vector<2x32xf32>
    %191 = arith.addf %189, %190 : vector<2x32xf32>
    %192 = math.tanh %191 : vector<2x32xf32>
    %193 = arith.mulf %188, %192 : vector<2x32xf32>
    %194 = vector.broadcast %134 : vector<2x1xf32> to vector<2x32xf32>
    %195 = arith.mulf %194, %166 : vector<2x32xf32>
    %cst_65 = arith.constant 1.000000e+00 : f32
    %196 = vector.broadcast %cst_65 : f32 to vector<2x1xf32>
    %197 = arith.subf %196, %134 : vector<2x1xf32>
    %198 = vector.broadcast %197 : vector<2x1xf32> to vector<2x32xf32>
    %199 = arith.mulf %198, %131 : vector<2x32xf32>
    %200 = arith.addf %195, %199 : vector<2x32xf32>
    %201 = vector.broadcast %134 : vector<2x1xf32> to vector<2x32xf32>
    %202 = arith.mulf %201, %168 : vector<2x32xf32>
    %cst_66 = arith.constant 1.000000e+00 : f32
    %203 = vector.broadcast %cst_66 : f32 to vector<2x1xf32>
    %204 = arith.subf %203, %134 : vector<2x1xf32>
    %205 = vector.broadcast %204 : vector<2x1xf32> to vector<2x32xf32>
    %206 = arith.mulf %205, %130 : vector<2x32xf32>
    %207 = arith.addf %202, %206 : vector<2x32xf32>
    %208 = vector.broadcast %135 : vector<2x1xf32> to vector<2x32xf32>
    %209 = arith.mulf %208, %191 : vector<2x32xf32>
    %cst_67 = arith.constant 1.000000e+00 : f32
    %210 = vector.broadcast %cst_67 : f32 to vector<2x1xf32>
    %211 = arith.subf %210, %135 : vector<2x1xf32>
    %212 = vector.broadcast %211 : vector<2x1xf32> to vector<2x32xf32>
    %213 = arith.mulf %212, %133 : vector<2x32xf32>
    %214 = arith.addf %209, %213 : vector<2x32xf32>
    %215 = vector.broadcast %135 : vector<2x1xf32> to vector<2x32xf32>
    %216 = arith.mulf %215, %193 : vector<2x32xf32>
    %cst_68 = arith.constant 1.000000e+00 : f32
    %217 = vector.broadcast %cst_68 : f32 to vector<2x1xf32>
    %218 = arith.subf %217, %135 : vector<2x1xf32>
    %219 = vector.broadcast %218 : vector<2x1xf32> to vector<2x32xf32>
    %220 = arith.mulf %219, %132 : vector<2x32xf32>
    %221 = arith.addf %216, %220 : vector<2x32xf32>
    %222 = vector.broadcast %134 : vector<2x1xf32> to vector<2x32xf32>
    %223 = arith.mulf %222, %168 : vector<2x32xf32>
    %224 = vector.broadcast %135 : vector<2x1xf32> to vector<2x32xf32>
    %225 = arith.mulf %224, %193 : vector<2x32xf32>
    %226 = vector.extract_strided_slice %10 {offsets = [2, 0], sizes = [2, 1], strides = [1, 1]} : vector<16x1xf32> to vector<2x1xf32>
    %227 = vector.extract_strided_slice %10 {offsets = [12, 0], sizes = [2, 1], strides = [1, 1]} : vector<16x1xf32> to vector<2x1xf32>
    %228 = tpu.concatenate %207, %221 in 1 : vector<2x32xf32>, vector<2x32xf32> -> vector<2x64xf32>
    %cst_69 = arith.constant dense<0.000000e+00> : vector<2x256xf32>
    %229 = tpu.matmul %228, %129, %cst_69 {dimension_numbers = #tpu.dot_dimension_numbers<[1], [0], [0], [1], [0, 0, 1, 1], [], []>} : vector<2x64xf32>, vector<64x256xf32>, vector<2x256xf32> -> vector<2x256xf32>
    %230 = vector.extract_strided_slice %128 {offsets = [2, 0], sizes = [2, 128], strides = [1, 1]} : vector<16x256xf32> to vector<2x128xf32>
    %231 = vector.extract_strided_slice %229 {offsets = [0, 0], sizes = [2, 128], strides = [1, 1]} : vector<2x256xf32> to vector<2x128xf32>
    %232 = arith.addf %230, %231 : vector<2x128xf32>
    %233 = vector.extract_strided_slice %128 {offsets = [12, 128], sizes = [2, 128], strides = [1, 1]} : vector<16x256xf32> to vector<2x128xf32>
    %234 = vector.extract_strided_slice %229 {offsets = [0, 128], sizes = [2, 128], strides = [1, 1]} : vector<2x256xf32> to vector<2x128xf32>
    %235 = arith.addf %233, %234 : vector<2x128xf32>
    %236 = vector.extract_strided_slice %232 {offsets = [0, 0], sizes = [2, 32], strides = [1, 1]} : vector<2x128xf32> to vector<2x32xf32>
    %237 = arith.negf %236 : vector<2x32xf32>
    %238 = math.exp %237 : vector<2x32xf32>
    %cst_70 = arith.constant 1.000000e+00 : f32
    %239 = vector.broadcast %cst_70 : f32 to vector<2x32xf32>
    %240 = arith.addf %239, %238 : vector<2x32xf32>
    %241 = arith.divf %239, %240 : vector<2x32xf32>
    %242 = vector.extract_strided_slice %232 {offsets = [0, 32], sizes = [2, 32], strides = [1, 1]} : vector<2x128xf32> to vector<2x32xf32>
    %243 = arith.negf %242 : vector<2x32xf32>
    %244 = math.exp %243 : vector<2x32xf32>
    %cst_71 = arith.constant 1.000000e+00 : f32
    %245 = vector.broadcast %cst_71 : f32 to vector<2x32xf32>
    %246 = arith.addf %245, %244 : vector<2x32xf32>
    %247 = arith.divf %245, %246 : vector<2x32xf32>
    %248 = vector.extract_strided_slice %232 {offsets = [0, 64], sizes = [2, 32], strides = [1, 1]} : vector<2x128xf32> to vector<2x32xf32>
    %249 = math.tanh %248 : vector<2x32xf32>
    %250 = vector.extract_strided_slice %232 {offsets = [0, 96], sizes = [2, 32], strides = [1, 1]} : vector<2x128xf32> to vector<2x32xf32>
    %251 = arith.negf %250 : vector<2x32xf32>
    %252 = math.exp %251 : vector<2x32xf32>
    %cst_72 = arith.constant 1.000000e+00 : f32
    %253 = vector.broadcast %cst_72 : f32 to vector<2x32xf32>
    %254 = arith.addf %253, %252 : vector<2x32xf32>
    %255 = arith.divf %253, %254 : vector<2x32xf32>
    %256 = arith.mulf %247, %200 : vector<2x32xf32>
    %257 = arith.mulf %241, %249 : vector<2x32xf32>
    %258 = arith.addf %256, %257 : vector<2x32xf32>
    %259 = math.tanh %258 : vector<2x32xf32>
    %260 = arith.mulf %255, %259 : vector<2x32xf32>
    %261 = vector.extract_strided_slice %235 {offsets = [0, 0], sizes = [2, 32], strides = [1, 1]} : vector<2x128xf32> to vector<2x32xf32>
    %262 = arith.negf %261 : vector<2x32xf32>
    %263 = math.exp %262 : vector<2x32xf32>
    %cst_73 = arith.constant 1.000000e+00 : f32
    %264 = vector.broadcast %cst_73 : f32 to vector<2x32xf32>
    %265 = arith.addf %264, %263 : vector<2x32xf32>
    %266 = arith.divf %264, %265 : vector<2x32xf32>
    %267 = vector.extract_strided_slice %235 {offsets = [0, 32], sizes = [2, 32], strides = [1, 1]} : vector<2x128xf32> to vector<2x32xf32>
    %268 = arith.negf %267 : vector<2x32xf32>
    %269 = math.exp %268 : vector<2x32xf32>
    %cst_74 = arith.constant 1.000000e+00 : f32
    %270 = vector.broadcast %cst_74 : f32 to vector<2x32xf32>
    %271 = arith.addf %270, %269 : vector<2x32xf32>
    %272 = arith.divf %270, %271 : vector<2x32xf32>
    %273 = vector.extract_strided_slice %235 {offsets = [0, 64], sizes = [2, 32], strides = [1, 1]} : vector<2x128xf32> to vector<2x32xf32>
    %274 = math.tanh %273 : vector<2x32xf32>
    %275 = vector.extract_strided_slice %235 {offsets = [0, 96], sizes = [2, 32], strides = [1, 1]} : vector<2x128xf32> to vector<2x32xf32>
    %276 = arith.negf %275 : vector<2x32xf32>
    %277 = math.exp %276 : vector<2x32xf32>
    %cst_75 = arith.constant 1.000000e+00 : f32
    %278 = vector.broadcast %cst_75 : f32 to vector<2x32xf32>
    %279 = arith.addf %278, %277 : vector<2x32xf32>
    %280 = arith.divf %278, %279 : vector<2x32xf32>
    %281 = arith.mulf %272, %214 : vector<2x32xf32>
    %282 = arith.mulf %266, %274 : vector<2x32xf32>
    %283 = arith.addf %281, %282 : vector<2x32xf32>
    %284 = math.tanh %283 : vector<2x32xf32>
    %285 = arith.mulf %280, %284 : vector<2x32xf32>
    %286 = vector.broadcast %226 : vector<2x1xf32> to vector<2x32xf32>
    %287 = arith.mulf %286, %258 : vector<2x32xf32>
    %cst_76 = arith.constant 1.000000e+00 : f32
    %288 = vector.broadcast %cst_76 : f32 to vector<2x1xf32>
    %289 = arith.subf %288, %226 : vector<2x1xf32>
    %290 = vector.broadcast %289 : vector<2x1xf32> to vector<2x32xf32>
    %291 = arith.mulf %290, %200 : vector<2x32xf32>
    %292 = arith.addf %287, %291 : vector<2x32xf32>
    %293 = vector.broadcast %226 : vector<2x1xf32> to vector<2x32xf32>
    %294 = arith.mulf %293, %260 : vector<2x32xf32>
    %cst_77 = arith.constant 1.000000e+00 : f32
    %295 = vector.broadcast %cst_77 : f32 to vector<2x1xf32>
    %296 = arith.subf %295, %226 : vector<2x1xf32>
    %297 = vector.broadcast %296 : vector<2x1xf32> to vector<2x32xf32>
    %298 = arith.mulf %297, %207 : vector<2x32xf32>
    %299 = arith.addf %294, %298 : vector<2x32xf32>
    %300 = vector.broadcast %227 : vector<2x1xf32> to vector<2x32xf32>
    %301 = arith.mulf %300, %283 : vector<2x32xf32>
    %cst_78 = arith.constant 1.000000e+00 : f32
    %302 = vector.broadcast %cst_78 : f32 to vector<2x1xf32>
    %303 = arith.subf %302, %227 : vector<2x1xf32>
    %304 = vector.broadcast %303 : vector<2x1xf32> to vector<2x32xf32>
    %305 = arith.mulf %304, %214 : vector<2x32xf32>
    %306 = arith.addf %301, %305 : vector<2x32xf32>
    %307 = vector.broadcast %227 : vector<2x1xf32> to vector<2x32xf32>
    %308 = arith.mulf %307, %285 : vector<2x32xf32>
    %cst_79 = arith.constant 1.000000e+00 : f32
    %309 = vector.broadcast %cst_79 : f32 to vector<2x1xf32>
    %310 = arith.subf %309, %227 : vector<2x1xf32>
    %311 = vector.broadcast %310 : vector<2x1xf32> to vector<2x32xf32>
    %312 = arith.mulf %311, %221 : vector<2x32xf32>
    %313 = arith.addf %308, %312 : vector<2x32xf32>
    %314 = vector.broadcast %226 : vector<2x1xf32> to vector<2x32xf32>
    %315 = arith.mulf %314, %260 : vector<2x32xf32>
    %316 = vector.broadcast %227 : vector<2x1xf32> to vector<2x32xf32>
    %317 = arith.mulf %316, %285 : vector<2x32xf32>
    %318 = vector.extract_strided_slice %10 {offsets = [4, 0], sizes = [2, 1], strides = [1, 1]} : vector<16x1xf32> to vector<2x1xf32>
    %319 = vector.extract_strided_slice %10 {offsets = [10, 0], sizes = [2, 1], strides = [1, 1]} : vector<16x1xf32> to vector<2x1xf32>
    %320 = tpu.concatenate %299, %313 in 1 : vector<2x32xf32>, vector<2x32xf32> -> vector<2x64xf32>
    %cst_80 = arith.constant dense<0.000000e+00> : vector<2x256xf32>
    %321 = tpu.matmul %320, %129, %cst_80 {dimension_numbers = #tpu.dot_dimension_numbers<[1], [0], [0], [1], [0, 0, 1, 1], [], []>} : vector<2x64xf32>, vector<64x256xf32>, vector<2x256xf32> -> vector<2x256xf32>
    %322 = vector.extract_strided_slice %128 {offsets = [4, 0], sizes = [2, 128], strides = [1, 1]} : vector<16x256xf32> to vector<2x128xf32>
    %323 = vector.extract_strided_slice %321 {offsets = [0, 0], sizes = [2, 128], strides = [1, 1]} : vector<2x256xf32> to vector<2x128xf32>
    %324 = arith.addf %322, %323 : vector<2x128xf32>
    %325 = vector.extract_strided_slice %128 {offsets = [10, 128], sizes = [2, 128], strides = [1, 1]} : vector<16x256xf32> to vector<2x128xf32>
    %326 = vector.extract_strided_slice %321 {offsets = [0, 128], sizes = [2, 128], strides = [1, 1]} : vector<2x256xf32> to vector<2x128xf32>
    %327 = arith.addf %325, %326 : vector<2x128xf32>
    %328 = vector.extract_strided_slice %324 {offsets = [0, 0], sizes = [2, 32], strides = [1, 1]} : vector<2x128xf32> to vector<2x32xf32>
    %329 = arith.negf %328 : vector<2x32xf32>
    %330 = math.exp %329 : vector<2x32xf32>
    %cst_81 = arith.constant 1.000000e+00 : f32
    %331 = vector.broadcast %cst_81 : f32 to vector<2x32xf32>
    %332 = arith.addf %331, %330 : vector<2x32xf32>
    %333 = arith.divf %331, %332 : vector<2x32xf32>
    %334 = vector.extract_strided_slice %324 {offsets = [0, 32], sizes = [2, 32], strides = [1, 1]} : vector<2x128xf32> to vector<2x32xf32>
    %335 = arith.negf %334 : vector<2x32xf32>
    %336 = math.exp %335 : vector<2x32xf32>
    %cst_82 = arith.constant 1.000000e+00 : f32
    %337 = vector.broadcast %cst_82 : f32 to vector<2x32xf32>
    %338 = arith.addf %337, %336 : vector<2x32xf32>
    %339 = arith.divf %337, %338 : vector<2x32xf32>
    %340 = vector.extract_strided_slice %324 {offsets = [0, 64], sizes = [2, 32], strides = [1, 1]} : vector<2x128xf32> to vector<2x32xf32>
    %341 = math.tanh %340 : vector<2x32xf32>
    %342 = vector.extract_strided_slice %324 {offsets = [0, 96], sizes = [2, 32], strides = [1, 1]} : vector<2x128xf32> to vector<2x32xf32>
    %343 = arith.negf %342 : vector<2x32xf32>
    %344 = math.exp %343 : vector<2x32xf32>
    %cst_83 = arith.constant 1.000000e+00 : f32
    %345 = vector.broadcast %cst_83 : f32 to vector<2x32xf32>
    %346 = arith.addf %345, %344 : vector<2x32xf32>
    %347 = arith.divf %345, %346 : vector<2x32xf32>
    %348 = arith.mulf %339, %292 : vector<2x32xf32>
    %349 = arith.mulf %333, %341 : vector<2x32xf32>
    %350 = arith.addf %348, %349 : vector<2x32xf32>
    %351 = math.tanh %350 : vector<2x32xf32>
    %352 = arith.mulf %347, %351 : vector<2x32xf32>
    %353 = vector.extract_strided_slice %327 {offsets = [0, 0], sizes = [2, 32], strides = [1, 1]} : vector<2x128xf32> to vector<2x32xf32>
    %354 = arith.negf %353 : vector<2x32xf32>
    %355 = math.exp %354 : vector<2x32xf32>
    %cst_84 = arith.constant 1.000000e+00 : f32
    %356 = vector.broadcast %cst_84 : f32 to vector<2x32xf32>
    %357 = arith.addf %356, %355 : vector<2x32xf32>
    %358 = arith.divf %356, %357 : vector<2x32xf32>
    %359 = vector.extract_strided_slice %327 {offsets = [0, 32], sizes = [2, 32], strides = [1, 1]} : vector<2x128xf32> to vector<2x32xf32>
    %360 = arith.negf %359 : vector<2x32xf32>
    %361 = math.exp %360 : vector<2x32xf32>
    %cst_85 = arith.constant 1.000000e+00 : f32
    %362 = vector.broadcast %cst_85 : f32 to vector<2x32xf32>
    %363 = arith.addf %362, %361 : vector<2x32xf32>
    %364 = arith.divf %362, %363 : vector<2x32xf32>
    %365 = vector.extract_strided_slice %327 {offsets = [0, 64], sizes = [2, 32], strides = [1, 1]} : vector<2x128xf32> to vector<2x32xf32>
    %366 = math.tanh %365 : vector<2x32xf32>
    %367 = vector.extract_strided_slice %327 {offsets = [0, 96], sizes = [2, 32], strides = [1, 1]} : vector<2x128xf32> to vector<2x32xf32>
    %368 = arith.negf %367 : vector<2x32xf32>
    %369 = math.exp %368 : vector<2x32xf32>
    %cst_86 = arith.constant 1.000000e+00 : f32
    %370 = vector.broadcast %cst_86 : f32 to vector<2x32xf32>
    %371 = arith.addf %370, %369 : vector<2x32xf32>
    %372 = arith.divf %370, %371 : vector<2x32xf32>
    %373 = arith.mulf %364, %306 : vector<2x32xf32>
    %374 = arith.mulf %358, %366 : vector<2x32xf32>
    %375 = arith.addf %373, %374 : vector<2x32xf32>
    %376 = math.tanh %375 : vector<2x32xf32>
    %377 = arith.mulf %372, %376 : vector<2x32xf32>
    %378 = vector.broadcast %318 : vector<2x1xf32> to vector<2x32xf32>
    %379 = arith.mulf %378, %350 : vector<2x32xf32>
    %cst_87 = arith.constant 1.000000e+00 : f32
    %380 = vector.broadcast %cst_87 : f32 to vector<2x1xf32>
    %381 = arith.subf %380, %318 : vector<2x1xf32>
    %382 = vector.broadcast %381 : vector<2x1xf32> to vector<2x32xf32>
    %383 = arith.mulf %382, %292 : vector<2x32xf32>
    %384 = arith.addf %379, %383 : vector<2x32xf32>
    %385 = vector.broadcast %318 : vector<2x1xf32> to vector<2x32xf32>
    %386 = arith.mulf %385, %352 : vector<2x32xf32>
    %cst_88 = arith.constant 1.000000e+00 : f32
    %387 = vector.broadcast %cst_88 : f32 to vector<2x1xf32>
    %388 = arith.subf %387, %318 : vector<2x1xf32>
    %389 = vector.broadcast %388 : vector<2x1xf32> to vector<2x32xf32>
    %390 = arith.mulf %389, %299 : vector<2x32xf32>
    %391 = arith.addf %386, %390 : vector<2x32xf32>
    %392 = vector.broadcast %319 : vector<2x1xf32> to vector<2x32xf32>
    %393 = arith.mulf %392, %375 : vector<2x32xf32>
    %cst_89 = arith.constant 1.000000e+00 : f32
    %394 = vector.broadcast %cst_89 : f32 to vector<2x1xf32>
    %395 = arith.subf %394, %319 : vector<2x1xf32>
    %396 = vector.broadcast %395 : vector<2x1xf32> to vector<2x32xf32>
    %397 = arith.mulf %396, %306 : vector<2x32xf32>
    %398 = arith.addf %393, %397 : vector<2x32xf32>
    %399 = vector.broadcast %319 : vector<2x1xf32> to vector<2x32xf32>
    %400 = arith.mulf %399, %377 : vector<2x32xf32>
    %cst_90 = arith.constant 1.000000e+00 : f32
    %401 = vector.broadcast %cst_90 : f32 to vector<2x1xf32>
    %402 = arith.subf %401, %319 : vector<2x1xf32>
    %403 = vector.broadcast %402 : vector<2x1xf32> to vector<2x32xf32>
    %404 = arith.mulf %403, %313 : vector<2x32xf32>
    %405 = arith.addf %400, %404 : vector<2x32xf32>
    %406 = vector.broadcast %318 : vector<2x1xf32> to vector<2x32xf32>
    %407 = arith.mulf %406, %352 : vector<2x32xf32>
    %408 = vector.broadcast %319 : vector<2x1xf32> to vector<2x32xf32>
    %409 = arith.mulf %408, %377 : vector<2x32xf32>
    %410 = vector.extract_strided_slice %10 {offsets = [6, 0], sizes = [2, 1], strides = [1, 1]} : vector<16x1xf32> to vector<2x1xf32>
    %411 = vector.extract_strided_slice %10 {offsets = [8, 0], sizes = [2, 1], strides = [1, 1]} : vector<16x1xf32> to vector<2x1xf32>
    %412 = tpu.concatenate %391, %405 in 1 : vector<2x32xf32>, vector<2x32xf32> -> vector<2x64xf32>
    %cst_91 = arith.constant dense<0.000000e+00> : vector<2x256xf32>
    %413 = tpu.matmul %412, %129, %cst_91 {dimension_numbers = #tpu.dot_dimension_numbers<[1], [0], [0], [1], [0, 0, 1, 1], [], []>} : vector<2x64xf32>, vector<64x256xf32>, vector<2x256xf32> -> vector<2x256xf32>
    %414 = vector.extract_strided_slice %128 {offsets = [6, 0], sizes = [2, 128], strides = [1, 1]} : vector<16x256xf32> to vector<2x128xf32>
    %415 = vector.extract_strided_slice %413 {offsets = [0, 0], sizes = [2, 128], strides = [1, 1]} : vector<2x256xf32> to vector<2x128xf32>
    %416 = arith.addf %414, %415 : vector<2x128xf32>
    %417 = vector.extract_strided_slice %128 {offsets = [8, 128], sizes = [2, 128], strides = [1, 1]} : vector<16x256xf32> to vector<2x128xf32>
    %418 = vector.extract_strided_slice %413 {offsets = [0, 128], sizes = [2, 128], strides = [1, 1]} : vector<2x256xf32> to vector<2x128xf32>
    %419 = arith.addf %417, %418 : vector<2x128xf32>
    %420 = vector.extract_strided_slice %416 {offsets = [0, 0], sizes = [2, 32], strides = [1, 1]} : vector<2x128xf32> to vector<2x32xf32>
    %421 = arith.negf %420 : vector<2x32xf32>
    %422 = math.exp %421 : vector<2x32xf32>
    %cst_92 = arith.constant 1.000000e+00 : f32
    %423 = vector.broadcast %cst_92 : f32 to vector<2x32xf32>
    %424 = arith.addf %423, %422 : vector<2x32xf32>
    %425 = arith.divf %423, %424 : vector<2x32xf32>
    %426 = vector.extract_strided_slice %416 {offsets = [0, 32], sizes = [2, 32], strides = [1, 1]} : vector<2x128xf32> to vector<2x32xf32>
    %427 = arith.negf %426 : vector<2x32xf32>
    %428 = math.exp %427 : vector<2x32xf32>
    %cst_93 = arith.constant 1.000000e+00 : f32
    %429 = vector.broadcast %cst_93 : f32 to vector<2x32xf32>
    %430 = arith.addf %429, %428 : vector<2x32xf32>
    %431 = arith.divf %429, %430 : vector<2x32xf32>
    %432 = vector.extract_strided_slice %416 {offsets = [0, 64], sizes = [2, 32], strides = [1, 1]} : vector<2x128xf32> to vector<2x32xf32>
    %433 = math.tanh %432 : vector<2x32xf32>
    %434 = vector.extract_strided_slice %416 {offsets = [0, 96], sizes = [2, 32], strides = [1, 1]} : vector<2x128xf32> to vector<2x32xf32>
    %435 = arith.negf %434 : vector<2x32xf32>
    %436 = math.exp %435 : vector<2x32xf32>
    %cst_94 = arith.constant 1.000000e+00 : f32
    %437 = vector.broadcast %cst_94 : f32 to vector<2x32xf32>
    %438 = arith.addf %437, %436 : vector<2x32xf32>
    %439 = arith.divf %437, %438 : vector<2x32xf32>
    %440 = arith.mulf %431, %384 : vector<2x32xf32>
    %441 = arith.mulf %425, %433 : vector<2x32xf32>
    %442 = arith.addf %440, %441 : vector<2x32xf32>
    %443 = math.tanh %442 : vector<2x32xf32>
    %444 = arith.mulf %439, %443 : vector<2x32xf32>
    %445 = vector.extract_strided_slice %419 {offsets = [0, 0], sizes = [2, 32], strides = [1, 1]} : vector<2x128xf32> to vector<2x32xf32>
    %446 = arith.negf %445 : vector<2x32xf32>
    %447 = math.exp %446 : vector<2x32xf32>
    %cst_95 = arith.constant 1.000000e+00 : f32
    %448 = vector.broadcast %cst_95 : f32 to vector<2x32xf32>
    %449 = arith.addf %448, %447 : vector<2x32xf32>
    %450 = arith.divf %448, %449 : vector<2x32xf32>
    %451 = vector.extract_strided_slice %419 {offsets = [0, 32], sizes = [2, 32], strides = [1, 1]} : vector<2x128xf32> to vector<2x32xf32>
    %452 = arith.negf %451 : vector<2x32xf32>
    %453 = math.exp %452 : vector<2x32xf32>
    %cst_96 = arith.constant 1.000000e+00 : f32
    %454 = vector.broadcast %cst_96 : f32 to vector<2x32xf32>
    %455 = arith.addf %454, %453 : vector<2x32xf32>
    %456 = arith.divf %454, %455 : vector<2x32xf32>
    %457 = vector.extract_strided_slice %419 {offsets = [0, 64], sizes = [2, 32], strides = [1, 1]} : vector<2x128xf32> to vector<2x32xf32>
    %458 = math.tanh %457 : vector<2x32xf32>
    %459 = vector.extract_strided_slice %419 {offsets = [0, 96], sizes = [2, 32], strides = [1, 1]} : vector<2x128xf32> to vector<2x32xf32>
    %460 = arith.negf %459 : vector<2x32xf32>
    %461 = math.exp %460 : vector<2x32xf32>
    %cst_97 = arith.constant 1.000000e+00 : f32
    %462 = vector.broadcast %cst_97 : f32 to vector<2x32xf32>
    %463 = arith.addf %462, %461 : vector<2x32xf32>
    %464 = arith.divf %462, %463 : vector<2x32xf32>
    %465 = arith.mulf %456, %398 : vector<2x32xf32>
    %466 = arith.mulf %450, %458 : vector<2x32xf32>
    %467 = arith.addf %465, %466 : vector<2x32xf32>
    %468 = math.tanh %467 : vector<2x32xf32>
    %469 = arith.mulf %464, %468 : vector<2x32xf32>
    %470 = vector.broadcast %410 : vector<2x1xf32> to vector<2x32xf32>
    %471 = arith.mulf %470, %442 : vector<2x32xf32>
    %cst_98 = arith.constant 1.000000e+00 : f32
    %472 = vector.broadcast %cst_98 : f32 to vector<2x1xf32>
    %473 = arith.subf %472, %410 : vector<2x1xf32>
    %474 = vector.broadcast %473 : vector<2x1xf32> to vector<2x32xf32>
    %475 = arith.mulf %474, %384 : vector<2x32xf32>
    %476 = arith.addf %471, %475 : vector<2x32xf32>
    %477 = vector.broadcast %410 : vector<2x1xf32> to vector<2x32xf32>
    %478 = arith.mulf %477, %444 : vector<2x32xf32>
    %cst_99 = arith.constant 1.000000e+00 : f32
    %479 = vector.broadcast %cst_99 : f32 to vector<2x1xf32>
    %480 = arith.subf %479, %410 : vector<2x1xf32>
    %481 = vector.broadcast %480 : vector<2x1xf32> to vector<2x32xf32>
    %482 = arith.mulf %481, %391 : vector<2x32xf32>
    %483 = arith.addf %478, %482 : vector<2x32xf32>
    %484 = vector.broadcast %411 : vector<2x1xf32> to vector<2x32xf32>
    %485 = arith.mulf %484, %467 : vector<2x32xf32>
    %cst_100 = arith.constant 1.000000e+00 : f32
    %486 = vector.broadcast %cst_100 : f32 to vector<2x1xf32>
    %487 = arith.subf %486, %411 : vector<2x1xf32>
    %488 = vector.broadcast %487 : vector<2x1xf32> to vector<2x32xf32>
    %489 = arith.mulf %488, %398 : vector<2x32xf32>
    %490 = arith.addf %485, %489 : vector<2x32xf32>
    %491 = vector.broadcast %411 : vector<2x1xf32> to vector<2x32xf32>
    %492 = arith.mulf %491, %469 : vector<2x32xf32>
    %cst_101 = arith.constant 1.000000e+00 : f32
    %493 = vector.broadcast %cst_101 : f32 to vector<2x1xf32>
    %494 = arith.subf %493, %411 : vector<2x1xf32>
    %495 = vector.broadcast %494 : vector<2x1xf32> to vector<2x32xf32>
    %496 = arith.mulf %495, %405 : vector<2x32xf32>
    %497 = arith.addf %492, %496 : vector<2x32xf32>
    %498 = vector.broadcast %410 : vector<2x1xf32> to vector<2x32xf32>
    %499 = arith.mulf %498, %444 : vector<2x32xf32>
    %500 = vector.broadcast %411 : vector<2x1xf32> to vector<2x32xf32>
    %501 = arith.mulf %500, %469 : vector<2x32xf32>
    %502 = vector.extract_strided_slice %10 {offsets = [8, 0], sizes = [2, 1], strides = [1, 1]} : vector<16x1xf32> to vector<2x1xf32>
    %503 = vector.extract_strided_slice %10 {offsets = [6, 0], sizes = [2, 1], strides = [1, 1]} : vector<16x1xf32> to vector<2x1xf32>
    %504 = tpu.concatenate %483, %497 in 1 : vector<2x32xf32>, vector<2x32xf32> -> vector<2x64xf32>
    %cst_102 = arith.constant dense<0.000000e+00> : vector<2x256xf32>
    %505 = tpu.matmul %504, %129, %cst_102 {dimension_numbers = #tpu.dot_dimension_numbers<[1], [0], [0], [1], [0, 0, 1, 1], [], []>} : vector<2x64xf32>, vector<64x256xf32>, vector<2x256xf32> -> vector<2x256xf32>
    %506 = vector.extract_strided_slice %128 {offsets = [8, 0], sizes = [2, 128], strides = [1, 1]} : vector<16x256xf32> to vector<2x128xf32>
    %507 = vector.extract_strided_slice %505 {offsets = [0, 0], sizes = [2, 128], strides = [1, 1]} : vector<2x256xf32> to vector<2x128xf32>
    %508 = arith.addf %506, %507 : vector<2x128xf32>
    %509 = vector.extract_strided_slice %128 {offsets = [6, 128], sizes = [2, 128], strides = [1, 1]} : vector<16x256xf32> to vector<2x128xf32>
    %510 = vector.extract_strided_slice %505 {offsets = [0, 128], sizes = [2, 128], strides = [1, 1]} : vector<2x256xf32> to vector<2x128xf32>
    %511 = arith.addf %509, %510 : vector<2x128xf32>
    %512 = vector.extract_strided_slice %508 {offsets = [0, 0], sizes = [2, 32], strides = [1, 1]} : vector<2x128xf32> to vector<2x32xf32>
    %513 = arith.negf %512 : vector<2x32xf32>
    %514 = math.exp %513 : vector<2x32xf32>
    %cst_103 = arith.constant 1.000000e+00 : f32
    %515 = vector.broadcast %cst_103 : f32 to vector<2x32xf32>
    %516 = arith.addf %515, %514 : vector<2x32xf32>
    %517 = arith.divf %515, %516 : vector<2x32xf32>
    %518 = vector.extract_strided_slice %508 {offsets = [0, 32], sizes = [2, 32], strides = [1, 1]} : vector<2x128xf32> to vector<2x32xf32>
    %519 = arith.negf %518 : vector<2x32xf32>
    %520 = math.exp %519 : vector<2x32xf32>
    %cst_104 = arith.constant 1.000000e+00 : f32
    %521 = vector.broadcast %cst_104 : f32 to vector<2x32xf32>
    %522 = arith.addf %521, %520 : vector<2x32xf32>
    %523 = arith.divf %521, %522 : vector<2x32xf32>
    %524 = vector.extract_strided_slice %508 {offsets = [0, 64], sizes = [2, 32], strides = [1, 1]} : vector<2x128xf32> to vector<2x32xf32>
    %525 = math.tanh %524 : vector<2x32xf32>
    %526 = vector.extract_strided_slice %508 {offsets = [0, 96], sizes = [2, 32], strides = [1, 1]} : vector<2x128xf32> to vector<2x32xf32>
    %527 = arith.negf %526 : vector<2x32xf32>
    %528 = math.exp %527 : vector<2x32xf32>
    %cst_105 = arith.constant 1.000000e+00 : f32
    %529 = vector.broadcast %cst_105 : f32 to vector<2x32xf32>
    %530 = arith.addf %529, %528 : vector<2x32xf32>
    %531 = arith.divf %529, %530 : vector<2x32xf32>
    %532 = arith.mulf %523, %476 : vector<2x32xf32>
    %533 = arith.mulf %517, %525 : vector<2x32xf32>
    %534 = arith.addf %532, %533 : vector<2x32xf32>
    %535 = math.tanh %534 : vector<2x32xf32>
    %536 = arith.mulf %531, %535 : vector<2x32xf32>
    %537 = vector.extract_strided_slice %511 {offsets = [0, 0], sizes = [2, 32], strides = [1, 1]} : vector<2x128xf32> to vector<2x32xf32>
    %538 = arith.negf %537 : vector<2x32xf32>
    %539 = math.exp %538 : vector<2x32xf32>
    %cst_106 = arith.constant 1.000000e+00 : f32
    %540 = vector.broadcast %cst_106 : f32 to vector<2x32xf32>
    %541 = arith.addf %540, %539 : vector<2x32xf32>
    %542 = arith.divf %540, %541 : vector<2x32xf32>
    %543 = vector.extract_strided_slice %511 {offsets = [0, 32], sizes = [2, 32], strides = [1, 1]} : vector<2x128xf32> to vector<2x32xf32>
    %544 = arith.negf %543 : vector<2x32xf32>
    %545 = math.exp %544 : vector<2x32xf32>
    %cst_107 = arith.constant 1.000000e+00 : f32
    %546 = vector.broadcast %cst_107 : f32 to vector<2x32xf32>
    %547 = arith.addf %546, %545 : vector<2x32xf32>
    %548 = arith.divf %546, %547 : vector<2x32xf32>
    %549 = vector.extract_strided_slice %511 {offsets = [0, 64], sizes = [2, 32], strides = [1, 1]} : vector<2x128xf32> to vector<2x32xf32>
    %550 = math.tanh %549 : vector<2x32xf32>
    %551 = vector.extract_strided_slice %511 {offsets = [0, 96], sizes = [2, 32], strides = [1, 1]} : vector<2x128xf32> to vector<2x32xf32>
    %552 = arith.negf %551 : vector<2x32xf32>
    %553 = math.exp %552 : vector<2x32xf32>
    %cst_108 = arith.constant 1.000000e+00 : f32
    %554 = vector.broadcast %cst_108 : f32 to vector<2x32xf32>
    %555 = arith.addf %554, %553 : vector<2x32xf32>
    %556 = arith.divf %554, %555 : vector<2x32xf32>
    %557 = arith.mulf %548, %490 : vector<2x32xf32>
    %558 = arith.mulf %542, %550 : vector<2x32xf32>
    %559 = arith.addf %557, %558 : vector<2x32xf32>
    %560 = math.tanh %559 : vector<2x32xf32>
    %561 = arith.mulf %556, %560 : vector<2x32xf32>
    %562 = vector.broadcast %502 : vector<2x1xf32> to vector<2x32xf32>
    %563 = arith.mulf %562, %534 : vector<2x32xf32>
    %cst_109 = arith.constant 1.000000e+00 : f32
    %564 = vector.broadcast %cst_109 : f32 to vector<2x1xf32>
    %565 = arith.subf %564, %502 : vector<2x1xf32>
    %566 = vector.broadcast %565 : vector<2x1xf32> to vector<2x32xf32>
    %567 = arith.mulf %566, %476 : vector<2x32xf32>
    %568 = arith.addf %563, %567 : vector<2x32xf32>
    %569 = vector.broadcast %502 : vector<2x1xf32> to vector<2x32xf32>
    %570 = arith.mulf %569, %536 : vector<2x32xf32>
    %cst_110 = arith.constant 1.000000e+00 : f32
    %571 = vector.broadcast %cst_110 : f32 to vector<2x1xf32>
    %572 = arith.subf %571, %502 : vector<2x1xf32>
    %573 = vector.broadcast %572 : vector<2x1xf32> to vector<2x32xf32>
    %574 = arith.mulf %573, %483 : vector<2x32xf32>
    %575 = arith.addf %570, %574 : vector<2x32xf32>
    %576 = vector.broadcast %503 : vector<2x1xf32> to vector<2x32xf32>
    %577 = arith.mulf %576, %559 : vector<2x32xf32>
    %cst_111 = arith.constant 1.000000e+00 : f32
    %578 = vector.broadcast %cst_111 : f32 to vector<2x1xf32>
    %579 = arith.subf %578, %503 : vector<2x1xf32>
    %580 = vector.broadcast %579 : vector<2x1xf32> to vector<2x32xf32>
    %581 = arith.mulf %580, %490 : vector<2x32xf32>
    %582 = arith.addf %577, %581 : vector<2x32xf32>
    %583 = vector.broadcast %503 : vector<2x1xf32> to vector<2x32xf32>
    %584 = arith.mulf %583, %561 : vector<2x32xf32>
    %cst_112 = arith.constant 1.000000e+00 : f32
    %585 = vector.broadcast %cst_112 : f32 to vector<2x1xf32>
    %586 = arith.subf %585, %503 : vector<2x1xf32>
    %587 = vector.broadcast %586 : vector<2x1xf32> to vector<2x32xf32>
    %588 = arith.mulf %587, %497 : vector<2x32xf32>
    %589 = arith.addf %584, %588 : vector<2x32xf32>
    %590 = vector.broadcast %502 : vector<2x1xf32> to vector<2x32xf32>
    %591 = arith.mulf %590, %536 : vector<2x32xf32>
    %592 = vector.broadcast %503 : vector<2x1xf32> to vector<2x32xf32>
    %593 = arith.mulf %592, %561 : vector<2x32xf32>
    %594 = vector.extract_strided_slice %10 {offsets = [10, 0], sizes = [2, 1], strides = [1, 1]} : vector<16x1xf32> to vector<2x1xf32>
    %595 = vector.extract_strided_slice %10 {offsets = [4, 0], sizes = [2, 1], strides = [1, 1]} : vector<16x1xf32> to vector<2x1xf32>
    %596 = tpu.concatenate %575, %589 in 1 : vector<2x32xf32>, vector<2x32xf32> -> vector<2x64xf32>
    %cst_113 = arith.constant dense<0.000000e+00> : vector<2x256xf32>
    %597 = tpu.matmul %596, %129, %cst_113 {dimension_numbers = #tpu.dot_dimension_numbers<[1], [0], [0], [1], [0, 0, 1, 1], [], []>} : vector<2x64xf32>, vector<64x256xf32>, vector<2x256xf32> -> vector<2x256xf32>
    %598 = vector.extract_strided_slice %128 {offsets = [10, 0], sizes = [2, 128], strides = [1, 1]} : vector<16x256xf32> to vector<2x128xf32>
    %599 = vector.extract_strided_slice %597 {offsets = [0, 0], sizes = [2, 128], strides = [1, 1]} : vector<2x256xf32> to vector<2x128xf32>
    %600 = arith.addf %598, %599 : vector<2x128xf32>
    %601 = vector.extract_strided_slice %128 {offsets = [4, 128], sizes = [2, 128], strides = [1, 1]} : vector<16x256xf32> to vector<2x128xf32>
    %602 = vector.extract_strided_slice %597 {offsets = [0, 128], sizes = [2, 128], strides = [1, 1]} : vector<2x256xf32> to vector<2x128xf32>
    %603 = arith.addf %601, %602 : vector<2x128xf32>
    %604 = vector.extract_strided_slice %600 {offsets = [0, 0], sizes = [2, 32], strides = [1, 1]} : vector<2x128xf32> to vector<2x32xf32>
    %605 = arith.negf %604 : vector<2x32xf32>
    %606 = math.exp %605 : vector<2x32xf32>
    %cst_114 = arith.constant 1.000000e+00 : f32
    %607 = vector.broadcast %cst_114 : f32 to vector<2x32xf32>
    %608 = arith.addf %607, %606 : vector<2x32xf32>
    %609 = arith.divf %607, %608 : vector<2x32xf32>
    %610 = vector.extract_strided_slice %600 {offsets = [0, 32], sizes = [2, 32], strides = [1, 1]} : vector<2x128xf32> to vector<2x32xf32>
    %611 = arith.negf %610 : vector<2x32xf32>
    %612 = math.exp %611 : vector<2x32xf32>
    %cst_115 = arith.constant 1.000000e+00 : f32
    %613 = vector.broadcast %cst_115 : f32 to vector<2x32xf32>
    %614 = arith.addf %613, %612 : vector<2x32xf32>
    %615 = arith.divf %613, %614 : vector<2x32xf32>
    %616 = vector.extract_strided_slice %600 {offsets = [0, 64], sizes = [2, 32], strides = [1, 1]} : vector<2x128xf32> to vector<2x32xf32>
    %617 = math.tanh %616 : vector<2x32xf32>
    %618 = vector.extract_strided_slice %600 {offsets = [0, 96], sizes = [2, 32], strides = [1, 1]} : vector<2x128xf32> to vector<2x32xf32>
    %619 = arith.negf %618 : vector<2x32xf32>
    %620 = math.exp %619 : vector<2x32xf32>
    %cst_116 = arith.constant 1.000000e+00 : f32
    %621 = vector.broadcast %cst_116 : f32 to vector<2x32xf32>
    %622 = arith.addf %621, %620 : vector<2x32xf32>
    %623 = arith.divf %621, %622 : vector<2x32xf32>
    %624 = arith.mulf %615, %568 : vector<2x32xf32>
    %625 = arith.mulf %609, %617 : vector<2x32xf32>
    %626 = arith.addf %624, %625 : vector<2x32xf32>
    %627 = math.tanh %626 : vector<2x32xf32>
    %628 = arith.mulf %623, %627 : vector<2x32xf32>
    %629 = vector.extract_strided_slice %603 {offsets = [0, 0], sizes = [2, 32], strides = [1, 1]} : vector<2x128xf32> to vector<2x32xf32>
    %630 = arith.negf %629 : vector<2x32xf32>
    %631 = math.exp %630 : vector<2x32xf32>
    %cst_117 = arith.constant 1.000000e+00 : f32
    %632 = vector.broadcast %cst_117 : f32 to vector<2x32xf32>
    %633 = arith.addf %632, %631 : vector<2x32xf32>
    %634 = arith.divf %632, %633 : vector<2x32xf32>
    %635 = vector.extract_strided_slice %603 {offsets = [0, 32], sizes = [2, 32], strides = [1, 1]} : vector<2x128xf32> to vector<2x32xf32>
    %636 = arith.negf %635 : vector<2x32xf32>
    %637 = math.exp %636 : vector<2x32xf32>
    %cst_118 = arith.constant 1.000000e+00 : f32
    %638 = vector.broadcast %cst_118 : f32 to vector<2x32xf32>
    %639 = arith.addf %638, %637 : vector<2x32xf32>
    %640 = arith.divf %638, %639 : vector<2x32xf32>
    %641 = vector.extract_strided_slice %603 {offsets = [0, 64], sizes = [2, 32], strides = [1, 1]} : vector<2x128xf32> to vector<2x32xf32>
    %642 = math.tanh %641 : vector<2x32xf32>
    %643 = vector.extract_strided_slice %603 {offsets = [0, 96], sizes = [2, 32], strides = [1, 1]} : vector<2x128xf32> to vector<2x32xf32>
    %644 = arith.negf %643 : vector<2x32xf32>
    %645 = math.exp %644 : vector<2x32xf32>
    %cst_119 = arith.constant 1.000000e+00 : f32
    %646 = vector.broadcast %cst_119 : f32 to vector<2x32xf32>
    %647 = arith.addf %646, %645 : vector<2x32xf32>
    %648 = arith.divf %646, %647 : vector<2x32xf32>
    %649 = arith.mulf %640, %582 : vector<2x32xf32>
    %650 = arith.mulf %634, %642 : vector<2x32xf32>
    %651 = arith.addf %649, %650 : vector<2x32xf32>
    %652 = math.tanh %651 : vector<2x32xf32>
    %653 = arith.mulf %648, %652 : vector<2x32xf32>
    %654 = vector.broadcast %594 : vector<2x1xf32> to vector<2x32xf32>
    %655 = arith.mulf %654, %626 : vector<2x32xf32>
    %cst_120 = arith.constant 1.000000e+00 : f32
    %656 = vector.broadcast %cst_120 : f32 to vector<2x1xf32>
    %657 = arith.subf %656, %594 : vector<2x1xf32>
    %658 = vector.broadcast %657 : vector<2x1xf32> to vector<2x32xf32>
    %659 = arith.mulf %658, %568 : vector<2x32xf32>
    %660 = arith.addf %655, %659 : vector<2x32xf32>
    %661 = vector.broadcast %594 : vector<2x1xf32> to vector<2x32xf32>
    %662 = arith.mulf %661, %628 : vector<2x32xf32>
    %cst_121 = arith.constant 1.000000e+00 : f32
    %663 = vector.broadcast %cst_121 : f32 to vector<2x1xf32>
    %664 = arith.subf %663, %594 : vector<2x1xf32>
    %665 = vector.broadcast %664 : vector<2x1xf32> to vector<2x32xf32>
    %666 = arith.mulf %665, %575 : vector<2x32xf32>
    %667 = arith.addf %662, %666 : vector<2x32xf32>
    %668 = vector.broadcast %595 : vector<2x1xf32> to vector<2x32xf32>
    %669 = arith.mulf %668, %651 : vector<2x32xf32>
    %cst_122 = arith.constant 1.000000e+00 : f32
    %670 = vector.broadcast %cst_122 : f32 to vector<2x1xf32>
    %671 = arith.subf %670, %595 : vector<2x1xf32>
    %672 = vector.broadcast %671 : vector<2x1xf32> to vector<2x32xf32>
    %673 = arith.mulf %672, %582 : vector<2x32xf32>
    %674 = arith.addf %669, %673 : vector<2x32xf32>
    %675 = vector.broadcast %595 : vector<2x1xf32> to vector<2x32xf32>
    %676 = arith.mulf %675, %653 : vector<2x32xf32>
    %cst_123 = arith.constant 1.000000e+00 : f32
    %677 = vector.broadcast %cst_123 : f32 to vector<2x1xf32>
    %678 = arith.subf %677, %595 : vector<2x1xf32>
    %679 = vector.broadcast %678 : vector<2x1xf32> to vector<2x32xf32>
    %680 = arith.mulf %679, %589 : vector<2x32xf32>
    %681 = arith.addf %676, %680 : vector<2x32xf32>
    %682 = vector.broadcast %594 : vector<2x1xf32> to vector<2x32xf32>
    %683 = arith.mulf %682, %628 : vector<2x32xf32>
    %684 = vector.broadcast %595 : vector<2x1xf32> to vector<2x32xf32>
    %685 = arith.mulf %684, %653 : vector<2x32xf32>
    %686 = vector.extract_strided_slice %10 {offsets = [12, 0], sizes = [2, 1], strides = [1, 1]} : vector<16x1xf32> to vector<2x1xf32>
    %687 = vector.extract_strided_slice %10 {offsets = [2, 0], sizes = [2, 1], strides = [1, 1]} : vector<16x1xf32> to vector<2x1xf32>
    %688 = tpu.concatenate %667, %681 in 1 : vector<2x32xf32>, vector<2x32xf32> -> vector<2x64xf32>
    %cst_124 = arith.constant dense<0.000000e+00> : vector<2x256xf32>
    %689 = tpu.matmul %688, %129, %cst_124 {dimension_numbers = #tpu.dot_dimension_numbers<[1], [0], [0], [1], [0, 0, 1, 1], [], []>} : vector<2x64xf32>, vector<64x256xf32>, vector<2x256xf32> -> vector<2x256xf32>
    %690 = vector.extract_strided_slice %128 {offsets = [12, 0], sizes = [2, 128], strides = [1, 1]} : vector<16x256xf32> to vector<2x128xf32>
    %691 = vector.extract_strided_slice %689 {offsets = [0, 0], sizes = [2, 128], strides = [1, 1]} : vector<2x256xf32> to vector<2x128xf32>
    %692 = arith.addf %690, %691 : vector<2x128xf32>
    %693 = vector.extract_strided_slice %128 {offsets = [2, 128], sizes = [2, 128], strides = [1, 1]} : vector<16x256xf32> to vector<2x128xf32>
    %694 = vector.extract_strided_slice %689 {offsets = [0, 128], sizes = [2, 128], strides = [1, 1]} : vector<2x256xf32> to vector<2x128xf32>
    %695 = arith.addf %693, %694 : vector<2x128xf32>
    %696 = vector.extract_strided_slice %692 {offsets = [0, 0], sizes = [2, 32], strides = [1, 1]} : vector<2x128xf32> to vector<2x32xf32>
    %697 = arith.negf %696 : vector<2x32xf32>
    %698 = math.exp %697 : vector<2x32xf32>
    %cst_125 = arith.constant 1.000000e+00 : f32
    %699 = vector.broadcast %cst_125 : f32 to vector<2x32xf32>
    %700 = arith.addf %699, %698 : vector<2x32xf32>
    %701 = arith.divf %699, %700 : vector<2x32xf32>
    %702 = vector.extract_strided_slice %692 {offsets = [0, 32], sizes = [2, 32], strides = [1, 1]} : vector<2x128xf32> to vector<2x32xf32>
    %703 = arith.negf %702 : vector<2x32xf32>
    %704 = math.exp %703 : vector<2x32xf32>
    %cst_126 = arith.constant 1.000000e+00 : f32
    %705 = vector.broadcast %cst_126 : f32 to vector<2x32xf32>
    %706 = arith.addf %705, %704 : vector<2x32xf32>
    %707 = arith.divf %705, %706 : vector<2x32xf32>
    %708 = vector.extract_strided_slice %692 {offsets = [0, 64], sizes = [2, 32], strides = [1, 1]} : vector<2x128xf32> to vector<2x32xf32>
    %709 = math.tanh %708 : vector<2x32xf32>
    %710 = vector.extract_strided_slice %692 {offsets = [0, 96], sizes = [2, 32], strides = [1, 1]} : vector<2x128xf32> to vector<2x32xf32>
    %711 = arith.negf %710 : vector<2x32xf32>
    %712 = math.exp %711 : vector<2x32xf32>
    %cst_127 = arith.constant 1.000000e+00 : f32
    %713 = vector.broadcast %cst_127 : f32 to vector<2x32xf32>
    %714 = arith.addf %713, %712 : vector<2x32xf32>
    %715 = arith.divf %713, %714 : vector<2x32xf32>
    %716 = arith.mulf %707, %660 : vector<2x32xf32>
    %717 = arith.mulf %701, %709 : vector<2x32xf32>
    %718 = arith.addf %716, %717 : vector<2x32xf32>
    %719 = math.tanh %718 : vector<2x32xf32>
    %720 = arith.mulf %715, %719 : vector<2x32xf32>
    %721 = vector.extract_strided_slice %695 {offsets = [0, 0], sizes = [2, 32], strides = [1, 1]} : vector<2x128xf32> to vector<2x32xf32>
    %722 = arith.negf %721 : vector<2x32xf32>
    %723 = math.exp %722 : vector<2x32xf32>
    %cst_128 = arith.constant 1.000000e+00 : f32
    %724 = vector.broadcast %cst_128 : f32 to vector<2x32xf32>
    %725 = arith.addf %724, %723 : vector<2x32xf32>
    %726 = arith.divf %724, %725 : vector<2x32xf32>
    %727 = vector.extract_strided_slice %695 {offsets = [0, 32], sizes = [2, 32], strides = [1, 1]} : vector<2x128xf32> to vector<2x32xf32>
    %728 = arith.negf %727 : vector<2x32xf32>
    %729 = math.exp %728 : vector<2x32xf32>
    %cst_129 = arith.constant 1.000000e+00 : f32
    %730 = vector.broadcast %cst_129 : f32 to vector<2x32xf32>
    %731 = arith.addf %730, %729 : vector<2x32xf32>
    %732 = arith.divf %730, %731 : vector<2x32xf32>
    %733 = vector.extract_strided_slice %695 {offsets = [0, 64], sizes = [2, 32], strides = [1, 1]} : vector<2x128xf32> to vector<2x32xf32>
    %734 = math.tanh %733 : vector<2x32xf32>
    %735 = vector.extract_strided_slice %695 {offsets = [0, 96], sizes = [2, 32], strides = [1, 1]} : vector<2x128xf32> to vector<2x32xf32>
    %736 = arith.negf %735 : vector<2x32xf32>
    %737 = math.exp %736 : vector<2x32xf32>
    %cst_130 = arith.constant 1.000000e+00 : f32
    %738 = vector.broadcast %cst_130 : f32 to vector<2x32xf32>
    %739 = arith.addf %738, %737 : vector<2x32xf32>
    %740 = arith.divf %738, %739 : vector<2x32xf32>
    %741 = arith.mulf %732, %674 : vector<2x32xf32>
    %742 = arith.mulf %726, %734 : vector<2x32xf32>
    %743 = arith.addf %741, %742 : vector<2x32xf32>
    %744 = math.tanh %743 : vector<2x32xf32>
    %745 = arith.mulf %740, %744 : vector<2x32xf32>
    %746 = vector.broadcast %686 : vector<2x1xf32> to vector<2x32xf32>
    %747 = arith.mulf %746, %718 : vector<2x32xf32>
    %cst_131 = arith.constant 1.000000e+00 : f32
    %748 = vector.broadcast %cst_131 : f32 to vector<2x1xf32>
    %749 = arith.subf %748, %686 : vector<2x1xf32>
    %750 = vector.broadcast %749 : vector<2x1xf32> to vector<2x32xf32>
    %751 = arith.mulf %750, %660 : vector<2x32xf32>
    %752 = arith.addf %747, %751 : vector<2x32xf32>
    %753 = vector.broadcast %686 : vector<2x1xf32> to vector<2x32xf32>
    %754 = arith.mulf %753, %720 : vector<2x32xf32>
    %cst_132 = arith.constant 1.000000e+00 : f32
    %755 = vector.broadcast %cst_132 : f32 to vector<2x1xf32>
    %756 = arith.subf %755, %686 : vector<2x1xf32>
    %757 = vector.broadcast %756 : vector<2x1xf32> to vector<2x32xf32>
    %758 = arith.mulf %757, %667 : vector<2x32xf32>
    %759 = arith.addf %754, %758 : vector<2x32xf32>
    %760 = vector.broadcast %687 : vector<2x1xf32> to vector<2x32xf32>
    %761 = arith.mulf %760, %743 : vector<2x32xf32>
    %cst_133 = arith.constant 1.000000e+00 : f32
    %762 = vector.broadcast %cst_133 : f32 to vector<2x1xf32>
    %763 = arith.subf %762, %687 : vector<2x1xf32>
    %764 = vector.broadcast %763 : vector<2x1xf32> to vector<2x32xf32>
    %765 = arith.mulf %764, %674 : vector<2x32xf32>
    %766 = arith.addf %761, %765 : vector<2x32xf32>
    %767 = vector.broadcast %687 : vector<2x1xf32> to vector<2x32xf32>
    %768 = arith.mulf %767, %745 : vector<2x32xf32>
    %cst_134 = arith.constant 1.000000e+00 : f32
    %769 = vector.broadcast %cst_134 : f32 to vector<2x1xf32>
    %770 = arith.subf %769, %687 : vector<2x1xf32>
    %771 = vector.broadcast %770 : vector<2x1xf32> to vector<2x32xf32>
    %772 = arith.mulf %771, %681 : vector<2x32xf32>
    %773 = arith.addf %768, %772 : vector<2x32xf32>
    %774 = vector.broadcast %686 : vector<2x1xf32> to vector<2x32xf32>
    %775 = arith.mulf %774, %720 : vector<2x32xf32>
    %776 = vector.broadcast %687 : vector<2x1xf32> to vector<2x32xf32>
    %777 = arith.mulf %776, %745 : vector<2x32xf32>
    %778 = vector.extract_strided_slice %10 {offsets = [14, 0], sizes = [2, 1], strides = [1, 1]} : vector<16x1xf32> to vector<2x1xf32>
    %779 = vector.extract_strided_slice %10 {offsets = [0, 0], sizes = [2, 1], strides = [1, 1]} : vector<16x1xf32> to vector<2x1xf32>
    %780 = tpu.concatenate %759, %773 in 1 : vector<2x32xf32>, vector<2x32xf32> -> vector<2x64xf32>
    %cst_135 = arith.constant dense<0.000000e+00> : vector<2x256xf32>
    %781 = tpu.matmul %780, %129, %cst_135 {dimension_numbers = #tpu.dot_dimension_numbers<[1], [0], [0], [1], [0, 0, 1, 1], [], []>} : vector<2x64xf32>, vector<64x256xf32>, vector<2x256xf32> -> vector<2x256xf32>
    %782 = vector.extract_strided_slice %128 {offsets = [14, 0], sizes = [2, 128], strides = [1, 1]} : vector<16x256xf32> to vector<2x128xf32>
    %783 = vector.extract_strided_slice %781 {offsets = [0, 0], sizes = [2, 128], strides = [1, 1]} : vector<2x256xf32> to vector<2x128xf32>
    %784 = arith.addf %782, %783 : vector<2x128xf32>
    %785 = vector.extract_strided_slice %128 {offsets = [0, 128], sizes = [2, 128], strides = [1, 1]} : vector<16x256xf32> to vector<2x128xf32>
    %786 = vector.extract_strided_slice %781 {offsets = [0, 128], sizes = [2, 128], strides = [1, 1]} : vector<2x256xf32> to vector<2x128xf32>
    %787 = arith.addf %785, %786 : vector<2x128xf32>
    %788 = vector.extract_strided_slice %784 {offsets = [0, 0], sizes = [2, 32], strides = [1, 1]} : vector<2x128xf32> to vector<2x32xf32>
    %789 = arith.negf %788 : vector<2x32xf32>
    %790 = math.exp %789 : vector<2x32xf32>
    %cst_136 = arith.constant 1.000000e+00 : f32
    %791 = vector.broadcast %cst_136 : f32 to vector<2x32xf32>
    %792 = arith.addf %791, %790 : vector<2x32xf32>
    %793 = arith.divf %791, %792 : vector<2x32xf32>
    %794 = vector.extract_strided_slice %784 {offsets = [0, 32], sizes = [2, 32], strides = [1, 1]} : vector<2x128xf32> to vector<2x32xf32>
    %795 = arith.negf %794 : vector<2x32xf32>
    %796 = math.exp %795 : vector<2x32xf32>
    %cst_137 = arith.constant 1.000000e+00 : f32
    %797 = vector.broadcast %cst_137 : f32 to vector<2x32xf32>
    %798 = arith.addf %797, %796 : vector<2x32xf32>
    %799 = arith.divf %797, %798 : vector<2x32xf32>
    %800 = vector.extract_strided_slice %784 {offsets = [0, 64], sizes = [2, 32], strides = [1, 1]} : vector<2x128xf32> to vector<2x32xf32>
    %801 = math.tanh %800 : vector<2x32xf32>
    %802 = vector.extract_strided_slice %784 {offsets = [0, 96], sizes = [2, 32], strides = [1, 1]} : vector<2x128xf32> to vector<2x32xf32>
    %803 = arith.negf %802 : vector<2x32xf32>
    %804 = math.exp %803 : vector<2x32xf32>
    %cst_138 = arith.constant 1.000000e+00 : f32
    %805 = vector.broadcast %cst_138 : f32 to vector<2x32xf32>
    %806 = arith.addf %805, %804 : vector<2x32xf32>
    %807 = arith.divf %805, %806 : vector<2x32xf32>
    %808 = arith.mulf %799, %752 : vector<2x32xf32>
    %809 = arith.mulf %793, %801 : vector<2x32xf32>
    %810 = arith.addf %808, %809 : vector<2x32xf32>
    %811 = math.tanh %810 : vector<2x32xf32>
    %812 = arith.mulf %807, %811 : vector<2x32xf32>
    %813 = vector.extract_strided_slice %787 {offsets = [0, 0], sizes = [2, 32], strides = [1, 1]} : vector<2x128xf32> to vector<2x32xf32>
    %814 = arith.negf %813 : vector<2x32xf32>
    %815 = math.exp %814 : vector<2x32xf32>
    %cst_139 = arith.constant 1.000000e+00 : f32
    %816 = vector.broadcast %cst_139 : f32 to vector<2x32xf32>
    %817 = arith.addf %816, %815 : vector<2x32xf32>
    %818 = arith.divf %816, %817 : vector<2x32xf32>
    %819 = vector.extract_strided_slice %787 {offsets = [0, 32], sizes = [2, 32], strides = [1, 1]} : vector<2x128xf32> to vector<2x32xf32>
    %820 = arith.negf %819 : vector<2x32xf32>
    %821 = math.exp %820 : vector<2x32xf32>
    %cst_140 = arith.constant 1.000000e+00 : f32
    %822 = vector.broadcast %cst_140 : f32 to vector<2x32xf32>
    %823 = arith.addf %822, %821 : vector<2x32xf32>
    %824 = arith.divf %822, %823 : vector<2x32xf32>
    %825 = vector.extract_strided_slice %787 {offsets = [0, 64], sizes = [2, 32], strides = [1, 1]} : vector<2x128xf32> to vector<2x32xf32>
    %826 = math.tanh %825 : vector<2x32xf32>
    %827 = vector.extract_strided_slice %787 {offsets = [0, 96], sizes = [2, 32], strides = [1, 1]} : vector<2x128xf32> to vector<2x32xf32>
    %828 = arith.negf %827 : vector<2x32xf32>
    %829 = math.exp %828 : vector<2x32xf32>
    %cst_141 = arith.constant 1.000000e+00 : f32
    %830 = vector.broadcast %cst_141 : f32 to vector<2x32xf32>
    %831 = arith.addf %830, %829 : vector<2x32xf32>
    %832 = arith.divf %830, %831 : vector<2x32xf32>
    %833 = arith.mulf %824, %766 : vector<2x32xf32>
    %834 = arith.mulf %818, %826 : vector<2x32xf32>
    %835 = arith.addf %833, %834 : vector<2x32xf32>
    %836 = math.tanh %835 : vector<2x32xf32>
    %837 = arith.mulf %832, %836 : vector<2x32xf32>
    %838 = vector.broadcast %778 : vector<2x1xf32> to vector<2x32xf32>
    %839 = arith.mulf %838, %812 : vector<2x32xf32>
    %840 = vector.broadcast %779 : vector<2x1xf32> to vector<2x32xf32>
    %841 = arith.mulf %840, %837 : vector<2x32xf32>
    %842 = tpu.concatenate %223, %841 in 1 : vector<2x32xf32>, vector<2x32xf32> -> vector<2x64xf32>
    %843 = tpu.concatenate %315, %777 in 1 : vector<2x32xf32>, vector<2x32xf32> -> vector<2x64xf32>
    %844 = tpu.concatenate %407, %685 in 1 : vector<2x32xf32>, vector<2x32xf32> -> vector<2x64xf32>
    %845 = tpu.concatenate %499, %593 in 1 : vector<2x32xf32>, vector<2x32xf32> -> vector<2x64xf32>
    %846 = tpu.concatenate %591, %501 in 1 : vector<2x32xf32>, vector<2x32xf32> -> vector<2x64xf32>
    %847 = tpu.concatenate %683, %409 in 1 : vector<2x32xf32>, vector<2x32xf32> -> vector<2x64xf32>
    %848 = tpu.concatenate %775, %317 in 1 : vector<2x32xf32>, vector<2x32xf32> -> vector<2x64xf32>
    %849 = tpu.concatenate %839, %225 in 1 : vector<2x32xf32>, vector<2x32xf32> -> vector<2x64xf32>
    %850 = tpu.concatenate %842, %843, %844, %845, %846, %847, %848, %849 in 0 : vector<2x64xf32>, vector<2x64xf32>, vector<2x64xf32>, vector<2x64xf32>, vector<2x64xf32>, vector<2x64xf32>, vector<2x64xf32>, vector<2x64xf32> -> vector<16x64xf32>
    %c0_142 = arith.constant 0 : index
    %c0_143 = arith.constant 0 : index
    %851 = vector.load %arg17[%c0_142, %c0_143] : memref<64x256xf32, #tpu.memory_space<vmem>>, vector<64x256xf32>
    %cst_144 = arith.constant dense<0.000000e+00> : vector<16x256xf32>
    %852 = tpu.matmul %850, %851, %cst_144 {dimension_numbers = #tpu.dot_dimension_numbers<[1], [0], [0], [1], [0, 0, 1, 1], [], []>} : vector<16x64xf32>, vector<64x256xf32>, vector<16x256xf32> -> vector<16x256xf32>
    %c0_145 = arith.constant 0 : index
    %c0_146 = arith.constant 0 : index
    %853 = vector.load %arg19[%c0_145, %c0_146] : memref<1x256xf32, #tpu.memory_space<vmem>>, vector<1x256xf32>
    %854 = vector.broadcast %853 : vector<1x256xf32> to vector<16x256xf32>
    %855 = arith.addf %852, %854 : vector<16x256xf32>
    %c0_147 = arith.constant 0 : index
    %c0_148 = arith.constant 0 : index
    %856 = vector.load %arg18[%c0_147, %c0_148] : memref<64x256xf32, #tpu.memory_space<vmem>>, vector<64x256xf32>
    %cst_149 = arith.constant 0.000000e+00 : f32
    %857 = vector.broadcast %cst_149 : f32 to vector<2x32xf32>
    %cst_150 = arith.constant 0.000000e+00 : f32
    %858 = vector.broadcast %cst_150 : f32 to vector<2x32xf32>
    %cst_151 = arith.constant 0.000000e+00 : f32
    %859 = vector.broadcast %cst_151 : f32 to vector<2x32xf32>
    %cst_152 = arith.constant 0.000000e+00 : f32
    %860 = vector.broadcast %cst_152 : f32 to vector<2x32xf32>
    %861 = vector.extract_strided_slice %10 {offsets = [0, 0], sizes = [2, 1], strides = [1, 1]} : vector<16x1xf32> to vector<2x1xf32>
    %862 = vector.extract_strided_slice %10 {offsets = [14, 0], sizes = [2, 1], strides = [1, 1]} : vector<16x1xf32> to vector<2x1xf32>
    %863 = tpu.concatenate %857, %859 in 1 : vector<2x32xf32>, vector<2x32xf32> -> vector<2x64xf32>
    %cst_153 = arith.constant dense<0.000000e+00> : vector<2x256xf32>
    %864 = tpu.matmul %863, %856, %cst_153 {dimension_numbers = #tpu.dot_dimension_numbers<[1], [0], [0], [1], [0, 0, 1, 1], [], []>} : vector<2x64xf32>, vector<64x256xf32>, vector<2x256xf32> -> vector<2x256xf32>
    %865 = vector.extract_strided_slice %855 {offsets = [0, 0], sizes = [2, 128], strides = [1, 1]} : vector<16x256xf32> to vector<2x128xf32>
    %866 = vector.extract_strided_slice %864 {offsets = [0, 0], sizes = [2, 128], strides = [1, 1]} : vector<2x256xf32> to vector<2x128xf32>
    %867 = arith.addf %865, %866 : vector<2x128xf32>
    %868 = vector.extract_strided_slice %855 {offsets = [14, 128], sizes = [2, 128], strides = [1, 1]} : vector<16x256xf32> to vector<2x128xf32>
    %869 = vector.extract_strided_slice %864 {offsets = [0, 128], sizes = [2, 128], strides = [1, 1]} : vector<2x256xf32> to vector<2x128xf32>
    %870 = arith.addf %868, %869 : vector<2x128xf32>
    %871 = vector.extract_strided_slice %867 {offsets = [0, 0], sizes = [2, 32], strides = [1, 1]} : vector<2x128xf32> to vector<2x32xf32>
    %872 = arith.negf %871 : vector<2x32xf32>
    %873 = math.exp %872 : vector<2x32xf32>
    %cst_154 = arith.constant 1.000000e+00 : f32
    %874 = vector.broadcast %cst_154 : f32 to vector<2x32xf32>
    %875 = arith.addf %874, %873 : vector<2x32xf32>
    %876 = arith.divf %874, %875 : vector<2x32xf32>
    %877 = vector.extract_strided_slice %867 {offsets = [0, 32], sizes = [2, 32], strides = [1, 1]} : vector<2x128xf32> to vector<2x32xf32>
    %878 = arith.negf %877 : vector<2x32xf32>
    %879 = math.exp %878 : vector<2x32xf32>
    %cst_155 = arith.constant 1.000000e+00 : f32
    %880 = vector.broadcast %cst_155 : f32 to vector<2x32xf32>
    %881 = arith.addf %880, %879 : vector<2x32xf32>
    %882 = arith.divf %880, %881 : vector<2x32xf32>
    %883 = vector.extract_strided_slice %867 {offsets = [0, 64], sizes = [2, 32], strides = [1, 1]} : vector<2x128xf32> to vector<2x32xf32>
    %884 = math.tanh %883 : vector<2x32xf32>
    %885 = vector.extract_strided_slice %867 {offsets = [0, 96], sizes = [2, 32], strides = [1, 1]} : vector<2x128xf32> to vector<2x32xf32>
    %886 = arith.negf %885 : vector<2x32xf32>
    %887 = math.exp %886 : vector<2x32xf32>
    %cst_156 = arith.constant 1.000000e+00 : f32
    %888 = vector.broadcast %cst_156 : f32 to vector<2x32xf32>
    %889 = arith.addf %888, %887 : vector<2x32xf32>
    %890 = arith.divf %888, %889 : vector<2x32xf32>
    %891 = arith.mulf %882, %858 : vector<2x32xf32>
    %892 = arith.mulf %876, %884 : vector<2x32xf32>
    %893 = arith.addf %891, %892 : vector<2x32xf32>
    %894 = math.tanh %893 : vector<2x32xf32>
    %895 = arith.mulf %890, %894 : vector<2x32xf32>
    %896 = vector.extract_strided_slice %870 {offsets = [0, 0], sizes = [2, 32], strides = [1, 1]} : vector<2x128xf32> to vector<2x32xf32>
    %897 = arith.negf %896 : vector<2x32xf32>
    %898 = math.exp %897 : vector<2x32xf32>
    %cst_157 = arith.constant 1.000000e+00 : f32
    %899 = vector.broadcast %cst_157 : f32 to vector<2x32xf32>
    %900 = arith.addf %899, %898 : vector<2x32xf32>
    %901 = arith.divf %899, %900 : vector<2x32xf32>
    %902 = vector.extract_strided_slice %870 {offsets = [0, 32], sizes = [2, 32], strides = [1, 1]} : vector<2x128xf32> to vector<2x32xf32>
    %903 = arith.negf %902 : vector<2x32xf32>
    %904 = math.exp %903 : vector<2x32xf32>
    %cst_158 = arith.constant 1.000000e+00 : f32
    %905 = vector.broadcast %cst_158 : f32 to vector<2x32xf32>
    %906 = arith.addf %905, %904 : vector<2x32xf32>
    %907 = arith.divf %905, %906 : vector<2x32xf32>
    %908 = vector.extract_strided_slice %870 {offsets = [0, 64], sizes = [2, 32], strides = [1, 1]} : vector<2x128xf32> to vector<2x32xf32>
    %909 = math.tanh %908 : vector<2x32xf32>
    %910 = vector.extract_strided_slice %870 {offsets = [0, 96], sizes = [2, 32], strides = [1, 1]} : vector<2x128xf32> to vector<2x32xf32>
    %911 = arith.negf %910 : vector<2x32xf32>
    %912 = math.exp %911 : vector<2x32xf32>
    %cst_159 = arith.constant 1.000000e+00 : f32
    %913 = vector.broadcast %cst_159 : f32 to vector<2x32xf32>
    %914 = arith.addf %913, %912 : vector<2x32xf32>
    %915 = arith.divf %913, %914 : vector<2x32xf32>
    %916 = arith.mulf %907, %860 : vector<2x32xf32>
    %917 = arith.mulf %901, %909 : vector<2x32xf32>
    %918 = arith.addf %916, %917 : vector<2x32xf32>
    %919 = math.tanh %918 : vector<2x32xf32>
    %920 = arith.mulf %915, %919 : vector<2x32xf32>
    %921 = vector.broadcast %861 : vector<2x1xf32> to vector<2x32xf32>
    %922 = arith.mulf %921, %893 : vector<2x32xf32>
    %cst_160 = arith.constant 1.000000e+00 : f32
    %923 = vector.broadcast %cst_160 : f32 to vector<2x1xf32>
    %924 = arith.subf %923, %861 : vector<2x1xf32>
    %925 = vector.broadcast %924 : vector<2x1xf32> to vector<2x32xf32>
    %926 = arith.mulf %925, %858 : vector<2x32xf32>
    %927 = arith.addf %922, %926 : vector<2x32xf32>
    %928 = vector.broadcast %861 : vector<2x1xf32> to vector<2x32xf32>
    %929 = arith.mulf %928, %895 : vector<2x32xf32>
    %cst_161 = arith.constant 1.000000e+00 : f32
    %930 = vector.broadcast %cst_161 : f32 to vector<2x1xf32>
    %931 = arith.subf %930, %861 : vector<2x1xf32>
    %932 = vector.broadcast %931 : vector<2x1xf32> to vector<2x32xf32>
    %933 = arith.mulf %932, %857 : vector<2x32xf32>
    %934 = arith.addf %929, %933 : vector<2x32xf32>
    %935 = vector.broadcast %862 : vector<2x1xf32> to vector<2x32xf32>
    %936 = arith.mulf %935, %918 : vector<2x32xf32>
    %cst_162 = arith.constant 1.000000e+00 : f32
    %937 = vector.broadcast %cst_162 : f32 to vector<2x1xf32>
    %938 = arith.subf %937, %862 : vector<2x1xf32>
    %939 = vector.broadcast %938 : vector<2x1xf32> to vector<2x32xf32>
    %940 = arith.mulf %939, %860 : vector<2x32xf32>
    %941 = arith.addf %936, %940 : vector<2x32xf32>
    %942 = vector.broadcast %862 : vector<2x1xf32> to vector<2x32xf32>
    %943 = arith.mulf %942, %920 : vector<2x32xf32>
    %cst_163 = arith.constant 1.000000e+00 : f32
    %944 = vector.broadcast %cst_163 : f32 to vector<2x1xf32>
    %945 = arith.subf %944, %862 : vector<2x1xf32>
    %946 = vector.broadcast %945 : vector<2x1xf32> to vector<2x32xf32>
    %947 = arith.mulf %946, %859 : vector<2x32xf32>
    %948 = arith.addf %943, %947 : vector<2x32xf32>
    %949 = vector.broadcast %861 : vector<2x1xf32> to vector<2x32xf32>
    %950 = arith.mulf %949, %895 : vector<2x32xf32>
    %951 = vector.broadcast %862 : vector<2x1xf32> to vector<2x32xf32>
    %952 = arith.mulf %951, %920 : vector<2x32xf32>
    %953 = vector.extract_strided_slice %10 {offsets = [2, 0], sizes = [2, 1], strides = [1, 1]} : vector<16x1xf32> to vector<2x1xf32>
    %954 = vector.extract_strided_slice %10 {offsets = [12, 0], sizes = [2, 1], strides = [1, 1]} : vector<16x1xf32> to vector<2x1xf32>
    %955 = tpu.concatenate %934, %948 in 1 : vector<2x32xf32>, vector<2x32xf32> -> vector<2x64xf32>
    %cst_164 = arith.constant dense<0.000000e+00> : vector<2x256xf32>
    %956 = tpu.matmul %955, %856, %cst_164 {dimension_numbers = #tpu.dot_dimension_numbers<[1], [0], [0], [1], [0, 0, 1, 1], [], []>} : vector<2x64xf32>, vector<64x256xf32>, vector<2x256xf32> -> vector<2x256xf32>
    %957 = vector.extract_strided_slice %855 {offsets = [2, 0], sizes = [2, 128], strides = [1, 1]} : vector<16x256xf32> to vector<2x128xf32>
    %958 = vector.extract_strided_slice %956 {offsets = [0, 0], sizes = [2, 128], strides = [1, 1]} : vector<2x256xf32> to vector<2x128xf32>
    %959 = arith.addf %957, %958 : vector<2x128xf32>
    %960 = vector.extract_strided_slice %855 {offsets = [12, 128], sizes = [2, 128], strides = [1, 1]} : vector<16x256xf32> to vector<2x128xf32>
    %961 = vector.extract_strided_slice %956 {offsets = [0, 128], sizes = [2, 128], strides = [1, 1]} : vector<2x256xf32> to vector<2x128xf32>
    %962 = arith.addf %960, %961 : vector<2x128xf32>
    %963 = vector.extract_strided_slice %959 {offsets = [0, 0], sizes = [2, 32], strides = [1, 1]} : vector<2x128xf32> to vector<2x32xf32>
    %964 = arith.negf %963 : vector<2x32xf32>
    %965 = math.exp %964 : vector<2x32xf32>
    %cst_165 = arith.constant 1.000000e+00 : f32
    %966 = vector.broadcast %cst_165 : f32 to vector<2x32xf32>
    %967 = arith.addf %966, %965 : vector<2x32xf32>
    %968 = arith.divf %966, %967 : vector<2x32xf32>
    %969 = vector.extract_strided_slice %959 {offsets = [0, 32], sizes = [2, 32], strides = [1, 1]} : vector<2x128xf32> to vector<2x32xf32>
    %970 = arith.negf %969 : vector<2x32xf32>
    %971 = math.exp %970 : vector<2x32xf32>
    %cst_166 = arith.constant 1.000000e+00 : f32
    %972 = vector.broadcast %cst_166 : f32 to vector<2x32xf32>
    %973 = arith.addf %972, %971 : vector<2x32xf32>
    %974 = arith.divf %972, %973 : vector<2x32xf32>
    %975 = vector.extract_strided_slice %959 {offsets = [0, 64], sizes = [2, 32], strides = [1, 1]} : vector<2x128xf32> to vector<2x32xf32>
    %976 = math.tanh %975 : vector<2x32xf32>
    %977 = vector.extract_strided_slice %959 {offsets = [0, 96], sizes = [2, 32], strides = [1, 1]} : vector<2x128xf32> to vector<2x32xf32>
    %978 = arith.negf %977 : vector<2x32xf32>
    %979 = math.exp %978 : vector<2x32xf32>
    %cst_167 = arith.constant 1.000000e+00 : f32
    %980 = vector.broadcast %cst_167 : f32 to vector<2x32xf32>
    %981 = arith.addf %980, %979 : vector<2x32xf32>
    %982 = arith.divf %980, %981 : vector<2x32xf32>
    %983 = arith.mulf %974, %927 : vector<2x32xf32>
    %984 = arith.mulf %968, %976 : vector<2x32xf32>
    %985 = arith.addf %983, %984 : vector<2x32xf32>
    %986 = math.tanh %985 : vector<2x32xf32>
    %987 = arith.mulf %982, %986 : vector<2x32xf32>
    %988 = vector.extract_strided_slice %962 {offsets = [0, 0], sizes = [2, 32], strides = [1, 1]} : vector<2x128xf32> to vector<2x32xf32>
    %989 = arith.negf %988 : vector<2x32xf32>
    %990 = math.exp %989 : vector<2x32xf32>
    %cst_168 = arith.constant 1.000000e+00 : f32
    %991 = vector.broadcast %cst_168 : f32 to vector<2x32xf32>
    %992 = arith.addf %991, %990 : vector<2x32xf32>
    %993 = arith.divf %991, %992 : vector<2x32xf32>
    %994 = vector.extract_strided_slice %962 {offsets = [0, 32], sizes = [2, 32], strides = [1, 1]} : vector<2x128xf32> to vector<2x32xf32>
    %995 = arith.negf %994 : vector<2x32xf32>
    %996 = math.exp %995 : vector<2x32xf32>
    %cst_169 = arith.constant 1.000000e+00 : f32
    %997 = vector.broadcast %cst_169 : f32 to vector<2x32xf32>
    %998 = arith.addf %997, %996 : vector<2x32xf32>
    %999 = arith.divf %997, %998 : vector<2x32xf32>
    %1000 = vector.extract_strided_slice %962 {offsets = [0, 64], sizes = [2, 32], strides = [1, 1]} : vector<2x128xf32> to vector<2x32xf32>
    %1001 = math.tanh %1000 : vector<2x32xf32>
    %1002 = vector.extract_strided_slice %962 {offsets = [0, 96], sizes = [2, 32], strides = [1, 1]} : vector<2x128xf32> to vector<2x32xf32>
    %1003 = arith.negf %1002 : vector<2x32xf32>
    %1004 = math.exp %1003 : vector<2x32xf32>
    %cst_170 = arith.constant 1.000000e+00 : f32
    %1005 = vector.broadcast %cst_170 : f32 to vector<2x32xf32>
    %1006 = arith.addf %1005, %1004 : vector<2x32xf32>
    %1007 = arith.divf %1005, %1006 : vector<2x32xf32>
    %1008 = arith.mulf %999, %941 : vector<2x32xf32>
    %1009 = arith.mulf %993, %1001 : vector<2x32xf32>
    %1010 = arith.addf %1008, %1009 : vector<2x32xf32>
    %1011 = math.tanh %1010 : vector<2x32xf32>
    %1012 = arith.mulf %1007, %1011 : vector<2x32xf32>
    %1013 = vector.broadcast %953 : vector<2x1xf32> to vector<2x32xf32>
    %1014 = arith.mulf %1013, %985 : vector<2x32xf32>
    %cst_171 = arith.constant 1.000000e+00 : f32
    %1015 = vector.broadcast %cst_171 : f32 to vector<2x1xf32>
    %1016 = arith.subf %1015, %953 : vector<2x1xf32>
    %1017 = vector.broadcast %1016 : vector<2x1xf32> to vector<2x32xf32>
    %1018 = arith.mulf %1017, %927 : vector<2x32xf32>
    %1019 = arith.addf %1014, %1018 : vector<2x32xf32>
    %1020 = vector.broadcast %953 : vector<2x1xf32> to vector<2x32xf32>
    %1021 = arith.mulf %1020, %987 : vector<2x32xf32>
    %cst_172 = arith.constant 1.000000e+00 : f32
    %1022 = vector.broadcast %cst_172 : f32 to vector<2x1xf32>
    %1023 = arith.subf %1022, %953 : vector<2x1xf32>
    %1024 = vector.broadcast %1023 : vector<2x1xf32> to vector<2x32xf32>
    %1025 = arith.mulf %1024, %934 : vector<2x32xf32>
    %1026 = arith.addf %1021, %1025 : vector<2x32xf32>
    %1027 = vector.broadcast %954 : vector<2x1xf32> to vector<2x32xf32>
    %1028 = arith.mulf %1027, %1010 : vector<2x32xf32>
    %cst_173 = arith.constant 1.000000e+00 : f32
    %1029 = vector.broadcast %cst_173 : f32 to vector<2x1xf32>
    %1030 = arith.subf %1029, %954 : vector<2x1xf32>
    %1031 = vector.broadcast %1030 : vector<2x1xf32> to vector<2x32xf32>
    %1032 = arith.mulf %1031, %941 : vector<2x32xf32>
    %1033 = arith.addf %1028, %1032 : vector<2x32xf32>
    %1034 = vector.broadcast %954 : vector<2x1xf32> to vector<2x32xf32>
    %1035 = arith.mulf %1034, %1012 : vector<2x32xf32>
    %cst_174 = arith.constant 1.000000e+00 : f32
    %1036 = vector.broadcast %cst_174 : f32 to vector<2x1xf32>
    %1037 = arith.subf %1036, %954 : vector<2x1xf32>
    %1038 = vector.broadcast %1037 : vector<2x1xf32> to vector<2x32xf32>
    %1039 = arith.mulf %1038, %948 : vector<2x32xf32>
    %1040 = arith.addf %1035, %1039 : vector<2x32xf32>
    %1041 = vector.broadcast %953 : vector<2x1xf32> to vector<2x32xf32>
    %1042 = arith.mulf %1041, %987 : vector<2x32xf32>
    %1043 = vector.broadcast %954 : vector<2x1xf32> to vector<2x32xf32>
    %1044 = arith.mulf %1043, %1012 : vector<2x32xf32>
    %1045 = vector.extract_strided_slice %10 {offsets = [4, 0], sizes = [2, 1], strides = [1, 1]} : vector<16x1xf32> to vector<2x1xf32>
    %1046 = vector.extract_strided_slice %10 {offsets = [10, 0], sizes = [2, 1], strides = [1, 1]} : vector<16x1xf32> to vector<2x1xf32>
    %1047 = tpu.concatenate %1026, %1040 in 1 : vector<2x32xf32>, vector<2x32xf32> -> vector<2x64xf32>
    %cst_175 = arith.constant dense<0.000000e+00> : vector<2x256xf32>
    %1048 = tpu.matmul %1047, %856, %cst_175 {dimension_numbers = #tpu.dot_dimension_numbers<[1], [0], [0], [1], [0, 0, 1, 1], [], []>} : vector<2x64xf32>, vector<64x256xf32>, vector<2x256xf32> -> vector<2x256xf32>
    %1049 = vector.extract_strided_slice %855 {offsets = [4, 0], sizes = [2, 128], strides = [1, 1]} : vector<16x256xf32> to vector<2x128xf32>
    %1050 = vector.extract_strided_slice %1048 {offsets = [0, 0], sizes = [2, 128], strides = [1, 1]} : vector<2x256xf32> to vector<2x128xf32>
    %1051 = arith.addf %1049, %1050 : vector<2x128xf32>
    %1052 = vector.extract_strided_slice %855 {offsets = [10, 128], sizes = [2, 128], strides = [1, 1]} : vector<16x256xf32> to vector<2x128xf32>
    %1053 = vector.extract_strided_slice %1048 {offsets = [0, 128], sizes = [2, 128], strides = [1, 1]} : vector<2x256xf32> to vector<2x128xf32>
    %1054 = arith.addf %1052, %1053 : vector<2x128xf32>
    %1055 = vector.extract_strided_slice %1051 {offsets = [0, 0], sizes = [2, 32], strides = [1, 1]} : vector<2x128xf32> to vector<2x32xf32>
    %1056 = arith.negf %1055 : vector<2x32xf32>
    %1057 = math.exp %1056 : vector<2x32xf32>
    %cst_176 = arith.constant 1.000000e+00 : f32
    %1058 = vector.broadcast %cst_176 : f32 to vector<2x32xf32>
    %1059 = arith.addf %1058, %1057 : vector<2x32xf32>
    %1060 = arith.divf %1058, %1059 : vector<2x32xf32>
    %1061 = vector.extract_strided_slice %1051 {offsets = [0, 32], sizes = [2, 32], strides = [1, 1]} : vector<2x128xf32> to vector<2x32xf32>
    %1062 = arith.negf %1061 : vector<2x32xf32>
    %1063 = math.exp %1062 : vector<2x32xf32>
    %cst_177 = arith.constant 1.000000e+00 : f32
    %1064 = vector.broadcast %cst_177 : f32 to vector<2x32xf32>
    %1065 = arith.addf %1064, %1063 : vector<2x32xf32>
    %1066 = arith.divf %1064, %1065 : vector<2x32xf32>
    %1067 = vector.extract_strided_slice %1051 {offsets = [0, 64], sizes = [2, 32], strides = [1, 1]} : vector<2x128xf32> to vector<2x32xf32>
    %1068 = math.tanh %1067 : vector<2x32xf32>
    %1069 = vector.extract_strided_slice %1051 {offsets = [0, 96], sizes = [2, 32], strides = [1, 1]} : vector<2x128xf32> to vector<2x32xf32>
    %1070 = arith.negf %1069 : vector<2x32xf32>
    %1071 = math.exp %1070 : vector<2x32xf32>
    %cst_178 = arith.constant 1.000000e+00 : f32
    %1072 = vector.broadcast %cst_178 : f32 to vector<2x32xf32>
    %1073 = arith.addf %1072, %1071 : vector<2x32xf32>
    %1074 = arith.divf %1072, %1073 : vector<2x32xf32>
    %1075 = arith.mulf %1066, %1019 : vector<2x32xf32>
    %1076 = arith.mulf %1060, %1068 : vector<2x32xf32>
    %1077 = arith.addf %1075, %1076 : vector<2x32xf32>
    %1078 = math.tanh %1077 : vector<2x32xf32>
    %1079 = arith.mulf %1074, %1078 : vector<2x32xf32>
    %1080 = vector.extract_strided_slice %1054 {offsets = [0, 0], sizes = [2, 32], strides = [1, 1]} : vector<2x128xf32> to vector<2x32xf32>
    %1081 = arith.negf %1080 : vector<2x32xf32>
    %1082 = math.exp %1081 : vector<2x32xf32>
    %cst_179 = arith.constant 1.000000e+00 : f32
    %1083 = vector.broadcast %cst_179 : f32 to vector<2x32xf32>
    %1084 = arith.addf %1083, %1082 : vector<2x32xf32>
    %1085 = arith.divf %1083, %1084 : vector<2x32xf32>
    %1086 = vector.extract_strided_slice %1054 {offsets = [0, 32], sizes = [2, 32], strides = [1, 1]} : vector<2x128xf32> to vector<2x32xf32>
    %1087 = arith.negf %1086 : vector<2x32xf32>
    %1088 = math.exp %1087 : vector<2x32xf32>
    %cst_180 = arith.constant 1.000000e+00 : f32
    %1089 = vector.broadcast %cst_180 : f32 to vector<2x32xf32>
    %1090 = arith.addf %1089, %1088 : vector<2x32xf32>
    %1091 = arith.divf %1089, %1090 : vector<2x32xf32>
    %1092 = vector.extract_strided_slice %1054 {offsets = [0, 64], sizes = [2, 32], strides = [1, 1]} : vector<2x128xf32> to vector<2x32xf32>
    %1093 = math.tanh %1092 : vector<2x32xf32>
    %1094 = vector.extract_strided_slice %1054 {offsets = [0, 96], sizes = [2, 32], strides = [1, 1]} : vector<2x128xf32> to vector<2x32xf32>
    %1095 = arith.negf %1094 : vector<2x32xf32>
    %1096 = math.exp %1095 : vector<2x32xf32>
    %cst_181 = arith.constant 1.000000e+00 : f32
    %1097 = vector.broadcast %cst_181 : f32 to vector<2x32xf32>
    %1098 = arith.addf %1097, %1096 : vector<2x32xf32>
    %1099 = arith.divf %1097, %1098 : vector<2x32xf32>
    %1100 = arith.mulf %1091, %1033 : vector<2x32xf32>
    %1101 = arith.mulf %1085, %1093 : vector<2x32xf32>
    %1102 = arith.addf %1100, %1101 : vector<2x32xf32>
    %1103 = math.tanh %1102 : vector<2x32xf32>
    %1104 = arith.mulf %1099, %1103 : vector<2x32xf32>
    %1105 = vector.broadcast %1045 : vector<2x1xf32> to vector<2x32xf32>
    %1106 = arith.mulf %1105, %1077 : vector<2x32xf32>
    %cst_182 = arith.constant 1.000000e+00 : f32
    %1107 = vector.broadcast %cst_182 : f32 to vector<2x1xf32>
    %1108 = arith.subf %1107, %1045 : vector<2x1xf32>
    %1109 = vector.broadcast %1108 : vector<2x1xf32> to vector<2x32xf32>
    %1110 = arith.mulf %1109, %1019 : vector<2x32xf32>
    %1111 = arith.addf %1106, %1110 : vector<2x32xf32>
    %1112 = vector.broadcast %1045 : vector<2x1xf32> to vector<2x32xf32>
    %1113 = arith.mulf %1112, %1079 : vector<2x32xf32>
    %cst_183 = arith.constant 1.000000e+00 : f32
    %1114 = vector.broadcast %cst_183 : f32 to vector<2x1xf32>
    %1115 = arith.subf %1114, %1045 : vector<2x1xf32>
    %1116 = vector.broadcast %1115 : vector<2x1xf32> to vector<2x32xf32>
    %1117 = arith.mulf %1116, %1026 : vector<2x32xf32>
    %1118 = arith.addf %1113, %1117 : vector<2x32xf32>
    %1119 = vector.broadcast %1046 : vector<2x1xf32> to vector<2x32xf32>
    %1120 = arith.mulf %1119, %1102 : vector<2x32xf32>
    %cst_184 = arith.constant 1.000000e+00 : f32
    %1121 = vector.broadcast %cst_184 : f32 to vector<2x1xf32>
    %1122 = arith.subf %1121, %1046 : vector<2x1xf32>
    %1123 = vector.broadcast %1122 : vector<2x1xf32> to vector<2x32xf32>
    %1124 = arith.mulf %1123, %1033 : vector<2x32xf32>
    %1125 = arith.addf %1120, %1124 : vector<2x32xf32>
    %1126 = vector.broadcast %1046 : vector<2x1xf32> to vector<2x32xf32>
    %1127 = arith.mulf %1126, %1104 : vector<2x32xf32>
    %cst_185 = arith.constant 1.000000e+00 : f32
    %1128 = vector.broadcast %cst_185 : f32 to vector<2x1xf32>
    %1129 = arith.subf %1128, %1046 : vector<2x1xf32>
    %1130 = vector.broadcast %1129 : vector<2x1xf32> to vector<2x32xf32>
    %1131 = arith.mulf %1130, %1040 : vector<2x32xf32>
    %1132 = arith.addf %1127, %1131 : vector<2x32xf32>
    %1133 = vector.broadcast %1045 : vector<2x1xf32> to vector<2x32xf32>
    %1134 = arith.mulf %1133, %1079 : vector<2x32xf32>
    %1135 = vector.broadcast %1046 : vector<2x1xf32> to vector<2x32xf32>
    %1136 = arith.mulf %1135, %1104 : vector<2x32xf32>
    %1137 = vector.extract_strided_slice %10 {offsets = [6, 0], sizes = [2, 1], strides = [1, 1]} : vector<16x1xf32> to vector<2x1xf32>
    %1138 = vector.extract_strided_slice %10 {offsets = [8, 0], sizes = [2, 1], strides = [1, 1]} : vector<16x1xf32> to vector<2x1xf32>
    %1139 = tpu.concatenate %1118, %1132 in 1 : vector<2x32xf32>, vector<2x32xf32> -> vector<2x64xf32>
    %cst_186 = arith.constant dense<0.000000e+00> : vector<2x256xf32>
    %1140 = tpu.matmul %1139, %856, %cst_186 {dimension_numbers = #tpu.dot_dimension_numbers<[1], [0], [0], [1], [0, 0, 1, 1], [], []>} : vector<2x64xf32>, vector<64x256xf32>, vector<2x256xf32> -> vector<2x256xf32>
    %1141 = vector.extract_strided_slice %855 {offsets = [6, 0], sizes = [2, 128], strides = [1, 1]} : vector<16x256xf32> to vector<2x128xf32>
    %1142 = vector.extract_strided_slice %1140 {offsets = [0, 0], sizes = [2, 128], strides = [1, 1]} : vector<2x256xf32> to vector<2x128xf32>
    %1143 = arith.addf %1141, %1142 : vector<2x128xf32>
    %1144 = vector.extract_strided_slice %855 {offsets = [8, 128], sizes = [2, 128], strides = [1, 1]} : vector<16x256xf32> to vector<2x128xf32>
    %1145 = vector.extract_strided_slice %1140 {offsets = [0, 128], sizes = [2, 128], strides = [1, 1]} : vector<2x256xf32> to vector<2x128xf32>
    %1146 = arith.addf %1144, %1145 : vector<2x128xf32>
    %1147 = vector.extract_strided_slice %1143 {offsets = [0, 0], sizes = [2, 32], strides = [1, 1]} : vector<2x128xf32> to vector<2x32xf32>
    %1148 = arith.negf %1147 : vector<2x32xf32>
    %1149 = math.exp %1148 : vector<2x32xf32>
    %cst_187 = arith.constant 1.000000e+00 : f32
    %1150 = vector.broadcast %cst_187 : f32 to vector<2x32xf32>
    %1151 = arith.addf %1150, %1149 : vector<2x32xf32>
    %1152 = arith.divf %1150, %1151 : vector<2x32xf32>
    %1153 = vector.extract_strided_slice %1143 {offsets = [0, 32], sizes = [2, 32], strides = [1, 1]} : vector<2x128xf32> to vector<2x32xf32>
    %1154 = arith.negf %1153 : vector<2x32xf32>
    %1155 = math.exp %1154 : vector<2x32xf32>
    %cst_188 = arith.constant 1.000000e+00 : f32
    %1156 = vector.broadcast %cst_188 : f32 to vector<2x32xf32>
    %1157 = arith.addf %1156, %1155 : vector<2x32xf32>
    %1158 = arith.divf %1156, %1157 : vector<2x32xf32>
    %1159 = vector.extract_strided_slice %1143 {offsets = [0, 64], sizes = [2, 32], strides = [1, 1]} : vector<2x128xf32> to vector<2x32xf32>
    %1160 = math.tanh %1159 : vector<2x32xf32>
    %1161 = vector.extract_strided_slice %1143 {offsets = [0, 96], sizes = [2, 32], strides = [1, 1]} : vector<2x128xf32> to vector<2x32xf32>
    %1162 = arith.negf %1161 : vector<2x32xf32>
    %1163 = math.exp %1162 : vector<2x32xf32>
    %cst_189 = arith.constant 1.000000e+00 : f32
    %1164 = vector.broadcast %cst_189 : f32 to vector<2x32xf32>
    %1165 = arith.addf %1164, %1163 : vector<2x32xf32>
    %1166 = arith.divf %1164, %1165 : vector<2x32xf32>
    %1167 = arith.mulf %1158, %1111 : vector<2x32xf32>
    %1168 = arith.mulf %1152, %1160 : vector<2x32xf32>
    %1169 = arith.addf %1167, %1168 : vector<2x32xf32>
    %1170 = math.tanh %1169 : vector<2x32xf32>
    %1171 = arith.mulf %1166, %1170 : vector<2x32xf32>
    %1172 = vector.extract_strided_slice %1146 {offsets = [0, 0], sizes = [2, 32], strides = [1, 1]} : vector<2x128xf32> to vector<2x32xf32>
    %1173 = arith.negf %1172 : vector<2x32xf32>
    %1174 = math.exp %1173 : vector<2x32xf32>
    %cst_190 = arith.constant 1.000000e+00 : f32
    %1175 = vector.broadcast %cst_190 : f32 to vector<2x32xf32>
    %1176 = arith.addf %1175, %1174 : vector<2x32xf32>
    %1177 = arith.divf %1175, %1176 : vector<2x32xf32>
    %1178 = vector.extract_strided_slice %1146 {offsets = [0, 32], sizes = [2, 32], strides = [1, 1]} : vector<2x128xf32> to vector<2x32xf32>
    %1179 = arith.negf %1178 : vector<2x32xf32>
    %1180 = math.exp %1179 : vector<2x32xf32>
    %cst_191 = arith.constant 1.000000e+00 : f32
    %1181 = vector.broadcast %cst_191 : f32 to vector<2x32xf32>
    %1182 = arith.addf %1181, %1180 : vector<2x32xf32>
    %1183 = arith.divf %1181, %1182 : vector<2x32xf32>
    %1184 = vector.extract_strided_slice %1146 {offsets = [0, 64], sizes = [2, 32], strides = [1, 1]} : vector<2x128xf32> to vector<2x32xf32>
    %1185 = math.tanh %1184 : vector<2x32xf32>
    %1186 = vector.extract_strided_slice %1146 {offsets = [0, 96], sizes = [2, 32], strides = [1, 1]} : vector<2x128xf32> to vector<2x32xf32>
    %1187 = arith.negf %1186 : vector<2x32xf32>
    %1188 = math.exp %1187 : vector<2x32xf32>
    %cst_192 = arith.constant 1.000000e+00 : f32
    %1189 = vector.broadcast %cst_192 : f32 to vector<2x32xf32>
    %1190 = arith.addf %1189, %1188 : vector<2x32xf32>
    %1191 = arith.divf %1189, %1190 : vector<2x32xf32>
    %1192 = arith.mulf %1183, %1125 : vector<2x32xf32>
    %1193 = arith.mulf %1177, %1185 : vector<2x32xf32>
    %1194 = arith.addf %1192, %1193 : vector<2x32xf32>
    %1195 = math.tanh %1194 : vector<2x32xf32>
    %1196 = arith.mulf %1191, %1195 : vector<2x32xf32>
    %1197 = vector.broadcast %1137 : vector<2x1xf32> to vector<2x32xf32>
    %1198 = arith.mulf %1197, %1169 : vector<2x32xf32>
    %cst_193 = arith.constant 1.000000e+00 : f32
    %1199 = vector.broadcast %cst_193 : f32 to vector<2x1xf32>
    %1200 = arith.subf %1199, %1137 : vector<2x1xf32>
    %1201 = vector.broadcast %1200 : vector<2x1xf32> to vector<2x32xf32>
    %1202 = arith.mulf %1201, %1111 : vector<2x32xf32>
    %1203 = arith.addf %1198, %1202 : vector<2x32xf32>
    %1204 = vector.broadcast %1137 : vector<2x1xf32> to vector<2x32xf32>
    %1205 = arith.mulf %1204, %1171 : vector<2x32xf32>
    %cst_194 = arith.constant 1.000000e+00 : f32
    %1206 = vector.broadcast %cst_194 : f32 to vector<2x1xf32>
    %1207 = arith.subf %1206, %1137 : vector<2x1xf32>
    %1208 = vector.broadcast %1207 : vector<2x1xf32> to vector<2x32xf32>
    %1209 = arith.mulf %1208, %1118 : vector<2x32xf32>
    %1210 = arith.addf %1205, %1209 : vector<2x32xf32>
    %1211 = vector.broadcast %1138 : vector<2x1xf32> to vector<2x32xf32>
    %1212 = arith.mulf %1211, %1194 : vector<2x32xf32>
    %cst_195 = arith.constant 1.000000e+00 : f32
    %1213 = vector.broadcast %cst_195 : f32 to vector<2x1xf32>
    %1214 = arith.subf %1213, %1138 : vector<2x1xf32>
    %1215 = vector.broadcast %1214 : vector<2x1xf32> to vector<2x32xf32>
    %1216 = arith.mulf %1215, %1125 : vector<2x32xf32>
    %1217 = arith.addf %1212, %1216 : vector<2x32xf32>
    %1218 = vector.broadcast %1138 : vector<2x1xf32> to vector<2x32xf32>
    %1219 = arith.mulf %1218, %1196 : vector<2x32xf32>
    %cst_196 = arith.constant 1.000000e+00 : f32
    %1220 = vector.broadcast %cst_196 : f32 to vector<2x1xf32>
    %1221 = arith.subf %1220, %1138 : vector<2x1xf32>
    %1222 = vector.broadcast %1221 : vector<2x1xf32> to vector<2x32xf32>
    %1223 = arith.mulf %1222, %1132 : vector<2x32xf32>
    %1224 = arith.addf %1219, %1223 : vector<2x32xf32>
    %1225 = vector.broadcast %1137 : vector<2x1xf32> to vector<2x32xf32>
    %1226 = arith.mulf %1225, %1171 : vector<2x32xf32>
    %1227 = vector.broadcast %1138 : vector<2x1xf32> to vector<2x32xf32>
    %1228 = arith.mulf %1227, %1196 : vector<2x32xf32>
    %1229 = vector.extract_strided_slice %10 {offsets = [8, 0], sizes = [2, 1], strides = [1, 1]} : vector<16x1xf32> to vector<2x1xf32>
    %1230 = vector.extract_strided_slice %10 {offsets = [6, 0], sizes = [2, 1], strides = [1, 1]} : vector<16x1xf32> to vector<2x1xf32>
    %1231 = tpu.concatenate %1210, %1224 in 1 : vector<2x32xf32>, vector<2x32xf32> -> vector<2x64xf32>
    %cst_197 = arith.constant dense<0.000000e+00> : vector<2x256xf32>
    %1232 = tpu.matmul %1231, %856, %cst_197 {dimension_numbers = #tpu.dot_dimension_numbers<[1], [0], [0], [1], [0, 0, 1, 1], [], []>} : vector<2x64xf32>, vector<64x256xf32>, vector<2x256xf32> -> vector<2x256xf32>
    %1233 = vector.extract_strided_slice %855 {offsets = [8, 0], sizes = [2, 128], strides = [1, 1]} : vector<16x256xf32> to vector<2x128xf32>
    %1234 = vector.extract_strided_slice %1232 {offsets = [0, 0], sizes = [2, 128], strides = [1, 1]} : vector<2x256xf32> to vector<2x128xf32>
    %1235 = arith.addf %1233, %1234 : vector<2x128xf32>
    %1236 = vector.extract_strided_slice %855 {offsets = [6, 128], sizes = [2, 128], strides = [1, 1]} : vector<16x256xf32> to vector<2x128xf32>
    %1237 = vector.extract_strided_slice %1232 {offsets = [0, 128], sizes = [2, 128], strides = [1, 1]} : vector<2x256xf32> to vector<2x128xf32>
    %1238 = arith.addf %1236, %1237 : vector<2x128xf32>
    %1239 = vector.extract_strided_slice %1235 {offsets = [0, 0], sizes = [2, 32], strides = [1, 1]} : vector<2x128xf32> to vector<2x32xf32>
    %1240 = arith.negf %1239 : vector<2x32xf32>
    %1241 = math.exp %1240 : vector<2x32xf32>
    %cst_198 = arith.constant 1.000000e+00 : f32
    %1242 = vector.broadcast %cst_198 : f32 to vector<2x32xf32>
    %1243 = arith.addf %1242, %1241 : vector<2x32xf32>
    %1244 = arith.divf %1242, %1243 : vector<2x32xf32>
    %1245 = vector.extract_strided_slice %1235 {offsets = [0, 32], sizes = [2, 32], strides = [1, 1]} : vector<2x128xf32> to vector<2x32xf32>
    %1246 = arith.negf %1245 : vector<2x32xf32>
    %1247 = math.exp %1246 : vector<2x32xf32>
    %cst_199 = arith.constant 1.000000e+00 : f32
    %1248 = vector.broadcast %cst_199 : f32 to vector<2x32xf32>
    %1249 = arith.addf %1248, %1247 : vector<2x32xf32>
    %1250 = arith.divf %1248, %1249 : vector<2x32xf32>
    %1251 = vector.extract_strided_slice %1235 {offsets = [0, 64], sizes = [2, 32], strides = [1, 1]} : vector<2x128xf32> to vector<2x32xf32>
    %1252 = math.tanh %1251 : vector<2x32xf32>
    %1253 = vector.extract_strided_slice %1235 {offsets = [0, 96], sizes = [2, 32], strides = [1, 1]} : vector<2x128xf32> to vector<2x32xf32>
    %1254 = arith.negf %1253 : vector<2x32xf32>
    %1255 = math.exp %1254 : vector<2x32xf32>
    %cst_200 = arith.constant 1.000000e+00 : f32
    %1256 = vector.broadcast %cst_200 : f32 to vector<2x32xf32>
    %1257 = arith.addf %1256, %1255 : vector<2x32xf32>
    %1258 = arith.divf %1256, %1257 : vector<2x32xf32>
    %1259 = arith.mulf %1250, %1203 : vector<2x32xf32>
    %1260 = arith.mulf %1244, %1252 : vector<2x32xf32>
    %1261 = arith.addf %1259, %1260 : vector<2x32xf32>
    %1262 = math.tanh %1261 : vector<2x32xf32>
    %1263 = arith.mulf %1258, %1262 : vector<2x32xf32>
    %1264 = vector.extract_strided_slice %1238 {offsets = [0, 0], sizes = [2, 32], strides = [1, 1]} : vector<2x128xf32> to vector<2x32xf32>
    %1265 = arith.negf %1264 : vector<2x32xf32>
    %1266 = math.exp %1265 : vector<2x32xf32>
    %cst_201 = arith.constant 1.000000e+00 : f32
    %1267 = vector.broadcast %cst_201 : f32 to vector<2x32xf32>
    %1268 = arith.addf %1267, %1266 : vector<2x32xf32>
    %1269 = arith.divf %1267, %1268 : vector<2x32xf32>
    %1270 = vector.extract_strided_slice %1238 {offsets = [0, 32], sizes = [2, 32], strides = [1, 1]} : vector<2x128xf32> to vector<2x32xf32>
    %1271 = arith.negf %1270 : vector<2x32xf32>
    %1272 = math.exp %1271 : vector<2x32xf32>
    %cst_202 = arith.constant 1.000000e+00 : f32
    %1273 = vector.broadcast %cst_202 : f32 to vector<2x32xf32>
    %1274 = arith.addf %1273, %1272 : vector<2x32xf32>
    %1275 = arith.divf %1273, %1274 : vector<2x32xf32>
    %1276 = vector.extract_strided_slice %1238 {offsets = [0, 64], sizes = [2, 32], strides = [1, 1]} : vector<2x128xf32> to vector<2x32xf32>
    %1277 = math.tanh %1276 : vector<2x32xf32>
    %1278 = vector.extract_strided_slice %1238 {offsets = [0, 96], sizes = [2, 32], strides = [1, 1]} : vector<2x128xf32> to vector<2x32xf32>
    %1279 = arith.negf %1278 : vector<2x32xf32>
    %1280 = math.exp %1279 : vector<2x32xf32>
    %cst_203 = arith.constant 1.000000e+00 : f32
    %1281 = vector.broadcast %cst_203 : f32 to vector<2x32xf32>
    %1282 = arith.addf %1281, %1280 : vector<2x32xf32>
    %1283 = arith.divf %1281, %1282 : vector<2x32xf32>
    %1284 = arith.mulf %1275, %1217 : vector<2x32xf32>
    %1285 = arith.mulf %1269, %1277 : vector<2x32xf32>
    %1286 = arith.addf %1284, %1285 : vector<2x32xf32>
    %1287 = math.tanh %1286 : vector<2x32xf32>
    %1288 = arith.mulf %1283, %1287 : vector<2x32xf32>
    %1289 = vector.broadcast %1229 : vector<2x1xf32> to vector<2x32xf32>
    %1290 = arith.mulf %1289, %1261 : vector<2x32xf32>
    %cst_204 = arith.constant 1.000000e+00 : f32
    %1291 = vector.broadcast %cst_204 : f32 to vector<2x1xf32>
    %1292 = arith.subf %1291, %1229 : vector<2x1xf32>
    %1293 = vector.broadcast %1292 : vector<2x1xf32> to vector<2x32xf32>
    %1294 = arith.mulf %1293, %1203 : vector<2x32xf32>
    %1295 = arith.addf %1290, %1294 : vector<2x32xf32>
    %1296 = vector.broadcast %1229 : vector<2x1xf32> to vector<2x32xf32>
    %1297 = arith.mulf %1296, %1263 : vector<2x32xf32>
    %cst_205 = arith.constant 1.000000e+00 : f32
    %1298 = vector.broadcast %cst_205 : f32 to vector<2x1xf32>
    %1299 = arith.subf %1298, %1229 : vector<2x1xf32>
    %1300 = vector.broadcast %1299 : vector<2x1xf32> to vector<2x32xf32>
    %1301 = arith.mulf %1300, %1210 : vector<2x32xf32>
    %1302 = arith.addf %1297, %1301 : vector<2x32xf32>
    %1303 = vector.broadcast %1230 : vector<2x1xf32> to vector<2x32xf32>
    %1304 = arith.mulf %1303, %1286 : vector<2x32xf32>
    %cst_206 = arith.constant 1.000000e+00 : f32
    %1305 = vector.broadcast %cst_206 : f32 to vector<2x1xf32>
    %1306 = arith.subf %1305, %1230 : vector<2x1xf32>
    %1307 = vector.broadcast %1306 : vector<2x1xf32> to vector<2x32xf32>
    %1308 = arith.mulf %1307, %1217 : vector<2x32xf32>
    %1309 = arith.addf %1304, %1308 : vector<2x32xf32>
    %1310 = vector.broadcast %1230 : vector<2x1xf32> to vector<2x32xf32>
    %1311 = arith.mulf %1310, %1288 : vector<2x32xf32>
    %cst_207 = arith.constant 1.000000e+00 : f32
    %1312 = vector.broadcast %cst_207 : f32 to vector<2x1xf32>
    %1313 = arith.subf %1312, %1230 : vector<2x1xf32>
    %1314 = vector.broadcast %1313 : vector<2x1xf32> to vector<2x32xf32>
    %1315 = arith.mulf %1314, %1224 : vector<2x32xf32>
    %1316 = arith.addf %1311, %1315 : vector<2x32xf32>
    %1317 = vector.broadcast %1229 : vector<2x1xf32> to vector<2x32xf32>
    %1318 = arith.mulf %1317, %1263 : vector<2x32xf32>
    %1319 = vector.broadcast %1230 : vector<2x1xf32> to vector<2x32xf32>
    %1320 = arith.mulf %1319, %1288 : vector<2x32xf32>
    %1321 = vector.extract_strided_slice %10 {offsets = [10, 0], sizes = [2, 1], strides = [1, 1]} : vector<16x1xf32> to vector<2x1xf32>
    %1322 = vector.extract_strided_slice %10 {offsets = [4, 0], sizes = [2, 1], strides = [1, 1]} : vector<16x1xf32> to vector<2x1xf32>
    %1323 = tpu.concatenate %1302, %1316 in 1 : vector<2x32xf32>, vector<2x32xf32> -> vector<2x64xf32>
    %cst_208 = arith.constant dense<0.000000e+00> : vector<2x256xf32>
    %1324 = tpu.matmul %1323, %856, %cst_208 {dimension_numbers = #tpu.dot_dimension_numbers<[1], [0], [0], [1], [0, 0, 1, 1], [], []>} : vector<2x64xf32>, vector<64x256xf32>, vector<2x256xf32> -> vector<2x256xf32>
    %1325 = vector.extract_strided_slice %855 {offsets = [10, 0], sizes = [2, 128], strides = [1, 1]} : vector<16x256xf32> to vector<2x128xf32>
    %1326 = vector.extract_strided_slice %1324 {offsets = [0, 0], sizes = [2, 128], strides = [1, 1]} : vector<2x256xf32> to vector<2x128xf32>
    %1327 = arith.addf %1325, %1326 : vector<2x128xf32>
    %1328 = vector.extract_strided_slice %855 {offsets = [4, 128], sizes = [2, 128], strides = [1, 1]} : vector<16x256xf32> to vector<2x128xf32>
    %1329 = vector.extract_strided_slice %1324 {offsets = [0, 128], sizes = [2, 128], strides = [1, 1]} : vector<2x256xf32> to vector<2x128xf32>
    %1330 = arith.addf %1328, %1329 : vector<2x128xf32>
    %1331 = vector.extract_strided_slice %1327 {offsets = [0, 0], sizes = [2, 32], strides = [1, 1]} : vector<2x128xf32> to vector<2x32xf32>
    %1332 = arith.negf %1331 : vector<2x32xf32>
    %1333 = math.exp %1332 : vector<2x32xf32>
    %cst_209 = arith.constant 1.000000e+00 : f32
    %1334 = vector.broadcast %cst_209 : f32 to vector<2x32xf32>
    %1335 = arith.addf %1334, %1333 : vector<2x32xf32>
    %1336 = arith.divf %1334, %1335 : vector<2x32xf32>
    %1337 = vector.extract_strided_slice %1327 {offsets = [0, 32], sizes = [2, 32], strides = [1, 1]} : vector<2x128xf32> to vector<2x32xf32>
    %1338 = arith.negf %1337 : vector<2x32xf32>
    %1339 = math.exp %1338 : vector<2x32xf32>
    %cst_210 = arith.constant 1.000000e+00 : f32
    %1340 = vector.broadcast %cst_210 : f32 to vector<2x32xf32>
    %1341 = arith.addf %1340, %1339 : vector<2x32xf32>
    %1342 = arith.divf %1340, %1341 : vector<2x32xf32>
    %1343 = vector.extract_strided_slice %1327 {offsets = [0, 64], sizes = [2, 32], strides = [1, 1]} : vector<2x128xf32> to vector<2x32xf32>
    %1344 = math.tanh %1343 : vector<2x32xf32>
    %1345 = vector.extract_strided_slice %1327 {offsets = [0, 96], sizes = [2, 32], strides = [1, 1]} : vector<2x128xf32> to vector<2x32xf32>
    %1346 = arith.negf %1345 : vector<2x32xf32>
    %1347 = math.exp %1346 : vector<2x32xf32>
    %cst_211 = arith.constant 1.000000e+00 : f32
    %1348 = vector.broadcast %cst_211 : f32 to vector<2x32xf32>
    %1349 = arith.addf %1348, %1347 : vector<2x32xf32>
    %1350 = arith.divf %1348, %1349 : vector<2x32xf32>
    %1351 = arith.mulf %1342, %1295 : vector<2x32xf32>
    %1352 = arith.mulf %1336, %1344 : vector<2x32xf32>
    %1353 = arith.addf %1351, %1352 : vector<2x32xf32>
    %1354 = math.tanh %1353 : vector<2x32xf32>
    %1355 = arith.mulf %1350, %1354 : vector<2x32xf32>
    %1356 = vector.extract_strided_slice %1330 {offsets = [0, 0], sizes = [2, 32], strides = [1, 1]} : vector<2x128xf32> to vector<2x32xf32>
    %1357 = arith.negf %1356 : vector<2x32xf32>
    %1358 = math.exp %1357 : vector<2x32xf32>
    %cst_212 = arith.constant 1.000000e+00 : f32
    %1359 = vector.broadcast %cst_212 : f32 to vector<2x32xf32>
    %1360 = arith.addf %1359, %1358 : vector<2x32xf32>
    %1361 = arith.divf %1359, %1360 : vector<2x32xf32>
    %1362 = vector.extract_strided_slice %1330 {offsets = [0, 32], sizes = [2, 32], strides = [1, 1]} : vector<2x128xf32> to vector<2x32xf32>
    %1363 = arith.negf %1362 : vector<2x32xf32>
    %1364 = math.exp %1363 : vector<2x32xf32>
    %cst_213 = arith.constant 1.000000e+00 : f32
    %1365 = vector.broadcast %cst_213 : f32 to vector<2x32xf32>
    %1366 = arith.addf %1365, %1364 : vector<2x32xf32>
    %1367 = arith.divf %1365, %1366 : vector<2x32xf32>
    %1368 = vector.extract_strided_slice %1330 {offsets = [0, 64], sizes = [2, 32], strides = [1, 1]} : vector<2x128xf32> to vector<2x32xf32>
    %1369 = math.tanh %1368 : vector<2x32xf32>
    %1370 = vector.extract_strided_slice %1330 {offsets = [0, 96], sizes = [2, 32], strides = [1, 1]} : vector<2x128xf32> to vector<2x32xf32>
    %1371 = arith.negf %1370 : vector<2x32xf32>
    %1372 = math.exp %1371 : vector<2x32xf32>
    %cst_214 = arith.constant 1.000000e+00 : f32
    %1373 = vector.broadcast %cst_214 : f32 to vector<2x32xf32>
    %1374 = arith.addf %1373, %1372 : vector<2x32xf32>
    %1375 = arith.divf %1373, %1374 : vector<2x32xf32>
    %1376 = arith.mulf %1367, %1309 : vector<2x32xf32>
    %1377 = arith.mulf %1361, %1369 : vector<2x32xf32>
    %1378 = arith.addf %1376, %1377 : vector<2x32xf32>
    %1379 = math.tanh %1378 : vector<2x32xf32>
    %1380 = arith.mulf %1375, %1379 : vector<2x32xf32>
    %1381 = vector.broadcast %1321 : vector<2x1xf32> to vector<2x32xf32>
    %1382 = arith.mulf %1381, %1353 : vector<2x32xf32>
    %cst_215 = arith.constant 1.000000e+00 : f32
    %1383 = vector.broadcast %cst_215 : f32 to vector<2x1xf32>
    %1384 = arith.subf %1383, %1321 : vector<2x1xf32>
    %1385 = vector.broadcast %1384 : vector<2x1xf32> to vector<2x32xf32>
    %1386 = arith.mulf %1385, %1295 : vector<2x32xf32>
    %1387 = arith.addf %1382, %1386 : vector<2x32xf32>
    %1388 = vector.broadcast %1321 : vector<2x1xf32> to vector<2x32xf32>
    %1389 = arith.mulf %1388, %1355 : vector<2x32xf32>
    %cst_216 = arith.constant 1.000000e+00 : f32
    %1390 = vector.broadcast %cst_216 : f32 to vector<2x1xf32>
    %1391 = arith.subf %1390, %1321 : vector<2x1xf32>
    %1392 = vector.broadcast %1391 : vector<2x1xf32> to vector<2x32xf32>
    %1393 = arith.mulf %1392, %1302 : vector<2x32xf32>
    %1394 = arith.addf %1389, %1393 : vector<2x32xf32>
    %1395 = vector.broadcast %1322 : vector<2x1xf32> to vector<2x32xf32>
    %1396 = arith.mulf %1395, %1378 : vector<2x32xf32>
    %cst_217 = arith.constant 1.000000e+00 : f32
    %1397 = vector.broadcast %cst_217 : f32 to vector<2x1xf32>
    %1398 = arith.subf %1397, %1322 : vector<2x1xf32>
    %1399 = vector.broadcast %1398 : vector<2x1xf32> to vector<2x32xf32>
    %1400 = arith.mulf %1399, %1309 : vector<2x32xf32>
    %1401 = arith.addf %1396, %1400 : vector<2x32xf32>
    %1402 = vector.broadcast %1322 : vector<2x1xf32> to vector<2x32xf32>
    %1403 = arith.mulf %1402, %1380 : vector<2x32xf32>
    %cst_218 = arith.constant 1.000000e+00 : f32
    %1404 = vector.broadcast %cst_218 : f32 to vector<2x1xf32>
    %1405 = arith.subf %1404, %1322 : vector<2x1xf32>
    %1406 = vector.broadcast %1405 : vector<2x1xf32> to vector<2x32xf32>
    %1407 = arith.mulf %1406, %1316 : vector<2x32xf32>
    %1408 = arith.addf %1403, %1407 : vector<2x32xf32>
    %1409 = vector.broadcast %1321 : vector<2x1xf32> to vector<2x32xf32>
    %1410 = arith.mulf %1409, %1355 : vector<2x32xf32>
    %1411 = vector.broadcast %1322 : vector<2x1xf32> to vector<2x32xf32>
    %1412 = arith.mulf %1411, %1380 : vector<2x32xf32>
    %1413 = vector.extract_strided_slice %10 {offsets = [12, 0], sizes = [2, 1], strides = [1, 1]} : vector<16x1xf32> to vector<2x1xf32>
    %1414 = vector.extract_strided_slice %10 {offsets = [2, 0], sizes = [2, 1], strides = [1, 1]} : vector<16x1xf32> to vector<2x1xf32>
    %1415 = tpu.concatenate %1394, %1408 in 1 : vector<2x32xf32>, vector<2x32xf32> -> vector<2x64xf32>
    %cst_219 = arith.constant dense<0.000000e+00> : vector<2x256xf32>
    %1416 = tpu.matmul %1415, %856, %cst_219 {dimension_numbers = #tpu.dot_dimension_numbers<[1], [0], [0], [1], [0, 0, 1, 1], [], []>} : vector<2x64xf32>, vector<64x256xf32>, vector<2x256xf32> -> vector<2x256xf32>
    %1417 = vector.extract_strided_slice %855 {offsets = [12, 0], sizes = [2, 128], strides = [1, 1]} : vector<16x256xf32> to vector<2x128xf32>
    %1418 = vector.extract_strided_slice %1416 {offsets = [0, 0], sizes = [2, 128], strides = [1, 1]} : vector<2x256xf32> to vector<2x128xf32>
    %1419 = arith.addf %1417, %1418 : vector<2x128xf32>
    %1420 = vector.extract_strided_slice %855 {offsets = [2, 128], sizes = [2, 128], strides = [1, 1]} : vector<16x256xf32> to vector<2x128xf32>
    %1421 = vector.extract_strided_slice %1416 {offsets = [0, 128], sizes = [2, 128], strides = [1, 1]} : vector<2x256xf32> to vector<2x128xf32>
    %1422 = arith.addf %1420, %1421 : vector<2x128xf32>
    %1423 = vector.extract_strided_slice %1419 {offsets = [0, 0], sizes = [2, 32], strides = [1, 1]} : vector<2x128xf32> to vector<2x32xf32>
    %1424 = arith.negf %1423 : vector<2x32xf32>
    %1425 = math.exp %1424 : vector<2x32xf32>
    %cst_220 = arith.constant 1.000000e+00 : f32
    %1426 = vector.broadcast %cst_220 : f32 to vector<2x32xf32>
    %1427 = arith.addf %1426, %1425 : vector<2x32xf32>
    %1428 = arith.divf %1426, %1427 : vector<2x32xf32>
    %1429 = vector.extract_strided_slice %1419 {offsets = [0, 32], sizes = [2, 32], strides = [1, 1]} : vector<2x128xf32> to vector<2x32xf32>
    %1430 = arith.negf %1429 : vector<2x32xf32>
    %1431 = math.exp %1430 : vector<2x32xf32>
    %cst_221 = arith.constant 1.000000e+00 : f32
    %1432 = vector.broadcast %cst_221 : f32 to vector<2x32xf32>
    %1433 = arith.addf %1432, %1431 : vector<2x32xf32>
    %1434 = arith.divf %1432, %1433 : vector<2x32xf32>
    %1435 = vector.extract_strided_slice %1419 {offsets = [0, 64], sizes = [2, 32], strides = [1, 1]} : vector<2x128xf32> to vector<2x32xf32>
    %1436 = math.tanh %1435 : vector<2x32xf32>
    %1437 = vector.extract_strided_slice %1419 {offsets = [0, 96], sizes = [2, 32], strides = [1, 1]} : vector<2x128xf32> to vector<2x32xf32>
    %1438 = arith.negf %1437 : vector<2x32xf32>
    %1439 = math.exp %1438 : vector<2x32xf32>
    %cst_222 = arith.constant 1.000000e+00 : f32
    %1440 = vector.broadcast %cst_222 : f32 to vector<2x32xf32>
    %1441 = arith.addf %1440, %1439 : vector<2x32xf32>
    %1442 = arith.divf %1440, %1441 : vector<2x32xf32>
    %1443 = arith.mulf %1434, %1387 : vector<2x32xf32>
    %1444 = arith.mulf %1428, %1436 : vector<2x32xf32>
    %1445 = arith.addf %1443, %1444 : vector<2x32xf32>
    %1446 = math.tanh %1445 : vector<2x32xf32>
    %1447 = arith.mulf %1442, %1446 : vector<2x32xf32>
    %1448 = vector.extract_strided_slice %1422 {offsets = [0, 0], sizes = [2, 32], strides = [1, 1]} : vector<2x128xf32> to vector<2x32xf32>
    %1449 = arith.negf %1448 : vector<2x32xf32>
    %1450 = math.exp %1449 : vector<2x32xf32>
    %cst_223 = arith.constant 1.000000e+00 : f32
    %1451 = vector.broadcast %cst_223 : f32 to vector<2x32xf32>
    %1452 = arith.addf %1451, %1450 : vector<2x32xf32>
    %1453 = arith.divf %1451, %1452 : vector<2x32xf32>
    %1454 = vector.extract_strided_slice %1422 {offsets = [0, 32], sizes = [2, 32], strides = [1, 1]} : vector<2x128xf32> to vector<2x32xf32>
    %1455 = arith.negf %1454 : vector<2x32xf32>
    %1456 = math.exp %1455 : vector<2x32xf32>
    %cst_224 = arith.constant 1.000000e+00 : f32
    %1457 = vector.broadcast %cst_224 : f32 to vector<2x32xf32>
    %1458 = arith.addf %1457, %1456 : vector<2x32xf32>
    %1459 = arith.divf %1457, %1458 : vector<2x32xf32>
    %1460 = vector.extract_strided_slice %1422 {offsets = [0, 64], sizes = [2, 32], strides = [1, 1]} : vector<2x128xf32> to vector<2x32xf32>
    %1461 = math.tanh %1460 : vector<2x32xf32>
    %1462 = vector.extract_strided_slice %1422 {offsets = [0, 96], sizes = [2, 32], strides = [1, 1]} : vector<2x128xf32> to vector<2x32xf32>
    %1463 = arith.negf %1462 : vector<2x32xf32>
    %1464 = math.exp %1463 : vector<2x32xf32>
    %cst_225 = arith.constant 1.000000e+00 : f32
    %1465 = vector.broadcast %cst_225 : f32 to vector<2x32xf32>
    %1466 = arith.addf %1465, %1464 : vector<2x32xf32>
    %1467 = arith.divf %1465, %1466 : vector<2x32xf32>
    %1468 = arith.mulf %1459, %1401 : vector<2x32xf32>
    %1469 = arith.mulf %1453, %1461 : vector<2x32xf32>
    %1470 = arith.addf %1468, %1469 : vector<2x32xf32>
    %1471 = math.tanh %1470 : vector<2x32xf32>
    %1472 = arith.mulf %1467, %1471 : vector<2x32xf32>
    %1473 = vector.broadcast %1413 : vector<2x1xf32> to vector<2x32xf32>
    %1474 = arith.mulf %1473, %1445 : vector<2x32xf32>
    %cst_226 = arith.constant 1.000000e+00 : f32
    %1475 = vector.broadcast %cst_226 : f32 to vector<2x1xf32>
    %1476 = arith.subf %1475, %1413 : vector<2x1xf32>
    %1477 = vector.broadcast %1476 : vector<2x1xf32> to vector<2x32xf32>
    %1478 = arith.mulf %1477, %1387 : vector<2x32xf32>
    %1479 = arith.addf %1474, %1478 : vector<2x32xf32>
    %1480 = vector.broadcast %1413 : vector<2x1xf32> to vector<2x32xf32>
    %1481 = arith.mulf %1480, %1447 : vector<2x32xf32>
    %cst_227 = arith.constant 1.000000e+00 : f32
    %1482 = vector.broadcast %cst_227 : f32 to vector<2x1xf32>
    %1483 = arith.subf %1482, %1413 : vector<2x1xf32>
    %1484 = vector.broadcast %1483 : vector<2x1xf32> to vector<2x32xf32>
    %1485 = arith.mulf %1484, %1394 : vector<2x32xf32>
    %1486 = arith.addf %1481, %1485 : vector<2x32xf32>
    %1487 = vector.broadcast %1414 : vector<2x1xf32> to vector<2x32xf32>
    %1488 = arith.mulf %1487, %1470 : vector<2x32xf32>
    %cst_228 = arith.constant 1.000000e+00 : f32
    %1489 = vector.broadcast %cst_228 : f32 to vector<2x1xf32>
    %1490 = arith.subf %1489, %1414 : vector<2x1xf32>
    %1491 = vector.broadcast %1490 : vector<2x1xf32> to vector<2x32xf32>
    %1492 = arith.mulf %1491, %1401 : vector<2x32xf32>
    %1493 = arith.addf %1488, %1492 : vector<2x32xf32>
    %1494 = vector.broadcast %1414 : vector<2x1xf32> to vector<2x32xf32>
    %1495 = arith.mulf %1494, %1472 : vector<2x32xf32>
    %cst_229 = arith.constant 1.000000e+00 : f32
    %1496 = vector.broadcast %cst_229 : f32 to vector<2x1xf32>
    %1497 = arith.subf %1496, %1414 : vector<2x1xf32>
    %1498 = vector.broadcast %1497 : vector<2x1xf32> to vector<2x32xf32>
    %1499 = arith.mulf %1498, %1408 : vector<2x32xf32>
    %1500 = arith.addf %1495, %1499 : vector<2x32xf32>
    %1501 = vector.broadcast %1413 : vector<2x1xf32> to vector<2x32xf32>
    %1502 = arith.mulf %1501, %1447 : vector<2x32xf32>
    %1503 = vector.broadcast %1414 : vector<2x1xf32> to vector<2x32xf32>
    %1504 = arith.mulf %1503, %1472 : vector<2x32xf32>
    %1505 = vector.extract_strided_slice %10 {offsets = [14, 0], sizes = [2, 1], strides = [1, 1]} : vector<16x1xf32> to vector<2x1xf32>
    %1506 = vector.extract_strided_slice %10 {offsets = [0, 0], sizes = [2, 1], strides = [1, 1]} : vector<16x1xf32> to vector<2x1xf32>
    %1507 = tpu.concatenate %1486, %1500 in 1 : vector<2x32xf32>, vector<2x32xf32> -> vector<2x64xf32>
    %cst_230 = arith.constant dense<0.000000e+00> : vector<2x256xf32>
    %1508 = tpu.matmul %1507, %856, %cst_230 {dimension_numbers = #tpu.dot_dimension_numbers<[1], [0], [0], [1], [0, 0, 1, 1], [], []>} : vector<2x64xf32>, vector<64x256xf32>, vector<2x256xf32> -> vector<2x256xf32>
    %1509 = vector.extract_strided_slice %855 {offsets = [14, 0], sizes = [2, 128], strides = [1, 1]} : vector<16x256xf32> to vector<2x128xf32>
    %1510 = vector.extract_strided_slice %1508 {offsets = [0, 0], sizes = [2, 128], strides = [1, 1]} : vector<2x256xf32> to vector<2x128xf32>
    %1511 = arith.addf %1509, %1510 : vector<2x128xf32>
    %1512 = vector.extract_strided_slice %855 {offsets = [0, 128], sizes = [2, 128], strides = [1, 1]} : vector<16x256xf32> to vector<2x128xf32>
    %1513 = vector.extract_strided_slice %1508 {offsets = [0, 128], sizes = [2, 128], strides = [1, 1]} : vector<2x256xf32> to vector<2x128xf32>
    %1514 = arith.addf %1512, %1513 : vector<2x128xf32>
    %1515 = vector.extract_strided_slice %1511 {offsets = [0, 0], sizes = [2, 32], strides = [1, 1]} : vector<2x128xf32> to vector<2x32xf32>
    %1516 = arith.negf %1515 : vector<2x32xf32>
    %1517 = math.exp %1516 : vector<2x32xf32>
    %cst_231 = arith.constant 1.000000e+00 : f32
    %1518 = vector.broadcast %cst_231 : f32 to vector<2x32xf32>
    %1519 = arith.addf %1518, %1517 : vector<2x32xf32>
    %1520 = arith.divf %1518, %1519 : vector<2x32xf32>
    %1521 = vector.extract_strided_slice %1511 {offsets = [0, 32], sizes = [2, 32], strides = [1, 1]} : vector<2x128xf32> to vector<2x32xf32>
    %1522 = arith.negf %1521 : vector<2x32xf32>
    %1523 = math.exp %1522 : vector<2x32xf32>
    %cst_232 = arith.constant 1.000000e+00 : f32
    %1524 = vector.broadcast %cst_232 : f32 to vector<2x32xf32>
    %1525 = arith.addf %1524, %1523 : vector<2x32xf32>
    %1526 = arith.divf %1524, %1525 : vector<2x32xf32>
    %1527 = vector.extract_strided_slice %1511 {offsets = [0, 64], sizes = [2, 32], strides = [1, 1]} : vector<2x128xf32> to vector<2x32xf32>
    %1528 = math.tanh %1527 : vector<2x32xf32>
    %1529 = vector.extract_strided_slice %1511 {offsets = [0, 96], sizes = [2, 32], strides = [1, 1]} : vector<2x128xf32> to vector<2x32xf32>
    %1530 = arith.negf %1529 : vector<2x32xf32>
    %1531 = math.exp %1530 : vector<2x32xf32>
    %cst_233 = arith.constant 1.000000e+00 : f32
    %1532 = vector.broadcast %cst_233 : f32 to vector<2x32xf32>
    %1533 = arith.addf %1532, %1531 : vector<2x32xf32>
    %1534 = arith.divf %1532, %1533 : vector<2x32xf32>
    %1535 = arith.mulf %1526, %1479 : vector<2x32xf32>
    %1536 = arith.mulf %1520, %1528 : vector<2x32xf32>
    %1537 = arith.addf %1535, %1536 : vector<2x32xf32>
    %1538 = math.tanh %1537 : vector<2x32xf32>
    %1539 = arith.mulf %1534, %1538 : vector<2x32xf32>
    %1540 = vector.extract_strided_slice %1514 {offsets = [0, 0], sizes = [2, 32], strides = [1, 1]} : vector<2x128xf32> to vector<2x32xf32>
    %1541 = arith.negf %1540 : vector<2x32xf32>
    %1542 = math.exp %1541 : vector<2x32xf32>
    %cst_234 = arith.constant 1.000000e+00 : f32
    %1543 = vector.broadcast %cst_234 : f32 to vector<2x32xf32>
    %1544 = arith.addf %1543, %1542 : vector<2x32xf32>
    %1545 = arith.divf %1543, %1544 : vector<2x32xf32>
    %1546 = vector.extract_strided_slice %1514 {offsets = [0, 32], sizes = [2, 32], strides = [1, 1]} : vector<2x128xf32> to vector<2x32xf32>
    %1547 = arith.negf %1546 : vector<2x32xf32>
    %1548 = math.exp %1547 : vector<2x32xf32>
    %cst_235 = arith.constant 1.000000e+00 : f32
    %1549 = vector.broadcast %cst_235 : f32 to vector<2x32xf32>
    %1550 = arith.addf %1549, %1548 : vector<2x32xf32>
    %1551 = arith.divf %1549, %1550 : vector<2x32xf32>
    %1552 = vector.extract_strided_slice %1514 {offsets = [0, 64], sizes = [2, 32], strides = [1, 1]} : vector<2x128xf32> to vector<2x32xf32>
    %1553 = math.tanh %1552 : vector<2x32xf32>
    %1554 = vector.extract_strided_slice %1514 {offsets = [0, 96], sizes = [2, 32], strides = [1, 1]} : vector<2x128xf32> to vector<2x32xf32>
    %1555 = arith.negf %1554 : vector<2x32xf32>
    %1556 = math.exp %1555 : vector<2x32xf32>
    %cst_236 = arith.constant 1.000000e+00 : f32
    %1557 = vector.broadcast %cst_236 : f32 to vector<2x32xf32>
    %1558 = arith.addf %1557, %1556 : vector<2x32xf32>
    %1559 = arith.divf %1557, %1558 : vector<2x32xf32>
    %1560 = arith.mulf %1551, %1493 : vector<2x32xf32>
    %1561 = arith.mulf %1545, %1553 : vector<2x32xf32>
    %1562 = arith.addf %1560, %1561 : vector<2x32xf32>
    %1563 = math.tanh %1562 : vector<2x32xf32>
    %1564 = arith.mulf %1559, %1563 : vector<2x32xf32>
    %1565 = vector.broadcast %1505 : vector<2x1xf32> to vector<2x32xf32>
    %1566 = arith.mulf %1565, %1539 : vector<2x32xf32>
    %1567 = vector.broadcast %1506 : vector<2x1xf32> to vector<2x32xf32>
    %1568 = arith.mulf %1567, %1564 : vector<2x32xf32>
    %1569 = tpu.concatenate %950, %1568 in 1 : vector<2x32xf32>, vector<2x32xf32> -> vector<2x64xf32>
    %1570 = tpu.concatenate %1042, %1504 in 1 : vector<2x32xf32>, vector<2x32xf32> -> vector<2x64xf32>
    %1571 = tpu.concatenate %1134, %1412 in 1 : vector<2x32xf32>, vector<2x32xf32> -> vector<2x64xf32>
    %1572 = tpu.concatenate %1226, %1320 in 1 : vector<2x32xf32>, vector<2x32xf32> -> vector<2x64xf32>
    %1573 = tpu.concatenate %1318, %1228 in 1 : vector<2x32xf32>, vector<2x32xf32> -> vector<2x64xf32>
    %1574 = tpu.concatenate %1410, %1136 in 1 : vector<2x32xf32>, vector<2x32xf32> -> vector<2x64xf32>
    %1575 = tpu.concatenate %1502, %1044 in 1 : vector<2x32xf32>, vector<2x32xf32> -> vector<2x64xf32>
    %1576 = tpu.concatenate %1566, %952 in 1 : vector<2x32xf32>, vector<2x32xf32> -> vector<2x64xf32>
    %1577 = tpu.concatenate %1569, %1570, %1571, %1572, %1573, %1574, %1575, %1576 in 0 : vector<2x64xf32>, vector<2x64xf32>, vector<2x64xf32>, vector<2x64xf32>, vector<2x64xf32>, vector<2x64xf32>, vector<2x64xf32>, vector<2x64xf32> -> vector<16x64xf32>
    %c0_237 = arith.constant 0 : index
    %c0_238 = arith.constant 0 : index
    %1578 = vector.load %arg20[%c0_237, %c0_238] : memref<64x64xf32, #tpu.memory_space<vmem>>, vector<64x64xf32>
    %cst_239 = arith.constant dense<0.000000e+00> : vector<16x64xf32>
    %1579 = tpu.matmul %1577, %1578, %cst_239 {dimension_numbers = #tpu.dot_dimension_numbers<[1], [0], [0], [1], [0, 0, 1, 1], [], []>} : vector<16x64xf32>, vector<64x64xf32>, vector<16x64xf32> -> vector<16x64xf32>
    %1580 = math.tanh %1579 : vector<16x64xf32>
    %c0_240 = arith.constant 0 : index
    %c0_241 = arith.constant 0 : index
    %1581 = vector.load %arg21[%c0_240, %c0_241] : memref<64x1xf32, #tpu.memory_space<vmem>>, vector<64x1xf32>
    %cst_242 = arith.constant dense<0.000000e+00> : vector<16x1xf32>
    %1582 = tpu.matmul %1580, %1581, %cst_242 {dimension_numbers = #tpu.dot_dimension_numbers<[1], [0], [0], [1], [0, 0, 1, 1], [], []>} : vector<16x64xf32>, vector<64x1xf32>, vector<16x1xf32> -> vector<16x1xf32>
    %cst_243 = arith.constant 0.000000e+00 : f32
    %1583 = vector.broadcast %cst_243 : f32 to vector<16x1xf32>
    %1584 = arith.cmpf oeq, %10, %1583 : vector<16x1xf32>
    %cst_244 = arith.constant -1.000000e+10 : f32
    %1585 = vector.broadcast %cst_244 : f32 to vector<16x1xf32>
    %1586 = arith.select %1584, %1585, %1582 : vector<16x1xi1>, vector<16x1xf32>
    %1587 = vector.extract_strided_slice %1586 {offsets = [0, 0], sizes = [2, 1], strides = [1, 1]} : vector<16x1xf32> to vector<2x1xf32>
    %1588 = vector.extract_strided_slice %1586 {offsets = [2, 0], sizes = [2, 1], strides = [1, 1]} : vector<16x1xf32> to vector<2x1xf32>
    %1589 = vector.extract_strided_slice %1586 {offsets = [4, 0], sizes = [2, 1], strides = [1, 1]} : vector<16x1xf32> to vector<2x1xf32>
    %1590 = vector.extract_strided_slice %1586 {offsets = [6, 0], sizes = [2, 1], strides = [1, 1]} : vector<16x1xf32> to vector<2x1xf32>
    %1591 = vector.extract_strided_slice %1586 {offsets = [8, 0], sizes = [2, 1], strides = [1, 1]} : vector<16x1xf32> to vector<2x1xf32>
    %1592 = vector.extract_strided_slice %1586 {offsets = [10, 0], sizes = [2, 1], strides = [1, 1]} : vector<16x1xf32> to vector<2x1xf32>
    %1593 = vector.extract_strided_slice %1586 {offsets = [12, 0], sizes = [2, 1], strides = [1, 1]} : vector<16x1xf32> to vector<2x1xf32>
    %1594 = vector.extract_strided_slice %1586 {offsets = [14, 0], sizes = [2, 1], strides = [1, 1]} : vector<16x1xf32> to vector<2x1xf32>
    %1595 = tpu.concatenate %1587, %1588, %1589, %1590, %1591, %1592, %1593, %1594 in 1 : vector<2x1xf32>, vector<2x1xf32>, vector<2x1xf32>, vector<2x1xf32>, vector<2x1xf32>, vector<2x1xf32>, vector<2x1xf32>, vector<2x1xf32> -> vector<2x8xf32>
    %cst_245 = arith.constant dense<0xFF800000> : vector<2xf32>
    %1596 = vector.multi_reduction <maximumf>, %1595, %cst_245 [1] : vector<2x8xf32> to vector<2xf32>
    %1597 = vector.shape_cast %1596 : vector<2xf32> to vector<2x1xf32>
    %1598 = vector.broadcast %1597 : vector<2x1xf32> to vector<2x8xf32>
    %1599 = arith.subf %1595, %1598 : vector<2x8xf32>
    %1600 = math.exp %1599 : vector<2x8xf32>
    %cst_246 = arith.constant dense<0.000000e+00> : vector<2xf32>
    %1601 = vector.multi_reduction <add>, %1600, %cst_246 [1] : vector<2x8xf32> to vector<2xf32>
    %1602 = vector.shape_cast %1601 : vector<2xf32> to vector<2x1xf32>
    %1603 = tpu.reciprocal %1602 {approx = true} : vector<2x1xf32> -> vector<2x1xf32>
    %1604 = vector.broadcast %1603 : vector<2x1xf32> to vector<2x8xf32>
    %1605 = arith.mulf %1600, %1604 : vector<2x8xf32>
    %cst_247 = arith.constant 0.000000e+00 : f32
    %1606 = vector.broadcast %cst_247 : f32 to vector<2x64xf32>
    %1607 = vector.extract_strided_slice %1605 {offsets = [0, 0], sizes = [2, 1], strides = [1, 1]} : vector<2x8xf32> to vector<2x1xf32>
    %1608 = vector.extract_strided_slice %1577 {offsets = [0, 0], sizes = [2, 64], strides = [1, 1]} : vector<16x64xf32> to vector<2x64xf32>
    %1609 = vector.broadcast %1607 : vector<2x1xf32> to vector<2x64xf32>
    %1610 = arith.mulf %1609, %1608 : vector<2x64xf32>
    %1611 = arith.addf %1606, %1610 : vector<2x64xf32>
    %1612 = vector.extract_strided_slice %1605 {offsets = [0, 1], sizes = [2, 1], strides = [1, 1]} : vector<2x8xf32> to vector<2x1xf32>
    %1613 = vector.extract_strided_slice %1577 {offsets = [2, 0], sizes = [2, 64], strides = [1, 1]} : vector<16x64xf32> to vector<2x64xf32>
    %1614 = vector.broadcast %1612 : vector<2x1xf32> to vector<2x64xf32>
    %1615 = arith.mulf %1614, %1613 : vector<2x64xf32>
    %1616 = arith.addf %1611, %1615 : vector<2x64xf32>
    %1617 = vector.extract_strided_slice %1605 {offsets = [0, 2], sizes = [2, 1], strides = [1, 1]} : vector<2x8xf32> to vector<2x1xf32>
    %1618 = vector.extract_strided_slice %1577 {offsets = [4, 0], sizes = [2, 64], strides = [1, 1]} : vector<16x64xf32> to vector<2x64xf32>
    %1619 = vector.broadcast %1617 : vector<2x1xf32> to vector<2x64xf32>
    %1620 = arith.mulf %1619, %1618 : vector<2x64xf32>
    %1621 = arith.addf %1616, %1620 : vector<2x64xf32>
    %1622 = vector.extract_strided_slice %1605 {offsets = [0, 3], sizes = [2, 1], strides = [1, 1]} : vector<2x8xf32> to vector<2x1xf32>
    %1623 = vector.extract_strided_slice %1577 {offsets = [6, 0], sizes = [2, 64], strides = [1, 1]} : vector<16x64xf32> to vector<2x64xf32>
    %1624 = vector.broadcast %1622 : vector<2x1xf32> to vector<2x64xf32>
    %1625 = arith.mulf %1624, %1623 : vector<2x64xf32>
    %1626 = arith.addf %1621, %1625 : vector<2x64xf32>
    %1627 = vector.extract_strided_slice %1605 {offsets = [0, 4], sizes = [2, 1], strides = [1, 1]} : vector<2x8xf32> to vector<2x1xf32>
    %1628 = vector.extract_strided_slice %1577 {offsets = [8, 0], sizes = [2, 64], strides = [1, 1]} : vector<16x64xf32> to vector<2x64xf32>
    %1629 = vector.broadcast %1627 : vector<2x1xf32> to vector<2x64xf32>
    %1630 = arith.mulf %1629, %1628 : vector<2x64xf32>
    %1631 = arith.addf %1626, %1630 : vector<2x64xf32>
    %1632 = vector.extract_strided_slice %1605 {offsets = [0, 5], sizes = [2, 1], strides = [1, 1]} : vector<2x8xf32> to vector<2x1xf32>
    %1633 = vector.extract_strided_slice %1577 {offsets = [10, 0], sizes = [2, 64], strides = [1, 1]} : vector<16x64xf32> to vector<2x64xf32>
    %1634 = vector.broadcast %1632 : vector<2x1xf32> to vector<2x64xf32>
    %1635 = arith.mulf %1634, %1633 : vector<2x64xf32>
    %1636 = arith.addf %1631, %1635 : vector<2x64xf32>
    %1637 = vector.extract_strided_slice %1605 {offsets = [0, 6], sizes = [2, 1], strides = [1, 1]} : vector<2x8xf32> to vector<2x1xf32>
    %1638 = vector.extract_strided_slice %1577 {offsets = [12, 0], sizes = [2, 64], strides = [1, 1]} : vector<16x64xf32> to vector<2x64xf32>
    %1639 = vector.broadcast %1637 : vector<2x1xf32> to vector<2x64xf32>
    %1640 = arith.mulf %1639, %1638 : vector<2x64xf32>
    %1641 = arith.addf %1636, %1640 : vector<2x64xf32>
    %1642 = vector.extract_strided_slice %1605 {offsets = [0, 7], sizes = [2, 1], strides = [1, 1]} : vector<2x8xf32> to vector<2x1xf32>
    %1643 = vector.extract_strided_slice %1577 {offsets = [14, 0], sizes = [2, 64], strides = [1, 1]} : vector<16x64xf32> to vector<2x64xf32>
    %1644 = vector.broadcast %1642 : vector<2x1xf32> to vector<2x64xf32>
    %1645 = arith.mulf %1644, %1643 : vector<2x64xf32>
    %1646 = arith.addf %1641, %1645 : vector<2x64xf32>
    %c0_248 = arith.constant 0 : index
    %c0_249 = arith.constant 0 : index
    %1647 = vector.load %arg22[%c0_248, %c0_249] : memref<2x64xf32, #tpu.memory_space<vmem>>, vector<2x64xf32>
    tpu.vector_store %arg22[%c0_248, %c0_249], %1646 {strides = array<i32>} : memref<2x64xf32, #tpu.memory_space<vmem>>, vector<2x64xf32>,
    return
  }
}

</mosaic_0001>

<bundles_post_ra>
// kernel: st_encoder_forward.1
= control target key start
LH: loop header
LB: loop body
LE: loop exit
PB: predicated region body
PF: predicated region fallthrough
CT: control target
= control target key end

     0   :  { %s6184_s0 = inlined_call_operand.vmem [shape: s32[16,1], index: 0, kind: input, shape index: {}]   ;;  %s6185_s1 = inlined_call_operand.vmem [shape: f32[16,1], index: 1, kind: input, shape index: {}]   ;;  %s6186_s2 = inlined_call_operand.vmem [shape: f32[16,32], index: 2, kind: input, shape index: {}]   ;;  %s6187_s3 = inlined_call_operand.vmem [shape: f32[16,16], index: 3, kind: input, shape index: {}]   ;;  %s6188_s4 = inlined_call_operand.vmem [shape: f32[16,8], index: 4, kind: input, shape index: {}]   ;;  %s6189_s5 = inlined_call_operand.hbm [shape: f32[8,32], index: 5, kind: input, shape index: {}]   ;;  %s6190_s6 = inlined_call_operand.vmem [shape: f32[1,32], index: 6, kind: input, shape index: {}]   ;;  %s6191_s7 = inlined_call_operand.vmem [shape: f32[32,96], index: 7, kind: input, shape index: {}]   ;;  %s6192_s8 = inlined_call_operand.vmem [shape: f32[32,16], index: 8, kind: input, shape index: {}]   ;;  %s6193_s9 = inlined_call_operand.vmem [shape: f32[1,16], index: 9, kind: input, shape index: {}]   ;;  %s6194_s10 = inlined_call_operand.vmem [shape: f32[16,32], index: 10, kind: input, shape index: {}]   ;;  %s6195_s11 = inlined_call_operand.vmem [shape: f32[1,32], index: 11, kind: input, shape index: {}]   ;;  %s6196_s12 = inlined_call_operand.vmem [shape: f32[1,32], index: 12, kind: input, shape index: {}]   ;;  %s6197_s13 = inlined_call_operand.vmem [shape: f32[1,32], index: 13, kind: input, shape index: {}]   ;;  %s6198_s14 = inlined_call_operand.hbm [shape: f32[64,256], index: 14, kind: input, shape index: {}]   ;;  %s6199_s15 = inlined_call_operand.hbm [shape: f32[64,256], index: 15, kind: input, shape index: {}]   ;;  %s6200_s16 = inlined_call_operand.vmem [shape: f32[1,256], index: 16, kind: input, shape index: {}]   ;;  %s6201_s17 = inlined_call_operand.hbm [shape: f32[64,256], index: 17, kind: input, shape index: {}]   ;;  %s6202_s18 = inlined_call_operand.hbm [shape: f32[64,256], index: 18, kind: input, shape index: {}]   ;;  %s6203_s19 = inlined_call_operand.vmem [shape: f32[1,256], index: 19, kind: input, shape index: {}]   ;;  %s6204_s20 = inlined_call_operand.hbm [shape: f32[64,64], index: 20, kind: input, shape index: {}]   ;;  %s6205_s21 = inlined_call_operand.hbm [shape: f32[64,1], index: 21, kind: input, shape index: {}]   ;;  %s6206_s22 = inlined_call_operand.hbm [shape: f32[2,64], index: 22, kind: output, shape index: {}]  }
   0x1   :  { %6214 = sst [smem:[#allocation20_spill]] %s6184_s0 }
   0x2   :  { %6215 = sst [smem:[#allocation21_spill]] %s6185_s1 }
   0x3   :  { %6216 = sst [smem:[#allocation22_spill]] %s6186_s2 }
   0x4   :  { %6217 = sst [smem:[#allocation23_spill]] %s6187_s3 }
   0x5   :  { %6218 = sst [smem:[#allocation24_spill]] %s6188_s4 }
   0x6   :  { %6219 = sst [smem:[#allocation25_spill]] %s6189_s5 }
   0x7   :  { %6220 = sst [smem:[#allocation26_spill]] %s6190_s6 }
   0x8   :  { %27 = vsyncpa [#allocation3], 0 }
   0x9   :  { %28 = vsyncpa [#allocation6], 0 }
   0xa   :  { %29 = vsyncpa [#allocation9], 0 }
   0xb   :  { %30 = vsyncpa [#allocation12], 0  ;;  %s73_s29 = sshll.u32 %s6198_s14, 4  ;;  %s74_s29 = int_to_ptr.hbm [resolvable:$true] %s73_s29 }
   0xc   :  { %31 = vsyncpa [#allocation4], 0  ;;  %s4667_s30 = smov [#allocation5]   ;;  %s101_s1 = sshll.u32 %s6201_s17, 4  ;;  %s102_s1 = int_to_ptr.hbm [resolvable:$true] %s101_s1 }
   0xd   :  { %s75_s4 = sshll.u32 %s4667_s30, 4  ;;  %s6212_s5 = smov 256   ;;  %s76_s4 = int_to_ptr.vmem [resolvable:$true] %s75_s4 }
   0xe   :  { %s4669_s24 = smov 16   ;;  %s4670_s6 = smov [#allocation8]  }
   0xf   :  { %81 = dma.hbm_to_vmem [thread:$0]  %s74_s29, 2048, %s76_s4, [#allocation6], %s6212_s5, %s6212_s5, %s4669_s24  }
  0x10   :  { %s103_s25 = sshll.u32 %s4670_s6, 4  ;;  %s129_s2 = sshll.u32 %s6204_s20, 4  ;;  %s104_s25 = int_to_ptr.vmem [resolvable:$true] %s103_s25  ;;  %s130_s2 = int_to_ptr.hbm [resolvable:$true] %s129_s2 }
  0x11   :  { %109 = dma.hbm_to_vmem [thread:$0]  %s102_s1, 2048, %s104_s25, [#allocation9], %s6212_s5, %s6212_s5, %s4669_s24  }
  0x12   :  { %s4671_s17 = smov [#allocation11]   ;;  %s6221_s30 = sld [smem:[#allocation25_spill]] }
  0x13   :  { %s131_s27 = sshll.u32 %s4671_s17, 4  ;;  %s4672_s4 = smov 128   ;;  %s132_s27 = int_to_ptr.vmem [resolvable:$true] %s131_s27 }
  0x14   :  { %s4673_s0 = smov 8   ;;  %s4674_s23 = smov [#allocation2]  }
  0x15   :  { %137 = dma.hbm_to_vmem [thread:$0]  %s130_s2, 1024, %s132_s27, [#allocation12], %s4672_s4, %s4672_s4, %s4673_s0  }
  0x16   :  { %s49_s6 = sshll.u32 %s4674_s23, 4  ;;  %s86_s14 = sshll.u32 %s6199_s15, 4  ;;  %s50_s6 = int_to_ptr.vmem [resolvable:$true] %s49_s6  ;;  %s87_s14 = int_to_ptr.hbm [resolvable:$true] %s86_s14 }
  0x17   :  { %s114_s17 = sshll.u32 %s6202_s18, 4  ;;  %s4675_s5 = smov [#allocation7]   ;;  %s115_s17 = int_to_ptr.hbm [resolvable:$true] %s114_s17 }
  0x18   :  { %s47_s29 = sshll.u32 %s6221_s30, 4  ;;  %s88_s3 = sshll.u32 %s4675_s5, 4  ;;  %s48_s29 = int_to_ptr.hbm [resolvable:$true] %s47_s29  ;;  %s89_s3 = int_to_ptr.vmem [resolvable:$true] %s88_s3 }
  0x19   :  { %52 = dma.hbm_to_vmem [thread:$0]  %s48_s29, 128, %s50_s6, [#allocation3]  }
  0x1a   :  { %s6222_s2 = smov 256   ;;  %s4676_s27 = smov [#allocation10]  }
  0x1b   :  { %94 = dma.hbm_to_vmem [thread:$0]  %s87_s14, 2048, %s89_s3, [#allocation6], %s6222_s2, %s6222_s2, %s4669_s24  }
  0x1c   :  { %s116_s28 = sshll.u32 %s4676_s27, 4  ;;  %s142_s15 = sshll.u32 %s6205_s21, 4  ;;  %s117_s28 = int_to_ptr.vmem [resolvable:$true] %s116_s28  ;;  %s143_s15 = int_to_ptr.hbm [resolvable:$true] %s142_s15 }
  0x1d   :  { %122 = dma.hbm_to_vmem [thread:$0]  %s115_s17, 2048, %s117_s28, [#allocation9], %s6222_s2, %s6222_s2, %s4669_s24  }
  0x1e   :  { %s4677_s18 = smov [#allocation13]  }
  0x1f   :  { %s144_s5 = sshll.u32 %s4677_s18, 4  ;;  %s145_s5 = int_to_ptr.vmem [resolvable:$true] %s144_s5 }
  0x20   :  { %150 = dma.hbm_to_vmem [thread:$0]  %s143_s15, 1024, %s145_s5, [#allocation12], %s4672_s4, %s4672_s4, %s4673_s0  }
  0x21   :  { %4657 = dma.done.wait [#allocation3], 128  }
  0x22   :  { %4658 = vsyncadd [#allocation3], 4294967168 }
  0x23   :  { %4659 = dma.done.wait [#allocation6], 4096  }
  0x24   :  { %4660 = vsyncadd [#allocation6], 4294963200 }
  0x25   :  { %4661 = dma.done.wait [#allocation9], 4096  }
  0x26   :  { %4662 = vsyncadd [#allocation9], 4294963200 }
  0x27   :  { %4663 = dma.done.wait [#allocation12], 2048  }
  0x28   :  { %4664 = vsyncadd [#allocation12], 4294965248  ;;  %vm182_vm0 = vcmask 64512   ;;  %v181_v0 = vld [vmem:[#allocation2] sm:$0xff]  ;;  %s6223_s6 = sld [smem:[#allocation24_spill]]  ;;  %v4678_v4 = vmov 0   ;;  %v252_v15 = vlaneseq }
  0x29   :  { %204 = vmatpush.msra.mxu0 %v181_v0  ;;  %s6224_s26 = sld [smem:[#allocation20_spill]]  ;;  %4139 = vset.pattern.permute.xlu0 %v4678_v4  ;;  %vm218_vm1 = vcmask 130048   ;;  %v314_v11 = vld [vmem:[%s6191_s7 + $0x18] sm:$0xff]  ;;  %v313_v12 = vld [vmem:[%s6191_s7 + $0x10] sm:$0xff]  ;;  %v4679_v24 = vmov 0.0   ;;  %v312_v28 = vld [vmem:[%s6191_s7 + $0x8] sm:$0xff] }
  0x2a   :  { %4140 = vset.pattern.permute.xlu1 %v4678_v4  ;;  %4141 = vset.pattern.permute.xlu2 %v4678_v4  ;;  %s6225_s3 = sld [smem:[#allocation23_spill]]  ;;  %v253_v17 = vand.u32 127, %v252_v15  ;;  %v311_v29 = vld [vmem:[%s6191_s7] sm:$0xff]  ;;  %vm315_vm4 = vcmask 261120   ;;  %s4680_s27 = smov 96  }
  0x2b   :  { %s6226_s23 = sld [smem:[#allocation21_spill]]  ;;  %v4681_v62 = vmov 5.656854   ;;  %s4682_s28 = smov 64  }
  0x2c   :  { %s6227_s4 = sld [smem:[#allocation26_spill]]  ;;  %4155 = vrcp.f32 %v4681_v62  ;;  %s4686_s5 = smov 2  }
  0x2d   :  { %s6228_s7 = sld [smem:[#allocation22_spill]]  ;;  %s4687_s21 = smov 1  }
  0x2e   :  { %v179_v1 = vld [vmem:[%s6223_s6] sm:$0xff]  ;;  %v180_v2 = vld [vmem:[%s6223_s6 + $0x8] sm:$0xff]  ;;  %s4688_s24 = smov 4   ;;  %s4690_s20 = smov 5  }
  0x2f   :  { %4006 = vmatmul.msk.f32.vlgmr.msra.gmra.mxu0 %vm182_vm0, %v179_v1  ;;  %v254_v3 = vld [vmem:[%s6224_s26] sm:$0xff]  ;;  %v255_v5 = vld [vmem:[%s6224_s26 + $0x8] sm:$0xff] }
  0x30   :  { %257 = vperm.xlu0 %4139, %v254_v3   ;;  %v212_v8 = vld [vmem:[%s6225_s3] sm:$0xff]  ;;  %v213_v9 = vld [vmem:[%s6225_s3 + $0x8] sm:$0xff] }
  0x31   :  { %v250_v10 = vld [vmem:[%s6226_s23] sm:$0xff]  ;;  %v251_v13 = vld [vmem:[%s6226_s23 + $0x8] sm:$0xff] }
  0x32   :  { %299 = vperm.xlu1 %4140, %v250_v10   ;;  %v4150_v16 = vld [vmem:[%s6227_s4] ss:$0 sm:$0xff]  ;;  %v4156_v63 = vpop.eup %4155  ;;  %s4691_s4 = smov 7  }
  0x33   :  { %v309_v36 = vld [vmem:[%s6228_s7] sm:$0xff]  ;;  %v310_v37 = vld [vmem:[%s6228_s7 + $0x8] sm:$0xff]  ;;  %v374_v0 = vmul.f32 5.656854, %v4156_v63  ;;  %vm378_vm5 = vweird.f32 %v4156_v63 }
  0x35   :  { %v375_v1 = vsub.f32 1.0, %v374_v0 }
  0x37   :  { %4007 = vmatmul.msk.f32.gmra.mxu0 %vm182_vm0, %v180_v2  ;;  %v376_v2 = vmul.f32 %v4156_v63, %v375_v1 }
  0x38   :  { %260 = vperm.xlu0 %4139, %v255_v5  }
  0x39   :  { %v377_v3 = vadd.f32 %v4156_v63, %v376_v2 }
  0x3a   :  { %304 = vperm.xlu1 %4140, %v251_v13  }
  0x3b   :  { %v379_v4 = vsel %vm378_vm5, %v4156_v63, %v377_v3 }
  0xa2   :  { %v258_v18 = vpop.permute.xlu0 %257 }
  0xa3   :  { %vm262_vm2 = vcmp.eq.s32.totalorder %v253_v17, %v258_v18 }
  0xa4   :  { %v4010_v25 = vsel %vm262_vm2, 1.0, %v4679_v24  ;;  %v4893_v30 = vpop.permute.xlu1 %299 }
  0xaa   :  { %v261_v26 = vpop.permute.xlu0 %260 }
  0xab   :  { %vm263_vm3 = vcmp.eq.s32.totalorder %v253_v17, %v261_v26 }
  0xac   :  { %v206_v6 = vpop.f32.mrf.mxu0  ;;  %v4011_v27 = vsel %vm263_vm3, 1.0, %v4679_v24  ;;  %v4897_v33 = vpop.permute.xlu1 %304  ;;  %vm731_vm3 = vcmask 523264  }
  0xb4   :  { %v209_v7 = vpop.f32.mrf.mxu0 }
  0xb5   :  { %239 = vmatpush.msra.mxu3 %v209_v7 }
  0xb7   :  { %240 = vmatpush.msra.mxu3 %v206_v6 }
  0xb8   :  { %4008 = vmatmul.msk.f32.vlgmr.msra.gmra.mxu3 %vm218_vm1, %v212_v8 }
  0xb9   :  { %340 = vmatpush.msrb.mxu3 %v314_v11 }
  0xbb   :  { %341 = vmatpush.msrb.mxu3 %v313_v12 }
  0xbd   :  { %342 = vmatpush.msrb.mxu3 %v312_v28 }
  0xbf   :  { %343 = vmatpush.msrb.mxu3 %v311_v29 }
  0xc0   :  { %4009 = vmatmul.msk.f32.gmra.mxu3 %vm218_vm1, %v213_v9 }
 0x13b   :  { %v242_v14 = vpop.f32.mrf.mxu3 }
 0x13c   :  { %v243_v20 = vadd.f32 %v4150_v16, %v242_v14 }
 0x13e   :  { %v248_v23 = vmax.f32 %v243_v20, 0.0 }
 0x143   :  { %v245_v19 = vpop.f32.mrf.mxu3 }
 0x144   :  { %v246_v21 = vadd.f32 %v4150_v16, %v245_v19 }
 0x146   :  { %v249_v22 = vmax.f32 %v246_v21, 0.0 }
 0x148   :  { %288 = vmatpush.msra.mxu2 %v249_v22 }
 0x14a   :  { %289 = vmatpush.msra.mxu2 %v248_v23 }
 0x14b   :  { %4012 = vmatmul.msk.f32.vlgmr.msra.gmra.mxu2 %vm218_vm1, %v4010_v25 }
 0x153   :  { %4013 = vmatmul.msk.f32.gmra.mxu2 %vm218_vm1, %v4011_v27 }
 0x1ce   :  { %v291_v31 = vpop.f32.mrf.mxu2 }
 0x1cf   :  { %v307_v32 = vmul.f32 %v4893_v30, %v291_v31 }
 0x1d1   :  { %4014 = vmatmul.msk.f32.vlgmr.msrb.gmra.mxu3 %vm315_vm4, %v307_v32 }
 0x1d6   :  { %v294_v34 = vpop.f32.mrf.mxu2 }
 0x1d7   :  { %v308_v35 = vmul.f32 %v4897_v33, %v294_v34 }
 0x1d9   :  { %4015 = vmatmul.msk.f32.gmra.mxu3 %vm315_vm4, %v308_v35 }
 0x1e1   :  { %4016 = vmatmul.msk.f32.gmra.mxu3 %vm315_vm4, %v309_v36 }
 0x1e9   :  { %4017 = vmatmul.msk.f32.gmra.mxu3 %vm315_vm4, %v310_v37 }
 0x254   :  { %v4909_v38 = vpop.f32.mrf.mxu3 }
 0x255   :  { %359 = vrot.lane.b32.xlu2 %v4909_v38, %s4680_s27 }
 0x25c   :  { %v4913_v39 = vpop.f32.mrf.mxu3 }
 0x25d   :  { %361 = vrot.lane.b32.xlu0 %v4913_v39, %s4680_s27 }
 0x264   :  { %v4917_v40 = vpop.f32.mrf.mxu3 }
 0x265   :  { %384 = vrot.lane.b32.xlu2 %v4917_v40, %s4680_s27 }
 0x26c   :  { %v4921_v41 = vpop.f32.mrf.mxu3 }
 0x26d   :  { %386 = vrot.lane.b32.xlu1 %v4921_v41, %s4680_s27 }
 0x2af   :  { %v360_v42 = vpop.permute.xlu2 %359 }
 0x2b0   :  { %v365_v43 = vmul.f32 %v360_v42, %v4909_v38  ;;  %v400_v58 = vmul.f32 %v360_v42, %v4917_v40 }
 0x2b2   :  { %v367_v44 = vsel %vm315_vm4, %v365_v43, 0.0  ;;  %v402_v59 = vsel %vm315_vm4, %v400_v58, 0.0  ;;  %v475_v43 = vld [vmem:[%s6192_s8 + $0x18] sm:$0xff] }
 0x2b3   :  { %368 = vadd.xlane.f32.xlu2 %v367_v44  ;;  %v474_v44 = vld [vmem:[%s6192_s8 + $0x10] sm:$0xff]  ;;  %512 = vmatpush.msrb.mxu0 %v475_v43 }
 0x2b5   :  { %513 = vmatpush.msrb.mxu0 %v474_v44 }
 0x2bf   :  { %v385_v45 = vpop.permute.xlu2 %384 }
 0x2c0   :  { %v390_v46 = vmul.f32 %v385_v45, %v4909_v38  ;;  %v410_v48 = vmul.f32 %v385_v45, %v4917_v40 }
 0x2c2   :  { %v392_v47 = vsel %vm315_vm4, %v390_v46, 0.0  ;;  %v412_v49 = vsel %vm315_vm4, %v410_v48, 0.0  ;;  %v473_v48 = vld [vmem:[%s6192_s8 + $0x8] sm:$0xff] }
 0x2c3   :  { %393 = vadd.xlane.f32.xlu0 %v392_v47  ;;  %514 = vmatpush.msrb.mxu0 %v473_v48 }
 0x2cb   :  { %413 = vadd.xlane.f32.xlu0 %v412_v49 }
 0x2cf   :  { %v362_v50 = vpop.permute.xlu0 %361 }
 0x2d0   :  { %v366_v51 = vmul.f32 %v362_v50, %v4913_v39  ;;  %v401_v53 = vmul.f32 %v362_v50, %v4921_v41 }
 0x2d2   :  { %v370_v52 = vsel %vm315_vm4, %v366_v51, 0.0  ;;  %v405_v54 = vsel %vm315_vm4, %v401_v53, 0.0 }
 0x2d3   :  { %371 = vadd.xlane.f32.xlu1 %v370_v52 }
 0x2db   :  { %406 = vadd.xlane.f32.xlu1 %v405_v54  ;;  %v472_v54 = vld [vmem:[%s6192_s8] sm:$0xff]  ;;  %s4689_s8 = smov 6  }
 0x2dc   :  { %515 = vmatpush.msrb.mxu0 %v472_v54 }
 0x2df   :  { %v387_v55 = vpop.permute.xlu1 %386 }
 0x2e0   :  { %v391_v56 = vmul.f32 %v387_v55, %v4913_v39  ;;  %v411_v60 = vmul.f32 %v387_v55, %v4921_v41 }
 0x2e2   :  { %v395_v57 = vsel %vm315_vm4, %v391_v56, 0.0  ;;  %v415_v61 = vsel %vm315_vm4, %v411_v60, 0.0 }
 0x2e3   :  { %396 = vadd.xlane.f32.xlu2 %v395_v57 }
 0x2eb   :  { %403 = vadd.xlane.f32.xlu2 %v402_v59 }
 0x2f3   :  { %416 = vadd.xlane.f32.xlu2 %v415_v61 }
 0x326   :  { %v369_v5 = vpop.xlane.xlu2 %368 }
 0x327   :  { %v380_v7 = vmul.f32 %v379_v4, %v369_v5 }
 0x336   :  { %v394_v6 = vpop.xlane.xlu0 %393 }
 0x337   :  { %v398_v8 = vmul.f32 %v394_v6, %v379_v4 }
 0x339   :  { %v420_v9 = vmax.f32 %v380_v7, %v398_v8 }
 0x33b   :  { %v422_v10 = vsub.f32 %v380_v7, %v420_v9  ;;  %v428_v11 = vsub.f32 %v398_v8, %v420_v9 }
 0x33d   :  { %v424_v12 = vmul.f32 1.442695, %v422_v10  ;;  %v430_v13 = vmul.f32 1.442695, %v428_v11 }
 0x33e   :  { %v414_v31 = vpop.xlane.xlu0 %413 }
 0x33f   :  { %4157 = vpow2.f32 %v424_v12  ;;  %v418_v36 = vmul.f32 %v414_v31, %v379_v4 }
 0x340   :  { %4159 = vpow2.f32 %v430_v13 }
 0x345   :  { %v4158_v14 = vpop.eup %4157 }
 0x346   :  { %v4160_v15 = vpop.eup %4159  ;;  %v434_v17 = vmul.f32 %v4158_v14, %v4909_v38  ;;  %v372_v22 = vpop.xlane.xlu1 %371 }
 0x347   :  { %v440_v16 = vadd.f32 %v4160_v15, %v4158_v14  ;;  %v436_v18 = vmul.f32 %v4160_v15, %v4917_v40  ;;  %v381_v25 = vmul.f32 %v379_v4, %v372_v22  ;;  %v4151_v22 = vld [vmem:[%s6193_s9] ss:$0 sm:$0xff]  ;;  %s3993_s9 = sshll.u32 %s6206_s22, 4  ;;  %s3994_s9 = int_to_ptr.hbm [resolvable:$true] %s3993_s9 }
 0x349   :  { %4161 = vrcp.f32 %v440_v16  ;;  %v438_v19 = vadd.f32 %v436_v18, %v434_v17 }
 0x34e   :  { %v407_v47 = vpop.xlane.xlu1 %406 }
 0x34f   :  { %v4162_v20 = vpop.eup %4161  ;;  %v409_v55 = vmul.f32 %v407_v47, %v379_v4 }
 0x350   :  { %v444_v21 = vmul.f32 %v4162_v20, %v438_v19 }
 0x352   :  { %484 = vrot.lane.b32.xlu0 %v444_v21, %s4682_s28 }
 0x356   :  { %v397_v23 = vpop.xlane.xlu2 %396 }
 0x357   :  { %v399_v26 = vmul.f32 %v397_v23, %v379_v4 }
 0x359   :  { %v421_v27 = vmax.f32 %v381_v25, %v399_v26 }
 0x35b   :  { %v423_v28 = vsub.f32 %v381_v25, %v421_v27  ;;  %v429_v29 = vsub.f32 %v399_v26, %v421_v27 }
 0x35d   :  { %v426_v32 = vmul.f32 1.442695, %v423_v28  ;;  %v432_v34 = vmul.f32 1.442695, %v429_v29 }
 0x35e   :  { %v404_v35 = vpop.xlane.xlu2 %403 }
 0x35f   :  { %4163 = vpow2.f32 %v426_v32  ;;  %v408_v37 = vmul.f32 %v404_v35, %v379_v4 }
 0x360   :  { %4165 = vpow2.f32 %v432_v34 }
 0x361   :  { %v446_v42 = vmax.f32 %v408_v37, %v418_v36 }
 0x363   :  { %v448_v45 = vsub.f32 %v408_v37, %v446_v42  ;;  %v454_v46 = vsub.f32 %v418_v36, %v446_v42  ;;  %v4152_v42 = vld [vmem:[%s6195_s11] ss:$0 sm:$0xff] }
 0x365   :  { %v4164_v49 = vpop.eup %4163  ;;  %v450_v50 = vmul.f32 1.442695, %v448_v45  ;;  %v456_v51 = vmul.f32 1.442695, %v454_v46 }
 0x366   :  { %v4166_v52 = vpop.eup %4165  ;;  %v417_v53 = vpop.xlane.xlu2 %416  ;;  %v435_v59 = vmul.f32 %v4164_v49, %v4913_v39 }
 0x367   :  { %4167 = vpow2.f32 %v450_v50  ;;  %v419_v56 = vmul.f32 %v417_v53, %v379_v4  ;;  %v441_v57 = vadd.f32 %v4166_v52, %v4164_v49  ;;  %v437_v60 = vmul.f32 %v4166_v52, %v4921_v41 }
 0x368   :  { %4169 = vpow2.f32 %v456_v51 }
 0x369   :  { %v447_v58 = vmax.f32 %v409_v55, %v419_v56  ;;  %4171 = vrcp.f32 %v441_v57  ;;  %v439_v3 = vadd.f32 %v437_v60, %v435_v59  ;;  %v4683_v59 = vmov 32.0  }
 0x36b   :  { %v449_v61 = vsub.f32 %v409_v55, %v447_v58  ;;  %v455_v62 = vsub.f32 %v419_v56, %v447_v58 }
 0x36d   :  { %v4168_v63 = vpop.eup %4167  ;;  %v452_v0 = vmul.f32 1.442695, %v449_v61  ;;  %v458_v1 = vmul.f32 1.442695, %v455_v62 }
 0x36e   :  { %v4170_v2 = vpop.eup %4169  ;;  %v460_v7 = vmul.f32 %v4168_v63, %v4909_v38 }
 0x36f   :  { %v4172_v5 = vpop.eup %4171  ;;  %4173 = vpow2.f32 %v452_v0  ;;  %v466_v4 = vadd.f32 %v4170_v2, %v4168_v63  ;;  %v462_v8 = vmul.f32 %v4170_v2, %v4917_v40 }
 0x370   :  { %4175 = vpow2.f32 %v458_v1  ;;  %v445_v6 = vmul.f32 %v4172_v5, %v439_v3 }
 0x371   :  { %4177 = vrcp.f32 %v466_v4  ;;  %v464_v11 = vadd.f32 %v462_v8, %v460_v7 }
 0x372   :  { %486 = vrot.lane.b32.xlu1 %v445_v6, %s4682_s28 }
 0x375   :  { %v4174_v9 = vpop.eup %4173 }
 0x376   :  { %v4176_v10 = vpop.eup %4175  ;;  %v461_v15 = vmul.f32 %v4174_v9, %v4913_v39  ;;  %v534_v39 = vld [vmem:[%s6194_s10 + $0x8] sm:$0xff] }
 0x377   :  { %v4178_v12 = vpop.eup %4177  ;;  %v467_v13 = vadd.f32 %v4176_v10, %v4174_v9  ;;  %v463_v16 = vmul.f32 %v4176_v10, %v4921_v41  ;;  %565 = vmatpush.msra.mxu1 %v534_v39  ;;  %v533_v41 = vld [vmem:[%s6194_s10] sm:$0xff] }
 0x378   :  { %v470_v14 = vmul.f32 %v4178_v12, %v464_v11 }
 0x379   :  { %4179 = vrcp.f32 %v467_v13  ;;  %v465_v17 = vadd.f32 %v463_v16, %v461_v15  ;;  %566 = vmatpush.msra.mxu1 %v533_v41 }
 0x37a   :  { %488 = vrot.lane.b32.xlu2 %v470_v14, %s4682_s28  ;;  %4181 = vrcp.f32 %v4683_v59  ;;  %v5032_v59 = vld [vmem:[#allocation7 + $0x30] sm:$0xff] }
 0x37f   :  { %v4180_v18 = vpop.eup %4179 }
 0x380   :  { %v471_v19 = vmul.f32 %v4180_v18, %v465_v17  ;;  %v4182_v60 = vpop.eup %4181 }
 0x381   :  { %v601_v61 = vmul.f32 32.0, %v4182_v60  ;;  %vm605_vm6 = vweird.f32 %v4182_v60 }
 0x382   :  { %490 = vrot.lane.b32.xlu0 %v471_v19, %s4682_s28 }
 0x383   :  { %v602_v62 = vsub.f32 1.0, %v601_v61  ;;  %v713_v61 = vld [vmem:[#allocation5 + $0x20] sm:$0xff] }
 0x385   :  { %v603_v63 = vmul.f32 %v4182_v60, %v602_v62  ;;  %v5036_v62 = vld [vmem:[#allocation7 + $0x20] sm:$0xff] }
 0x387   :  { %v604_v0 = vadd.f32 %v4182_v60, %v603_v63 }
 0x389   :  { %v606_v1 = vsel %vm605_vm6, %v4182_v60, %v604_v0  ;;  %v711_v0 = vld [vmem:[#allocation5 + $0x10] sm:$0xff] }
 0x3c4   :  { %v485_v38 = vpop.permute.xlu0 %484 }
 0x3c5   :  { %4018 = vmatmul.msk.f32.vlgmr.msrb.gmra.mxu0 %vm315_vm4, %v485_v38 }
 0x3d4   :  { %v489_v20 = vpop.permute.xlu2 %488 }
 0x3e4   :  { %v487_v40 = vpop.permute.xlu1 %486 }
 0x3e5   :  { %4019 = vmatmul.msk.f32.gmra.mxu0 %vm315_vm4, %v487_v40 }
 0x3ed   :  { %4020 = vmatmul.msk.f32.gmra.mxu0 %vm315_vm4, %v489_v20 }
 0x3f4   :  { %v491_v21 = vpop.permute.xlu0 %490 }
 0x3f5   :  { %4021 = vmatmul.msk.f32.gmra.mxu0 %vm315_vm4, %v491_v21 }
 0x442   :  { %v517_v23 = vpop.f32.mrf.mxu0 }
 0x443   :  { %v518_v25 = vadd.f32 %v4151_v22, %v517_v23 }
 0x445   :  { %v529_v26 = vmax.f32 %v518_v25, 0.0 }
 0x447   :  { %4022 = vmatmul.msk.f32.vlgmr.msra.gmra.mxu1 %vm218_vm1, %v529_v26 }
 0x462   :  { %v520_v27 = vpop.f32.mrf.mxu0 }
 0x463   :  { %v521_v28 = vadd.f32 %v4151_v22, %v520_v27 }
 0x465   :  { %v530_v29 = vmax.f32 %v521_v28, 0.0  ;;  %v5008_v28 = vld [vmem:[%s6196_s12] ss:$0 sm:$0xff]  ;;  %s4684_s12 = smov 32  }
 0x467   :  { %4023 = vmatmul.msk.f32.gmra.mxu1 %vm218_vm1, %v530_v29 }
 0x46a   :  { %v523_v31 = vpop.f32.mrf.mxu0 }
 0x46b   :  { %v524_v32 = vadd.f32 %v4151_v22, %v523_v31  ;;  %v5013_v31 = vld [vmem:[%s6197_s13] ss:$0 sm:$0xff] }
 0x46d   :  { %v531_v34 = vmax.f32 %v524_v32, 0.0 }
 0x46f   :  { %4024 = vmatmul.msk.f32.gmra.mxu1 %vm218_vm1, %v531_v34 }
 0x472   :  { %v526_v35 = vpop.f32.mrf.mxu0 }
 0x473   :  { %v527_v36 = vadd.f32 %v4151_v22, %v526_v35 }
 0x475   :  { %v532_v37 = vmax.f32 %v527_v36, 0.0 }
 0x477   :  { %4025 = vmatmul.msk.f32.gmra.mxu1 %vm218_vm1, %v532_v37 }
 0x4c4   :  { %v568_v43 = vpop.f32.mrf.mxu1 }
 0x4c5   :  { %v569_v44 = vadd.f32 %v4152_v42, %v568_v43  ;;  %v723_v43 = vld [vmem:[#allocation5 + $0x70] sm:$0xff] }
 0x4c6   :  { %746 = vmatpush.msrb.mxu2 %v723_v43 }
 0x4c7   :  { %v584_v45 = vadd.f32 %v569_v44, %v485_v38  ;;  %v721_v44 = vld [vmem:[#allocation5 + $0x60] sm:$0xff] }
 0x4c8   :  { %747 = vmatpush.msrb.mxu2 %v721_v44  ;;  %v716_v44 = vld [vmem:[#allocation5 + $0x38] sm:$0xff] }
 0x4c9   :  { %v588_v46 = vsel %vm315_vm4, %v584_v45, 0.0 }
 0x4ca   :  { %589 = vadd.xlane.f32.xlu2 %v588_v46  ;;  %v5022_v46 = vld [vmem:[#allocation7 + $0x60] sm:$0xff] }
 0x4e4   :  { %v571_v47 = vpop.f32.mrf.mxu1 }
 0x4e5   :  { %v572_v51 = vadd.f32 %v4152_v42, %v571_v47  ;;  %v719_v47 = vld [vmem:[#allocation5 + $0x50] sm:$0xff] }
 0x4e6   :  { %748 = vmatpush.msrb.mxu2 %v719_v47  ;;  %v714_v47 = vld [vmem:[#allocation5 + $0x28] sm:$0xff] }
 0x4e7   :  { %v585_v55 = vadd.f32 %v572_v51, %v487_v40 }
 0x4e9   :  { %v591_v58 = vsel %vm315_vm4, %v585_v55, 0.0 }
 0x4ec   :  { %v574_v48 = vpop.f32.mrf.mxu1 }
 0x4ed   :  { %v575_v49 = vadd.f32 %v4152_v42, %v574_v48  ;;  %v5024_v48 = vld [vmem:[#allocation7 + $0x50] sm:$0xff] }
 0x4ef   :  { %v586_v50 = vadd.f32 %v575_v49, %v489_v20 }
 0x4f1   :  { %v594_v52 = vsel %vm315_vm4, %v586_v50, 0.0 }
 0x4f2   :  { %595 = vadd.xlane.f32.xlu1 %v594_v52 }
 0x4f4   :  { %v577_v53 = vpop.f32.mrf.mxu1 }
 0x4f5   :  { %v578_v54 = vadd.f32 %v4152_v42, %v577_v53  ;;  %v717_v53 = vld [vmem:[#allocation5 + $0x40] sm:$0xff] }
 0x4f6   :  { %749 = vmatpush.msrb.mxu2 %v717_v53  ;;  %v5109_v53 = vld [vmem:[#allocation7 + $0x18] sm:$0xff] }
 0x4f7   :  { %v587_v56 = vadd.f32 %v578_v54, %v491_v21  ;;  %v5028_v54 = vld [vmem:[#allocation7 + $0x40] sm:$0xff] }
 0x4f9   :  { %v597_v57 = vsel %vm315_vm4, %v587_v56, 0.0 }
 0x4fa   :  { %598 = vadd.xlane.f32.xlu0 %v597_v57  ;;  %592 = vadd.xlane.f32.xlu1 %v591_v58  ;;  %v715_v58 = vld [vmem:[#allocation5 + $0x30] sm:$0xff] }
 0x4fb   :  { %750 = vmatpush.msrb.mxu2 %v715_v58  ;;  %v725_v58 = vld [vmem:[%s6200_s16] sm:$0x3] }
 0x4fd   :  { %751 = vmatpush.msrb.mxu2 %v713_v61 }
 0x4ff   :  { %752 = vmatpush.msrb.mxu2 %v711_v0 }
 0x53d   :  { %v590_v2 = vpop.xlane.xlu2 %589 }
 0x53e   :  { %v607_v3 = vmul.f32 %v606_v1, %v590_v2 }
 0x540   :  { %v611_v5 = vsub.f32 %v584_v45, %v607_v3  ;;  %v5019_v45 = vld [vmem:[#allocation7 + $0x70] sm:$0xff] }
 0x541   :  { %811 = vmatpush.msra.mxu3 %v5019_v45  ;;  %965 = vmatpush.msrb.mxu1 %v5019_v45 }
 0x542   :  { %v615_v4 = vmul.f32 %v611_v5, %v611_v5 }
 0x543   :  { %812 = vmatpush.msra.mxu3 %v5022_v46  ;;  %966 = vmatpush.msrb.mxu1 %v5022_v46 }
 0x544   :  { %v619_v6 = vsel %vm315_vm4, %v615_v4, 0.0 }
 0x545   :  { %620 = vadd.xlane.f32.xlu1 %v619_v6  ;;  %813 = vmatpush.msra.mxu3 %v5024_v48 }
 0x546   :  { %967 = vmatpush.msrb.mxu1 %v5024_v48 }
 0x547   :  { %814 = vmatpush.msra.mxu3 %v5028_v54 }
 0x548   :  { %968 = vmatpush.msrb.mxu1 %v5028_v54 }
 0x549   :  { %815 = vmatpush.msra.mxu3 %v5032_v59 }
 0x54a   :  { %969 = vmatpush.msrb.mxu1 %v5032_v59 }
 0x54b   :  { %816 = vmatpush.msra.mxu3 %v5036_v62 }
 0x54c   :  { %970 = vmatpush.msrb.mxu1 %v5036_v62 }
 0x565   :  { %v596_v7 = vpop.xlane.xlu1 %595 }
 0x566   :  { %v609_v8 = vmul.f32 %v606_v1, %v596_v7 }
 0x568   :  { %v4990_v9 = vsub.f32 %v586_v50, %v609_v8 }
 0x56a   :  { %v617_v10 = vmul.f32 %v4990_v9, %v4990_v9 }
 0x56c   :  { %v625_v11 = vsel %vm315_vm4, %v617_v10, 0.0 }
 0x56d   :  { %v599_v12 = vpop.xlane.xlu0 %598  ;;  %626 = vadd.xlane.f32.xlu0 %v625_v11  ;;  %v593_v13 = vpop.xlane.xlu1 %592 }
 0x56e   :  { %v610_v14 = vmul.f32 %v606_v1, %v599_v12  ;;  %v608_v15 = vmul.f32 %v606_v1, %v593_v13 }
 0x570   :  { %v4995_v16 = vsub.f32 %v587_v56, %v610_v14  ;;  %v4997_v17 = vsub.f32 %v585_v55, %v608_v15 }
 0x572   :  { %v618_v18 = vmul.f32 %v4995_v16, %v4995_v16  ;;  %v616_v19 = vmul.f32 %v4997_v17, %v4997_v17 }
 0x574   :  { %v628_v38 = vsel %vm315_vm4, %v618_v18, 0.0  ;;  %v622_v40 = vsel %vm315_vm4, %v616_v19, 0.0 }
 0x575   :  { %629 = vadd.xlane.f32.xlu2 %v628_v38  ;;  %623 = vadd.xlane.f32.xlu0 %v622_v40 }
 0x5b8   :  { %v621_v20 = vpop.xlane.xlu1 %620 }
 0x5b9   :  { %v631_v21 = vmul.f32 %v621_v20, %v606_v1 }
 0x5bb   :  { %v635_v39 = vadd.f32 1e-06, %v631_v21 }
 0x5bd   :  { %4183 = vrsqrt.f32 %v635_v39  ;;  %vm645_vm8 = vweird.f32 %v635_v39 }
 0x5c3   :  { %v4184_v41 = vpop.eup %4183 }
 0x5c4   :  { %v640_v22 = vmul.f32 %v4184_v41, %v635_v39  ;;  %vm646_vm7 = vweird.f32 %v4184_v41 }
 0x5c5   :  { %vm647_vm9 = vmor %vm645_vm8, %vm646_vm7 }
 0x5c6   :  { %v641_v23 = vmul.f32 %v4184_v41, %v640_v22 }
 0x5c8   :  { %v642_v25 = vmul.f32 0.5, %v641_v23 }
 0x5ca   :  { %v643_v26 = vsub.f32 1.5, %v642_v25 }
 0x5cc   :  { %v644_v27 = vmul.f32 %v4184_v41, %v643_v26 }
 0x5ce   :  { %v648_v29 = vsel %vm647_vm9, %v4184_v41, %v644_v27  ;;  %v709_v27 = vld [vmem:[#allocation5] sm:$0xff] }
 0x5cf   :  { %v679_v32 = vmul.f32 %v648_v29, %v611_v5  ;;  %v5056_v29 = vld [vmem:[#allocation7 + $0x10] sm:$0xff]  ;;  %753 = vmatpush.msrb.mxu2 %v709_v27 }
 0x5d0   :  { %817 = vmatpush.msra.mxu3 %v5056_v29  ;;  %971 = vmatpush.msrb.mxu1 %v5056_v29 }
 0x5d1   :  { %v687_v34 = vmul.f32 %v5008_v28, %v679_v32  ;;  %v724_v32 = vld [vmem:[#allocation5 + $0x78] sm:$0xff] }
 0x5d2   :  { %769 = vmatpush.msra.mxu2 %v724_v32  ;;  %v4455_v32 = vld [vmem:[%s6226_s23 + $0x8] sm:$0xff] }
 0x5d3   :  { %v5017_v35 = vadd.f32 %v5013_v31, %v687_v34  ;;  %v5064_v34 = vld [vmem:[#allocation7 + $0x68] sm:$0xff] }
 0x5e0   :  { %v627_v36 = vpop.xlane.xlu0 %626 }
 0x5e1   :  { %v633_v37 = vmul.f32 %v627_v36, %v606_v1  ;;  %v5069_v36 = vld [vmem:[#allocation7 + $0x58] sm:$0xff] }
 0x5e3   :  { %v637_v42 = vadd.f32 1e-06, %v633_v37  ;;  %v718_v37 = vld [vmem:[#allocation5 + $0x48] sm:$0xff] }
 0x5e5   :  { %4185 = vrsqrt.f32 %v637_v42  ;;  %vm665_vm11 = vweird.f32 %v637_v42 }
 0x5e8   :  { %v630_v49 = vpop.xlane.xlu2 %629  ;;  %v624_v50 = vpop.xlane.xlu0 %623 }
 0x5e9   :  { %v634_v51 = vmul.f32 %v630_v49, %v606_v1  ;;  %v632_v52 = vmul.f32 %v624_v50, %v606_v1  ;;  %v5099_v49 = vld [vmem:[#allocation7 + $0x48] sm:$0xff]  ;;  %v5103_v50 = vld [vmem:[#allocation7 + $0x38] sm:$0xff] }
 0x5eb   :  { %v4186_v55 = vpop.eup %4185  ;;  %v638_v56 = vadd.f32 1e-06, %v634_v51  ;;  %v636_v57 = vadd.f32 1e-06, %v632_v52  ;;  %v712_v51 = vld [vmem:[#allocation5 + $0x18] sm:$0xff]  ;;  %v5107_v52 = vld [vmem:[#allocation7 + $0x28] sm:$0xff] }
 0x5ec   :  { %v660_v60 = vmul.f32 %v4186_v55, %v637_v42  ;;  %vm666_vm10 = vweird.f32 %v4186_v55 }
 0x5ed   :  { %4187 = vrsqrt.f32 %v638_v56  ;;  %vm667_vm12 = vmor %vm665_vm11, %vm666_vm10  ;;  %vm675_vm15 = vweird.f32 %v638_v56  ;;  %vm655_vm1 = vweird.f32 %v636_v57 }
 0x5ee   :  { %v661_v63 = vmul.f32 %v4186_v55, %v660_v60  ;;  %4189 = vrsqrt.f32 %v636_v57  ;;  %v727_v60 = vperm.slane %v725_v58, 0 }
 0x5f0   :  { %v662_v1 = vmul.f32 0.5, %v661_v63 }
 0x5f2   :  { %v663_v2 = vsub.f32 1.5, %v662_v1 }
 0x5f3   :  { %v4188_v3 = vpop.eup %4187 }
 0x5f4   :  { %v4190_v5 = vpop.eup %4189  ;;  %v664_v4 = vmul.f32 %v4186_v55, %v663_v2  ;;  %v670_v6 = vmul.f32 %v4188_v3, %v638_v56  ;;  %vm676_vm13 = vweird.f32 %v4188_v3 }
 0x5f5   :  { %v650_v7 = vmul.f32 %v4190_v5, %v636_v57  ;;  %vm656_vm14 = vweird.f32 %v4190_v5  ;;  %vm677_vm0 = vmor %vm675_vm15, %vm676_vm13 }
 0x5f6   :  { %v671_v8 = vmul.f32 %v4188_v3, %v670_v6  ;;  %v668_v10 = vsel %vm667_vm12, %v4186_v55, %v664_v4  ;;  %vm657_vm2 = vmor %vm655_vm1, %vm656_vm14  ;;  %v5117_v55 = vld [vmem:[#allocation7 + $0x8] sm:$0xff]  ;;  %v728_v4 = vperm.slane %v725_v58, 1 }
 0x5f7   :  { %v651_v11 = vmul.f32 %v4190_v5, %v650_v7  ;;  %v681_v12 = vmul.f32 %v668_v10, %v4990_v9 }
 0x5f8   :  { %v672_v13 = vmul.f32 0.5, %v671_v8 }
 0x5f9   :  { %v652_v14 = vmul.f32 0.5, %v651_v11  ;;  %v689_v15 = vmul.f32 %v5008_v28, %v681_v12 }
 0x5fa   :  { %v673_v18 = vsub.f32 1.5, %v672_v13 }
 0x5fb   :  { %v653_v19 = vsub.f32 1.5, %v652_v14  ;;  %v697_v38 = vadd.f32 %v5013_v31, %v689_v15 }
 0x5fc   :  { %v674_v40 = vmul.f32 %v4188_v3, %v673_v18 }
 0x5fd   :  { %v654_v20 = vmul.f32 %v4190_v5, %v653_v19  ;;  %701 = vrot.lane.b32.xlu2 %v697_v38, %s4684_s12 }
 0x5fe   :  { %v678_v9 = vsel %vm677_vm0, %v4188_v3, %v674_v40 }
 0x5ff   :  { %v658_v21 = vsel %vm657_vm2, %v4190_v5, %v654_v20  ;;  %v682_v39 = vmul.f32 %v678_v9, %v4995_v16  ;;  %v5059_v16 = vld [vmem:[#allocation7] sm:$0xff] }
 0x600   :  { %v680_v41 = vmul.f32 %v658_v21, %v4997_v17  ;;  %v5061_v17 = vld [vmem:[#allocation7 + $0x78] sm:$0xff]  ;;  %818 = vmatpush.msra.mxu3 %v5059_v16  ;;  %972 = vmatpush.msrb.mxu1 %v5059_v16 }
 0x601   :  { %v690_v22 = vmul.f32 %v5008_v28, %v682_v39  ;;  %831 = vmatpush.msra.mxu0 %v5061_v17  ;;  %819 = vmatmul.f32.vlgmr.msra.gmra.mxu3 %v4679_v24 }
 0x602   :  { %v688_v23 = vmul.f32 %v5008_v28, %v680_v41  ;;  %v722_v28 = vld [vmem:[#allocation5 + $0x68] sm:$0xff]  ;;  %1149 = vmatpush.msrb.mxu3 %v5019_v45  ;;  %1332 = vmatpush.msra.mxu1 %v5019_v45 }
 0x603   :  { %v698_v25 = vadd.f32 %v5013_v31, %v690_v22  ;;  %770 = vmatpush.msra.mxu2 %v722_v28  ;;  %832 = vmatpush.msra.mxu0 %v5064_v34  ;;  %v934_v28 = vsub.f32 1.0, %v4455_v32 }
 0x604   :  { %v5053_v26 = vadd.f32 %v5013_v31, %v688_v23  ;;  %v720_v31 = vld [vmem:[#allocation5 + $0x58] sm:$0xff]  ;;  %1150 = vmatpush.msrb.mxu3 %v5022_v46  ;;  %1333 = vmatpush.msra.mxu1 %v5022_v46 }
 0x605   :  { %703 = vrot.lane.b32.xlu1 %v698_v25, %s4684_s12  ;;  %771 = vmatpush.msra.mxu2 %v720_v31 }
 0x606   :  { %833 = vmatpush.msra.mxu0 %v5069_v36  ;;  %1151 = vmatpush.msrb.mxu3 %v5024_v48 }
 0x607   :  { %772 = vmatpush.msra.mxu2 %v718_v37  ;;  %1334 = vmatpush.msra.mxu1 %v5024_v48 }
 0x608   :  { %1152 = vmatpush.msrb.mxu3 %v5028_v54  ;;  %834 = vmatpush.msra.mxu0 %v5099_v49 }
 0x609   :  { %1335 = vmatpush.msra.mxu1 %v5028_v54  ;;  %773 = vmatpush.msra.mxu2 %v716_v44 }
 0x60a   :  { %1153 = vmatpush.msrb.mxu3 %v5032_v59  ;;  %835 = vmatpush.msra.mxu0 %v5103_v50 }
 0x60b   :  { %1336 = vmatpush.msra.mxu1 %v5032_v59  ;;  %774 = vmatpush.msra.mxu2 %v714_v47 }
 0x60c   :  { %1154 = vmatpush.msrb.mxu3 %v5036_v62  ;;  %836 = vmatpush.msra.mxu0 %v5107_v52 }
 0x60d   :  { %1337 = vmatpush.msra.mxu1 %v5036_v62  ;;  %775 = vmatpush.msra.mxu2 %v712_v51 }
 0x60e   :  { %1155 = vmatpush.msrb.mxu3 %v5056_v29  ;;  %837 = vmatpush.msra.mxu0 %v5109_v53 }
 0x60f   :  { %1338 = vmatpush.msra.mxu1 %v5056_v29 }
 0x610   :  { %1156 = vmatpush.msrb.mxu3 %v5059_v16  ;;  %838 = vmatpush.msra.mxu0 %v5117_v55 }
 0x611   :  { %1339 = vmatpush.msra.mxu1 %v5059_v16  ;;  %839 = vmatmul.f32.vlgmr.msra.gmra.mxu0 %v4679_v24 }
 0x612   :  { %1513 = vmatpush.msra.mxu3 %v5019_v45  ;;  %1169 = vmatpush.msrb.mxu0 %v5061_v17 }
 0x614   :  { %1514 = vmatpush.msra.mxu3 %v5022_v46  ;;  %1170 = vmatpush.msrb.mxu0 %v5064_v34 }
 0x616   :  { %1515 = vmatpush.msra.mxu3 %v5024_v48  ;;  %1171 = vmatpush.msrb.mxu0 %v5069_v36 }
 0x618   :  { %1516 = vmatpush.msra.mxu3 %v5028_v54  ;;  %1172 = vmatpush.msrb.mxu0 %v5099_v49 }
 0x61a   :  { %1517 = vmatpush.msra.mxu3 %v5032_v59  ;;  %1173 = vmatpush.msrb.mxu0 %v5103_v50 }
 0x61c   :  { %1518 = vmatpush.msra.mxu3 %v5036_v62  ;;  %1174 = vmatpush.msrb.mxu0 %v5107_v52 }
 0x61e   :  { %1519 = vmatpush.msra.mxu3 %v5056_v29  ;;  %1175 = vmatpush.msrb.mxu0 %v5109_v53 }
 0x620   :  { %1520 = vmatpush.msra.mxu3 %v5059_v16  ;;  %1176 = vmatpush.msrb.mxu0 %v5117_v55 }
 0x622   :  { %1533 = vmatpush.msra.mxu0 %v5061_v17 }
 0x624   :  { %1534 = vmatpush.msra.mxu0 %v5064_v34 }
 0x626   :  { %1535 = vmatpush.msra.mxu0 %v5069_v36 }
 0x628   :  { %1536 = vmatpush.msra.mxu0 %v5099_v49 }
 0x62a   :  { %1537 = vmatpush.msra.mxu0 %v5103_v50 }
 0x62c   :  { %1538 = vmatpush.msra.mxu0 %v5107_v52 }
 0x62e   :  { %1539 = vmatpush.msra.mxu0 %v5109_v53 }
 0x630   :  { %1540 = vmatpush.msra.mxu0 %v5117_v55 }
 0x657   :  { %v702_v42 = vpop.permute.xlu2 %701 }
 0x658   :  { %v707_v43 = vsel %vm315_vm4, %v5017_v35, %v702_v42  ;;  %v710_v35 = vld [vmem:[#allocation5 + $0x8] sm:$0xff] }
 0x659   :  { %4026 = vmatmul.msk.f32.vlgmr.msrb.gmra.mxu2 %vm731_vm3, %v707_v43 }
 0x65a   :  { %776 = vmatpush.msra.mxu2 %v710_v35 }
 0x65c   :  { %985 = vmatpush.msrb.mxu2 %v5061_v17 }
 0x65e   :  { %986 = vmatpush.msrb.mxu2 %v5064_v34 }
 0x660   :  { %987 = vmatpush.msrb.mxu2 %v5069_v36 }
 0x662   :  { %988 = vmatpush.msrb.mxu2 %v5099_v49 }
 0x664   :  { %989 = vmatpush.msrb.mxu2 %v5103_v50 }
 0x666   :  { %990 = vmatpush.msrb.mxu2 %v5107_v52 }
 0x668   :  { %991 = vmatpush.msrb.mxu2 %v5109_v53 }
 0x66a   :  { %992 = vmatpush.msrb.mxu2 %v5117_v55 }
 0x677   :  { %v704_v56 = vpop.permute.xlu1 %703 }
 0x678   :  { %v708_v57 = vsel %vm315_vm4, %v5053_v26, %v704_v56 }
 0x679   :  { %4027 = vmatmul.msk.f32.gmra.mxu2 %vm731_vm3, %v708_v57 }
 0x681   :  { %4028 = vmatmul.msk.f32.vlgmr.msra.gmra.mxu2 %vm731_vm3, %v707_v43 }
 0x682   :  { %1352 = vmatpush.msra.mxu2 %v5061_v17 }
 0x684   :  { %1353 = vmatpush.msra.mxu2 %v5064_v34  ;;  %v820_v63 = vpop.f32.mrf.mxu3 }
 0x686   :  { %1354 = vmatpush.msra.mxu2 %v5069_v36 }
 0x688   :  { %1355 = vmatpush.msra.mxu2 %v5099_v49 }
 0x689   :  { %4029 = vmatmul.msk.f32.gmra.mxu2 %vm731_vm3, %v708_v57 }
 0x68a   :  { %1356 = vmatpush.msra.mxu2 %v5103_v50 }
 0x68c   :  { %1357 = vmatpush.msra.mxu2 %v5107_v52 }
 0x68e   :  { %1358 = vmatpush.msra.mxu2 %v5109_v53  ;;  %v840_v8 = vpop.f32.mrf.mxu0 }
 0x68f   :  { %v845_v10 = vrot.slane %v840_v8, 2 }
 0x690   :  { %1359 = vmatpush.msra.mxu2 %v5117_v55 }
 0x6dc   :  { %v755_v61 = vpop.f32.mrf.mxu2 }
 0x6dd   :  { %v5157_v0 = vadd.f32 %v755_v61, %v727_v60 }
 0x6df   :  { %v843_v1 = vadd.f32 %v820_v63, %v5157_v0 }
 0x6e1   :  { %4191 = vtanh.f32 %v843_v1  ;;  %v4030_v14 = vmul.f32 -1.442695, %v843_v1 }
 0x6e7   :  { %v4192_v2 = vpop.eup %4191 }
 0x6e8   :  { %870 = vrot.lane.b32.xlu2 %v4192_v2, %s4682_s28 }
 0x6fc   :  { %v758_v3 = vpop.f32.mrf.mxu2 }
 0x6fd   :  { %v5161_v5 = vadd.f32 %v758_v3, %v727_v60 }
 0x704   :  { %v778_v6 = vpop.f32.mrf.mxu2 }
 0x705   :  { %v5163_v7 = vadd.f32 %v778_v6, %v728_v4 }
 0x70c   :  { %v781_v11 = vpop.f32.mrf.mxu2 }
 0x70d   :  { %v5165_v12 = vadd.f32 %v781_v11, %v728_v4 }
 0x70f   :  { %v847_v13 = vadd.f32 %v845_v10, %v5165_v12 }
 0x711   :  { %4193 = vtanh.f32 %v847_v13  ;;  %v4031_v31 = vmul.f32 -1.442695, %v847_v13 }
 0x712   :  { %4195 = vpow2.f32 %v4030_v14  ;;  %v4456_v14 = vld [vmem:[%s6226_s23] sm:$0xff] }
 0x717   :  { %v4194_v15 = vpop.eup %4193 }
 0x718   :  { %907 = vrot.lane.b32.xlu0 %v4194_v15, %s4682_s28  ;;  %v4196_v18 = vpop.eup %4195  ;;  %v923_v15 = vsub.f32 1.0, %v4456_v14 }
 0x719   :  { %v851_v19 = vadd.f32 1.0, %v4196_v18 }
 0x71b   :  { %4197 = vrcp.f32 %v851_v19  ;;  %v863_v39 = vand.u32 2147483648, %v851_v19  ;;  %vm857_vm6 = vweird.f32 %v851_v19  ;;  %v861_v41 = vand.u32 2147483647, %v851_v19 }
 0x71c   :  { %4199 = vpow2.f32 %v4031_v31 }
 0x71d   :  { %v864_v23 = vor.u32 1.1754944e-38, %v863_v39  ;;  %vm862_vm8 = vcmp.eq.f32.partialorder %v861_v41, 8.507059e+37 }
 0x721   :  { %v4198_v38 = vpop.eup %4197 }
 0x722   :  { %v853_v40 = vmul.f32 %v4198_v38, %v851_v19  ;;  %vm858_vm5 = vweird.f32 %v4198_v38  ;;  %v4200_v37 = vpop.eup %4199 }
 0x723   :  { %vm859_vm7 = vmor %vm857_vm6, %vm858_vm5  ;;  %v888_v42 = vadd.f32 1.0, %v4200_v37 }
 0x724   :  { %v854_v20 = vsub.f32 1.0, %v853_v40 }
 0x725   :  { %4201 = vrcp.f32 %v888_v42  ;;  %v900_v56 = vand.u32 2147483648, %v888_v42  ;;  %vm894_vm10 = vweird.f32 %v888_v42  ;;  %v898_v57 = vand.u32 2147483647, %v888_v42 }
 0x726   :  { %v855_v9 = vmul.f32 %v4198_v38, %v854_v20 }
 0x727   :  { %v901_v60 = vor.u32 1.1754944e-38, %v900_v56  ;;  %vm899_vm12 = vcmp.eq.f32.partialorder %v898_v57, 8.507059e+37 }
 0x728   :  { %v856_v21 = vadd.f32 %v4198_v38, %v855_v9 }
 0x72a   :  { %v860_v22 = vsel %vm859_vm7, %v4198_v38, %v856_v21 }
 0x72b   :  { %v865_v26 = vsel %vm862_vm8, %v864_v23, %v860_v22  ;;  %v4202_v43 = vpop.eup %4201 }
 0x72c   :  { %v890_v44 = vmul.f32 %v4202_v43, %v888_v42  ;;  %vm895_vm9 = vweird.f32 %v4202_v43  ;;  %v868_v2 = vmul.f32 0.0, %v865_v26 }
 0x72d   :  { %vm896_vm11 = vmor %vm894_vm10, %vm895_vm9 }
 0x72e   :  { %v891_v47 = vsub.f32 1.0, %v890_v44 }
 0x730   :  { %v892_v51 = vmul.f32 %v4202_v43, %v891_v47 }
 0x732   :  { %v893_v35 = vadd.f32 %v4202_v43, %v892_v51 }
 0x734   :  { %v897_v58 = vsel %vm896_vm11, %v4202_v43, %v893_v35 }
 0x735   :  { %v902_v63 = vsel %vm899_vm12, %v901_v60, %v897_v58 }
 0x736   :  { %v905_v8 = vmul.f32 0.0, %v902_v63 }
 0x742   :  { %v871_v25 = vpop.permute.xlu2 %870 }
 0x743   :  { %v873_v27 = vmul.f32 %v871_v25, %v865_v26 }
 0x745   :  { %875 = vrot.lane.b32.xlu1 %v873_v27, %s4684_s12 }
 0x74d   :  { %937 = vperm.xlu1 %4140, %v934_v28  }
 0x78a   :  { %v908_v61 = vpop.permute.xlu0 %907 }
 0x78b   :  { %v910_v1 = vmul.f32 %v908_v61, %v902_v63 }
 0x78d   :  { %912 = vrot.lane.b32.xlu0 %v910_v1, %s4684_s12 }
 0x7b7   :  { %v876_v3 = vpop.permute.xlu1 %875 }
 0x7b8   :  { %v5174_v4 = vadd.f32 %v876_v3, %v868_v2 }
 0x7ba   :  { %4203 = vtanh.f32 %v5174_v4 }
 0x7bf   :  { %v5185_v18 = vpop.permute.xlu1 %937 }
 0x7c0   :  { %v4204_v6 = vpop.eup %4203  ;;  %v5188_v20 = vmul.f32 0.0, %v5185_v18 }
 0x7c1   :  { %881 = vrot.lane.b32.xlu0 %v4204_v6, %s4682_s28 }
 0x7ff   :  { %v913_v10 = vpop.permute.xlu0 %912 }
 0x800   :  { %v5178_v11 = vadd.f32 %v913_v10, %v905_v8 }
 0x802   :  { %4205 = vtanh.f32 %v5178_v11 }
 0x808   :  { %v4206_v13 = vpop.eup %4205 }
 0x809   :  { %918 = vrot.lane.b32.xlu2 %v4206_v13, %s4682_s28 }
 0x811   :  { %926 = vperm.xlu2 %4141, %v923_v15  }
 0x833   :  { %v882_v40 = vpop.permute.xlu0 %881 }
 0x834   :  { %v884_v21 = vmul.f32 %v882_v40, %v865_v26 }
 0x836   :  { %v5198_v23 = vmul.f32 %v884_v21, %v4893_v30 }
 0x863   :  { %v919_v19 = vpop.permute.xlu2 %918 }
 0x864   :  { %v921_v38 = vmul.f32 %v919_v19, %v902_v63 }
 0x866   :  { %v5191_v9 = vmul.f32 %v921_v38, %v4897_v33 }
 0x868   :  { %v943_v39 = vadd.f32 %v5191_v9, %v5188_v20 }
 0x86a   :  { %v949_v41 = vrot.slane %v943_v39, 6  ;;  %v1117_v56 = vrot.slane %v943_v39, 2 }
 0x86b   :  { %v5195_v22 = vpop.permute.xlu2 %926 }
 0x86c   :  { %950 = vrot.lane.b32.xlu1 %v949_v41, %s4682_s28  ;;  %v5202_v25 = vmul.f32 0.0, %v5195_v22 }
 0x86e   :  { %v5206_v27 = vadd.f32 %v5198_v23, %v5202_v25 }
 0x870   :  { %945 = vrot.lane.b32.xlu0 %v5206_v27, %s4684_s12 }
 0x8de   :  { %v951_v26 = vpop.permute.xlu1 %950 }
 0x8e2   :  { %v946_v32 = vpop.permute.xlu0 %945 }
 0x8e3   :  { %v953_v28 = vsel %vm315_vm4, %v946_v32, %v951_v26 }
 0x8e4   :  { %4032 = vmatmul.msk.f32.vlgmr.msrb.gmra.mxu1 %vm731_vm3, %v953_v28  ;;  %4033 = vmatmul.msk.f32.vlgmr.msrb.gmra.mxu2 %vm731_vm3, %v953_v28  ;;  %v1096_v28 = vrot.slane %v5206_v27, 6  ;;  %v922_v27 = vmul.f32 %v5174_v4, %v4893_v30 }
 0x8e5   :  { %1692 = vmatpush.msrb.mxu1 %v5019_v45  ;;  %1712 = vmatpush.msrb.mxu2 %v5061_v17 }
 0x8e7   :  { %1693 = vmatpush.msrb.mxu1 %v5022_v46  ;;  %1713 = vmatpush.msrb.mxu2 %v5064_v34 }
 0x8e9   :  { %1694 = vmatpush.msrb.mxu1 %v5024_v48  ;;  %1714 = vmatpush.msrb.mxu2 %v5069_v36 }
 0x8eb   :  { %1695 = vmatpush.msrb.mxu1 %v5028_v54  ;;  %1715 = vmatpush.msrb.mxu2 %v5099_v49 }
 0x8ed   :  { %1696 = vmatpush.msrb.mxu1 %v5032_v59  ;;  %1716 = vmatpush.msrb.mxu2 %v5103_v50 }
 0x8ef   :  { %1697 = vmatpush.msrb.mxu1 %v5036_v62  ;;  %1717 = vmatpush.msrb.mxu2 %v5107_v52 }
 0x8f1   :  { %1698 = vmatpush.msrb.mxu1 %v5056_v29  ;;  %1718 = vmatpush.msrb.mxu2 %v5109_v53 }
 0x8f3   :  { %1699 = vmatpush.msrb.mxu1 %v5059_v16  ;;  %1719 = vmatpush.msrb.mxu2 %v5117_v55 }
 0x961   :  { %v974_v31 = vpop.f32.mrf.mxu1 }
 0x962   :  { %v998_v37 = vrot.slane %v974_v31, 6 }
 0x964   :  { %v1000_v42 = vadd.f32 %v998_v37, %v5157_v0 }
 0x966   :  { %4207 = vtanh.f32 %v1000_v42  ;;  %v4034_v61 = vmul.f32 -1.442695, %v1000_v42 }
 0x967   :  { %v994_v43 = vpop.f32.mrf.mxu2 }
 0x968   :  { %v1002_v44 = vrot.slane %v994_v43, 4 }
 0x96a   :  { %v1004_v47 = vadd.f32 %v1002_v44, %v5165_v12 }
 0x96c   :  { %v4208_v51 = vpop.eup %4207  ;;  %4209 = vtanh.f32 %v1004_v47  ;;  %v4035_v57 = vmul.f32 -1.442695, %v1004_v47 }
 0x96d   :  { %1030 = vrot.lane.b32.xlu0 %v4208_v51, %s4682_s28 }
 0x96e   :  { %4211 = vpow2.f32 %v4035_v57 }
 0x972   :  { %v4210_v35 = vpop.eup %4209 }
 0x973   :  { %1070 = vrot.lane.b32.xlu2 %v4210_v35, %s4682_s28 }
 0x974   :  { %v4212_v58 = vpop.eup %4211 }
 0x975   :  { %1118 = vrot.lane.b32.xlu0 %v1117_v56, %s4684_s12  ;;  %v1048_v60 = vadd.f32 1.0, %v4212_v58  ;;  %v930_v58 = vadd.f32 %v5202_v25, %v922_v27 }
 0x977   :  { %4213 = vrcp.f32 %v1048_v60  ;;  %v1060_v13 = vand.u32 2147483648, %v1048_v60  ;;  %vm1054_vm14 = vweird.f32 %v1048_v60  ;;  %v1058_v14 = vand.u32 2147483647, %v1048_v60 }
 0x978   :  { %4215 = vpow2.f32 %v4034_v61  ;;  %v1026_v61 = vrot.slane %v930_v58, 6 }
 0x979   :  { %v1061_v38 = vor.u32 1.1754944e-38, %v1060_v13  ;;  %vm1059_vm0 = vcmp.eq.f32.partialorder %v1058_v14, 8.507059e+37 }
 0x97d   :  { %v4214_v63 = vpop.eup %4213 }
 0x97e   :  { %v1050_v1 = vmul.f32 %v4214_v63, %v1048_v60  ;;  %v4216_v2 = vpop.eup %4215  ;;  %vm1055_vm13 = vweird.f32 %v4214_v63  ;;  %v933_v60 = vmul.f32 %v5178_v11, %v4897_v33 }
 0x97f   :  { %v1008_v6 = vadd.f32 1.0, %v4216_v2  ;;  %vm1056_vm15 = vmor %vm1054_vm14, %vm1055_vm13 }
 0x980   :  { %v1051_v3 = vsub.f32 1.0, %v1050_v1 }
 0x981   :  { %4217 = vrcp.f32 %v1008_v6  ;;  %v1020_v37 = vand.u32 2147483648, %v1008_v6  ;;  %vm1014_vm2 = vweird.f32 %v1008_v6  ;;  %v1018_v42 = vand.u32 2147483647, %v1008_v6 }
 0x982   :  { %v1052_v8 = vmul.f32 %v4214_v63, %v1051_v3 }
 0x983   :  { %v1021_v44 = vor.u32 1.1754944e-38, %v1020_v37  ;;  %vm1019_vm6 = vcmp.eq.f32.partialorder %v1018_v42, 8.507059e+37 }
 0x984   :  { %v1053_v10 = vadd.f32 %v4214_v63, %v1052_v8 }
 0x986   :  { %v1057_v19 = vsel %vm1056_vm15, %v4214_v63, %v1053_v10  ;;  %v941_v63 = vadd.f32 %v5188_v20, %v933_v60 }
 0x987   :  { %v4218_v15 = vpop.eup %4217  ;;  %v1062_v39 = vsel %vm1059_vm0, %v1061_v38, %v1057_v19 }
 0x988   :  { %v1010_v40 = vmul.f32 %v4218_v15, %v1008_v6  ;;  %vm1015_vm1 = vweird.f32 %v4218_v15  ;;  %v1066_v6 = vrot.slane %v941_v63, 2 }
 0x989   :  { %vm1016_vm5 = vmor %vm1014_vm2, %vm1015_vm1 }
 0x98a   :  { %v1011_v26 = vsub.f32 1.0, %v1010_v40  ;;  %v1068_v8 = vmul.f32 %v1066_v6, %v1062_v39 }
 0x98c   :  { %v1012_v32 = vmul.f32 %v4218_v15, %v1011_v26 }
 0x98e   :  { %v1013_v31 = vadd.f32 %v4218_v15, %v1012_v32 }
 0x990   :  { %v1017_v43 = vsel %vm1016_vm5, %v4218_v15, %v1013_v31 }
 0x991   :  { %v1022_v51 = vsel %vm1019_vm6, %v1021_v44, %v1017_v43 }
 0x992   :  { %v1028_v1 = vmul.f32 %v1026_v61, %v1022_v51 }
 0x9cd   :  { %v1071_v21 = vpop.permute.xlu2 %1070 }
 0x9ce   :  { %v1073_v41 = vmul.f32 %v1071_v21, %v1062_v39 }
 0x9d0   :  { %1075 = vrot.lane.b32.xlu1 %v1073_v41, %s4684_s12 }
 0x9d8   :  { %1097 = vrot.lane.b32.xlu1 %v1096_v28, %s4684_s12 }
 0x9df   :  { %v1031_v47 = vpop.permute.xlu0 %1030 }
 0x9e0   :  { %v1033_v35 = vmul.f32 %v1031_v47, %v1022_v51 }
 0x9e2   :  { %1035 = vrot.lane.b32.xlu2 %v1033_v35, %s4684_s12 }
 0x9e7   :  { %v1119_v56 = vpop.permute.xlu0 %1118 }
 0x9e8   :  { %v1121_v57 = vmul.f32 %v1119_v56, %v5185_v18 }
 0x9ea   :  { %1123 = vrot.lane.b32.xlu1 %v1121_v57, %s4680_s27 }
 0xa3c   :  { %v1036_v2 = vpop.permute.xlu2 %1035 }
 0xa3d   :  { %v5246_v3 = vadd.f32 %v1036_v2, %v1028_v1 }
 0xa3f   :  { %4219 = vtanh.f32 %v5246_v3 }
 0xa42   :  { %v1076_v10 = vpop.permute.xlu1 %1075 }
 0xa43   :  { %v5249_v13 = vadd.f32 %v1076_v10, %v1068_v8 }
 0xa45   :  { %v4220_v4 = vpop.eup %4219  ;;  %4221 = vtanh.f32 %v5249_v13 }
 0xa46   :  { %1041 = vrot.lane.b32.xlu0 %v4220_v4, %s4682_s28 }
 0xa4a   :  { %v1098_v14 = vpop.permute.xlu1 %1097 }
 0xa4b   :  { %v4222_v11 = vpop.eup %4221  ;;  %v1100_v15 = vmul.f32 %v1098_v14, %v5195_v22 }
 0xa4c   :  { %1081 = vrot.lane.b32.xlu2 %v4222_v11, %s4682_s28 }
 0xa54   :  { %1102 = vrot.lane.b32.xlu2 %v1100_v15, %s4680_s27 }
 0xa5c   :  { %1107 = vrot.lane.b32.xlu2 %v1066_v6, %s4680_s27  ;;  %v1124_v21 = vpop.permute.xlu1 %1123 }
 0xaa6   :  { %v1082_v19 = vpop.permute.xlu2 %1081 }
 0xaa7   :  { %v1084_v38 = vmul.f32 %v1082_v19, %v1062_v39 }
 0xaa9   :  { %v5258_v40 = vmul.f32 %v1084_v38, %v4897_v33 }
 0xaab   :  { %v1126_v41 = vadd.f32 %v1124_v21, %v5258_v40 }
 0xaad   :  { %v1132_v26 = vrot.slane %v1126_v41, 2 }
 0xaae   :  { %v1103_v37 = vpop.permute.xlu2 %1102 }
 0xaaf   :  { %1133 = vrot.lane.b32.xlu1 %v1132_v26, %s4682_s28 }
 0xab6   :  { %v1108_v39 = vpop.permute.xlu2 %1107 }
 0xab7   :  { %v1110_v43 = vmul.f32 %v1108_v39, %v5185_v18 }
 0xab8   :  { %v1042_v32 = vpop.permute.xlu0 %1041 }
 0xab9   :  { %v1044_v28 = vmul.f32 %v1042_v32, %v1022_v51 }
 0xabb   :  { %v5263_v31 = vmul.f32 %v1044_v28, %v4893_v30 }
 0xabd   :  { %v5266_v42 = vadd.f32 %v1103_v37, %v5263_v31 }
 0xabf   :  { %1128 = vrot.lane.b32.xlu0 %v5266_v42, %s4684_s12 }
 0xac7   :  { %1086 = vrot.lane.b32.xlu0 %v1026_v61, %s4680_s27 }
 0xacf   :  { %1112 = vrot.lane.b32.xlu0 %v1110_v43, %s4684_s12 }
 0xb21   :  { %v1134_v44 = vpop.permute.xlu1 %1133 }
 0xb31   :  { %v1129_v47 = vpop.permute.xlu0 %1128 }
 0xb32   :  { %v1136_v51 = vsel %vm315_vm4, %v1129_v47, %v1134_v44 }
 0xb33   :  { %v1138_v35 = vrot.slane %v1136_v51, 2 }
 0xb35   :  { %4036 = vmatmul.msk.f32.vlgmr.msrb.gmra.mxu3 %vm731_vm3, %v1138_v35  ;;  %4037 = vmatmul.msk.f32.vlgmr.msrb.gmra.mxu0 %vm731_vm3, %v1138_v35 }
 0xb36   :  { %1876 = vmatpush.msrb.mxu3 %v5019_v45  ;;  %1896 = vmatpush.msrb.mxu0 %v5061_v17 }
 0xb38   :  { %1877 = vmatpush.msrb.mxu3 %v5022_v46  ;;  %1897 = vmatpush.msrb.mxu0 %v5064_v34 }
 0xb39   :  { %v1087_v57 = vpop.permute.xlu0 %1086 }
 0xb3a   :  { %1878 = vmatpush.msrb.mxu3 %v5024_v48  ;;  %1898 = vmatpush.msrb.mxu0 %v5069_v36  ;;  %v1089_v58 = vmul.f32 %v1087_v57, %v5195_v22 }
 0xb3c   :  { %1879 = vmatpush.msrb.mxu3 %v5028_v54  ;;  %1899 = vmatpush.msrb.mxu0 %v5099_v49 }
 0xb3e   :  { %1880 = vmatpush.msrb.mxu3 %v5032_v59  ;;  %1900 = vmatpush.msrb.mxu0 %v5103_v50 }
 0xb40   :  { %1881 = vmatpush.msrb.mxu3 %v5036_v62  ;;  %1901 = vmatpush.msrb.mxu0 %v5107_v52 }
 0xb42   :  { %1882 = vmatpush.msrb.mxu3 %v5056_v29  ;;  %1902 = vmatpush.msrb.mxu0 %v5109_v53 }
 0xb44   :  { %1883 = vmatpush.msrb.mxu3 %v5059_v16  ;;  %1903 = vmatpush.msrb.mxu0 %v5117_v55 }
 0xbb2   :  { %v1178_v45 = vpop.f32.mrf.mxu0 }
 0xbb3   :  { %v1186_v46 = vrot.slane %v1178_v45, 6 }
 0xbb5   :  { %v1188_v48 = vadd.f32 %v1186_v46, %v5165_v12 }
 0xbb7   :  { %4223 = vtanh.f32 %v1188_v48  ;;  %v4039_v1 = vmul.f32 -1.442695, %v1188_v48 }
 0xbb8   :  { %v1158_v54 = vpop.f32.mrf.mxu3 }
 0xbb9   :  { %v1182_v59 = vrot.slane %v1158_v54, 4 }
 0xbbb   :  { %v1184_v56 = vadd.f32 %v1182_v59, %v5157_v0 }
 0xbbd   :  { %v4224_v62 = vpop.eup %4223  ;;  %4225 = vtanh.f32 %v1184_v56  ;;  %v4038_v60 = vmul.f32 -1.442695, %v1184_v56  ;;  %v1280_v56 = vrot.slane %v5266_v42, 6 }
 0xbbe   :  { %1254 = vrot.lane.b32.xlu1 %v4224_v62, %s4682_s28 }
 0xbbf   :  { %4227 = vpow2.f32 %v4038_v60 }
 0xbc3   :  { %v4226_v27 = vpop.eup %4225 }
 0xbc4   :  { %1214 = vrot.lane.b32.xlu2 %v4226_v27, %s4682_s28  ;;  %v1113_v27 = vpop.permute.xlu0 %1112 }
 0xbc5   :  { %v4228_v61 = vpop.eup %4227 }
 0xbc6   :  { %1091 = vrot.lane.b32.xlu1 %v1089_v58, %s4684_s12  ;;  %v1192_v63 = vadd.f32 1.0, %v4228_v61  ;;  %v1106_v58 = vmul.f32 %v5249_v13, %v4897_v33  ;;  %v1085_v61 = vmul.f32 %v5246_v3, %v4893_v30 }
 0xbc8   :  { %4229 = vrcp.f32 %v1192_v63  ;;  %v1204_v15 = vand.u32 2147483648, %v1192_v63  ;;  %vm1198_vm8 = vweird.f32 %v1192_v63  ;;  %v1202_v19 = vand.u32 2147483647, %v1192_v63 }
 0xbc9   :  { %4231 = vpow2.f32 %v4039_v1  ;;  %v1115_v60 = vadd.f32 %v1113_v27, %v1106_v58  ;;  %v4462_v27 = vld [vmem:[#allocation7 + $0x20] sm:$0xff] }
 0xbca   :  { %v1205_v41 = vor.u32 1.1754944e-38, %v1204_v15  ;;  %vm1203_vm10 = vcmp.eq.f32.partialorder %v1202_v19, 8.507059e+37 }
 0xbce   :  { %1301 = vrot.lane.b32.xlu1 %v1132_v26, %s4684_s12  ;;  %v4230_v2 = vpop.eup %4229 }
 0xbcf   :  { %v1194_v6 = vmul.f32 %v4230_v2, %v1192_v63  ;;  %v4232_v8 = vpop.eup %4231  ;;  %vm1199_vm7 = vweird.f32 %v4230_v2  ;;  %v1250_v63 = vrot.slane %v1115_v60, 2 }
 0xbd0   :  { %v1232_v4 = vadd.f32 1.0, %v4232_v8  ;;  %vm1200_vm9 = vmor %vm1198_vm8, %vm1199_vm7 }
 0xbd1   :  { %v1195_v10 = vsub.f32 1.0, %v1194_v6 }
 0xbd2   :  { %4233 = vrcp.f32 %v1232_v4  ;;  %v1244_v47 = vand.u32 2147483648, %v1232_v4  ;;  %vm1238_vm12 = vweird.f32 %v1232_v4  ;;  %v1242_v51 = vand.u32 2147483647, %v1232_v4 }
 0xbd3   :  { %v1196_v11 = vmul.f32 %v4230_v2, %v1195_v10 }
 0xbd4   :  { %v1245_v45 = vor.u32 1.1754944e-38, %v1244_v47  ;;  %vm1243_vm14 = vcmp.eq.f32.partialorder %v1242_v51, 8.507059e+37 }
 0xbd5   :  { %v1197_v14 = vadd.f32 %v4230_v2, %v1196_v11 }
 0xbd7   :  { %v1201_v21 = vsel %vm1200_vm9, %v4230_v2, %v1197_v14 }
 0xbd8   :  { %v4234_v38 = vpop.eup %4233  ;;  %v1206_v32 = vsel %vm1203_vm10, %v1205_v41, %v1201_v21 }
 0xbd9   :  { %v1234_v26 = vmul.f32 %v4234_v38, %v1232_v4  ;;  %vm1239_vm11 = vweird.f32 %v4234_v38 }
 0xbda   :  { %vm1240_vm13 = vmor %vm1238_vm12, %vm1239_vm11 }
 0xbdb   :  { %v1235_v39 = vsub.f32 1.0, %v1234_v26 }
 0xbdd   :  { %v1236_v43 = vmul.f32 %v4234_v38, %v1235_v39 }
 0xbdf   :  { %v1237_v44 = vadd.f32 %v4234_v38, %v1236_v43 }
 0xbe1   :  { %v1241_v35 = vsel %vm1240_vm13, %v4234_v38, %v1237_v44 }
 0xbe2   :  { %v1246_v48 = vsel %vm1243_vm14, %v1245_v45, %v1241_v35 }
 0xbe3   :  { %v1252_v2 = vmul.f32 %v1250_v63, %v1246_v48 }
 0xc1e   :  { %v1215_v28 = vpop.permute.xlu2 %1214 }
 0xc1f   :  { %v1217_v37 = vmul.f32 %v1215_v28, %v1206_v32 }
 0xc21   :  { %1219 = vrot.lane.b32.xlu0 %v1217_v37, %s4684_s12 }
 0xc30   :  { %v1255_v46 = vpop.permute.xlu1 %1254 }
 0xc31   :  { %v1257_v54 = vmul.f32 %v1255_v46, %v1246_v48 }
 0xc33   :  { %1259 = vrot.lane.b32.xlu2 %v1257_v54, %s4684_s12  ;;  %v4457_v54 = vld [vmem:[#allocation7 + $0x70] sm:$0xff] }
 0xc38   :  { %v1092_v59 = vpop.permute.xlu1 %1091 }
 0xc39   :  { %v1094_v1 = vadd.f32 %v1092_v59, %v1085_v61  ;;  %v4458_v59 = vld [vmem:[#allocation7 + $0x60] sm:$0xff] }
 0xc3b   :  { %1281 = vrot.lane.b32.xlu2 %v1280_v56, %s4684_s12  ;;  %v1210_v42 = vrot.slane %v1094_v1, 6  ;;  %v4459_v56 = vld [vmem:[#allocation7 + $0x50] sm:$0xff] }
 0xc3d   :  { %v1212_v10 = vmul.f32 %v1210_v42, %v1206_v32 }
 0xc40   :  { %v1302_v62 = vpop.permute.xlu1 %1301 }
 0xc41   :  { %v1304_v57 = vmul.f32 %v1302_v62, %v5185_v18  ;;  %v4460_v62 = vld [vmem:[#allocation7 + $0x40] sm:$0xff] }
 0xc43   :  { %1306 = vrot.lane.b32.xlu2 %v1304_v57, %s4680_s27  ;;  %v4461_v57 = vld [vmem:[#allocation7 + $0x30] sm:$0xff] }
 0xc8d   :  { %v1260_v6 = vpop.permute.xlu2 %1259 }
 0xc8e   :  { %v5309_v8 = vadd.f32 %v1260_v6, %v1252_v2 }
 0xc90   :  { %4235 = vtanh.f32 %v5309_v8 }
 0xc93   :  { %v1220_v4 = vpop.permute.xlu0 %1219 }
 0xc94   :  { %v5312_v11 = vadd.f32 %v1220_v4, %v1212_v10 }
 0xc95   :  { %v1282_v13 = vpop.permute.xlu2 %1281 }
 0xc96   :  { %v4236_v14 = vpop.eup %4235  ;;  %4237 = vtanh.f32 %v5312_v11  ;;  %v1284_v15 = vmul.f32 %v1282_v13, %v5195_v22 }
 0xc97   :  { %1265 = vrot.lane.b32.xlu0 %v4236_v14, %s4682_s28 }
 0xc9c   :  { %v4238_v3 = vpop.eup %4237 }
 0xc9d   :  { %1225 = vrot.lane.b32.xlu1 %v4238_v3, %s4682_s28  ;;  %v1307_v41 = vpop.permute.xlu2 %1306 }
 0xc9f   :  { %1286 = vrot.lane.b32.xlu0 %v1284_v15, %s4680_s27 }
 0xca7   :  { %1291 = vrot.lane.b32.xlu0 %v1250_v63, %s4680_s27 }
 0xd09   :  { %v1266_v19 = vpop.permute.xlu0 %1265 }
 0xd0a   :  { %v1268_v38 = vmul.f32 %v1266_v19, %v1246_v48 }
 0xd0c   :  { %v5321_v21 = vmul.f32 %v1268_v38, %v4897_v33 }
 0xd0e   :  { %v1309_v26 = vadd.f32 %v1307_v41, %v5321_v21 }
 0xd0f   :  { %v1226_v28 = vpop.permute.xlu1 %1225 }
 0xd10   :  { %v1228_v37 = vmul.f32 %v1226_v28, %v1206_v32  ;;  %v1315_v39 = vrot.slane %v1309_v26, 6 }
 0xd11   :  { %v1287_v44 = vpop.permute.xlu0 %1286 }
 0xd12   :  { %v5325_v43 = vmul.f32 %v1228_v37, %v4893_v30  ;;  %1316 = vrot.lane.b32.xlu2 %v1315_v39, %s4682_s28 }
 0xd14   :  { %v5329_v47 = vadd.f32 %v1287_v44, %v5325_v43 }
 0xd16   :  { %1311 = vrot.lane.b32.xlu1 %v5329_v47, %s4684_s12  ;;  %v1460_v39 = vrot.slane %v5329_v47, 6 }
 0xd19   :  { %v1292_v51 = vpop.permute.xlu0 %1291 }
 0xd1a   :  { %v1294_v35 = vmul.f32 %v1292_v51, %v5185_v18 }
 0xd1e   :  { %1270 = vrot.lane.b32.xlu1 %v1210_v42, %s4680_s27 }
 0xd26   :  { %1296 = vrot.lane.b32.xlu1 %v1294_v35, %s4684_s12 }
 0xd6c   :  { %v1317_v32 = vpop.permute.xlu2 %1316 }
 0xd88   :  { %v1312_v45 = vpop.permute.xlu1 %1311 }
 0xd89   :  { %v1319_v46 = vsel %vm315_vm4, %v1312_v45, %v1317_v32 }
 0xd8a   :  { %v1321_v48 = vrot.slane %v1319_v46, 4 }
 0xd8c   :  { %4040 = vmatmul.msk.f32.vlgmr.msra.gmra.mxu1 %vm731_vm3, %v1321_v48  ;;  %4041 = vmatmul.msk.f32.vlgmr.msra.gmra.mxu2 %vm731_vm3, %v1321_v48 }
 0xd8d   :  { %2059 = vmatpush.msra.mxu1 %v4457_v54  ;;  %2079 = vmatpush.msra.mxu2 %v5061_v17 }
 0xd8f   :  { %2060 = vmatpush.msra.mxu1 %v4458_v59  ;;  %2080 = vmatpush.msra.mxu2 %v5064_v34 }
 0xd91   :  { %2061 = vmatpush.msra.mxu1 %v4459_v56  ;;  %2081 = vmatpush.msra.mxu2 %v5069_v36 }
 0xd93   :  { %2062 = vmatpush.msra.mxu1 %v4460_v62  ;;  %2082 = vmatpush.msra.mxu2 %v5099_v49 }
 0xd95   :  { %2063 = vmatpush.msra.mxu1 %v4461_v57  ;;  %2083 = vmatpush.msra.mxu2 %v5103_v50  ;;  %v1290_v57 = vmul.f32 %v5309_v8, %v4897_v33 }
 0xd97   :  { %2064 = vmatpush.msra.mxu1 %v4462_v27  ;;  %2084 = vmatpush.msra.mxu2 %v5107_v52 }
 0xd99   :  { %2065 = vmatpush.msra.mxu1 %v5056_v29  ;;  %2085 = vmatpush.msra.mxu2 %v5109_v53  ;;  %v1271_v29 = vpop.permute.xlu1 %1270  ;;  %v1481_v53 = vrot.slane %v1309_v26, 2 }
 0xd9b   :  { %2066 = vmatpush.msra.mxu1 %v5059_v16  ;;  %2086 = vmatpush.msra.mxu2 %v5117_v55  ;;  %v1273_v16 = vmul.f32 %v1271_v29, %v5195_v22 }
 0xda1   :  { %v1297_v62 = vpop.permute.xlu1 %1296 }
 0xda2   :  { %v1299_v27 = vadd.f32 %v1297_v62, %v1290_v57 }
 0xe09   :  { %v1341_v17 = vpop.f32.mrf.mxu1 }
 0xe0a   :  { %v1365_v34 = vrot.slane %v1341_v17, 2  ;;  %v1430_v17 = vrot.slane %v1299_v27, 2 }
 0xe0c   :  { %v1367_v36 = vadd.f32 %v1365_v34, %v5157_v0 }
 0xe0e   :  { %4239 = vtanh.f32 %v1367_v36 }
 0xe0f   :  { %v1361_v49 = vpop.f32.mrf.mxu2 }
 0xe10   :  { %v1368_v50 = vadd.f32 %v1361_v49, %v5165_v12  ;;  %v4042_v12 = vmul.f32 -1.442695, %v1367_v36 }
 0xe12   :  { %4241 = vtanh.f32 %v1368_v50  ;;  %v4043_v55 = vmul.f32 -1.442695, %v1368_v50 }
 0xe14   :  { %v4240_v58 = vpop.eup %4239  ;;  %4243 = vpow2.f32 %v4043_v55 }
 0xe15   :  { %1394 = vrot.lane.b32.xlu0 %v4240_v58, %s4682_s28  ;;  %v1269_v58 = vmul.f32 %v5312_v11, %v4893_v30 }
 0xe18   :  { %v4242_v52 = vpop.eup %4241 }
 0xe19   :  { %1434 = vrot.lane.b32.xlu2 %v4242_v52, %s4682_s28 }
 0xe1a   :  { %v4244_v0 = vpop.eup %4243 }
 0xe1b   :  { %v1412_v60 = vadd.f32 1.0, %v4244_v0 }
 0xe1d   :  { %4245 = vrcp.f32 %v1412_v60  ;;  %v1424_v4 = vand.u32 2147483648, %v1412_v60  ;;  %vm1418_vm0 = vweird.f32 %v1412_v60  ;;  %v1422_v14 = vand.u32 2147483647, %v1412_v60 }
 0xe1e   :  { %4247 = vpow2.f32 %v4042_v12 }
 0xe1f   :  { %v1425_v15 = vor.u32 1.1754944e-38, %v1424_v4  ;;  %vm1423_vm2 = vcmp.eq.f32.partialorder %v1422_v14, 8.507059e+37 }
 0xe21   :  { %1275 = vrot.lane.b32.xlu2 %v1273_v16, %s4684_s12 }
 0xe23   :  { %v4246_v61 = vpop.eup %4245 }
 0xe24   :  { %v1414_v63 = vmul.f32 %v4246_v61, %v1412_v60  ;;  %v4248_v1 = vpop.eup %4247  ;;  %vm1419_vm15 = vweird.f32 %v4246_v61 }
 0xe25   :  { %v1372_v6 = vadd.f32 1.0, %v4248_v1  ;;  %vm1420_vm1 = vmor %vm1418_vm0, %vm1419_vm15 }
 0xe26   :  { %v1415_v2 = vsub.f32 1.0, %v1414_v63 }
 0xe27   :  { %4249 = vrcp.f32 %v1372_v6  ;;  %v1384_v35 = vand.u32 2147483648, %v1372_v6  ;;  %vm1378_vm6 = vweird.f32 %v1372_v6  ;;  %v1382_v32 = vand.u32 2147483647, %v1372_v6 }
 0xe28   :  { %v1416_v42 = vmul.f32 %v4246_v61, %v1415_v2 }
 0xe29   :  { %1482 = vrot.lane.b32.xlu2 %v1481_v53, %s4684_s12  ;;  %v1385_v54 = vor.u32 1.1754944e-38, %v1384_v35  ;;  %vm1383_vm8 = vcmp.eq.f32.partialorder %v1382_v32, 8.507059e+37 }
 0xe2a   :  { %v1417_v10 = vadd.f32 %v4246_v61, %v1416_v42 }
 0xe2c   :  { %v1421_v13 = vsel %vm1420_vm1, %v4246_v61, %v1417_v10 }
 0xe2d   :  { %v4250_v3 = vpop.eup %4249  ;;  %v1426_v38 = vsel %vm1423_vm2, %v1425_v15, %v1421_v13 }
 0xe2e   :  { %v1374_v26 = vmul.f32 %v4250_v3, %v1372_v6  ;;  %vm1379_vm5 = vweird.f32 %v4250_v3  ;;  %v1432_v34 = vmul.f32 %v1430_v17, %v1426_v38 }
 0xe2f   :  { %vm1380_vm7 = vmor %vm1378_vm6, %vm1379_vm5 }
 0xe30   :  { %v1375_v28 = vsub.f32 1.0, %v1374_v26 }
 0xe32   :  { %v1376_v44 = vmul.f32 %v4250_v3, %v1375_v28 }
 0xe34   :  { %v1377_v51 = vadd.f32 %v4250_v3, %v1376_v44 }
 0xe36   :  { %v1381_v48 = vsel %vm1380_vm7, %v4250_v3, %v1377_v51 }
 0xe37   :  { %v1386_v56 = vsel %vm1383_vm8, %v1385_v54, %v1381_v48 }
 0xe73   :  { %v1435_v19 = vpop.permute.xlu2 %1434 }
 0xe74   :  { %v1437_v41 = vmul.f32 %v1435_v19, %v1426_v38 }
 0xe76   :  { %1439 = vrot.lane.b32.xlu0 %v1437_v41, %s4684_s12 }
 0xe7b   :  { %v1276_v37 = vpop.permute.xlu2 %1275 }
 0xe7c   :  { %v1278_v52 = vadd.f32 %v1276_v37, %v1269_v58 }
 0xe7e   :  { %1461 = vrot.lane.b32.xlu0 %v1460_v39, %s4684_s12  ;;  %v1390_v16 = vrot.slane %v1278_v52, 6 }
 0xe80   :  { %v1392_v8 = vmul.f32 %v1390_v16, %v1386_v56 }
 0xe83   :  { %v1483_v45 = vpop.permute.xlu2 %1482 }
 0xe84   :  { %v1485_v46 = vmul.f32 %v1483_v45, %v5185_v18 }
 0xe86   :  { %1487 = vrot.lane.b32.xlu0 %v1485_v46, %s4680_s27 }
 0xe87   :  { %v1395_v59 = vpop.permute.xlu0 %1394 }
 0xe88   :  { %v1397_v47 = vmul.f32 %v1395_v59, %v1386_v56 }
 0xe8a   :  { %1399 = vrot.lane.b32.xlu1 %v1397_v47, %s4684_s12 }
 0xee8   :  { %v1440_v36 = vpop.permute.xlu0 %1439 }
 0xee9   :  { %v5364_v49 = vadd.f32 %v1440_v36, %v1432_v34 }
 0xeeb   :  { %4251 = vtanh.f32 %v5364_v49 }
 0xef0   :  { %v1462_v29 = vpop.permute.xlu0 %1461 }
 0xef1   :  { %v4252_v50 = vpop.eup %4251  ;;  %v1464_v53 = vmul.f32 %v1462_v29, %v5195_v22 }
 0xef2   :  { %1445 = vrot.lane.b32.xlu1 %v4252_v50, %s4682_s28 }
 0xef8   :  { %v1488_v2 = vpop.permute.xlu0 %1487 }
 0xefa   :  { %1466 = vrot.lane.b32.xlu1 %v1464_v53, %s4680_s27 }
 0xefc   :  { %v1400_v55 = vpop.permute.xlu1 %1399 }
 0xefd   :  { %v5372_v0 = vadd.f32 %v1400_v55, %v1392_v8 }
 0xeff   :  { %4253 = vtanh.f32 %v5372_v0 }
 0xf02   :  { %1471 = vrot.lane.b32.xlu1 %v1430_v17, %s4680_s27 }
 0xf05   :  { %v4254_v60 = vpop.eup %4253 }
 0xf06   :  { %1405 = vrot.lane.b32.xlu2 %v4254_v60, %s4682_s28 }
 0xf60   :  { %v1406_v11 = vpop.permute.xlu2 %1405 }
 0xf61   :  { %v1408_v63 = vmul.f32 %v1406_v11, %v1386_v56 }
 0xf63   :  { %v5382_v42 = vmul.f32 %v1408_v63, %v4893_v30 }
 0xf64   :  { %v1446_v12 = vpop.permute.xlu1 %1445 }
 0xf65   :  { %v1448_v61 = vmul.f32 %v1446_v12, %v1426_v38 }
 0xf67   :  { %v5378_v1 = vmul.f32 %v1448_v61, %v4897_v33 }
 0xf69   :  { %v1490_v6 = vadd.f32 %v1488_v2, %v5378_v1 }
 0xf6b   :  { %v1496_v10 = vrot.slane %v1490_v6, 2 }
 0xf6c   :  { %v1467_v4 = vpop.permute.xlu1 %1466 }
 0xf6d   :  { %v5385_v14 = vadd.f32 %v1467_v4, %v5382_v42  ;;  %1497 = vrot.lane.b32.xlu0 %v1496_v10, %s4682_s28 }
 0xf6f   :  { %1492 = vrot.lane.b32.xlu2 %v5385_v14, %s4684_s12 }
 0xf74   :  { %v1472_v13 = vpop.permute.xlu1 %1471 }
 0xf75   :  { %v1474_v3 = vmul.f32 %v1472_v13, %v5185_v18 }
 0xf77   :  { %1450 = vrot.lane.b32.xlu2 %v1390_v16, %s4680_s27 }
 0xf7f   :  { %1476 = vrot.lane.b32.xlu2 %v1474_v3, %s4684_s12 }
 0xfc9   :  { %v1493_v15 = vpop.permute.xlu2 %1492 }
 0xfd1   :  { %v1451_v32 = vpop.permute.xlu2 %1450 }
 0xfd2   :  { %v1453_v45 = vmul.f32 %v1451_v32, %v5195_v22 }
 0xfdf   :  { %v1498_v19 = vpop.permute.xlu0 %1497 }
 0xfe0   :  { %v1500_v38 = vsel %vm315_vm4, %v1493_v15, %v1498_v19  ;;  %v1641_v15 = vrot.slane %v5385_v14, 6 }
 0xfe1   :  { %v1502_v41 = vrot.slane %v1500_v38, 6 }
 0xfe3   :  { %4044 = vmatmul.msk.f32.vlgmr.msra.gmra.mxu3 %vm731_vm3, %v1502_v41  ;;  %4045 = vmatmul.msk.f32.vlgmr.msra.gmra.mxu0 %vm731_vm3, %v1502_v41  ;;  %v1449_v41 = vmul.f32 %v5372_v0, %v4893_v30 }
0x1060   :  { %v1542_v26 = vpop.f32.mrf.mxu0 }
0x1061   :  { %v1547_v28 = vrot.slane %v1542_v26, 2 }
0x1063   :  { %v1549_v37 = vadd.f32 %v1547_v28, %v5163_v7  ;;  %v1477_v28 = vpop.permute.xlu2 %1476 }
0x1065   :  { %4255 = vtanh.f32 %v1549_v37  ;;  %v4047_v46 = vmul.f32 -1.442695, %v1549_v37 }
0x1066   :  { %v1522_v39 = vpop.f32.mrf.mxu3 }
0x1067   :  { %v1545_v44 = vadd.f32 %v1522_v39, %v5161_v5 }
0x1069   :  { %4257 = vtanh.f32 %v1545_v44  ;;  %v4046_v48 = vmul.f32 -1.442695, %v1545_v44 }
0x106a   :  { %4259 = vpow2.f32 %v4047_v46 }
0x106b   :  { %v4256_v51 = vpop.eup %4255  ;;  %4261 = vpow2.f32 %v4046_v48 }
0x106c   :  { %1615 = vrot.lane.b32.xlu0 %v4256_v51, %s4682_s28 }
0x106f   :  { %v4258_v35 = vpop.eup %4257 }
0x1070   :  { %1575 = vrot.lane.b32.xlu1 %v4258_v35, %s4682_s28  ;;  %v4260_v54 = vpop.eup %4259  ;;  %v1470_v35 = vmul.f32 %v5364_v49, %v4897_v33 }
0x1071   :  { %v1593_v59 = vadd.f32 1.0, %v4260_v54  ;;  %v4262_v56 = vpop.eup %4261 }
0x1072   :  { %v1553_v47 = vadd.f32 1.0, %v4262_v56  ;;  %v1479_v32 = vadd.f32 %v1477_v28, %v1470_v35 }
0x1073   :  { %4263 = vrcp.f32 %v1593_v59  ;;  %v1605_v29 = vand.u32 2147483648, %v1593_v59  ;;  %vm1599_vm10 = vweird.f32 %v1593_v59  ;;  %v1603_v16 = vand.u32 2147483647, %v1593_v59 }
0x1074   :  { %1455 = vrot.lane.b32.xlu0 %v1453_v45, %s4684_s12  ;;  %4265 = vrcp.f32 %v1553_v47  ;;  %v1565_v60 = vand.u32 2147483648, %v1553_v47  ;;  %vm1559_vm14 = vweird.f32 %v1553_v47  ;;  %v1563_v11 = vand.u32 2147483647, %v1553_v47 }
0x1075   :  { %v1606_v55 = vor.u32 1.1754944e-38, %v1605_v29  ;;  %vm1604_vm13 = vcmp.eq.f32.partialorder %v1603_v16, 8.507059e+37  ;;  %v1611_v45 = vrot.slane %v1479_v32, 2 }
0x1076   :  { %v1566_v6 = vor.u32 1.1754944e-38, %v1565_v60  ;;  %vm1564_vm0 = vcmp.eq.f32.partialorder %v1563_v11, 8.507059e+37 }
0x1079   :  { %v4264_v62 = vpop.eup %4263 }
0x107a   :  { %v1595_v57 = vmul.f32 %v4264_v62, %v1593_v59  ;;  %v4266_v27 = vpop.eup %4265  ;;  %vm1600_vm9 = vweird.f32 %v4264_v62 }
0x107b   :  { %v1555_v34 = vmul.f32 %v4266_v27, %v1553_v47  ;;  %vm1601_vm11 = vmor %vm1599_vm10, %vm1600_vm9  ;;  %vm1560_vm12 = vweird.f32 %v4266_v27 }
0x107c   :  { %1662 = vrot.lane.b32.xlu0 %v1496_v10, %s4684_s12  ;;  %v1596_v17 = vsub.f32 1.0, %v1595_v57  ;;  %vm1561_vm15 = vmor %vm1559_vm14, %vm1560_vm12 }
0x107d   :  { %v1556_v50 = vsub.f32 1.0, %v1555_v34 }
0x107e   :  { %v1597_v36 = vmul.f32 %v4264_v62, %v1596_v17 }
0x107f   :  { %v1557_v52 = vmul.f32 %v4266_v27, %v1556_v50 }
0x1080   :  { %v1598_v58 = vadd.f32 %v4264_v62, %v1597_v36 }
0x1081   :  { %v1558_v8 = vadd.f32 %v4266_v27, %v1557_v52 }
0x1082   :  { %v1602_v53 = vsel %vm1601_vm11, %v4264_v62, %v1598_v58 }
0x1083   :  { %v1607_v61 = vsel %vm1604_vm13, %v1606_v55, %v1602_v53  ;;  %v1562_v2 = vsel %vm1561_vm15, %v4266_v27, %v1558_v8 }
0x1084   :  { %v1567_v4 = vsel %vm1564_vm0, %v1566_v6, %v1562_v2  ;;  %v1613_v46 = vmul.f32 %v1611_v45, %v1607_v61 }
0x10de   :  { %v1616_v12 = vpop.permute.xlu0 %1615 }
0x10df   :  { %v1618_v63 = vmul.f32 %v1616_v12, %v1607_v61 }
0x10e1   :  { %1620 = vrot.lane.b32.xlu1 %v1618_v63, %s4684_s12 }
0x10e2   :  { %v1576_v10 = vpop.permute.xlu1 %1575 }
0x10e3   :  { %v1578_v13 = vmul.f32 %v1576_v10, %v1567_v4 }
0x10e5   :  { %1580 = vrot.lane.b32.xlu2 %v1578_v13, %s4684_s12 }
0x10e6   :  { %v1456_v3 = vpop.permute.xlu0 %1455 }
0x10e7   :  { %v1458_v26 = vadd.f32 %v1456_v3, %v1449_v41 }
0x10e9   :  { %1642 = vrot.lane.b32.xlu1 %v1641_v15, %s4684_s12  ;;  %v1571_v37 = vrot.slane %v1458_v26, 6 }
0x10eb   :  { %v1573_v39 = vmul.f32 %v1571_v37, %v1567_v4 }
0x10ee   :  { %v1663_v19 = vpop.permute.xlu0 %1662 }
0x10ef   :  { %v1665_v38 = vmul.f32 %v1663_v19, %v5195_v22 }
0x10f1   :  { %1667 = vrot.lane.b32.xlu1 %v1665_v38, %s4680_s27 }
0x113f   :  { %v1581_v44 = vpop.permute.xlu2 %1580 }
0x1140   :  { %v5411_v51 = vadd.f32 %v1581_v44, %v1573_v39 }
0x1142   :  { %4267 = vtanh.f32 %v5411_v51 }
0x1148   :  { %v4268_v14 = vpop.eup %4267 }
0x1149   :  { %1586 = vrot.lane.b32.xlu0 %v4268_v14, %s4682_s28 }
0x1153   :  { %v1621_v48 = vpop.permute.xlu1 %1620 }
0x1154   :  { %v5417_v0 = vadd.f32 %v1621_v48, %v1613_v46 }
0x1156   :  { %4269 = vtanh.f32 %v5417_v0 }
0x115b   :  { %v1643_v59 = vpop.permute.xlu1 %1642 }
0x115c   :  { %v4270_v54 = vpop.eup %4269  ;;  %v1645_v56 = vmul.f32 %v1643_v59, %v5185_v18 }
0x115d   :  { %1626 = vrot.lane.b32.xlu2 %v4270_v54, %s4682_s28 }
0x1163   :  { %v1668_v57 = vpop.permute.xlu1 %1667 }
0x1165   :  { %1647 = vrot.lane.b32.xlu2 %v1645_v56, %s4680_s27 }
0x116d   :  { %1652 = vrot.lane.b32.xlu2 %v1611_v45, %s4680_s27 }
0x11b7   :  { %v1627_v47 = vpop.permute.xlu2 %1626 }
0x11b8   :  { %v1629_v49 = vmul.f32 %v1627_v47, %v1607_v61 }
0x11ba   :  { %v5425_v62 = vmul.f32 %v1629_v49, %v4893_v30 }
0x11bb   :  { %v1587_v27 = vpop.permute.xlu0 %1586 }
0x11bc   :  { %v1670_v17 = vadd.f32 %v1668_v57, %v5425_v62  ;;  %v1589_v34 = vmul.f32 %v1587_v27, %v1567_v4 }
0x11be   :  { %v5429_v36 = vmul.f32 %v1589_v34, %v4897_v33  ;;  %v1676_v50 = vrot.slane %v1670_v17, 6  ;;  %v1844_v3 = vrot.slane %v1670_v17, 2 }
0x11bf   :  { %v1648_v58 = vpop.permute.xlu2 %1647 }
0x11c0   :  { %v5432_v52 = vadd.f32 %v1648_v58, %v5429_v36  ;;  %1677 = vrot.lane.b32.xlu1 %v1676_v50, %s4682_s28 }
0x11c2   :  { %1672 = vrot.lane.b32.xlu0 %v5432_v52, %s4684_s12 }
0x11c7   :  { %v1653_v29 = vpop.permute.xlu2 %1652 }
0x11c8   :  { %v1655_v16 = vmul.f32 %v1653_v29, %v5195_v22 }
0x11ca   :  { %1631 = vrot.lane.b32.xlu0 %v1571_v37, %s4680_s27 }
0x11d2   :  { %1657 = vrot.lane.b32.xlu0 %v1655_v16, %s4684_s12 }
0x1232   :  { %v1678_v53 = vpop.permute.xlu1 %1677 }
0x1234   :  { %v1673_v8 = vpop.permute.xlu0 %1672 }
0x1235   :  { %v1680_v55 = vsel %vm315_vm4, %v1673_v8, %v1678_v53 }
0x1236   :  { %4048 = vmatmul.msk.f32.vlgmr.msrb.gmra.mxu1 %vm731_vm3, %v1680_v55  ;;  %4049 = vmatmul.msk.f32.vlgmr.msrb.gmra.mxu2 %vm731_vm3, %v1680_v55 }
0x123c   :  { %v1632_v4 = vpop.permute.xlu0 %1631 }
0x123d   :  { %v1634_v13 = vmul.f32 %v1632_v4, %v5185_v18 }
0x12b3   :  { %v1701_v60 = vpop.f32.mrf.mxu1 }
0x12b4   :  { %v1725_v11 = vrot.slane %v1701_v60, 6  ;;  %v1823_v60 = vrot.slane %v5432_v52, 6 }
0x12b6   :  { %v1727_v12 = vadd.f32 %v1725_v11, %v5161_v5 }
0x12b8   :  { %4271 = vtanh.f32 %v1727_v12  ;;  %v4050_v15 = vmul.f32 -1.442695, %v1727_v12 }
0x12b9   :  { %v1721_v61 = vpop.f32.mrf.mxu2 }
0x12ba   :  { %v1729_v63 = vrot.slane %v1721_v61, 4  ;;  %v1630_v61 = vmul.f32 %v5411_v51, %v4897_v33 }
0x12bc   :  { %v1731_v2 = vadd.f32 %v1729_v63, %v5163_v7 }
0x12be   :  { %v4272_v6 = vpop.eup %4271  ;;  %4273 = vtanh.f32 %v1731_v2  ;;  %v4051_v28 = vmul.f32 -1.442695, %v1731_v2  ;;  %v1658_v2 = vpop.permute.xlu0 %1657 }
0x12bf   :  { %1757 = vrot.lane.b32.xlu2 %v4272_v6, %s4682_s28  ;;  %4275 = vpow2.f32 %v4050_v15 }
0x12c4   :  { %v4274_v10 = vpop.eup %4273 }
0x12c5   :  { %1797 = vrot.lane.b32.xlu1 %v4274_v10, %s4682_s28  ;;  %v4276_v19 = vpop.eup %4275  ;;  %v1651_v10 = vmul.f32 %v5417_v0, %v4893_v30 }
0x12c6   :  { %v1735_v38 = vadd.f32 1.0, %v4276_v19 }
0x12c7   :  { %v1660_v4 = vadd.f32 %v1658_v2, %v1651_v10 }
0x12c8   :  { %4277 = vrcp.f32 %v1735_v38  ;;  %v1747_v14 = vand.u32 2147483648, %v1735_v38  ;;  %vm1741_vm2 = vweird.f32 %v1735_v38  ;;  %v1745_v32 = vand.u32 2147483647, %v1735_v38 }
0x12c9   :  { %4279 = vpow2.f32 %v4051_v28  ;;  %v1793_v15 = vrot.slane %v1660_v4, 2 }
0x12ca   :  { %v1748_v48 = vor.u32 1.1754944e-38, %v1747_v14  ;;  %vm1746_vm6 = vcmp.eq.f32.partialorder %v1745_v32, 8.507059e+37 }
0x12cd   :  { %1636 = vrot.lane.b32.xlu1 %v1634_v13, %s4684_s12 }
0x12ce   :  { %v4278_v41 = vpop.eup %4277 }
0x12cf   :  { %v1737_v26 = vmul.f32 %v4278_v41, %v1735_v38  ;;  %vm1742_vm1 = vweird.f32 %v4278_v41  ;;  %v4280_v35 = vpop.eup %4279 }
0x12d0   :  { %vm1743_vm5 = vmor %vm1741_vm2, %vm1742_vm1  ;;  %v1775_v46 = vadd.f32 1.0, %v4280_v35 }
0x12d1   :  { %v1738_v37 = vsub.f32 1.0, %v1737_v26 }
0x12d2   :  { %4281 = vrcp.f32 %v1775_v46  ;;  %v1787_v34 = vand.u32 2147483648, %v1775_v46  ;;  %vm1781_vm8 = vweird.f32 %v1775_v46  ;;  %v1785_v50 = vand.u32 2147483647, %v1775_v46 }
0x12d3   :  { %v1739_v39 = vmul.f32 %v4278_v41, %v1738_v37 }
0x12d4   :  { %v1788_v29 = vor.u32 1.1754944e-38, %v1787_v34  ;;  %vm1786_vm10 = vcmp.eq.f32.partialorder %v1785_v50, 8.507059e+37 }
0x12d5   :  { %1845 = vrot.lane.b32.xlu1 %v1844_v3, %s4684_s12  ;;  %v1740_v44 = vadd.f32 %v4278_v41, %v1739_v39 }
0x12d7   :  { %v1744_v45 = vsel %vm1743_vm5, %v4278_v41, %v1740_v44 }
0x12d8   :  { %v1749_v59 = vsel %vm1746_vm6, %v1748_v48, %v1744_v45  ;;  %v4282_v47 = vpop.eup %4281 }
0x12d9   :  { %v1777_v49 = vmul.f32 %v4282_v47, %v1775_v46  ;;  %vm1782_vm7 = vweird.f32 %v4282_v47 }
0x12da   :  { %vm1783_vm9 = vmor %vm1781_vm8, %vm1782_vm7 }
0x12db   :  { %v1778_v57 = vsub.f32 1.0, %v1777_v49 }
0x12dd   :  { %v1779_v27 = vmul.f32 %v4282_v47, %v1778_v57 }
0x12df   :  { %v1780_v17 = vadd.f32 %v4282_v47, %v1779_v27 }
0x12e1   :  { %v1784_v58 = vsel %vm1783_vm9, %v4282_v47, %v1780_v17 }
0x12e2   :  { %v1789_v53 = vsel %vm1786_vm10, %v1788_v29, %v1784_v58 }
0x12e3   :  { %v1795_v19 = vmul.f32 %v1793_v15, %v1789_v53 }
0x1319   :  { %v1758_v54 = vpop.permute.xlu2 %1757 }
0x131a   :  { %v1760_v56 = vmul.f32 %v1758_v54, %v1749_v59 }
0x131c   :  { %1762 = vrot.lane.b32.xlu0 %v1760_v56, %s4684_s12 }
0x1337   :  { %v1798_v16 = vpop.permute.xlu1 %1797 }
0x1338   :  { %v1800_v8 = vmul.f32 %v1798_v16, %v1789_v53 }
0x133a   :  { %1802 = vrot.lane.b32.xlu2 %v1800_v8, %s4684_s12 }
0x133f   :  { %v1637_v55 = vpop.permute.xlu1 %1636 }
0x1340   :  { %v1639_v63 = vadd.f32 %v1637_v55, %v1630_v61 }
0x1342   :  { %1824 = vrot.lane.b32.xlu2 %v1823_v60, %s4684_s12  ;;  %v1753_v6 = vrot.slane %v1639_v63, 6 }
0x1344   :  { %v1755_v13 = vmul.f32 %v1753_v6, %v1749_v59 }
0x1347   :  { %v1846_v11 = vpop.permute.xlu1 %1845 }
0x1348   :  { %v1848_v12 = vmul.f32 %v1846_v11, %v5195_v22 }
0x134a   :  { %1850 = vrot.lane.b32.xlu2 %v1848_v12, %s4680_s27 }
0x138e   :  { %v1763_v3 = vpop.permute.xlu0 %1762 }
0x138f   :  { %v5460_v52 = vadd.f32 %v1763_v3, %v1755_v13 }
0x1391   :  { %4283 = vtanh.f32 %v5460_v52 }
0x1394   :  { %v1803_v38 = vpop.permute.xlu2 %1802 }
0x1395   :  { %v5463_v41 = vadd.f32 %v1803_v38, %v1795_v19 }
0x1397   :  { %v4284_v26 = vpop.eup %4283  ;;  %4285 = vtanh.f32 %v5463_v41 }
0x1398   :  { %1768 = vrot.lane.b32.xlu1 %v4284_v26, %s4682_s28 }
0x139c   :  { %v1825_v0 = vpop.permute.xlu2 %1824 }
0x139d   :  { %v4286_v51 = vpop.eup %4285  ;;  %v1827_v28 = vmul.f32 %v1825_v0, %v5185_v18 }
0x139e   :  { %1808 = vrot.lane.b32.xlu0 %v4286_v51, %s4682_s28 }
0x13a4   :  { %v1851_v32 = vpop.permute.xlu2 %1850 }
0x13a6   :  { %1829 = vrot.lane.b32.xlu0 %v1827_v28, %s4680_s27 }
0x13ae   :  { %1834 = vrot.lane.b32.xlu0 %v1793_v15, %s4680_s27 }
0x140a   :  { %v1769_v37 = vpop.permute.xlu1 %1768 }
0x140b   :  { %v1771_v14 = vmul.f32 %v1769_v37, %v1749_v59 }
0x140d   :  { %v5476_v46 = vmul.f32 %v1771_v14, %v4897_v33 }
0x1410   :  { %v1809_v39 = vpop.permute.xlu0 %1808 }
0x1411   :  { %v1811_v44 = vmul.f32 %v1809_v39, %v1789_v53 }
0x1413   :  { %v5472_v35 = vmul.f32 %v1811_v44, %v4893_v30 }
0x1415   :  { %v1853_v45 = vadd.f32 %v1851_v32, %v5472_v35 }
0x1417   :  { %v1859_v48 = vrot.slane %v1853_v45, 2 }
0x1418   :  { %v1830_v54 = vpop.permute.xlu0 %1829 }
0x1419   :  { %v1832_v56 = vadd.f32 %v1830_v54, %v5476_v46  ;;  %1860 = vrot.lane.b32.xlu2 %v1859_v48, %s4682_s28 }
0x141b   :  { %1855 = vrot.lane.b32.xlu1 %v1832_v56, %s4684_s12  ;;  %v2007_v32 = vrot.slane %v1832_v56, 6 }
0x1420   :  { %v1835_v59 = vpop.permute.xlu0 %1834 }
0x1421   :  { %v1837_v47 = vmul.f32 %v1835_v59, %v5195_v22 }
0x1423   :  { %1813 = vrot.lane.b32.xlu1 %v1753_v6, %s4680_s27 }
0x142b   :  { %1839 = vrot.lane.b32.xlu1 %v1837_v47, %s4684_s12 }
0x1473   :  { %v1861_v49 = vpop.permute.xlu2 %1860 }
0x148d   :  { %v1856_v57 = vpop.permute.xlu1 %1855 }
0x148e   :  { %v1863_v27 = vsel %vm315_vm4, %v1856_v57, %v1861_v49 }
0x148f   :  { %v1865_v17 = vrot.slane %v1863_v27, 2 }
0x1491   :  { %4052 = vmatmul.msk.f32.vlgmr.msrb.gmra.mxu3 %vm731_vm3, %v1865_v17  ;;  %4053 = vmatmul.msk.f32.vlgmr.msrb.gmra.mxu0 %vm731_vm3, %v1865_v17 }
0x1495   :  { %v1814_v55 = vpop.permute.xlu1 %1813 }
0x1496   :  { %v1816_v11 = vmul.f32 %v1814_v55, %v5185_v18 }
0x150e   :  { %v1905_v34 = vpop.f32.mrf.mxu0 }
0x150f   :  { %v1913_v50 = vrot.slane %v1905_v34, 6 }
0x1511   :  { %v1915_v58 = vadd.f32 %v1913_v50, %v5163_v7 }
0x1513   :  { %4287 = vtanh.f32 %v1915_v58  ;;  %v4055_v12 = vmul.f32 -1.442695, %v1915_v58 }
0x1514   :  { %v1885_v29 = vpop.f32.mrf.mxu3 }
0x1515   :  { %v1909_v16 = vrot.slane %v1885_v29, 4  ;;  %v1840_v29 = vpop.permute.xlu1 %1839 }
0x1517   :  { %v1911_v53 = vadd.f32 %v1909_v16, %v5161_v5  ;;  %v1833_v16 = vmul.f32 %v5463_v41, %v4893_v30 }
0x1519   :  { %v4288_v8 = vpop.eup %4287  ;;  %4289 = vtanh.f32 %v1911_v53  ;;  %v4054_v10 = vmul.f32 -1.442695, %v1911_v53  ;;  %v1842_v53 = vadd.f32 %v1840_v29, %v1833_v16 }
0x151a   :  { %1981 = vrot.lane.b32.xlu2 %v4288_v8, %s4682_s28  ;;  %4291 = vpow2.f32 %v4055_v12 }
0x151b   :  { %v1977_v8 = vrot.slane %v1842_v53, 2 }
0x151f   :  { %v4290_v60 = vpop.eup %4289 }
0x1520   :  { %1941 = vrot.lane.b32.xlu0 %v4290_v60, %s4682_s28  ;;  %v4292_v61 = vpop.eup %4291 }
0x1521   :  { %v1959_v63 = vadd.f32 1.0, %v4292_v61 }
0x1522   :  { %1818 = vrot.lane.b32.xlu2 %v1816_v11, %s4684_s12 }
0x1523   :  { %4293 = vrcp.f32 %v1959_v63  ;;  %v1971_v15 = vand.u32 2147483648, %v1959_v63  ;;  %vm1965_vm12 = vweird.f32 %v1959_v63  ;;  %v1969_v38 = vand.u32 2147483647, %v1959_v63 }
0x1524   :  { %4295 = vpow2.f32 %v4054_v10 }
0x1525   :  { %v1972_v0 = vor.u32 1.1754944e-38, %v1971_v15  ;;  %vm1970_vm14 = vcmp.eq.f32.partialorder %v1969_v38, 8.507059e+37 }
0x1529   :  { %v4294_v2 = vpop.eup %4293 }
0x152a   :  { %2028 = vrot.lane.b32.xlu2 %v1859_v48, %s4684_s12  ;;  %v1961_v6 = vmul.f32 %v4294_v2, %v1959_v63  ;;  %vm1966_vm11 = vweird.f32 %v4294_v2  ;;  %v4296_v19 = vpop.eup %4295 }
0x152b   :  { %vm1967_vm13 = vmor %vm1965_vm12, %vm1966_vm11  ;;  %v1919_v51 = vadd.f32 1.0, %v4296_v19 }
0x152c   :  { %v1962_v4 = vsub.f32 1.0, %v1961_v6 }
0x152d   :  { %4297 = vrcp.f32 %v1919_v51  ;;  %v1931_v57 = vand.u32 2147483648, %v1919_v51  ;;  %vm1925_vm0 = vweird.f32 %v1919_v51  ;;  %v1929_v27 = vand.u32 2147483647, %v1919_v51 }
0x152e   :  { %v1963_v13 = vmul.f32 %v4294_v2, %v1962_v4 }
0x152f   :  { %v1932_v34 = vor.u32 1.1754944e-38, %v1931_v57  ;;  %vm1930_vm2 = vcmp.eq.f32.partialorder %v1929_v27, 8.507059e+37 }
0x1530   :  { %v1964_v3 = vadd.f32 %v4294_v2, %v1963_v13 }
0x1532   :  { %v1968_v26 = vsel %vm1967_vm13, %v4294_v2, %v1964_v3  ;;  %v1812_v2 = vmul.f32 %v5460_v52, %v4897_v33  ;;  %vm2250_vm13 = vcmask 1041408  }
0x1533   :  { %v1973_v37 = vsel %vm1970_vm14, %v1972_v0, %v1968_v26  ;;  %v4298_v44 = vpop.eup %4297  ;;  %vm2252_vm14 = vcmask 1043456  }
0x1534   :  { %v1921_v45 = vmul.f32 %v4298_v44, %v1919_v51  ;;  %vm1926_vm15 = vweird.f32 %v4298_v44  ;;  %v1979_v55 = vmul.f32 %v1977_v8, %v1973_v37 }
0x1535   :  { %vm1927_vm1 = vmor %vm1925_vm0, %vm1926_vm15  ;;  %vm2254_vm15 = vcmask 1045504  }
0x1536   :  { %v1922_v48 = vsub.f32 1.0, %v1921_v45 }
0x1538   :  { %v1923_v47 = vmul.f32 %v4298_v44, %v1922_v48 }
0x153a   :  { %v1924_v49 = vadd.f32 %v4298_v44, %v1923_v47 }
0x153c   :  { %v1928_v17 = vsel %vm1927_vm1, %v4298_v44, %v1924_v49 }
0x153d   :  { %v1933_v50 = vsel %vm1930_vm2, %v1932_v34, %v1928_v17 }
0x1574   :  { %v1982_v28 = vpop.permute.xlu2 %1981 }
0x1575   :  { %v1984_v39 = vmul.f32 %v1982_v28, %v1973_v37 }
0x1577   :  { %1986 = vrot.lane.b32.xlu0 %v1984_v39, %s4684_s12 }
0x157c   :  { %v1819_v14 = vpop.permute.xlu2 %1818 }
0x157d   :  { %v1821_v41 = vadd.f32 %v1819_v14, %v1812_v2 }
0x157f   :  { %2008 = vrot.lane.b32.xlu0 %v2007_v32, %s4684_s12  ;;  %v1937_v6 = vrot.slane %v1821_v41, 6 }
0x1581   :  { %v1939_v10 = vmul.f32 %v1937_v6, %v1933_v50 }
0x1584   :  { %v2029_v54 = vpop.permute.xlu2 %2028 }
0x1585   :  { %v2031_v59 = vmul.f32 %v2029_v54, %v5195_v22 }
0x1587   :  { %2033 = vrot.lane.b32.xlu0 %v2031_v59, %s4680_s27 }
0x1592   :  { %v1942_v56 = vpop.permute.xlu0 %1941 }
0x1593   :  { %v1944_v58 = vmul.f32 %v1942_v56, %v1933_v50 }
0x1595   :  { %1946 = vrot.lane.b32.xlu1 %v1944_v58, %s4684_s12 }
0x15e9   :  { %v1987_v60 = vpop.permute.xlu0 %1986 }
0x15ea   :  { %v5501_v11 = vadd.f32 %v1987_v60, %v1979_v55 }
0x15ec   :  { %4299 = vtanh.f32 %v5501_v11 }
0x15f1   :  { %v2009_v61 = vpop.permute.xlu0 %2008 }
0x15f2   :  { %v4300_v12 = vpop.eup %4299  ;;  %v2011_v63 = vmul.f32 %v2009_v61, %v5185_v18 }
0x15f3   :  { %1992 = vrot.lane.b32.xlu1 %v4300_v12, %s4682_s28 }
0x15f9   :  { %v2034_v26 = vpop.permute.xlu0 %2033 }
0x15fb   :  { %2013 = vrot.lane.b32.xlu1 %v2011_v63, %s4680_s27 }
0x1603   :  { %2018 = vrot.lane.b32.xlu1 %v1977_v8, %s4680_s27 }
0x1607   :  { %v1947_v4 = vpop.permute.xlu1 %1946 }
0x1608   :  { %v5510_v13 = vadd.f32 %v1947_v4, %v1939_v10 }
0x160a   :  { %4301 = vtanh.f32 %v5510_v13 }
0x1610   :  { %v4302_v3 = vpop.eup %4301 }
0x1611   :  { %1952 = vrot.lane.b32.xlu2 %v4302_v3, %s4682_s28 }
0x1665   :  { %v1993_v15 = vpop.permute.xlu1 %1992 }
0x1666   :  { %v1995_v19 = vmul.f32 %v1993_v15, %v1973_v37 }
0x1668   :  { %v5515_v38 = vmul.f32 %v1995_v19, %v4893_v30 }
0x166a   :  { %v2036_v52 = vadd.f32 %v2034_v26, %v5515_v38 }
0x166b   :  { %v1953_v51 = vpop.permute.xlu2 %1952 }
0x166c   :  { %v1955_v0 = vmul.f32 %v1953_v51, %v1933_v50  ;;  %v2042_v28 = vrot.slane %v2036_v52, 6 }
0x166d   :  { %v2014_v44 = vpop.permute.xlu1 %2013 }
0x166e   :  { %v5519_v39 = vmul.f32 %v1955_v0, %v4897_v33  ;;  %2043 = vrot.lane.b32.xlu0 %v2042_v28, %s4682_s28 }
0x1670   :  { %v2016_v14 = vadd.f32 %v2014_v44, %v5519_v39 }
0x1672   :  { %2038 = vrot.lane.b32.xlu2 %v2016_v14, %s4684_s12 }
0x1675   :  { %v2019_v50 = vpop.permute.xlu1 %2018 }
0x1676   :  { %1997 = vrot.lane.b32.xlu0 %v1937_v6, %s4680_s27  ;;  %v2021_v58 = vmul.f32 %v2019_v50, %v5195_v22  ;;  %v2273_v50 = vld [vmem:[#allocation8 + $0x70] sm:$0xff] }
0x1677   :  { %2295 = vmatpush.msra.mxu3 %v2273_v50 }
0x16cc   :  { %v2039_v37 = vpop.permute.xlu2 %2038 }
0x16e0   :  { %v2044_v32 = vpop.permute.xlu0 %2043 }
0x16e1   :  { %v2046_v45 = vsel %vm315_vm4, %v2039_v37, %v2044_v32 }
0x16e2   :  { %v2048_v48 = vrot.slane %v2046_v45, 4 }
0x16e4   :  { %4056 = vmatmul.msk.f32.vlgmr.msra.gmra.mxu1 %vm731_vm3, %v2048_v48  ;;  %4057 = vmatmul.msk.f32.vlgmr.msra.gmra.mxu2 %vm731_vm3, %v2048_v48 }
0x16e8   :  { %v1998_v34 = vpop.permute.xlu0 %1997 }
0x16e9   :  { %v2000_v56 = vmul.f32 %v1998_v34, %v5185_v18 }
0x1761   :  { %v2068_v54 = vpop.f32.mrf.mxu1 }
0x1762   :  { %v2092_v59 = vrot.slane %v2068_v54, 2 }
0x1764   :  { %v2094_v47 = vadd.f32 %v2092_v59, %v5161_v5  ;;  %v1996_v59 = vmul.f32 %v5510_v13, %v4897_v33 }
0x1766   :  { %4303 = vtanh.f32 %v2094_v47  ;;  %v4058_v16 = vmul.f32 -1.442695, %v2094_v47 }
0x1767   :  { %v2088_v49 = vpop.f32.mrf.mxu2 }
0x1768   :  { %v2095_v57 = vadd.f32 %v2088_v49, %v5163_v7 }
0x176a   :  { %4305 = vtanh.f32 %v2095_v57  ;;  %v4059_v5 = vmul.f32 -1.442695, %v2095_v57 }
0x176c   :  { %v4304_v27 = vpop.eup %4303  ;;  %4307 = vpow2.f32 %v4059_v5  ;;  %v2271_v5 = vld [vmem:[#allocation8 + $0x60] sm:$0xff] }
0x176d   :  { %2121 = vrot.lane.b32.xlu1 %v4304_v27, %s4682_s28  ;;  %2296 = vmatpush.msra.mxu3 %v2271_v5 }
0x1770   :  { %v4306_v17 = vpop.eup %4305 }
0x1771   :  { %2161 = vrot.lane.b32.xlu2 %v4306_v17, %s4682_s28 }
0x1772   :  { %v4308_v7 = vpop.eup %4307 }
0x1773   :  { %v2139_v29 = vadd.f32 1.0, %v4308_v7  ;;  %v2269_v7 = vld [vmem:[#allocation8 + $0x50] sm:$0xff] }
0x1774   :  { %2297 = vmatpush.msra.mxu3 %v2269_v7 }
0x1775   :  { %2002 = vrot.lane.b32.xlu1 %v2000_v56, %s4684_s12  ;;  %4309 = vrcp.f32 %v2139_v29  ;;  %v2151_v2 = vand.u32 2147483648, %v2139_v29  ;;  %vm2145_vm6 = vweird.f32 %v2139_v29  ;;  %v2149_v41 = vand.u32 2147483647, %v2139_v29 }
0x1776   :  { %4311 = vpow2.f32 %v4058_v16  ;;  %v2267_v16 = vld [vmem:[#allocation8 + $0x40] sm:$0xff] }
0x1777   :  { %v2152_v4 = vor.u32 1.1754944e-38, %v2151_v2  ;;  %vm2150_vm8 = vcmp.eq.f32.partialorder %v2149_v41, 8.507059e+37  ;;  %2298 = vmatpush.msra.mxu3 %v2267_v16  ;;  %v2261_v41 = vld [vmem:[#allocation8 + $0x10] sm:$0xff]  ;;  %v5719_v16 = vld [vmem:[%s6203_s19] sm:$0x3] }
0x1779   :  { %2023 = vrot.lane.b32.xlu2 %v2021_v58, %s4684_s12  ;;  %v2274_v58 = vld [vmem:[#allocation8 + $0x78] sm:$0xff] }
0x177a   :  { %2318 = vmatpush.msra.mxu0 %v2274_v58 }
0x177b   :  { %v4310_v53 = vpop.eup %4309 }
0x177c   :  { %v2141_v8 = vmul.f32 %v4310_v53, %v2139_v29  ;;  %v4312_v55 = vpop.eup %4311  ;;  %vm2146_vm5 = vweird.f32 %v4310_v53 }
0x177d   :  { %v2099_v12 = vadd.f32 1.0, %v4312_v55  ;;  %vm2147_vm7 = vmor %vm2145_vm6, %vm2146_vm5  ;;  %v2266_v55 = vld [vmem:[#allocation8 + $0x38] sm:$0xff] }
0x177e   :  { %v2142_v60 = vsub.f32 1.0, %v2141_v8  ;;  %v2265_v8 = vld [vmem:[#allocation8 + $0x30] sm:$0xff] }
0x177f   :  { %4313 = vrcp.f32 %v2099_v12  ;;  %v2111_v28 = vand.u32 2147483648, %v2099_v12  ;;  %vm2105_vm10 = vweird.f32 %v2099_v12  ;;  %v2109_v44 = vand.u32 2147483647, %v2099_v12  ;;  %2299 = vmatpush.msra.mxu3 %v2265_v8 }
0x1780   :  { %v2143_v61 = vmul.f32 %v4310_v53, %v2142_v60  ;;  %v5581_v60 = vld [vmem:[#allocation10 + $0x70] sm:$0xff]  ;;  %v2277_v8 = vperm.slane %v5719_v16, 0 }
0x1781   :  { %v2112_v37 = vor.u32 1.1754944e-38, %v2111_v28  ;;  %vm2110_vm12 = vcmp.eq.f32.partialorder %v2109_v44, 8.507059e+37  ;;  %2357 = vmatpush.msrb.mxu1 %v5581_v60 }
0x1782   :  { %v2144_v63 = vadd.f32 %v4310_v53, %v2143_v61  ;;  %v2263_v61 = vld [vmem:[#allocation8 + $0x20] sm:$0xff] }
0x1783   :  { %2300 = vmatpush.msra.mxu3 %v2263_v61 }
0x1784   :  { %v2148_v6 = vsel %vm2147_vm7, %v4310_v53, %v2144_v63  ;;  %v2264_v63 = vld [vmem:[#allocation8 + $0x28] sm:$0xff] }
0x1785   :  { %v4314_v10 = vpop.eup %4313  ;;  %v5536_v15 = vsel %vm2150_vm8, %v2152_v4, %v2148_v6  ;;  %v2262_v6 = vld [vmem:[#allocation8 + $0x18] sm:$0xff]  ;;  %2301 = vmatpush.msra.mxu3 %v2261_v41 }
0x1786   :  { %v2101_v26 = vmul.f32 %v4314_v10, %v2099_v12  ;;  %vm2106_vm9 = vweird.f32 %v4314_v10  ;;  %v5583_v12 = vld [vmem:[#allocation10 + $0x78] sm:$0xff] }
0x1787   :  { %vm2107_vm11 = vmor %vm2105_vm10, %vm2106_vm9  ;;  %2377 = vmatpush.msrb.mxu2 %v5583_v12  ;;  %v5597_v4 = vld [vmem:[#allocation10 + $0x58] sm:$0xff] }
0x1788   :  { %v2102_v52 = vsub.f32 1.0, %v2101_v26  ;;  %v5603_v26 = vld [vmem:[#allocation10 + $0x48] sm:$0xff] }
0x178a   :  { %v2103_v51 = vmul.f32 %v4314_v10, %v2102_v52  ;;  %v5605_v52 = vld [vmem:[#allocation10 + $0x30] sm:$0xff] }
0x178c   :  { %v2104_v0 = vadd.f32 %v4314_v10, %v2103_v51  ;;  %v5607_v51 = vld [vmem:[#allocation10 + $0x38] sm:$0xff] }
0x178e   :  { %v2108_v14 = vsel %vm2107_vm11, %v4314_v10, %v2104_v0  ;;  %v5595_v10 = vld [vmem:[#allocation10 + $0x50] sm:$0xff]  ;;  %v5611_v0 = vld [vmem:[#allocation10 + $0x20] sm:$0xff] }
0x178f   :  { %v2113_v45 = vsel %vm2110_vm12, %v2112_v37, %v2108_v14  ;;  %v5617_v14 = vld [vmem:[#allocation10 + $0x28] sm:$0xff]  ;;  %v5623_v37 = vld [vmem:[#allocation10 + $0x10] sm:$0xff] }
0x17cb   :  { %v2162_v3 = vpop.permute.xlu2 %2161 }
0x17cc   :  { %v2164_v19 = vmul.f32 %v2162_v3, %v5536_v15  ;;  %v2259_v3 = vld [vmem:[#allocation8] sm:$0xff] }
0x17cd   :  { %2302 = vmatpush.msra.mxu3 %v2259_v3 }
0x17ce   :  { %2166 = vrot.lane.b32.xlu0 %v2164_v19, %s4684_s12  ;;  %v5601_v19 = vld [vmem:[#allocation10 + $0x40] sm:$0xff] }
0x17cf   :  { %2497 = vmatpush.msrb.mxu3 %v5581_v60 }
0x17d3   :  { %v2024_v47 = vpop.permute.xlu2 %2023 }
0x17df   :  { %v2122_v32 = vpop.permute.xlu1 %2121 }
0x17e0   :  { %v2124_v48 = vmul.f32 %v2122_v32, %v2113_v45  ;;  %v5625_v32 = vld [vmem:[#allocation10 + $0x18] sm:$0xff] }
0x17e2   :  { %2126 = vrot.lane.b32.xlu2 %v2124_v48, %s4684_s12  ;;  %v5629_v48 = vld [vmem:[#allocation10 + $0x8] sm:$0xff] }
0x17e7   :  { %v2003_v54 = vpop.permute.xlu1 %2002 }
0x17ea   :  { %2179 = vrot.lane.b32.xlu2 %v5198_v23, %s4684_s12  ;;  %v2005_v23 = vadd.f32 %v2003_v54, %v1996_v59 }
0x17f2   :  { %2192 = vrot.lane.b32.xlu2 %v5515_v38, %s4682_s28  ;;  %v2017_v38 = vmul.f32 %v5501_v11, %v4893_v30 }
0x17f4   :  { %v2026_v49 = vadd.f32 %v2024_v47, %v2017_v38 }
0x17f6   :  { %v2157_v57 = vrot.slane %v2026_v49, 2 }
0x17fa   :  { %2206 = vrot.lane.b32.xlu2 %v5382_v42, %s4684_s12  ;;  %v2117_v42 = vrot.slane %v2005_v23, 6 }
0x17fc   :  { %v2119_v27 = vmul.f32 %v2117_v42, %v2113_v45 }
0x1802   :  { %2219 = vrot.lane.b32.xlu2 %v5378_v1, %s4682_s28 }
0x180a   :  { %2233 = vrot.lane.b32.xlu2 %v5519_v39, %s4684_s12  ;;  %v2159_v39 = vmul.f32 %v2157_v57, %v5536_v15 }
0x1812   :  { %2246 = vrot.lane.b32.xlu2 %v5191_v9, %s4682_s28 }
0x183c   :  { %v2127_v1 = vpop.permute.xlu2 %2126 }
0x183d   :  { %v2129_v17 = vadd.f32 %v2127_v1, %v2119_v27 }
0x183f   :  { %4315 = vtanh.f32 %v2129_v17 }
0x1840   :  { %v2167_v34 = vpop.permute.xlu0 %2166 }
0x1841   :  { %v2169_v9 = vadd.f32 %v2167_v34, %v2159_v39 }
0x1843   :  { %4317 = vtanh.f32 %v2169_v9 }
0x1844   :  { %v5585_v2 = vpop.permute.xlu2 %2179 }
0x1845   :  { %v4316_v56 = vpop.eup %4315 }
0x1846   :  { %2132 = vrot.lane.b32.xlu1 %v4316_v56, %s4682_s28 }
0x1849   :  { %v4318_v13 = vpop.eup %4317 }
0x184a   :  { %2172 = vrot.lane.b32.xlu0 %v4318_v13, %s4682_s28 }
0x184c   :  { %v2193_v28 = vpop.permute.xlu2 %2192 }
0x184e   :  { %2188 = vrot.lane.b32.xlu1 %v5263_v31, %s4684_s12 }
0x1852   :  { %2197 = vrot.lane.b32.xlu0 %v5325_v43, %s4684_s12  ;;  %v2272_v43 = vld [vmem:[#allocation8 + $0x68] sm:$0xff] }
0x1853   :  { %2319 = vmatpush.msra.mxu0 %v2272_v43 }
0x1854   :  { %v2207_v59 = vpop.permute.xlu2 %2206 }
0x1856   :  { %2201 = vrot.lane.b32.xlu1 %v5472_v35, %s4682_s28 }
0x185a   :  { %2210 = vrot.lane.b32.xlu0 %v5425_v62, %s4682_s28  ;;  %v2270_v62 = vld [vmem:[#allocation8 + $0x58] sm:$0xff] }
0x185b   :  { %2320 = vmatpush.msra.mxu0 %v2270_v62 }
0x185c   :  { %v2220_v47 = vpop.permute.xlu2 %2219 }
0x185e   :  { %2215 = vrot.lane.b32.xlu1 %v5429_v36, %s4684_s12 }
0x1864   :  { %v2234_v9 = vpop.permute.xlu2 %2233 }
0x1866   :  { %2228 = vrot.lane.b32.xlu1 %v5321_v21, %s4682_s28  ;;  %v2268_v21 = vld [vmem:[#allocation8 + $0x48] sm:$0xff] }
0x1867   :  { %2321 = vmatpush.msra.mxu0 %v2268_v21 }
0x1869   :  { %2322 = vmatpush.msra.mxu0 %v2266_v55 }
0x186b   :  { %2323 = vmatpush.msra.mxu0 %v2264_v63 }
0x186d   :  { %2324 = vmatpush.msra.mxu0 %v2262_v6 }
0x18b8   :  { %v2133_v11 = vpop.permute.xlu1 %2132 }
0x18b9   :  { %v2135_v31 = vmul.f32 %v2133_v11, %v2113_v45  ;;  %v5627_v45 = vld [vmem:[#allocation10] sm:$0xff] }
0x18bb   :  { %v2176_v35 = vmul.f32 %v2135_v31, %v4897_v33  ;;  %v2247_v31 = vpop.permute.xlu2 %2246 }
0x18bc   :  { %v2173_v29 = vpop.permute.xlu0 %2172 }
0x18bd   :  { %v2175_v36 = vmul.f32 %v2173_v29, %v5536_v15  ;;  %2242 = vrot.lane.b32.xlu1 %v2176_v35, %s4684_s12  ;;  %v2260_v15 = vld [vmem:[#allocation8 + $0x8] sm:$0xff] }
0x18be   :  { %2325 = vmatpush.msra.mxu0 %v2260_v15 }
0x18bf   :  { %v2177_v53 = vmul.f32 %v2175_v36, %v4893_v30  ;;  %v2278_v36 = vperm.slane %v5719_v16, 1 }
0x18c0   :  { %2517 = vmatpush.msrb.mxu0 %v5583_v12  ;;  %v2189_v44 = vpop.permute.xlu1 %2188 }
0x18c1   :  { %2183 = vrot.lane.b32.xlu0 %v2177_v53, %s4682_s28  ;;  %v2195_v42 = vsel %vm315_vm4, %v2189_v44, %v2193_v28 }
0x18c4   :  { %v2198_v54 = vpop.permute.xlu0 %2197 }
0x18c8   :  { %v2202_v23 = vpop.permute.xlu1 %2201 }
0x18c9   :  { %2224 = vrot.lane.b32.xlu0 %v5476_v46, %s4684_s12  ;;  %v5589_v46 = vld [vmem:[#allocation10 + $0x60] sm:$0xff]  ;;  %v2204_v27 = vsel %vm315_vm4, %v2198_v54, %v2202_v23 }
0x18ca   :  { %2358 = vmatpush.msrb.mxu1 %v5589_v46  ;;  %2498 = vmatpush.msrb.mxu3 %v5589_v46 }
0x18cc   :  { %2359 = vmatpush.msrb.mxu1 %v5595_v10  ;;  %2499 = vmatpush.msrb.mxu3 %v5595_v10 }
0x18ce   :  { %2360 = vmatpush.msrb.mxu1 %v5601_v19  ;;  %2500 = vmatpush.msrb.mxu3 %v5601_v19 }
0x18d0   :  { %2361 = vmatpush.msrb.mxu1 %v5605_v52  ;;  %2501 = vmatpush.msrb.mxu3 %v5605_v52  ;;  %v2216_v38 = vpop.permute.xlu1 %2215 }
0x18d1   :  { %2237 = vrot.lane.b32.xlu0 %v5258_v40, %s4682_s28  ;;  %v5592_v40 = vld [vmem:[#allocation10 + $0x68] sm:$0xff]  ;;  %v2222_v58 = vsel %vm315_vm4, %v2216_v38, %v2220_v47 }
0x18d2   :  { %2378 = vmatpush.msrb.mxu2 %v5592_v40  ;;  %2518 = vmatpush.msrb.mxu0 %v5592_v40 }
0x18d3   :  { %2362 = vmatpush.msrb.mxu1 %v5611_v0  ;;  %2502 = vmatpush.msrb.mxu3 %v5611_v0 }
0x18d4   :  { %2379 = vmatpush.msrb.mxu2 %v5597_v4  ;;  %2519 = vmatpush.msrb.mxu0 %v5597_v4 }
0x18d5   :  { %2363 = vmatpush.msrb.mxu1 %v5623_v37  ;;  %2503 = vmatpush.msrb.mxu3 %v5623_v37 }
0x18d6   :  { %2380 = vmatpush.msrb.mxu2 %v5603_v26  ;;  %2520 = vmatpush.msrb.mxu0 %v5603_v26 }
0x18d7   :  { %2364 = vmatpush.msrb.mxu1 %v5627_v45  ;;  %2504 = vmatpush.msrb.mxu3 %v5627_v45 }
0x18d8   :  { %2381 = vmatpush.msrb.mxu2 %v5607_v51  ;;  %2365 = vmatmul.f32.vlgmr.msrb.gmra.mxu1 %v4679_v24  ;;  %v2229_v56 = vpop.permute.xlu1 %2228 }
0x18d9   :  { %2521 = vmatpush.msrb.mxu0 %v5607_v51  ;;  %2681 = vmatpush.msra.mxu1 %v5581_v60 }
0x18da   :  { %2382 = vmatpush.msrb.mxu2 %v5617_v14 }
0x18db   :  { %2522 = vmatpush.msrb.mxu0 %v5617_v14  ;;  %2682 = vmatpush.msra.mxu1 %v5589_v46 }
0x18dc   :  { %2383 = vmatpush.msrb.mxu2 %v5625_v32 }
0x18dd   :  { %2523 = vmatpush.msrb.mxu0 %v5625_v32  ;;  %2683 = vmatpush.msra.mxu1 %v5595_v10 }
0x18de   :  { %2384 = vmatpush.msrb.mxu2 %v5629_v48 }
0x18df   :  { %2385 = vmatmul.f32.vlgmr.msrb.gmra.mxu2 %v4679_v24  ;;  %2524 = vmatpush.msrb.mxu0 %v5629_v48  ;;  %v2211_v24 = vpop.permute.xlu0 %2210 }
0x18e0   :  { %2701 = vmatpush.msra.mxu2 %v5583_v12  ;;  %2684 = vmatpush.msra.mxu1 %v5601_v19  ;;  %v2213_v17 = vsel %vm315_vm4, %v2207_v59, %v2211_v24 }
0x18e2   :  { %2702 = vmatpush.msra.mxu2 %v5592_v40  ;;  %2685 = vmatpush.msra.mxu1 %v5605_v52 }
0x18e4   :  { %2703 = vmatpush.msra.mxu2 %v5597_v4  ;;  %2686 = vmatpush.msra.mxu1 %v5611_v0 }
0x18e6   :  { %2704 = vmatpush.msra.mxu2 %v5603_v26  ;;  %2687 = vmatpush.msra.mxu1 %v5623_v37 }
0x18e8   :  { %2705 = vmatpush.msra.mxu2 %v5607_v51  ;;  %2688 = vmatpush.msra.mxu1 %v5627_v45 }
0x18ea   :  { %2706 = vmatpush.msra.mxu2 %v5617_v14  ;;  %3045 = vmatpush.msrb.mxu1 %v5581_v60 }
0x18ec   :  { %2707 = vmatpush.msra.mxu2 %v5625_v32  ;;  %3046 = vmatpush.msrb.mxu1 %v5589_v46 }
0x18ee   :  { %2708 = vmatpush.msra.mxu2 %v5629_v48  ;;  %3047 = vmatpush.msrb.mxu1 %v5595_v10 }
0x18f0   :  { %3065 = vmatpush.msrb.mxu2 %v5583_v12  ;;  %3048 = vmatpush.msrb.mxu1 %v5601_v19 }
0x18f2   :  { %3066 = vmatpush.msrb.mxu2 %v5592_v40  ;;  %3049 = vmatpush.msrb.mxu1 %v5605_v52 }
0x18f4   :  { %3067 = vmatpush.msrb.mxu2 %v5597_v4  ;;  %3050 = vmatpush.msrb.mxu1 %v5611_v0 }
0x18f6   :  { %3068 = vmatpush.msrb.mxu2 %v5603_v26  ;;  %3051 = vmatpush.msrb.mxu1 %v5623_v37 }
0x18f8   :  { %3069 = vmatpush.msrb.mxu2 %v5607_v51  ;;  %3052 = vmatpush.msrb.mxu1 %v5627_v45 }
0x18fa   :  { %3070 = vmatpush.msrb.mxu2 %v5617_v14 }
0x18fc   :  { %3071 = vmatpush.msrb.mxu2 %v5625_v32 }
0x18fe   :  { %3072 = vmatpush.msrb.mxu2 %v5629_v48 }
0x192f   :  { %v2243_v50 = vpop.permute.xlu1 %2242 }
0x1930   :  { %v2249_v35 = vsel %vm315_vm4, %v2243_v50, %v2247_v31 }
0x1933   :  { %v2184_v49 = vpop.permute.xlu0 %2183 }
0x1934   :  { %v2186_v57 = vsel %vm315_vm4, %v5585_v2, %v2184_v49 }
0x1935   :  { %v2251_v1 = vsel %vm2250_vm13, %v2186_v57, %v2195_v42 }
0x1936   :  { %v2253_v39 = vsel %vm2252_vm14, %v2251_v1, %v2204_v27 }
0x1937   :  { %v2255_v34 = vsel %vm2254_vm15, %v2253_v39, %v2213_v17 }
0x1938   :  { %4060 = vmatmul.msk.f32.vlgmr.msra.gmra.mxu3 %vm731_vm3, %v2255_v34  ;;  %4062 = vmatmul.msk.f32.vlgmr.msra.gmra.mxu0 %vm731_vm3, %v2255_v34 }
0x1939   :  { %2864 = vmatpush.msra.mxu3 %v5581_v60  ;;  %2884 = vmatpush.msra.mxu0 %v5583_v12 }
0x193b   :  { %v2225_v13 = vpop.permute.xlu0 %2224  ;;  %2865 = vmatpush.msra.mxu3 %v5589_v46  ;;  %2885 = vmatpush.msra.mxu0 %v5592_v40 }
0x193c   :  { %v2231_v11 = vsel %vm315_vm4, %v2225_v13, %v2229_v56 }
0x193d   :  { %2866 = vmatpush.msra.mxu3 %v5595_v10  ;;  %2886 = vmatpush.msra.mxu0 %v5597_v4  ;;  %v2256_v43 = vsel %vm2250_vm13, %v2222_v58, %v2231_v11 }
0x193f   :  { %2867 = vmatpush.msra.mxu3 %v5601_v19  ;;  %2887 = vmatpush.msra.mxu0 %v5603_v26 }
0x1941   :  { %2868 = vmatpush.msra.mxu3 %v5605_v52  ;;  %2888 = vmatpush.msra.mxu0 %v5607_v51 }
0x1943   :  { %v2238_v5 = vpop.permute.xlu0 %2237  ;;  %2869 = vmatpush.msra.mxu3 %v5611_v0  ;;  %2889 = vmatpush.msra.mxu0 %v5617_v14 }
0x1944   :  { %v2240_v7 = vsel %vm315_vm4, %v2234_v9, %v2238_v5 }
0x1945   :  { %v2257_v62 = vsel %vm2252_vm14, %v2256_v43, %v2240_v7  ;;  %2870 = vmatpush.msra.mxu3 %v5623_v37  ;;  %2890 = vmatpush.msra.mxu0 %v5625_v32 }
0x1946   :  { %v2258_v29 = vsel %vm2254_vm15, %v2257_v62, %v2249_v35 }
0x1947   :  { %4061 = vmatmul.msk.f32.gmra.mxu3 %vm731_vm3, %v2258_v29  ;;  %4063 = vmatmul.msk.f32.gmra.mxu0 %vm731_vm3, %v2258_v29 }
0x1948   :  { %2871 = vmatpush.msra.mxu3 %v5627_v45  ;;  %2891 = vmatpush.msra.mxu0 %v5629_v48 }
0x1955   :  { %v2366_v61 = vpop.f32.mrf.mxu1 }
0x1962   :  { %v2386_v41 = vpop.f32.mrf.mxu2 }
0x1963   :  { %v2391_v6 = vrot.slane %v2386_v41, 2 }
0x19b5   :  { %v2327_v21 = vpop.f32.mrf.mxu0 }
0x19b6   :  { %v5722_v53 = vadd.f32 %v2327_v21, %v2278_v36 }
0x19bb   :  { %v2304_v55 = vpop.f32.mrf.mxu3 }
0x19bc   :  { %v5727_v63 = vadd.f32 %v2304_v55, %v2277_v8 }
0x19be   :  { %v2389_v2 = vadd.f32 %v2366_v61, %v5727_v63 }
0x19c0   :  { %4319 = vtanh.f32 %v2389_v2  ;;  %v4064_v59 = vmul.f32 -1.442695, %v2389_v2 }
0x19c4   :  { %v2330_v3 = vpop.f32.mrf.mxu0 }
0x19c5   :  { %v5730_v15 = vadd.f32 %v2330_v3, %v2278_v36 }
0x19c6   :  { %v4320_v28 = vpop.eup %4319 }
0x19c7   :  { %v2393_v44 = vadd.f32 %v2391_v6, %v5730_v15  ;;  %2416 = vrot.lane.b32.xlu1 %v4320_v28, %s4682_s28 }
0x19c9   :  { %4321 = vtanh.f32 %v2393_v44  ;;  %v4065_v23 = vmul.f32 -1.442695, %v2393_v44 }
0x19ca   :  { %4323 = vpow2.f32 %v4064_v59 }
0x19cb   :  { %4325 = vpow2.f32 %v4065_v23 }
0x19cf   :  { %v4322_v54 = vpop.eup %4321 }
0x19d0   :  { %2453 = vrot.lane.b32.xlu0 %v4322_v54, %s4682_s28  ;;  %v4324_v24 = vpop.eup %4323 }
0x19d1   :  { %v2397_v47 = vadd.f32 1.0, %v4324_v24  ;;  %v4326_v38 = vpop.eup %4325 }
0x19d2   :  { %v2434_v49 = vadd.f32 1.0, %v4326_v38 }
0x19d3   :  { %4327 = vrcp.f32 %v2397_v47  ;;  %v2409_v9 = vand.u32 2147483648, %v2397_v47  ;;  %vm2403_vm1 = vweird.f32 %v2397_v47  ;;  %v2407_v13 = vand.u32 2147483647, %v2397_v47 }
0x19d4   :  { %4329 = vrcp.f32 %v2434_v49  ;;  %v2446_v35 = vand.u32 2147483648, %v2434_v49  ;;  %vm2440_vm7 = vweird.f32 %v2434_v49  ;;  %v2444_v62 = vand.u32 2147483647, %v2434_v49 }
0x19d5   :  { %v2410_v50 = vor.u32 1.1754944e-38, %v2409_v9  ;;  %vm2408_vm5 = vcmp.eq.f32.partialorder %v2407_v13, 8.507059e+37  ;;  %v5779_v9 = vpop.f32.mrf.mxu3 }
0x19d6   :  { %v2447_v36 = vor.u32 1.1754944e-38, %v2446_v35  ;;  %vm2445_vm9 = vcmp.eq.f32.partialorder %v2444_v62, 8.507059e+37 }
0x19d9   :  { %v4328_v42 = vpop.eup %4327 }
0x19da   :  { %v2399_v57 = vmul.f32 %v4328_v42, %v2397_v47  ;;  %v4330_v1 = vpop.eup %4329  ;;  %vm2404_vm0 = vweird.f32 %v4328_v42 }
0x19db   :  { %v2436_v39 = vmul.f32 %v4330_v1, %v2434_v49  ;;  %vm2405_vm2 = vmor %vm2403_vm1, %vm2404_vm0  ;;  %vm2441_vm6 = vweird.f32 %v4330_v1 }
0x19dc   :  { %v2400_v27 = vsub.f32 1.0, %v2399_v57  ;;  %vm2442_vm8 = vmor %vm2440_vm7, %vm2441_vm6 }
0x19dd   :  { %v2437_v56 = vsub.f32 1.0, %v2436_v39 }
0x19de   :  { %v2401_v17 = vmul.f32 %v4328_v42, %v2400_v27 }
0x19df   :  { %v2438_v58 = vmul.f32 %v4330_v1, %v2437_v56 }
0x19e0   :  { %v2402_v34 = vadd.f32 %v4328_v42, %v2401_v17 }
0x19e1   :  { %v2439_v7 = vadd.f32 %v4330_v1, %v2438_v58 }
0x19e2   :  { %v2406_v11 = vsel %vm2405_vm2, %v4328_v42, %v2402_v34 }
0x19e3   :  { %v2411_v31 = vsel %vm2408_vm5, %v2410_v50, %v2406_v11  ;;  %v2443_v29 = vsel %vm2442_vm8, %v4330_v1, %v2439_v7 }
0x19e4   :  { %v2448_v55 = vsel %vm2445_vm9, %v2447_v36, %v2443_v29  ;;  %v2414_v28 = vmul.f32 0.0, %v2411_v31 }
0x19e5   :  { %v2451_v2 = vmul.f32 0.0, %v2448_v55 }
0x1a39   :  { %v2417_v5 = vpop.permute.xlu1 %2416 }
0x1a3a   :  { %v2419_v43 = vmul.f32 %v2417_v5, %v2411_v31 }
0x1a3c   :  { %2421 = vrot.lane.b32.xlu0 %v2419_v43, %s4684_s12 }
0x1a42   :  { %v2454_v21 = vpop.permute.xlu0 %2453 }
0x1a43   :  { %v2456_v61 = vmul.f32 %v2454_v21, %v2448_v55 }
0x1a45   :  { %2458 = vrot.lane.b32.xlu2 %v2456_v61, %s4684_s12 }
0x1a9f   :  { %v2459_v41 = vpop.permute.xlu2 %2458 }
0x1aa0   :  { %v5737_v6 = vadd.f32 %v2459_v41, %v2451_v2 }
0x1aa2   :  { %4331 = vtanh.f32 %v5737_v6 }
0x1aa8   :  { %v4332_v3 = vpop.eup %4331 }
0x1aa9   :  { %2464 = vrot.lane.b32.xlu1 %v4332_v3, %s4682_s28 }
0x1aae   :  { %v2422_v44 = vpop.permute.xlu0 %2421 }
0x1aaf   :  { %v5741_v54 = vadd.f32 %v2422_v44, %v2414_v28 }
0x1ab1   :  { %4333 = vtanh.f32 %v5741_v54 }
0x1ab7   :  { %v4334_v59 = vpop.eup %4333 }
0x1ab8   :  { %2427 = vrot.lane.b32.xlu2 %v4334_v59, %s4682_s28 }
0x1b12   :  { %v2428_v23 = vpop.permute.xlu2 %2427 }
0x1b13   :  { %v2430_v24 = vmul.f32 %v2428_v23, %v2411_v31 }
0x1b15   :  { %v5746_v47 = vmul.f32 %v2430_v24, %v4893_v30 }
0x1b17   :  { %v5750_v38 = vadd.f32 %v5746_v47, %v5202_v25 }
0x1b19   :  { %2477 = vrot.lane.b32.xlu0 %v5750_v38, %s4684_s12 }
0x1b1b   :  { %v2465_v49 = vpop.permute.xlu1 %2464 }
0x1b1c   :  { %v2467_v42 = vmul.f32 %v2465_v49, %v2448_v55 }
0x1b1e   :  { %v5755_v57 = vmul.f32 %v2467_v42, %v4897_v33 }
0x1b20   :  { %v2475_v27 = vadd.f32 %v5755_v57, %v5188_v20 }
0x1b22   :  { %v2481_v1 = vrot.slane %v2475_v27, 6  ;;  %v2649_v7 = vrot.slane %v2475_v27, 2 }
0x1b24   :  { %2482 = vrot.lane.b32.xlu1 %v2481_v1, %s4682_s28 }
0x1b8b   :  { %v2478_v17 = vpop.permute.xlu0 %2477 }
0x1b96   :  { %v2483_v39 = vpop.permute.xlu1 %2482 }
0x1b97   :  { %v2485_v34 = vsel %vm315_vm4, %v2478_v17, %v2483_v39  ;;  %v2628_v17 = vrot.slane %v5750_v38, 6 }
0x1b98   :  { %4066 = vmatmul.msk.f32.vlgmr.msrb.gmra.mxu3 %vm731_vm3, %v2485_v34  ;;  %4067 = vmatmul.msk.f32.vlgmr.msrb.gmra.mxu0 %vm731_vm3, %v2485_v34 }
0x1b99   :  { %3224 = vmatpush.msrb.mxu3 %v5581_v60  ;;  %3244 = vmatpush.msrb.mxu0 %v5583_v12 }
0x1b9b   :  { %3225 = vmatpush.msrb.mxu3 %v5589_v46  ;;  %3245 = vmatpush.msrb.mxu0 %v5592_v40 }
0x1b9d   :  { %3226 = vmatpush.msrb.mxu3 %v5595_v10  ;;  %3246 = vmatpush.msrb.mxu0 %v5597_v4 }
0x1b9f   :  { %3227 = vmatpush.msrb.mxu3 %v5601_v19  ;;  %3247 = vmatpush.msrb.mxu0 %v5603_v26 }
0x1ba1   :  { %3228 = vmatpush.msrb.mxu3 %v5605_v52  ;;  %3248 = vmatpush.msrb.mxu0 %v5607_v51 }
0x1ba3   :  { %3229 = vmatpush.msrb.mxu3 %v5611_v0  ;;  %3249 = vmatpush.msrb.mxu0 %v5617_v14 }
0x1ba5   :  { %3230 = vmatpush.msrb.mxu3 %v5623_v37  ;;  %3250 = vmatpush.msrb.mxu0 %v5625_v32 }
0x1ba7   :  { %3231 = vmatpush.msrb.mxu3 %v5627_v45  ;;  %3251 = vmatpush.msrb.mxu0 %v5629_v48 }
0x1c15   :  { %v2526_v56 = vpop.f32.mrf.mxu0 }
0x1c16   :  { %v2534_v13 = vrot.slane %v2526_v56, 4 }
0x1c18   :  { %v2536_v11 = vadd.f32 %v2534_v13, %v5730_v15 }
0x1c1a   :  { %4335 = vtanh.f32 %v2536_v11  ;;  %v4069_v35 = vmul.f32 -1.442695, %v2536_v11 }
0x1c1b   :  { %v2506_v50 = vpop.f32.mrf.mxu3 }
0x1c1c   :  { %v2530_v58 = vrot.slane %v2506_v50, 6 }
0x1c1e   :  { %v2532_v5 = vadd.f32 %v2530_v58, %v5727_v63 }
0x1c20   :  { %v4336_v31 = vpop.eup %4335  ;;  %4337 = vtanh.f32 %v2532_v5  ;;  %v4068_v55 = vmul.f32 -1.442695, %v2532_v5 }
0x1c21   :  { %2602 = vrot.lane.b32.xlu2 %v4336_v31, %s4682_s28  ;;  %4339 = vpow2.f32 %v4069_v35 }
0x1c26   :  { %v4338_v43 = vpop.eup %4337 }
0x1c27   :  { %2562 = vrot.lane.b32.xlu0 %v4338_v43, %s4682_s28  ;;  %v4340_v62 = vpop.eup %4339 }
0x1c28   :  { %v2580_v29 = vadd.f32 1.0, %v4340_v62  ;;  %v2472_v62 = vmul.f32 %v5737_v6, %v4897_v33 }
0x1c2a   :  { %4341 = vrcp.f32 %v2580_v29  ;;  %v2592_v3 = vand.u32 2147483648, %v2580_v29  ;;  %vm2586_vm11 = vweird.f32 %v2580_v29  ;;  %v2590_v44 = vand.u32 2147483647, %v2580_v29 }
0x1c2b   :  { %4343 = vpow2.f32 %v4068_v55 }
0x1c2c   :  { %v2593_v24 = vor.u32 1.1754944e-38, %v2592_v3  ;;  %vm2591_vm0 = vcmp.eq.f32.partialorder %v2590_v44, 8.507059e+37 }
0x1c2f   :  { %2650 = vrot.lane.b32.xlu0 %v2649_v7, %s4684_s12 }
0x1c30   :  { %v4342_v36 = vpop.eup %4341 }
0x1c31   :  { %v2582_v21 = vmul.f32 %v4342_v36, %v2580_v29  ;;  %vm2587_vm10 = vweird.f32 %v4342_v36  ;;  %v4344_v28 = vpop.eup %4343  ;;  %v2473_v29 = vadd.f32 %v2472_v62, %v5188_v20 }
0x1c32   :  { %vm2588_vm12 = vmor %vm2586_vm11, %vm2587_vm10  ;;  %v2540_v23 = vadd.f32 1.0, %v4344_v28 }
0x1c33   :  { %v2583_v61 = vsub.f32 1.0, %v2582_v21  ;;  %v2598_v21 = vrot.slane %v2473_v29, 2 }
0x1c34   :  { %4345 = vrcp.f32 %v2540_v23  ;;  %v2552_v11 = vand.u32 2147483648, %v2540_v23  ;;  %vm2546_vm2 = vweird.f32 %v2540_v23  ;;  %v2550_v50 = vand.u32 2147483647, %v2540_v23 }
0x1c35   :  { %v2584_v2 = vmul.f32 %v4342_v36, %v2583_v61 }
0x1c36   :  { %v2553_v5 = vor.u32 1.1754944e-38, %v2552_v11  ;;  %vm2551_vm6 = vcmp.eq.f32.partialorder %v2550_v50, 8.507059e+37 }
0x1c37   :  { %v2585_v41 = vadd.f32 %v4342_v36, %v2584_v2 }
0x1c39   :  { %v2589_v59 = vsel %vm2588_vm12, %v4342_v36, %v2585_v41  ;;  %v2468_v36 = vmul.f32 %v5741_v54, %v4893_v30 }
0x1c3a   :  { %v2594_v42 = vsel %vm2591_vm0, %v2593_v24, %v2589_v59  ;;  %v4346_v1 = vpop.eup %4345 }
0x1c3b   :  { %v2542_v39 = vmul.f32 %v4346_v1, %v2540_v23  ;;  %vm2547_vm1 = vweird.f32 %v4346_v1  ;;  %v2469_v55 = vadd.f32 %v2468_v36, %v5202_v25  ;;  %v2600_v61 = vmul.f32 %v2598_v21, %v2594_v42 }
0x1c3c   :  { %vm2548_vm5 = vmor %vm2546_vm2, %vm2547_vm1 }
0x1c3d   :  { %v2543_v34 = vsub.f32 1.0, %v2542_v39  ;;  %v2558_v3 = vrot.slane %v2469_v55, 6 }
0x1c3f   :  { %v2544_v56 = vmul.f32 %v4346_v1, %v2543_v34 }
0x1c41   :  { %v2545_v13 = vadd.f32 %v4346_v1, %v2544_v56 }
0x1c43   :  { %v2549_v58 = vsel %vm2548_vm5, %v4346_v1, %v2545_v13 }
0x1c44   :  { %v2554_v43 = vsel %vm2551_vm6, %v2553_v5, %v2549_v58 }
0x1c45   :  { %v2560_v28 = vmul.f32 %v2558_v3, %v2554_v43 }
0x1c7b   :  { %v2603_v49 = vpop.permute.xlu2 %2602 }
0x1c7c   :  { %v2605_v27 = vmul.f32 %v2603_v49, %v2594_v42 }
0x1c7e   :  { %2607 = vrot.lane.b32.xlu1 %v2605_v27, %s4684_s12 }
0x1c86   :  { %2629 = vrot.lane.b32.xlu1 %v2628_v17, %s4684_s12 }
0x1c99   :  { %v2563_v31 = vpop.permute.xlu0 %2562 }
0x1c9a   :  { %v2565_v7 = vmul.f32 %v2563_v31, %v2554_v43 }
0x1c9c   :  { %2567 = vrot.lane.b32.xlu2 %v2565_v7, %s4684_s12 }
0x1ca1   :  { %v2651_v38 = vpop.permute.xlu0 %2650 }
0x1ca2   :  { %v2653_v35 = vmul.f32 %v2651_v38, %v5185_v18 }
0x1ca4   :  { %2655 = vrot.lane.b32.xlu1 %v2653_v35, %s4680_s27 }
0x1cf0   :  { %v2608_v2 = vpop.permute.xlu1 %2607 }
0x1cf1   :  { %v5798_v41 = vadd.f32 %v2608_v2, %v2600_v61 }
0x1cf3   :  { %4347 = vtanh.f32 %v5798_v41 }
0x1cf6   :  { %v2568_v44 = vpop.permute.xlu2 %2567 }
0x1cf7   :  { %v5801_v59 = vadd.f32 %v2568_v44, %v2560_v28 }
0x1cf8   :  { %v2630_v20 = vpop.permute.xlu1 %2629 }
0x1cf9   :  { %v4348_v6 = vpop.eup %4347  ;;  %4349 = vtanh.f32 %v5801_v59  ;;  %v2632_v25 = vmul.f32 %v2630_v20, %v5195_v22 }
0x1cfa   :  { %2613 = vrot.lane.b32.xlu2 %v4348_v6, %s4682_s28 }
0x1cff   :  { %v4350_v54 = vpop.eup %4349 }
0x1d00   :  { %2573 = vrot.lane.b32.xlu0 %v4350_v54, %s4682_s28 }
0x1d02   :  { %2634 = vrot.lane.b32.xlu2 %v2632_v25, %s4680_s27 }
0x1d0a   :  { %2639 = vrot.lane.b32.xlu2 %v2598_v21, %s4680_s27 }
0x1d16   :  { %v2656_v27 = vpop.permute.xlu1 %2655 }
0x1d54   :  { %v2614_v23 = vpop.permute.xlu2 %2613 }
0x1d55   :  { %v2616_v24 = vmul.f32 %v2614_v23, %v2594_v42 }
0x1d57   :  { %v5810_v49 = vmul.f32 %v2616_v24, %v4897_v33 }
0x1d59   :  { %v2658_v1 = vadd.f32 %v2656_v27, %v5810_v49 }
0x1d5b   :  { %v2664_v17 = vrot.slane %v2658_v1, 2 }
0x1d5c   :  { %v2635_v13 = vpop.permute.xlu2 %2634 }
0x1d5d   :  { %2665 = vrot.lane.b32.xlu1 %v2664_v17, %s4682_s28 }
0x1d64   :  { %v2640_v42 = vpop.permute.xlu2 %2639 }
0x1d65   :  { %v2642_v50 = vmul.f32 %v2640_v42, %v5185_v18 }
0x1d72   :  { %v2574_v39 = vpop.permute.xlu0 %2573 }
0x1d73   :  { %v2576_v34 = vmul.f32 %v2574_v39, %v2554_v43 }
0x1d75   :  { %v5815_v56 = vmul.f32 %v2576_v34, %v4893_v30 }
0x1d77   :  { %v5818_v11 = vadd.f32 %v2635_v13, %v5815_v56 }
0x1d79   :  { %2660 = vrot.lane.b32.xlu0 %v5818_v11, %s4684_s12 }
0x1d81   :  { %2618 = vrot.lane.b32.xlu0 %v2558_v3, %s4680_s27 }
0x1d89   :  { %2644 = vrot.lane.b32.xlu0 %v2642_v50, %s4684_s12 }
0x1dcf   :  { %v2666_v58 = vpop.permute.xlu1 %2665 }
0x1deb   :  { %v2661_v5 = vpop.permute.xlu0 %2660 }
0x1dec   :  { %v2668_v31 = vsel %vm315_vm4, %v2661_v5, %v2666_v58 }
0x1ded   :  { %v2670_v43 = vrot.slane %v2668_v31, 2 }
0x1def   :  { %4070 = vmatmul.msk.f32.vlgmr.msra.gmra.mxu1 %vm731_vm3, %v2670_v43  ;;  %4071 = vmatmul.msk.f32.vlgmr.msra.gmra.mxu2 %vm731_vm3, %v2670_v43 }
0x1df0   :  { %3408 = vmatpush.msra.mxu1 %v5581_v60  ;;  %3428 = vmatpush.msra.mxu2 %v5583_v12 }
0x1df2   :  { %3409 = vmatpush.msra.mxu1 %v5589_v46  ;;  %3429 = vmatpush.msra.mxu2 %v5592_v40 }
0x1df3   :  { %v2619_v61 = vpop.permute.xlu0 %2618 }
0x1df4   :  { %3410 = vmatpush.msra.mxu1 %v5595_v10  ;;  %3430 = vmatpush.msra.mxu2 %v5597_v4  ;;  %v2621_v2 = vmul.f32 %v2619_v61, %v5195_v22 }
0x1df6   :  { %3411 = vmatpush.msra.mxu1 %v5601_v19  ;;  %3431 = vmatpush.msra.mxu2 %v5603_v26 }
0x1df8   :  { %3412 = vmatpush.msra.mxu1 %v5605_v52  ;;  %3432 = vmatpush.msra.mxu2 %v5607_v51 }
0x1dfa   :  { %3413 = vmatpush.msra.mxu1 %v5611_v0  ;;  %3433 = vmatpush.msra.mxu2 %v5617_v14 }
0x1dfc   :  { %3414 = vmatpush.msra.mxu1 %v5623_v37  ;;  %3434 = vmatpush.msra.mxu2 %v5625_v32 }
0x1dfe   :  { %3415 = vmatpush.msra.mxu1 %v5627_v45  ;;  %3435 = vmatpush.msra.mxu2 %v5629_v48 }
0x1e6c   :  { %v2690_v7 = vpop.f32.mrf.mxu1 }
0x1e6d   :  { %v2714_v38 = vrot.slane %v2690_v7, 4 }
0x1e6f   :  { %v2716_v35 = vadd.f32 %v2714_v38, %v5727_v63 }
0x1e71   :  { %4351 = vtanh.f32 %v2716_v35  ;;  %v4072_v3 = vmul.f32 -1.442695, %v2716_v35 }
0x1e72   :  { %v2710_v62 = vpop.f32.mrf.mxu2 }
0x1e73   :  { %v2718_v29 = vrot.slane %v2710_v62, 6 }
0x1e75   :  { %v2720_v36 = vadd.f32 %v2718_v29, %v5730_v15 }
0x1e77   :  { %v4352_v21 = vpop.eup %4351  ;;  %4353 = vtanh.f32 %v2720_v36  ;;  %v4073_v54 = vmul.f32 -1.442695, %v2720_v36 }
0x1e78   :  { %2746 = vrot.lane.b32.xlu2 %v4352_v21, %s4682_s28  ;;  %4355 = vpow2.f32 %v4072_v3 }
0x1e7d   :  { %v4354_v55 = vpop.eup %4353 }
0x1e7e   :  { %2786 = vrot.lane.b32.xlu1 %v4354_v55, %s4682_s28  ;;  %v4356_v28 = vpop.eup %4355 }
0x1e7f   :  { %v2724_v44 = vadd.f32 1.0, %v4356_v28  ;;  %v2812_v28 = vrot.slane %v5818_v11, 6 }
0x1e81   :  { %4357 = vrcp.f32 %v2724_v44  ;;  %v2736_v27 = vand.u32 2147483648, %v2724_v44  ;;  %vm2730_vm8 = vweird.f32 %v2724_v44  ;;  %v2734_v39 = vand.u32 2147483647, %v2724_v44 }
0x1e82   :  { %4359 = vpow2.f32 %v4073_v54  ;;  %v2645_v54 = vpop.permute.xlu0 %2644 }
0x1e83   :  { %v2737_v13 = vor.u32 1.1754944e-38, %v2736_v27  ;;  %vm2735_vm10 = vcmp.eq.f32.partialorder %v2734_v39, 8.507059e+37 }
0x1e86   :  { %2623 = vrot.lane.b32.xlu1 %v2621_v2, %s4684_s12  ;;  %v2617_v2 = vmul.f32 %v5801_v59, %v4893_v30 }
0x1e87   :  { %v4358_v6 = vpop.eup %4357 }
0x1e88   :  { %v2726_v20 = vmul.f32 %v4358_v6, %v2724_v44  ;;  %vm2731_vm7 = vweird.f32 %v4358_v6  ;;  %v4360_v1 = vpop.eup %4359 }
0x1e89   :  { %vm2732_vm9 = vmor %vm2730_vm8, %vm2731_vm7 }
0x1e8a   :  { %v2727_v25 = vsub.f32 1.0, %v2726_v20 }
0x1e8c   :  { %v2728_v23 = vmul.f32 %v4358_v6, %v2727_v25 }
0x1e8e   :  { %2833 = vrot.lane.b32.xlu1 %v2664_v17, %s4684_s12  ;;  %v2729_v24 = vadd.f32 %v4358_v6, %v2728_v23  ;;  %v2764_v17 = vadd.f32 1.0, %v4360_v1  ;;  %v2638_v23 = vmul.f32 %v5798_v41, %v4897_v33 }
0x1e90   :  { %v2733_v34 = vsel %vm2732_vm9, %v4358_v6, %v2729_v24  ;;  %4361 = vrcp.f32 %v2764_v17  ;;  %v2776_v35 = vand.u32 2147483648, %v2764_v17  ;;  %vm2770_vm12 = vweird.f32 %v2764_v17 }
0x1e91   :  { %v2738_v50 = vsel %vm2735_vm10, %v2737_v13, %v2733_v34  ;;  %v2774_v62 = vand.u32 2147483647, %v2764_v17  ;;  %v2647_v24 = vadd.f32 %v2645_v54, %v2638_v23 }
0x1e92   :  { %v2777_v36 = vor.u32 1.1754944e-38, %v2776_v35 }
0x1e93   :  { %vm2775_vm1 = vcmp.eq.f32.partialorder %v2774_v62, 8.507059e+37  ;;  %v2782_v39 = vrot.slane %v2647_v24, 2 }
0x1e96   :  { %v4362_v5 = vpop.eup %4361 }
0x1e97   :  { %v2766_v31 = vmul.f32 %v4362_v5, %v2764_v17  ;;  %vm2771_vm11 = vweird.f32 %v4362_v5 }
0x1e98   :  { %vm2772_vm0 = vmor %vm2770_vm12, %vm2771_vm11 }
0x1e99   :  { %v2767_v43 = vsub.f32 1.0, %v2766_v31 }
0x1e9b   :  { %v2768_v7 = vmul.f32 %v4362_v5, %v2767_v43 }
0x1e9d   :  { %v2769_v38 = vadd.f32 %v4362_v5, %v2768_v7 }
0x1e9f   :  { %v2773_v29 = vsel %vm2772_vm0, %v4362_v5, %v2769_v38 }
0x1ea0   :  { %v2778_v55 = vsel %vm2775_vm1, %v2777_v36, %v2773_v29 }
0x1ea1   :  { %v2784_v11 = vmul.f32 %v2782_v39, %v2778_v55 }
0x1ed2   :  { %v2747_v42 = vpop.permute.xlu2 %2746 }
0x1ed3   :  { %v2749_v58 = vmul.f32 %v2747_v42, %v2738_v50 }
0x1ed5   :  { %2751 = vrot.lane.b32.xlu0 %v2749_v58, %s4684_s12 }
0x1ef0   :  { %v2787_v21 = vpop.permute.xlu1 %2786 }
0x1ef1   :  { %v2789_v61 = vmul.f32 %v2787_v21, %v2778_v55 }
0x1ef3   :  { %2791 = vrot.lane.b32.xlu2 %v2789_v61, %s4684_s12 }
0x1ef8   :  { %v2624_v3 = vpop.permute.xlu1 %2623 }
0x1ef9   :  { %v2626_v44 = vadd.f32 %v2624_v3, %v2617_v2 }
0x1efb   :  { %2813 = vrot.lane.b32.xlu2 %v2812_v28, %s4684_s12  ;;  %v2742_v25 = vrot.slane %v2626_v44, 6 }
0x1efd   :  { %v2744_v27 = vmul.f32 %v2742_v25, %v2738_v50 }
0x1f00   :  { %v2834_v6 = vpop.permute.xlu1 %2833 }
0x1f01   :  { %v2836_v20 = vmul.f32 %v2834_v6, %v5185_v18 }
0x1f03   :  { %2838 = vrot.lane.b32.xlu2 %v2836_v20, %s4680_s27 }
0x1f47   :  { %v2752_v1 = vpop.permute.xlu0 %2751 }
0x1f48   :  { %v5861_v59 = vadd.f32 %v2752_v1, %v2744_v27 }
0x1f4a   :  { %4363 = vtanh.f32 %v5861_v59 }
0x1f4d   :  { %v2792_v34 = vpop.permute.xlu2 %2791 }
0x1f4e   :  { %v5864_v17 = vadd.f32 %v2792_v34, %v2784_v11  ;;  %v2801_v34 = vmul.f32 %v5861_v59, %v4893_v30 }
0x1f50   :  { %v4364_v13 = vpop.eup %4363  ;;  %4365 = vtanh.f32 %v5864_v17 }
0x1f51   :  { %2757 = vrot.lane.b32.xlu1 %v4364_v13, %s4682_s28 }
0x1f55   :  { %v2814_v41 = vpop.permute.xlu2 %2813 }
0x1f56   :  { %v4366_v42 = vpop.eup %4365  ;;  %v2816_v58 = vmul.f32 %v2814_v41, %v5195_v22 }
0x1f57   :  { %2797 = vrot.lane.b32.xlu0 %v4366_v42, %s4682_s28 }
0x1f5d   :  { %v2839_v35 = vpop.permute.xlu2 %2838 }
0x1f5f   :  { %2818 = vrot.lane.b32.xlu0 %v2816_v58, %s4680_s27 }
0x1f67   :  { %2823 = vrot.lane.b32.xlu0 %v2782_v39, %s4680_s27 }
0x1fc3   :  { %v2758_v5 = vpop.permute.xlu1 %2757 }
0x1fc4   :  { %v2760_v7 = vmul.f32 %v2758_v5, %v2738_v50 }
0x1fc6   :  { %v5877_v36 = vmul.f32 %v2760_v7, %v4893_v30 }
0x1fc9   :  { %v2798_v31 = vpop.permute.xlu0 %2797 }
0x1fca   :  { %v2800_v43 = vmul.f32 %v2798_v31, %v2778_v55 }
0x1fcc   :  { %v5873_v38 = vmul.f32 %v2800_v43, %v4897_v33 }
0x1fce   :  { %v2841_v62 = vadd.f32 %v2839_v35, %v5873_v38 }
0x1fd0   :  { %v2847_v29 = vrot.slane %v2841_v62, 6 }
0x1fd1   :  { %v2819_v21 = vpop.permute.xlu0 %2818 }
0x1fd2   :  { %v5880_v61 = vadd.f32 %v2819_v21, %v5877_v36  ;;  %2848 = vrot.lane.b32.xlu2 %v2847_v29, %s4682_s28 }
0x1fd4   :  { %2843 = vrot.lane.b32.xlu1 %v5880_v61, %s4684_s12  ;;  %v2992_v42 = vrot.slane %v5880_v61, 6 }
0x1fd9   :  { %v2824_v50 = vpop.permute.xlu0 %2823 }
0x1fda   :  { %v2826_v55 = vmul.f32 %v2824_v50, %v5185_v18 }
0x1fdc   :  { %2802 = vrot.lane.b32.xlu1 %v2742_v25, %s4680_s27 }
0x1fe4   :  { %2828 = vrot.lane.b32.xlu1 %v2826_v55, %s4684_s12 }
0x202c   :  { %v2849_v2 = vpop.permute.xlu2 %2848 }
0x2046   :  { %v2844_v3 = vpop.permute.xlu1 %2843 }
0x2047   :  { %v2851_v28 = vsel %vm315_vm4, %v2844_v3, %v2849_v2 }
0x2048   :  { %v2853_v44 = vrot.slane %v2851_v28, 4  ;;  %v2822_v28 = vmul.f32 %v5864_v17, %v4897_v33 }
0x204a   :  { %4074 = vmatmul.msk.f32.vlgmr.msra.gmra.mxu3 %vm731_vm3, %v2853_v44  ;;  %4075 = vmatmul.msk.f32.vlgmr.msra.gmra.mxu0 %vm731_vm3, %v2853_v44 }
0x204b   :  { %3591 = vmatpush.msra.mxu3 %v5581_v60  ;;  %3611 = vmatpush.msra.mxu0 %v5583_v12 }
0x204d   :  { %3592 = vmatpush.msra.mxu3 %v5589_v46  ;;  %3612 = vmatpush.msra.mxu0 %v5592_v40 }
0x204f   :  { %3593 = vmatpush.msra.mxu3 %v5595_v10  ;;  %3613 = vmatpush.msra.mxu0 %v5597_v4 }
0x2051   :  { %3594 = vmatpush.msra.mxu3 %v5601_v19  ;;  %3614 = vmatpush.msra.mxu0 %v5603_v26  ;;  %v2803_v19 = vpop.permute.xlu1 %2802 }
0x2052   :  { %v2805_v26 = vmul.f32 %v2803_v19, %v5195_v22 }
0x2053   :  { %3595 = vmatpush.msra.mxu3 %v5605_v52  ;;  %3615 = vmatpush.msra.mxu0 %v5607_v51  ;;  %v3013_v51 = vrot.slane %v2841_v62, 2 }
0x2055   :  { %3596 = vmatpush.msra.mxu3 %v5611_v0  ;;  %3616 = vmatpush.msra.mxu0 %v5617_v14 }
0x2057   :  { %3597 = vmatpush.msra.mxu3 %v5623_v37  ;;  %3617 = vmatpush.msra.mxu0 %v5625_v32 }
0x2059   :  { %3598 = vmatpush.msra.mxu3 %v5627_v45  ;;  %3618 = vmatpush.msra.mxu0 %v5629_v48  ;;  %v2829_v3 = vpop.permute.xlu1 %2828 }
0x205a   :  { %v2831_v44 = vadd.f32 %v2829_v3, %v2822_v28 }
0x20c7   :  { %v2893_v60 = vpop.f32.mrf.mxu0 }
0x20c8   :  { %v2900_v12 = vadd.f32 %v2893_v60, %v5730_v15  ;;  %v2962_v60 = vrot.slane %v2831_v44, 2 }
0x20ca   :  { %4367 = vtanh.f32 %v2900_v12  ;;  %v4077_v0 = vmul.f32 -1.442695, %v2900_v12 }
0x20cd   :  { %v2873_v46 = vpop.f32.mrf.mxu3 }
0x20ce   :  { %v2897_v40 = vrot.slane %v2873_v46, 2 }
0x20d0   :  { %v4368_v10 = vpop.eup %4367  ;;  %v2899_v4 = vadd.f32 %v2897_v40, %v5727_v63 }
0x20d1   :  { %2966 = vrot.lane.b32.xlu2 %v4368_v10, %s4682_s28 }
0x20d2   :  { %4369 = vtanh.f32 %v2899_v4  ;;  %v4076_v63 = vmul.f32 -1.442695, %v2899_v4 }
0x20d3   :  { %4371 = vpow2.f32 %v4077_v0 }
0x20d8   :  { %v4370_v52 = vpop.eup %4369 }
0x20d9   :  { %2807 = vrot.lane.b32.xlu2 %v2805_v26, %s4684_s12  ;;  %2926 = vrot.lane.b32.xlu0 %v4370_v52, %s4682_s28  ;;  %v4372_v14 = vpop.eup %4371 }
0x20da   :  { %v2944_v37 = vadd.f32 1.0, %v4372_v14 }
0x20dc   :  { %4373 = vrcp.f32 %v2944_v37  ;;  %v2956_v20 = vand.u32 2147483648, %v2944_v37  ;;  %vm2950_vm5 = vweird.f32 %v2944_v37  ;;  %v2954_v54 = vand.u32 2147483647, %v2944_v37 }
0x20dd   :  { %4375 = vpow2.f32 %v4076_v63 }
0x20de   :  { %v2957_v24 = vor.u32 1.1754944e-38, %v2956_v20  ;;  %vm2955_vm7 = vcmp.eq.f32.partialorder %v2954_v54, 8.507059e+37 }
0x20e1   :  { %3014 = vrot.lane.b32.xlu2 %v3013_v51, %s4684_s12 }
0x20e2   :  { %v4374_v32 = vpop.eup %4373 }
0x20e3   :  { %v2946_v45 = vmul.f32 %v4374_v32, %v2944_v37  ;;  %vm2951_vm2 = vweird.f32 %v4374_v32  ;;  %v4376_v25 = vpop.eup %4375 }
0x20e4   :  { %vm2952_vm6 = vmor %vm2950_vm5, %vm2951_vm2  ;;  %v2904_v27 = vadd.f32 1.0, %v4376_v25 }
0x20e5   :  { %v2947_v48 = vsub.f32 1.0, %v2946_v45 }
0x20e6   :  { %4377 = vrcp.f32 %v2904_v27  ;;  %v2916_v29 = vand.u32 2147483648, %v2904_v27  ;;  %vm2910_vm9 = vweird.f32 %v2904_v27  ;;  %v2914_v59 = vand.u32 2147483647, %v2904_v27 }
0x20e7   :  { %v2948_v15 = vmul.f32 %v4374_v32, %v2947_v48 }
0x20e8   :  { %v2917_v61 = vor.u32 1.1754944e-38, %v2916_v29  ;;  %vm2915_vm11 = vcmp.eq.f32.partialorder %v2914_v59, 8.507059e+37 }
0x20e9   :  { %v2949_v6 = vadd.f32 %v4374_v32, %v2948_v15 }
0x20eb   :  { %v2953_v23 = vsel %vm2952_vm6, %v4374_v32, %v2949_v6 }
0x20ec   :  { %v2958_v39 = vsel %vm2955_vm7, %v2957_v24, %v2953_v23  ;;  %v4378_v58 = vpop.eup %4377 }
0x20ed   :  { %v2906_v5 = vmul.f32 %v4378_v58, %v2904_v27  ;;  %vm2911_vm8 = vweird.f32 %v4378_v58  ;;  %v2964_v12 = vmul.f32 %v2962_v60, %v2958_v39 }
0x20ee   :  { %vm2912_vm10 = vmor %vm2910_vm9, %vm2911_vm8 }
0x20ef   :  { %v2907_v7 = vsub.f32 1.0, %v2906_v5 }
0x20f1   :  { %v2908_v35 = vmul.f32 %v4378_v58, %v2907_v7 }
0x20f3   :  { %v2909_v62 = vadd.f32 %v4378_v58, %v2908_v35 }
0x20f5   :  { %v2913_v21 = vsel %vm2912_vm10, %v4378_v58, %v2909_v62 }
0x20f6   :  { %v2918_v55 = vsel %vm2915_vm11, %v2917_v61, %v2913_v21 }
0x212b   :  { %v2967_v1 = vpop.permute.xlu2 %2966 }
0x212c   :  { %v2969_v11 = vmul.f32 %v2967_v1, %v2958_v39 }
0x212e   :  { %2971 = vrot.lane.b32.xlu0 %v2969_v11, %s4684_s12 }
0x2133   :  { %v2808_v13 = vpop.permute.xlu2 %2807 }
0x2134   :  { %v2810_v41 = vadd.f32 %v2808_v13, %v2801_v34  ;;  %v5957_v34 = vadd.f32 %v5779_v9, %v2277_v8 }
0x2136   :  { %2993 = vrot.lane.b32.xlu0 %v2992_v42, %s4684_s12  ;;  %v2922_v26 = vrot.slane %v2810_v41, 6 }
0x2138   :  { %v2924_v17 = vmul.f32 %v2922_v26, %v2918_v55 }
0x213b   :  { %v3015_v31 = vpop.permute.xlu2 %3014 }
0x213c   :  { %v3017_v43 = vmul.f32 %v3015_v31, %v5185_v18 }
0x213e   :  { %3019 = vrot.lane.b32.xlu0 %v3017_v43, %s4680_s27 }
0x214b   :  { %v2927_v50 = vpop.permute.xlu0 %2926 }
0x214c   :  { %v2929_v2 = vmul.f32 %v2927_v50, %v2918_v55 }
0x214e   :  { %2931 = vrot.lane.b32.xlu1 %v2929_v2, %s4684_s12 }
0x21a0   :  { %v2972_v46 = vpop.permute.xlu0 %2971 }
0x21a1   :  { %v5924_v40 = vadd.f32 %v2972_v46, %v2964_v12 }
0x21a3   :  { %4379 = vtanh.f32 %v5924_v40 }
0x21a8   :  { %v2994_v4 = vpop.permute.xlu0 %2993 }
0x21a9   :  { %v4380_v10 = vpop.eup %4379  ;;  %v2996_v19 = vmul.f32 %v2994_v4, %v5195_v22 }
0x21aa   :  { %2977 = vrot.lane.b32.xlu1 %v4380_v10, %s4682_s28 }
0x21b0   :  { %v3020_v45 = vpop.permute.xlu0 %3019 }
0x21b2   :  { %2998 = vrot.lane.b32.xlu1 %v2996_v19, %s4680_s27 }
0x21ba   :  { %3003 = vrot.lane.b32.xlu1 %v2962_v60, %s4680_s27 }
0x21c0   :  { %v2932_v52 = vpop.permute.xlu1 %2931 }
0x21c1   :  { %v5931_v51 = vadd.f32 %v2932_v52, %v2924_v17 }
0x21c3   :  { %4381 = vtanh.f32 %v5931_v51 }
0x21c9   :  { %v4382_v0 = vpop.eup %4381 }
0x21ca   :  { %2937 = vrot.lane.b32.xlu2 %v4382_v0, %s4682_s28 }
0x221c   :  { %v2978_v14 = vpop.permute.xlu1 %2977 }
0x221d   :  { %v2980_v37 = vmul.f32 %v2978_v14, %v2958_v39 }
0x221f   :  { %v5936_v32 = vmul.f32 %v2980_v37, %v4897_v33 }
0x2221   :  { %v3022_v48 = vadd.f32 %v3020_v45, %v5936_v32 }
0x2223   :  { %v3028_v63 = vrot.slane %v3022_v48, 2 }
0x2224   :  { %v2938_v15 = vpop.permute.xlu2 %2937  ;;  %v2999_v54 = vpop.permute.xlu1 %2998 }
0x2225   :  { %v2940_v6 = vmul.f32 %v2938_v15, %v2918_v55  ;;  %3029 = vrot.lane.b32.xlu0 %v3028_v63, %s4682_s28 }
0x2227   :  { %v5941_v20 = vmul.f32 %v2940_v6, %v4893_v30  ;;  %v2981_v6 = vmul.f32 %v5931_v51, %v4893_v30 }
0x2229   :  { %v5944_v25 = vadd.f32 %v2999_v54, %v5941_v20 }
0x222b   :  { %3024 = vrot.lane.b32.xlu2 %v5944_v25, %s4684_s12 }
0x222c   :  { %v3004_v23 = vpop.permute.xlu1 %3003 }
0x222d   :  { %v3006_v24 = vmul.f32 %v3004_v23, %v5185_v18  ;;  %v3173_v23 = vrot.slane %v5944_v25, 6  ;;  %v3002_v25 = vmul.f32 %v5924_v40, %v4897_v33 }
0x2233   :  { %2982 = vrot.lane.b32.xlu2 %v2922_v26, %s4680_s27 }
0x223b   :  { %3008 = vrot.lane.b32.xlu2 %v3006_v24, %s4684_s12 }
0x2285   :  { %v3025_v27 = vpop.permute.xlu2 %3024 }
0x228d   :  { %v2983_v7 = vpop.permute.xlu2 %2982 }
0x228e   :  { %v2985_v16 = vmul.f32 %v2983_v7, %v5195_v22 }
0x2297   :  { %v3030_v1 = vpop.permute.xlu0 %3029 }
0x2298   :  { %v3032_v39 = vsel %vm315_vm4, %v3025_v27, %v3030_v1 }
0x2299   :  { %v3034_v11 = vrot.slane %v3032_v39, 6  ;;  %v3009_v39 = vpop.permute.xlu2 %3008 }
0x229b   :  { %4078 = vmatmul.msk.f32.vlgmr.msrb.gmra.mxu1 %vm731_vm3, %v3034_v11  ;;  %4079 = vmatmul.msk.f32.vlgmr.msrb.gmra.mxu2 %vm731_vm3, %v3034_v11 }
0x2318   :  { %v3054_v13 = vpop.f32.mrf.mxu1 }
0x2319   :  { %v3077_v42 = vadd.f32 %v3054_v13, %v5957_v34 }
0x231b   :  { %4383 = vtanh.f32 %v3077_v42  ;;  %v4080_v8 = vmul.f32 -1.442695, %v3077_v42 }
0x231e   :  { %v3074_v41 = vpop.f32.mrf.mxu2 }
0x231f   :  { %v3079_v58 = vrot.slane %v3074_v41, 2 }
0x2321   :  { %v4384_v5 = vpop.eup %4383  ;;  %v3081_v31 = vadd.f32 %v3079_v58, %v5722_v53  ;;  %v3011_v58 = vadd.f32 %v3009_v39, %v3002_v25 }
0x2322   :  { %3107 = vrot.lane.b32.xlu1 %v4384_v5, %s4682_s28 }
0x2323   :  { %4385 = vtanh.f32 %v3081_v31  ;;  %v4081_v9 = vmul.f32 -1.442695, %v3081_v31  ;;  %v3143_v5 = vrot.slane %v3011_v58, 2 }
0x2324   :  { %4387 = vpow2.f32 %v4080_v8 }
0x2325   :  { %4389 = vpow2.f32 %v4081_v9 }
0x2329   :  { %v4386_v43 = vpop.eup %4385 }
0x232a   :  { %3147 = vrot.lane.b32.xlu0 %v4386_v43, %s4682_s28  ;;  %v4388_v35 = vpop.eup %4387 }
0x232b   :  { %v3085_v62 = vadd.f32 1.0, %v4388_v35  ;;  %v4390_v29 = vpop.eup %4389 }
0x232c   :  { %v3125_v59 = vadd.f32 1.0, %v4390_v29 }
0x232d   :  { %4391 = vrcp.f32 %v3085_v62  ;;  %v3097_v60 = vand.u32 2147483648, %v3085_v62  ;;  %vm3091_vm0 = vweird.f32 %v3085_v62  ;;  %v3095_v12 = vand.u32 2147483647, %v3085_v62 }
0x232e   :  { %4393 = vrcp.f32 %v3125_v59  ;;  %v3137_v0 = vand.u32 2147483648, %v3125_v59  ;;  %vm3131_vm6 = vweird.f32 %v3125_v59  ;;  %v3135_v14 = vand.u32 2147483647, %v3125_v59 }
0x232f   :  { %v3098_v4 = vor.u32 1.1754944e-38, %v3097_v60  ;;  %vm3096_vm2 = vcmp.eq.f32.partialorder %v3095_v12, 8.507059e+37 }
0x2330   :  { %v3138_v45 = vor.u32 1.1754944e-38, %v3137_v0  ;;  %vm3136_vm8 = vcmp.eq.f32.partialorder %v3135_v14, 8.507059e+37 }
0x2332   :  { %2987 = vrot.lane.b32.xlu0 %v2985_v16, %s4684_s12 }
0x2333   :  { %v4392_v21 = vpop.eup %4391 }
0x2334   :  { %v3087_v61 = vmul.f32 %v4392_v21, %v3085_v62  ;;  %v4394_v55 = vpop.eup %4393  ;;  %vm3092_vm12 = vweird.f32 %v4392_v21 }
0x2335   :  { %v3127_v3 = vmul.f32 %v4394_v55, %v3125_v59  ;;  %vm3093_vm1 = vmor %vm3091_vm0, %vm3092_vm12  ;;  %vm3132_vm5 = vweird.f32 %v4394_v55 }
0x2336   :  { %v3088_v50 = vsub.f32 1.0, %v3087_v61  ;;  %vm3133_vm7 = vmor %vm3131_vm6, %vm3132_vm5 }
0x2337   :  { %v3128_v44 = vsub.f32 1.0, %v3127_v3 }
0x2338   :  { %v3089_v2 = vmul.f32 %v4392_v21, %v3088_v50 }
0x2339   :  { %v3129_v10 = vmul.f32 %v4394_v55, %v3128_v44 }
0x233a   :  { %3194 = vrot.lane.b32.xlu0 %v3028_v63, %s4684_s12  ;;  %v3090_v28 = vadd.f32 %v4392_v21, %v3089_v2 }
0x233b   :  { %v3130_v52 = vadd.f32 %v4394_v55, %v3129_v10 }
0x233c   :  { %v3094_v46 = vsel %vm3093_vm1, %v4392_v21, %v3090_v28 }
0x233d   :  { %v3099_v26 = vsel %vm3096_vm2, %v3098_v4, %v3094_v46  ;;  %v3134_v37 = vsel %vm3133_vm7, %v4394_v55, %v3130_v52 }
0x233e   :  { %v3139_v63 = vsel %vm3136_vm8, %v3138_v45, %v3134_v37 }
0x233f   :  { %v3145_v31 = vmul.f32 %v3143_v5, %v3139_v63 }
0x2394   :  { %v3108_v19 = vpop.permute.xlu1 %3107 }
0x2395   :  { %v3110_v17 = vmul.f32 %v3108_v19, %v3099_v26 }
0x2397   :  { %3112 = vrot.lane.b32.xlu2 %v3110_v17, %s4684_s12 }
0x239c   :  { %v3148_v48 = vpop.permute.xlu0 %3147 }
0x239d   :  { %v3150_v15 = vmul.f32 %v3148_v48, %v3139_v63 }
0x239f   :  { %3152 = vrot.lane.b32.xlu1 %v3150_v15, %s4684_s12 }
0x23a4   :  { %v2988_v54 = vpop.permute.xlu0 %2987 }
0x23a5   :  { %v2990_v24 = vadd.f32 %v2988_v54, %v2981_v6 }
0x23a7   :  { %3174 = vrot.lane.b32.xlu1 %v3173_v23, %s4684_s12  ;;  %v3103_v11 = vrot.slane %v2990_v24, 6 }
0x23a9   :  { %v3105_v13 = vmul.f32 %v3103_v11, %v3099_v26 }
0x23ac   :  { %v3195_v27 = vpop.permute.xlu0 %3194 }
0x23ad   :  { %v3197_v1 = vmul.f32 %v3195_v27, %v5195_v22 }
0x23af   :  { %3199 = vrot.lane.b32.xlu1 %v3197_v1, %s4680_s27 }
0x23f1   :  { %v3113_v42 = vpop.permute.xlu2 %3112 }
0x23f2   :  { %v5974_v41 = vadd.f32 %v3113_v42, %v3105_v13 }
0x23f4   :  { %4395 = vtanh.f32 %v5974_v41 }
0x23fa   :  { %v4396_v51 = vpop.eup %4395 }
0x23fb   :  { %3118 = vrot.lane.b32.xlu0 %v4396_v51, %s4682_s28 }
0x2411   :  { %v3153_v43 = vpop.permute.xlu1 %3152 }
0x2412   :  { %v5980_v7 = vadd.f32 %v3153_v43, %v3145_v31 }
0x2414   :  { %4397 = vtanh.f32 %v5980_v7 }
0x2419   :  { %v3175_v8 = vpop.permute.xlu1 %3174 }
0x241a   :  { %v4398_v16 = vpop.eup %4397  ;;  %v3177_v9 = vmul.f32 %v3175_v8, %v5185_v18 }
0x241b   :  { %3158 = vrot.lane.b32.xlu2 %v4398_v16, %s4682_s28 }
0x2421   :  { %v3200_v21 = vpop.permute.xlu1 %3199 }
0x2423   :  { %3179 = vrot.lane.b32.xlu2 %v3177_v9, %s4680_s27 }
0x242b   :  { %3184 = vrot.lane.b32.xlu2 %v3143_v5, %s4680_s27 }
0x246d   :  { %v3119_v35 = vpop.permute.xlu0 %3118 }
0x246e   :  { %v3121_v29 = vmul.f32 %v3119_v35, %v3099_v26 }
0x2470   :  { %v5992_v55 = vmul.f32 %v3121_v29, %v4897_v33 }
0x2475   :  { %v3159_v40 = vpop.permute.xlu2 %3158 }
0x2476   :  { %v3161_v62 = vmul.f32 %v3159_v40, %v3139_v63 }
0x2478   :  { %v5988_v59 = vmul.f32 %v3161_v62, %v4893_v30 }
0x247a   :  { %v3202_v61 = vadd.f32 %v3200_v21, %v5988_v59 }
0x247c   :  { %v3208_v50 = vrot.slane %v3202_v61, 6  ;;  %v3376_v48 = vrot.slane %v3202_v61, 2 }
0x247d   :  { %v3180_v2 = vpop.permute.xlu2 %3179 }
0x247e   :  { %v5995_v3 = vadd.f32 %v3180_v2, %v5992_v55  ;;  %3209 = vrot.lane.b32.xlu1 %v3208_v50, %s4682_s28 }
0x2480   :  { %3204 = vrot.lane.b32.xlu0 %v5995_v3, %s4684_s12 }
0x2485   :  { %v3185_v28 = vpop.permute.xlu2 %3184 }
0x2486   :  { %v3187_v44 = vmul.f32 %v3185_v28, %v5195_v22 }
0x2488   :  { %3163 = vrot.lane.b32.xlu0 %v3103_v11, %s4680_s27 }
0x2490   :  { %3189 = vrot.lane.b32.xlu0 %v3187_v44, %s4684_s12  ;;  %v3162_v44 = vmul.f32 %v5974_v41, %v4897_v33 }
0x24f0   :  { %v3210_v60 = vpop.permute.xlu1 %3209 }
0x24f2   :  { %v3205_v12 = vpop.permute.xlu0 %3204 }
0x24f3   :  { %v3212_v46 = vsel %vm315_vm4, %v3205_v12, %v3210_v60  ;;  %v3355_v12 = vrot.slane %v5995_v3, 6 }
0x24f4   :  { %4082 = vmatmul.msk.f32.vlgmr.msrb.gmra.mxu3 %vm731_vm3, %v3212_v46  ;;  %4083 = vmatmul.msk.f32.vlgmr.msrb.gmra.mxu0 %vm731_vm3, %v3212_v46 }
0x24fa   :  { %v3164_v14 = vpop.permute.xlu0 %3163 }
0x24fb   :  { %v3166_v45 = vmul.f32 %v3164_v14, %v5185_v18 }
0x2571   :  { %v3253_v10 = vpop.f32.mrf.mxu0 }
0x2572   :  { %v3261_v4 = vrot.slane %v3253_v10, 4 }
0x2574   :  { %v3263_v19 = vadd.f32 %v3261_v4, %v5722_v53 }
0x2576   :  { %4399 = vtanh.f32 %v3263_v19  ;;  %v4085_v54 = vmul.f32 -1.442695, %v3263_v19  ;;  %v3190_v19 = vpop.permute.xlu0 %3189 }
0x2577   :  { %v3233_v26 = vpop.f32.mrf.mxu3 }
0x2578   :  { %v3257_v17 = vrot.slane %v3233_v26, 6  ;;  %v3183_v26 = vmul.f32 %v5980_v7, %v4893_v30 }
0x257a   :  { %v3259_v52 = vadd.f32 %v3257_v17, %v5957_v34  ;;  %v3192_v17 = vadd.f32 %v3190_v19, %v3183_v26 }
0x257c   :  { %v4400_v0 = vpop.eup %4399  ;;  %4401 = vtanh.f32 %v3259_v52  ;;  %v4084_v63 = vmul.f32 -1.442695, %v3259_v52  ;;  %v3325_v52 = vrot.slane %v3192_v17, 2 }
0x257d   :  { %3329 = vrot.lane.b32.xlu1 %v4400_v0, %s4682_s28 }
0x257e   :  { %4403 = vpow2.f32 %v4084_v63 }
0x2582   :  { %v4402_v37 = vpop.eup %4401 }
0x2583   :  { %3289 = vrot.lane.b32.xlu2 %v4402_v37, %s4682_s28 }
0x2584   :  { %v4404_v15 = vpop.eup %4403 }
0x2585   :  { %3168 = vrot.lane.b32.xlu1 %v3166_v45, %s4684_s12  ;;  %v3267_v6 = vadd.f32 1.0, %v4404_v15 }
0x2587   :  { %4405 = vrcp.f32 %v3267_v6  ;;  %v3279_v42 = vand.u32 2147483648, %v3267_v6  ;;  %vm3273_vm10 = vweird.f32 %v3267_v6  ;;  %v3277_v51 = vand.u32 2147483647, %v3267_v6 }
0x2588   :  { %4407 = vpow2.f32 %v4085_v54 }
0x2589   :  { %v3280_v5 = vor.u32 1.1754944e-38, %v3279_v42  ;;  %vm3278_vm12 = vcmp.eq.f32.partialorder %v3277_v51, 8.507059e+37 }
0x258d   :  { %3377 = vrot.lane.b32.xlu1 %v3376_v48, %s4684_s12  ;;  %v4406_v23 = vpop.eup %4405 }
0x258e   :  { %v3269_v24 = vmul.f32 %v4406_v23, %v3267_v6  ;;  %v4408_v27 = vpop.eup %4407  ;;  %vm3274_vm9 = vweird.f32 %v4406_v23 }
0x258f   :  { %v3307_v39 = vadd.f32 1.0, %v4408_v27  ;;  %vm3275_vm11 = vmor %vm3273_vm10, %vm3274_vm9 }
0x2590   :  { %v3270_v1 = vsub.f32 1.0, %v3269_v24 }
0x2591   :  { %4409 = vrcp.f32 %v3307_v39  ;;  %v3319_v62 = vand.u32 2147483648, %v3307_v39  ;;  %vm3313_vm1 = vweird.f32 %v3307_v39  ;;  %v3317_v29 = vand.u32 2147483647, %v3307_v39 }
0x2592   :  { %v3271_v11 = vmul.f32 %v4406_v23, %v3270_v1 }
0x2593   :  { %v3320_v61 = vor.u32 1.1754944e-38, %v3319_v62  ;;  %vm3318_vm5 = vcmp.eq.f32.partialorder %v3317_v29, 8.507059e+37 }
0x2594   :  { %v3272_v13 = vadd.f32 %v4406_v23, %v3271_v11 }
0x2596   :  { %v3276_v58 = vsel %vm3275_vm11, %v4406_v23, %v3272_v13 }
0x2597   :  { %v4410_v25 = vpop.eup %4409  ;;  %v3281_v16 = vsel %vm3278_vm12, %v3280_v5, %v3276_v58 }
0x2598   :  { %v3309_v31 = vmul.f32 %v4410_v25, %v3307_v39  ;;  %vm3314_vm0 = vweird.f32 %v4410_v25 }
0x2599   :  { %vm3315_vm2 = vmor %vm3313_vm1, %vm3314_vm0 }
0x259a   :  { %v3310_v9 = vsub.f32 1.0, %v3309_v31 }
0x259c   :  { %v3311_v35 = vmul.f32 %v4410_v25, %v3310_v9 }
0x259e   :  { %v3312_v40 = vadd.f32 %v4410_v25, %v3311_v35 }
0x25a0   :  { %v3316_v21 = vsel %vm3315_vm2, %v4410_v25, %v3312_v40 }
0x25a1   :  { %v3321_v2 = vsel %vm3318_vm5, %v3320_v61, %v3316_v21 }
0x25a2   :  { %v3327_v0 = vmul.f32 %v3325_v52, %v3321_v2 }
0x25dd   :  { %v3290_v43 = vpop.permute.xlu2 %3289 }
0x25de   :  { %v3292_v8 = vmul.f32 %v3290_v43, %v3281_v16 }
0x25e0   :  { %3294 = vrot.lane.b32.xlu0 %v3292_v8, %s4684_s12 }
0x25ef   :  { %v3330_v50 = vpop.permute.xlu1 %3329 }
0x25f0   :  { %v3332_v28 = vmul.f32 %v3330_v50, %v3321_v2 }
0x25f2   :  { %3334 = vrot.lane.b32.xlu2 %v3332_v28, %s4684_s12 }
0x25f7   :  { %v3169_v60 = vpop.permute.xlu1 %3168 }
0x25f8   :  { %v3171_v46 = vadd.f32 %v3169_v60, %v3162_v44 }
0x25fa   :  { %3356 = vrot.lane.b32.xlu2 %v3355_v12, %s4684_s12  ;;  %v3285_v41 = vrot.slane %v3171_v46, 6 }
0x25fc   :  { %v3287_v3 = vmul.f32 %v3285_v41, %v3281_v16 }
0x25ff   :  { %v3378_v10 = vpop.permute.xlu1 %3377 }
0x2600   :  { %v3380_v4 = vmul.f32 %v3378_v10, %v5195_v22 }
0x2602   :  { %3382 = vrot.lane.b32.xlu2 %v3380_v4, %s4680_s27 }
0x264c   :  { %v3335_v14 = vpop.permute.xlu2 %3334 }
0x264d   :  { %v6023_v37 = vadd.f32 %v3335_v14, %v3327_v0 }
0x264f   :  { %4411 = vtanh.f32 %v6023_v37 }
0x2652   :  { %v3295_v45 = vpop.permute.xlu0 %3294 }
0x2653   :  { %v6026_v48 = vadd.f32 %v3295_v45, %v3287_v3 }
0x2654   :  { %v3357_v15 = vpop.permute.xlu2 %3356 }
0x2655   :  { %v4412_v63 = vpop.eup %4411  ;;  %4413 = vtanh.f32 %v6026_v48  ;;  %v3359_v6 = vmul.f32 %v3357_v15, %v5185_v18 }
0x2656   :  { %3340 = vrot.lane.b32.xlu0 %v4412_v63, %s4682_s28 }
0x265b   :  { %v4414_v7 = vpop.eup %4413 }
0x265c   :  { %3300 = vrot.lane.b32.xlu1 %v4414_v7, %s4682_s28  ;;  %v3383_v27 = vpop.permute.xlu2 %3382 }
0x265e   :  { %3361 = vrot.lane.b32.xlu0 %v3359_v6, %s4680_s27 }
0x2666   :  { %3366 = vrot.lane.b32.xlu0 %v3325_v52, %s4680_s27 }
0x26c8   :  { %v3341_v54 = vpop.permute.xlu0 %3340 }
0x26c9   :  { %v3343_v23 = vmul.f32 %v3341_v54, %v3321_v2 }
0x26cb   :  { %v6035_v24 = vmul.f32 %v3343_v23, %v4893_v30 }
0x26cd   :  { %v3385_v1 = vadd.f32 %v3383_v27, %v6035_v24  ;;  %v3344_v27 = vmul.f32 %v6026_v48, %v4897_v33 }
0x26ce   :  { %v3301_v39 = vpop.permute.xlu1 %3300 }
0x26cf   :  { %v3391_v11 = vrot.slane %v3385_v1, 2  ;;  %v3303_v13 = vmul.f32 %v3301_v39, %v3281_v16 }
0x26d0   :  { %v3362_v51 = vpop.permute.xlu0 %3361 }
0x26d1   :  { %v6039_v42 = vmul.f32 %v3303_v13, %v4897_v33  ;;  %3392 = vrot.lane.b32.xlu2 %v3391_v11, %s4682_s28 }
0x26d3   :  { %v6043_v25 = vadd.f32 %v3362_v51, %v6039_v42 }
0x26d5   :  { %3387 = vrot.lane.b32.xlu1 %v6043_v25, %s4684_s12 }
0x26d8   :  { %v3367_v58 = vpop.permute.xlu0 %3366 }
0x26d9   :  { %v3369_v5 = vmul.f32 %v3367_v58, %v5195_v22 }
0x26dd   :  { %3345 = vrot.lane.b32.xlu1 %v3285_v41, %s4680_s27 }
0x26e5   :  { %3371 = vrot.lane.b32.xlu1 %v3369_v5, %s4684_s12 }
0x272b   :  { %v3393_v31 = vpop.permute.xlu2 %3392 }
0x2747   :  { %v3388_v43 = vpop.permute.xlu1 %3387 }
0x2748   :  { %v3395_v16 = vsel %vm315_vm4, %v3388_v43, %v3393_v31 }
0x2749   :  { %v3397_v8 = vrot.slane %v3395_v16, 2 }
0x274b   :  { %4086 = vmatmul.msk.f32.vlgmr.msra.gmra.mxu1 %vm731_vm3, %v3397_v8  ;;  %4087 = vmatmul.msk.f32.vlgmr.msra.gmra.mxu2 %vm731_vm3, %v3397_v8 }
0x274f   :  { %v3346_v2 = vpop.permute.xlu1 %3345 }
0x2750   :  { %v3348_v28 = vmul.f32 %v3346_v2, %v5185_v18 }
0x27c8   :  { %v3417_v9 = vpop.f32.mrf.mxu1 }
0x27c9   :  { %v3441_v35 = vrot.slane %v3417_v9, 4 }
0x27cb   :  { %v3443_v40 = vadd.f32 %v3441_v35, %v5957_v34 }
0x27cd   :  { %4415 = vtanh.f32 %v3443_v40  ;;  %v4088_v46 = vmul.f32 -1.442695, %v3443_v40  ;;  %v3365_v40 = vmul.f32 %v6023_v37, %v4893_v30 }
0x27ce   :  { %v3437_v62 = vpop.f32.mrf.mxu2 }
0x27cf   :  { %v3445_v29 = vrot.slane %v3437_v62, 6 }
0x27d1   :  { %v3447_v21 = vadd.f32 %v3445_v29, %v5722_v53 }
0x27d3   :  { %v4416_v61 = vpop.eup %4415  ;;  %4417 = vtanh.f32 %v3447_v21  ;;  %v4089_v44 = vmul.f32 -1.442695, %v3447_v21 }
0x27d4   :  { %3473 = vrot.lane.b32.xlu0 %v4416_v61, %s4682_s28 }
0x27d5   :  { %4419 = vpow2.f32 %v4089_v44 }
0x27d9   :  { %v4418_v50 = vpop.eup %4417 }
0x27da   :  { %3513 = vrot.lane.b32.xlu2 %v4418_v50, %s4682_s28 }
0x27db   :  { %v4420_v60 = vpop.eup %4419 }
0x27dc   :  { %v3491_v12 = vadd.f32 1.0, %v4420_v60 }
0x27de   :  { %4421 = vrcp.f32 %v3491_v12  ;;  %v3503_v14 = vand.u32 2147483648, %v3491_v12  ;;  %vm3497_vm7 = vweird.f32 %v3491_v12  ;;  %v3501_v41 = vand.u32 2147483647, %v3491_v12 }
0x27df   :  { %4423 = vpow2.f32 %v4088_v46 }
0x27e0   :  { %v3504_v63 = vor.u32 1.1754944e-38, %v3503_v14  ;;  %vm3502_vm9 = vcmp.eq.f32.partialorder %v3501_v41, 8.507059e+37 }
0x27e2   :  { %3350 = vrot.lane.b32.xlu2 %v3348_v28, %s4684_s12 }
0x27e4   :  { %v4422_v10 = vpop.eup %4421 }
0x27e5   :  { %v3493_v4 = vmul.f32 %v4422_v10, %v3491_v12  ;;  %v4424_v19 = vpop.eup %4423  ;;  %vm3498_vm6 = vweird.f32 %v4422_v10 }
0x27e6   :  { %v3451_v17 = vadd.f32 1.0, %v4424_v19  ;;  %vm3499_vm8 = vmor %vm3497_vm7, %vm3498_vm6 }
0x27e7   :  { %v3494_v26 = vsub.f32 1.0, %v3493_v4 }
0x27e8   :  { %4425 = vrcp.f32 %v3451_v17  ;;  %v3463_v58 = vand.u32 2147483648, %v3451_v17  ;;  %vm3457_vm11 = vweird.f32 %v3451_v17  ;;  %v3461_v5 = vand.u32 2147483647, %v3451_v17 }
0x27e9   :  { %v3495_v52 = vmul.f32 %v4422_v10, %v3494_v26 }
0x27ea   :  { %3560 = vrot.lane.b32.xlu2 %v3391_v11, %s4684_s12  ;;  %v3539_v11 = vrot.slane %v6043_v25, 6  ;;  %v3464_v16 = vor.u32 1.1754944e-38, %v3463_v58  ;;  %vm3462_vm0 = vcmp.eq.f32.partialorder %v3461_v5, 8.507059e+37  ;;  %v3372_v25 = vpop.permute.xlu1 %3371 }
0x27eb   :  { %v3496_v0 = vadd.f32 %v4422_v10, %v3495_v52  ;;  %v3374_v62 = vadd.f32 %v3372_v25, %v3365_v40 }
0x27ed   :  { %v3500_v45 = vsel %vm3499_vm8, %v4422_v10, %v3496_v0  ;;  %v3509_v29 = vrot.slane %v3374_v62, 2 }
0x27ee   :  { %v4426_v3 = vpop.eup %4425  ;;  %v3505_v6 = vsel %vm3502_vm9, %v3504_v63, %v3500_v45 }
0x27ef   :  { %v3453_v15 = vmul.f32 %v4426_v3, %v3451_v17  ;;  %vm3458_vm10 = vweird.f32 %v4426_v3  ;;  %v3511_v21 = vmul.f32 %v3509_v29, %v3505_v6 }
0x27f0   :  { %vm3459_vm12 = vmor %vm3457_vm11, %vm3458_vm10  ;;  %vm3903_vm11 = vcmask 31744  }
0x27f1   :  { %v3454_v23 = vsub.f32 1.0, %v3453_v15 }
0x27f3   :  { %v3455_v1 = vmul.f32 %v4426_v3, %v3454_v23 }
0x27f5   :  { %v3456_v51 = vadd.f32 %v4426_v3, %v3455_v1 }
0x27f7   :  { %v3460_v31 = vsel %vm3459_vm12, %v4426_v3, %v3456_v51  ;;  %vm3905_vm12 = vcmask 39936  }
0x27f8   :  { %v3465_v9 = vsel %vm3462_vm0, %v3464_v16, %v3460_v31  ;;  %vm3907_vm0 = vcmask 48128  }
0x2834   :  { %v3514_v7 = vpop.permute.xlu2 %3513 }
0x2835   :  { %v3516_v54 = vmul.f32 %v3514_v7, %v3505_v6 }
0x2837   :  { %3518 = vrot.lane.b32.xlu0 %v3516_v54, %s4684_s12 }
0x283c   :  { %v3351_v39 = vpop.permute.xlu2 %3350 }
0x283d   :  { %v3353_v13 = vadd.f32 %v3351_v39, %v3344_v27 }
0x283f   :  { %3540 = vrot.lane.b32.xlu0 %v3539_v11, %s4684_s12  ;;  %v3469_v28 = vrot.slane %v3353_v13, 6 }
0x2841   :  { %v3471_v12 = vmul.f32 %v3469_v28, %v3465_v9 }
0x2844   :  { %v3561_v43 = vpop.permute.xlu2 %3560 }
0x2845   :  { %v3563_v8 = vmul.f32 %v3561_v43, %v5195_v22 }
0x2846   :  { %v3474_v48 = vpop.permute.xlu0 %3473 }
0x2847   :  { %v3476_v35 = vmul.f32 %v3474_v48, %v3465_v9  ;;  %3565 = vrot.lane.b32.xlu0 %v3563_v8, %s4680_s27 }
0x2849   :  { %3478 = vrot.lane.b32.xlu1 %v3476_v35, %s4684_s12 }
0x28a9   :  { %v3519_v61 = vpop.permute.xlu0 %3518 }
0x28aa   :  { %v6070_v50 = vadd.f32 %v3519_v61, %v3511_v21 }
0x28ac   :  { %4427 = vtanh.f32 %v6070_v50 }
0x28b1   :  { %v3541_v44 = vpop.permute.xlu0 %3540 }
0x28b2   :  { %v4428_v2 = vpop.eup %4427  ;;  %v3543_v60 = vmul.f32 %v3541_v44, %v5185_v18 }
0x28b3   :  { %3524 = vrot.lane.b32.xlu1 %v4428_v2, %s4682_s28 }
0x28b9   :  { %v3566_v0 = vpop.permute.xlu0 %3565 }
0x28bb   :  { %3545 = vrot.lane.b32.xlu1 %v3543_v60, %s4680_s27  ;;  %v3479_v46 = vpop.permute.xlu1 %3478 }
0x28bc   :  { %v6076_v37 = vadd.f32 %v3479_v46, %v3471_v12 }
0x28be   :  { %4429 = vtanh.f32 %v6076_v37 }
0x28c3   :  { %3550 = vrot.lane.b32.xlu1 %v3509_v29, %s4680_s27 }
0x28c4   :  { %v4430_v10 = vpop.eup %4429 }
0x28c5   :  { %3484 = vrot.lane.b32.xlu2 %v4430_v10, %s4682_s28 }
0x291f   :  { %v3485_v4 = vpop.permute.xlu2 %3484 }
0x2920   :  { %v3487_v17 = vmul.f32 %v3485_v4, %v3465_v9 }
0x2922   :  { %v6086_v3 = vmul.f32 %v3487_v17, %v4897_v33 }
0x2925   :  { %v3525_v19 = vpop.permute.xlu1 %3524 }
0x2926   :  { %v3527_v26 = vmul.f32 %v3525_v19, %v3505_v6 }
0x2928   :  { %v6082_v52 = vmul.f32 %v3527_v26, %v4893_v30 }
0x292a   :  { %v3568_v14 = vadd.f32 %v3566_v0, %v6082_v52 }
0x292c   :  { %v3574_v41 = vrot.slane %v3568_v14, 6 }
0x292d   :  { %v3546_v45 = vpop.permute.xlu1 %3545 }
0x292e   :  { %v3548_v63 = vadd.f32 %v3546_v45, %v6086_v3  ;;  %3575 = vrot.lane.b32.xlu0 %v3574_v41, %s4682_s28 }
0x2930   :  { %3570 = vrot.lane.b32.xlu2 %v3548_v63, %s4684_s12 }
0x2935   :  { %v3551_v51 = vpop.permute.xlu1 %3550 }
0x2936   :  { %3529 = vrot.lane.b32.xlu0 %v3469_v28, %s4680_s27  ;;  %v3553_v58 = vmul.f32 %v3551_v51, %v5195_v22  ;;  %v3794_v51 = vld [vmem:[#allocation11 + $0x30] sm:$0xff] }
0x298a   :  { %v3571_v15 = vpop.permute.xlu2 %3570 }
0x29a0   :  { %v3576_v7 = vpop.permute.xlu0 %3575 }
0x29a1   :  { %v3578_v6 = vsel %vm315_vm4, %v3571_v15, %v3576_v7  ;;  %v3549_v15 = vmul.f32 %v6070_v50, %v4893_v30 }
0x29a2   :  { %v3580_v54 = vrot.slane %v3578_v6, 4 }
0x29a4   :  { %4090 = vmatmul.msk.f32.vlgmr.msra.gmra.mxu3 %vm731_vm3, %v3580_v54  ;;  %4091 = vmatmul.msk.f32.vlgmr.msra.gmra.mxu0 %vm731_vm3, %v3580_v54 }
0x29a8   :  { %v3530_v31 = vpop.permute.xlu0 %3529 }
0x2a21   :  { %v3620_v23 = vpop.f32.mrf.mxu0 }
0x2a22   :  { %v3627_v27 = vadd.f32 %v3620_v23, %v5722_v53  ;;  %v3532_v53 = vmul.f32 %v3530_v31, %v5185_v18  ;;  %v3789_v31 = vld [vmem:[#allocation11 + $0x8] sm:$0xff] }
0x2a24   :  { %4431 = vtanh.f32 %v3627_v27  ;;  %v4093_v43 = vmul.f32 -1.442695, %v3627_v27 }
0x2a27   :  { %v3600_v1 = vpop.f32.mrf.mxu3 }
0x2a28   :  { %v3624_v39 = vrot.slane %v3600_v1, 2 }
0x2a2a   :  { %v4432_v11 = vpop.eup %4431  ;;  %v3626_v13 = vadd.f32 %v3624_v39, %v5957_v34 }
0x2a2b   :  { %3693 = vrot.lane.b32.xlu2 %v4432_v11, %s4682_s28 }
0x2a2c   :  { %4433 = vtanh.f32 %v3626_v13  ;;  %v4092_v35 = vmul.f32 -1.442695, %v3626_v13 }
0x2a2d   :  { %4435 = vpow2.f32 %v4093_v43 }
0x2a32   :  { %v4434_v5 = vpop.eup %4433 }
0x2a33   :  { %3555 = vrot.lane.b32.xlu2 %v3553_v58, %s4684_s12  ;;  %3653 = vrot.lane.b32.xlu1 %v4434_v5, %s4682_s28  ;;  %v4436_v16 = vpop.eup %4435 }
0x2a34   :  { %v3671_v34 = vadd.f32 1.0, %v4436_v16 }
0x2a36   :  { %4437 = vrcp.f32 %v3671_v34  ;;  %v3683_v40 = vand.u32 2147483648, %v3671_v34  ;;  %vm3677_vm2 = vweird.f32 %v3671_v34  ;;  %v3681_v62 = vand.u32 2147483647, %v3671_v34 }
0x2a37   :  { %4439 = vpow2.f32 %v4092_v35 }
0x2a38   :  { %v3684_v21 = vor.u32 1.1754944e-38, %v3683_v40  ;;  %vm3682_vm6 = vcmp.eq.f32.partialorder %v3681_v62, 8.507059e+37 }
0x2a3b   :  { %3534 = vrot.lane.b32.xlu1 %v3532_v53, %s4684_s12 }
0x2a3c   :  { %v4438_v8 = vpop.eup %4437 }
0x2a3d   :  { %v3673_v48 = vmul.f32 %v4438_v8, %v3671_v34  ;;  %vm3678_vm1 = vweird.f32 %v4438_v8  ;;  %v4440_v18 = vpop.eup %4439 }
0x2a3e   :  { %vm3679_vm5 = vmor %vm3677_vm2, %vm3678_vm1  ;;  %v3631_v61 = vadd.f32 1.0, %v4440_v18  ;;  %vm3909_vm1 = vcmask 56320   ;;  %vm3911_vm2 = vcmask 58368  }
0x2a3f   :  { %v3674_v9 = vsub.f32 1.0, %v3673_v48  ;;  %v3833_v48 = vld [vmem:[#allocation13 + $0x30] sm:$0xff] }
0x2a40   :  { %4441 = vrcp.f32 %v3631_v61  ;;  %v3643_v19 = vand.u32 2147483648, %v3631_v61  ;;  %vm3637_vm8 = vweird.f32 %v3631_v61  ;;  %v3641_v26 = vand.u32 2147483647, %v3631_v61 }
0x2a41   :  { %v3675_v22 = vmul.f32 %v4438_v8, %v3674_v9  ;;  %v3832_v9 = vld [vmem:[#allocation13 + $0x28] sm:$0xff] }
0x2a42   :  { %v3644_v0 = vor.u32 1.1754944e-38, %v3643_v19  ;;  %vm3642_vm10 = vcmp.eq.f32.partialorder %v3641_v26, 8.507059e+37 }
0x2a43   :  { %v3676_v25 = vadd.f32 %v4438_v8, %v3675_v22  ;;  %v3831_v22 = vld [vmem:[#allocation13 + $0x20] sm:$0xff] }
0x2a45   :  { %v3680_v29 = vsel %vm3679_vm5, %v4438_v8, %v3676_v25  ;;  %v3834_v8 = vld [vmem:[#allocation13 + $0x38] sm:$0xff]  ;;  %vm3984_vm5 = vcmask 517120  }
0x2a46   :  { %v3685_v28 = vsel %vm3682_vm6, %v3684_v21, %v3680_v29  ;;  %v4442_v60 = vpop.eup %4441  ;;  %4098 = vmatpush.msrb.mxu2 %v3834_v8 }
0x2a47   :  { %v3633_v12 = vmul.f32 %v4442_v60, %v3631_v61  ;;  %vm3638_vm7 = vweird.f32 %v4442_v60 }
0x2a48   :  { %vm3639_vm9 = vmor %vm3637_vm8, %vm3638_vm7  ;;  %4099 = vmatpush.msrb.mxu2 %v3833_v48 }
0x2a49   :  { %v3634_v46 = vsub.f32 1.0, %v3633_v12 }
0x2a4a   :  { %4100 = vmatpush.msrb.mxu2 %v3832_v9 }
0x2a4b   :  { %v3635_v10 = vmul.f32 %v4442_v60, %v3634_v46 }
0x2a4c   :  { %4101 = vmatpush.msrb.mxu2 %v3831_v22 }
0x2a4d   :  { %v3636_v4 = vadd.f32 %v4442_v60, %v3635_v10 }
0x2a4f   :  { %v3640_v17 = vsel %vm3639_vm9, %v4442_v60, %v3636_v4 }
0x2a50   :  { %v3645_v41 = vsel %vm3642_vm10, %v3644_v0, %v3640_v17 }
0x2a85   :  { %v3694_v2 = vpop.permute.xlu2 %3693 }
0x2a86   :  { %v3696_v44 = vmul.f32 %v3694_v2, %v3685_v28 }
0x2a88   :  { %3698 = vrot.lane.b32.xlu0 %v3696_v44, %s4684_s12 }
0x2a8d   :  { %v3556_v63 = vpop.permute.xlu2 %3555 }
0x2aa5   :  { %v3654_v14 = vpop.permute.xlu1 %3653 }
0x2aa6   :  { %v3656_v45 = vmul.f32 %v3654_v14, %v3645_v41 }
0x2aa8   :  { %3658 = vrot.lane.b32.xlu2 %v3656_v45, %s4684_s12 }
0x2aad   :  { %v3535_v6 = vpop.permute.xlu1 %3534 }
0x2ab0   :  { %3711 = vrot.lane.b32.xlu2 %v5746_v47, %s4684_s12  ;;  %v3558_v47 = vadd.f32 %v3556_v63, %v3549_v15  ;;  %v3830_v63 = vld [vmem:[#allocation13 + $0x18] sm:$0xff]  ;;  %v3829_v15 = vld [vmem:[#allocation13 + $0x10] sm:$0xff] }
0x2ab1   :  { %4102 = vmatpush.msrb.mxu2 %v3830_v63 }
0x2ab2   :  { %v3689_v7 = vrot.slane %v3558_v47, 2  ;;  %v3828_v47 = vld [vmem:[#allocation13 + $0x8] sm:$0xff] }
0x2ab3   :  { %4103 = vmatpush.msrb.mxu2 %v3829_v15 }
0x2ab4   :  { %v3691_v54 = vmul.f32 %v3689_v7, %v3685_v28  ;;  %v3827_v7 = vld [vmem:[#allocation13] sm:$0xff] }
0x2ab5   :  { %4104 = vmatpush.msrb.mxu2 %v3828_v47 }
0x2ab7   :  { %4105 = vmatpush.msrb.mxu2 %v3827_v7 }
0x2ab8   :  { %3724 = vrot.lane.b32.xlu2 %v6082_v52, %s4682_s28  ;;  %v3528_v52 = vmul.f32 %v6076_v37, %v4897_v33 }
0x2ac0   :  { %3738 = vrot.lane.b32.xlu2 %v5941_v20, %s4684_s12  ;;  %v3537_v20 = vadd.f32 %v3535_v6, %v3528_v52 }
0x2ac2   :  { %v3649_v27 = vrot.slane %v3537_v20, 6 }
0x2ac8   :  { %3751 = vrot.lane.b32.xlu2 %v5936_v32, %s4682_s28 }
0x2ad0   :  { %3765 = vrot.lane.b32.xlu2 %v6086_v3, %s4684_s12  ;;  %v3651_v3 = vmul.f32 %v3649_v27, %v3645_v41 }
0x2ad8   :  { %3778 = vrot.lane.b32.xlu2 %v5755_v57, %s4682_s28 }
0x2afa   :  { %v3699_v23 = vpop.permute.xlu0 %3698 }
0x2afb   :  { %v3701_v32 = vadd.f32 %v3699_v23, %v3691_v54  ;;  %v4463_v23 = vld [vmem:[%s6226_s23] sm:$0xff] }
0x2afd   :  { %4443 = vtanh.f32 %v3701_v32 }
0x2b02   :  { %v3659_v1 = vpop.permute.xlu2 %3658 }
0x2b03   :  { %v4444_v39 = vpop.eup %4443  ;;  %v3661_v57 = vadd.f32 %v3659_v1, %v3651_v3 }
0x2b04   :  { %3704 = vrot.lane.b32.xlu0 %v4444_v39, %s4682_s28 }
0x2b05   :  { %4445 = vtanh.f32 %v3661_v57  ;;  %v4464_v57 = vld [vmem:[%s6226_s23 + $0x8] sm:$0xff]  ;;  %s4699_s23 = smov [#allocation14]  }
0x2b06   :  { %s3991_s0 = sshll.u32 %s4699_s23, 4  ;;  %s3992_s0 = int_to_ptr.vmem [resolvable:$true] %s3991_s0 }
0x2b0a   :  { %v3712_v5 = vpop.permute.xlu2 %3711 }
0x2b0b   :  { %v4446_v50 = vpop.eup %4445 }
0x2b0c   :  { %3729 = vrot.lane.b32.xlu0 %v5877_v36, %s4684_s12  ;;  %3664 = vrot.lane.b32.xlu1 %v4446_v50, %s4682_s28 }
0x2b12   :  { %v3725_v53 = vpop.permute.xlu2 %3724 }
0x2b14   :  { %3742 = vrot.lane.b32.xlu0 %v5988_v59, %s4682_s28  ;;  %3720 = vrot.lane.b32.xlu1 %v5815_v56, %s4684_s12  ;;  %v3795_v59 = vld [vmem:[#allocation11 + $0x38] sm:$0xff] }
0x2b15   :  { %3810 = vmatpush.msrb.mxu1 %v3795_v59 }
0x2b17   :  { %3811 = vmatpush.msrb.mxu1 %v3794_v51 }
0x2b1a   :  { %v3739_v16 = vpop.permute.xlu2 %3738 }
0x2b1c   :  { %3733 = vrot.lane.b32.xlu1 %v6035_v24, %s4682_s28  ;;  %v3793_v24 = vld [vmem:[#allocation11 + $0x28] sm:$0xff] }
0x2b1d   :  { %3812 = vmatpush.msrb.mxu1 %v3793_v24 }
0x2b24   :  { %3747 = vrot.lane.b32.xlu1 %v5992_v55, %s4684_s12  ;;  %v3791_v55 = vld [vmem:[#allocation11 + $0x18] sm:$0xff] }
0x2b2c   :  { %3760 = vrot.lane.b32.xlu1 %v5873_v38, %s4682_s28  ;;  %v3792_v38 = vld [vmem:[#allocation11 + $0x20] sm:$0xff] }
0x2b2d   :  { %3813 = vmatpush.msrb.mxu1 %v3792_v38 }
0x2b2f   :  { %3814 = vmatpush.msrb.mxu1 %v3791_v55 }
0x2b76   :  { %v3705_v37 = vpop.permute.xlu0 %3704 }
0x2b77   :  { %v3707_v11 = vmul.f32 %v3705_v37, %v3685_v28 }
0x2b79   :  { %v3709_v36 = vmul.f32 %v3707_v11, %v4893_v30  ;;  %v3790_v30 = vld [vmem:[#allocation11 + $0x10] sm:$0xff] }
0x2b7a   :  { %3815 = vmatpush.msrb.mxu1 %v3790_v30 }
0x2b7b   :  { %3715 = vrot.lane.b32.xlu0 %v3709_v36, %s4682_s28 }
0x2b7c   :  { %3816 = vmatpush.msrb.mxu1 %v3789_v31 }
0x2b7e   :  { %v3665_v13 = vpop.permute.xlu1 %3664 }
0x2b7f   :  { %v3667_v58 = vmul.f32 %v3665_v13, %v3645_v41 }
0x2b81   :  { %v3708_v56 = vmul.f32 %v3667_v58, %v4897_v33  ;;  %v3788_v33 = vld [vmem:[#allocation11] sm:$0xff] }
0x2b82   :  { %3817 = vmatpush.msrb.mxu1 %v3788_v33 }
0x2b83   :  { %3756 = vrot.lane.b32.xlu0 %v6039_v42, %s4684_s12  ;;  %3774 = vrot.lane.b32.xlu1 %v3708_v56, %s4684_s12  ;;  %v3730_v42 = vpop.permute.xlu0 %3729 }
0x2b84   :  { %3849 = vmatpush.msra.mxu1 %v3834_v8 }
0x2b86   :  { %v3721_v43 = vpop.permute.xlu1 %3720  ;;  %3850 = vmatpush.msra.mxu1 %v3833_v48 }
0x2b87   :  { %v3727_v62 = vsel %vm315_vm4, %v3721_v43, %v3725_v53 }
0x2b88   :  { %3851 = vmatpush.msra.mxu1 %v3832_v9 }
0x2b8a   :  { %3852 = vmatpush.msra.mxu1 %v3831_v22  ;;  %v4692_v22 = vmov 3  }
0x2b8b   :  { %3769 = vrot.lane.b32.xlu0 %v5810_v49, %s4682_s28  ;;  %v3743_v35 = vpop.permute.xlu0 %3742  ;;  %v3752_v49 = vpop.permute.xlu2 %3751  ;;  %s4685_s28 = smov 3   ;;  %4144 = vset.pattern.permute.xlu1 %v4692_v22 }
0x2b8c   :  { %v3745_v61 = vsel %vm315_vm4, %v3739_v16, %v3743_v35  ;;  %3853 = vmatpush.msra.mxu1 %v3830_v63 }
0x2b8e   :  { %v3734_v34 = vpop.permute.xlu1 %3733  ;;  %3854 = vmatpush.msra.mxu1 %v3829_v15 }
0x2b8f   :  { %v3736_v29 = vsel %vm315_vm4, %v3730_v42, %v3734_v34 }
0x2b90   :  { %3855 = vmatpush.msra.mxu1 %v3828_v47 }
0x2b92   :  { %3856 = vmatpush.msra.mxu1 %v3827_v7 }
0x2b93   :  { %v3766_v44 = vpop.permute.xlu2 %3765 }
0x2b96   :  { %v3748_v25 = vpop.permute.xlu1 %3747 }
0x2b97   :  { %v3754_v4 = vsel %vm315_vm4, %v3748_v25, %v3752_v49  ;;  %v4693_v49 = vmov 4  }
0x2b98   :  { %4145 = vset.pattern.permute.xlu2 %v4693_v49 }
0x2b9b   :  { %v3779_v26 = vpop.permute.xlu2 %3778 }
0x2b9e   :  { %v3761_v60 = vpop.permute.xlu1 %3760 }
0x2bed   :  { %v3716_v40 = vpop.permute.xlu0 %3715 }
0x2bee   :  { %v3718_v18 = vsel %vm315_vm4, %v3712_v5, %v3716_v40 }
0x2bef   :  { %v3782_v21 = vsel %vm2250_vm13, %v3718_v18, %v3727_v62  ;;  %v4694_v18 = vmov 7  }
0x2bf0   :  { %v3783_v2 = vsel %vm2252_vm14, %v3782_v21, %v3736_v29  ;;  %v4695_v29 = vmov 1   ;;  %v4696_v21 = vmov 2  }
0x2bf1   :  { %v6150_v28 = vsel %vm2254_vm15, %v3783_v2, %v3745_v61  ;;  %v4697_v61 = vmov 5   ;;  %v4698_v2 = vmov 6  }
0x2bf2   :  { %4094 = vmatmul.msk.f32.vlgmr.msrb.gmra.mxu1 %vm731_vm3, %v6150_v28 }
0x2bf5   :  { %v3757_v12 = vpop.permute.xlu0 %3756  ;;  %v3775_v10 = vpop.permute.xlu1 %3774 }
0x2bf6   :  { %v3763_v46 = vsel %vm315_vm4, %v3757_v12, %v3761_v60  ;;  %v3781_v14 = vsel %vm315_vm4, %v3775_v10, %v3779_v26 }
0x2bf7   :  { %v3785_v17 = vsel %vm2250_vm13, %v3754_v4, %v3763_v46  ;;  %vm3897_vm13 = vcmask 7168   ;;  %v3934_v46 = vrot.slane %v6150_v28, 2  ;;  %v3942_v4 = vrot.slane %v6150_v28, 4 }
0x2bfd   :  { %v3770_v19 = vpop.permute.xlu0 %3769 }
0x2bfe   :  { %v3772_v0 = vsel %vm315_vm4, %v3766_v44, %v3770_v19  ;;  %vm3864_vm4 = vcmp.eq.f32.partialorder %v4463_v23, 0.0 }
0x2bff   :  { %v3786_v41 = vsel %vm2252_vm14, %v3785_v17, %v3772_v0  ;;  %vm3899_vm14 = vcmask 15360  }
0x2c00   :  { %v6161_v45 = vsel %vm2254_vm15, %v3786_v41, %v3781_v14  ;;  %vm3901_vm15 = vcmask 23552   ;;  %v3950_v14 = vrot.slane %v6150_v28, 6 }
0x2c01   :  { %4095 = vmatmul.msk.f32.gmra.mxu1 %vm731_vm3, %v6161_v45  ;;  %v3972_v23 = vrot.slane %v6161_v45, 4 }
0x2c6f   :  { %v3819_v6 = vpop.f32.mrf.mxu1 }
0x2c70   :  { %4447 = vtanh.f32 %v3819_v6  ;;  %v3964_v6 = vrot.slane %v6161_v45, 2 }
0x2c76   :  { %v4448_v52 = vpop.eup %4447 }
0x2c77   :  { %4096 = vmatmul.msk.f32.vlgmr.msra.gmra.mxu1 %vm731_vm3, %v4448_v52 }
0x2c7e   :  { %v3822_v20 = vpop.f32.mrf.mxu1 }
0x2c7f   :  { %4449 = vtanh.f32 %v3822_v20 }
0x2c85   :  { %v4450_v54 = vpop.eup %4449 }
0x2c86   :  { %4097 = vmatmul.msk.f32.vlgmr.msrb.gmra.mxu2 %vm731_vm3, %v4450_v54  ;;  %vm3865_vm3 = vcmp.eq.f32.partialorder %v4464_v57, 0.0 }
0x2cf4   :  { %v3858_v32 = vpop.f32.mrf.mxu1 }
0x2cf5   :  { %v3866_v27 = vsel %vm3864_vm4, -1e+10, %v3858_v32 }
0x2cf6   :  { %v3869_v3 = vrot.slane %v3866_v27, 2  ;;  %v3873_v1 = vrot.slane %v3866_v27, 4  ;;  %v3877_v39 = vrot.slane %v3866_v27, 6 }
0x2cf8   :  { %3878 = vrot.lane.b32.xlu2 %v3877_v39, %s4685_s28  ;;  %3874 = vrot.lane.b32.xlu1 %v3873_v1, %s4686_s5 }
0x2cf9   :  { %3870 = vrot.lane.b32.xlu0 %v3869_v3, %s4687_s21  ;;  %v3980_v3 = vrot.slane %v6161_v45, 6 }
0x2d09   :  { %v3861_v50 = vpop.f32.mrf.mxu2 }
0x2d0a   :  { %v3867_v37 = vsel %vm3865_vm3, -1e+10, %v3861_v50 }
0x2d0b   :  { %v3885_v11 = vrot.slane %v3867_v37, 2  ;;  %v3889_v36 = vrot.slane %v3867_v37, 4  ;;  %3882 = vrot.lane.b32.xlu0 %v3867_v37, %s4688_s24  ;;  %v3893_v13 = vrot.slane %v3867_v37, 6 }
0x2d0d   :  { %3890 = vrot.lane.b32.xlu2 %v3889_v36, %s4689_s8  ;;  %3886 = vrot.lane.b32.xlu1 %v3885_v11, %s4690_s20 }
0x2d13   :  { %3894 = vrot.lane.b32.xlu0 %v3893_v13, %s4691_s4 }
0x2d52   :  { %v3879_v24 = vpop.permute.xlu2 %3878 }
0x2d67   :  { %v3891_v33 = vpop.permute.xlu2 %3890 }
0x2d6a   :  { %v3875_v51 = vpop.permute.xlu1 %3874 }
0x2d6b   :  { %v3871_v59 = vpop.permute.xlu0 %3870 }
0x2d6c   :  { %v3898_v58 = vsel %vm3897_vm13, %v3866_v27, %v3871_v59 }
0x2d6d   :  { %v3900_v56 = vsel %vm3899_vm14, %v3898_v58, %v3875_v51 }
0x2d6e   :  { %v3902_v55 = vsel %vm3901_vm15, %v3900_v56, %v3879_v24 }
0x2d7d   :  { %v3883_v38 = vpop.permute.xlu0 %3882 }
0x2d7e   :  { %v3904_v30 = vsel %vm3903_vm11, %v3902_v55, %v3883_v38 }
0x2d7f   :  { %v3887_v5 = vpop.permute.xlu1 %3886 }
0x2d80   :  { %v3906_v31 = vsel %vm3905_vm12, %v3904_v30, %v3887_v5 }
0x2d81   :  { %v3908_v43 = vsel %vm3907_vm0, %v3906_v31, %v3891_v33 }
0x2d85   :  { %v3895_v53 = vpop.permute.xlu0 %3894 }
0x2d86   :  { %v3910_v42 = vsel %vm3909_vm1, %v3908_v43, %v3895_v53 }
0x2d87   :  { %v3912_v16 = vsel %vm3911_vm2, %v3910_v42, -inf }
0x2d88   :  { %3913 = vmax.xlane.f32.xlu1 %v3912_v16 }
0x2dfb   :  { %v3914_v34 = vpop.xlane.xlu1 %3913 }
0x2dfc   :  { %v3915_v8 = vsub.f32 %v3910_v42, %v3914_v34 }
0x2dfe   :  { %v3916_v48 = vmul.f32 1.442695, %v3915_v8 }
0x2e00   :  { %4451 = vpow2.f32 %v3916_v48 }
0x2e06   :  { %v4452_v9 = vpop.eup %4451 }
0x2e07   :  { %v3918_v35 = vsel %vm3911_vm2, %v4452_v9, 0.0 }
0x2e08   :  { %3919 = vadd.xlane.f32.xlu2 %v3918_v35 }
0x2e7b   :  { %v3920_v25 = vpop.xlane.xlu2 %3919 }
0x2e7c   :  { %4453 = vrcp.f32 %v3920_v25 }
0x2e82   :  { %v4454_v40 = vpop.eup %4453 }
0x2e83   :  { %v3922_v62 = vmul.f32 %v4454_v40, %v4452_v9 }
0x2e85   :  { %3955 = vperm.xlu2 %4145, %v3922_v62   ;;  %3947 = vperm.xlu1 %4144, %v3922_v62  }
0x2e86   :  { %3925 = vperm.xlu0 %4139, %v3922_v62  }
0x2e8d   :  { %4148 = vset.pattern.permute.xlu1 %v4694_v18 }
0x2e8e   :  { %4142 = vset.pattern.permute.xlu0 %v4695_v29  ;;  %3977 = vperm.xlu1 %4148, %v3922_v62  }
0x2e8f   :  { %3931 = vperm.xlu0 %4142, %v3922_v62  }
0x2e97   :  { %4143 = vset.pattern.permute.xlu0 %v4696_v21 }
0x2e98   :  { %3939 = vperm.xlu0 %4143, %v3922_v62  }
0x2ea0   :  { %4146 = vset.pattern.permute.xlu0 %v4697_v61 }
0x2ea1   :  { %3961 = vperm.xlu0 %4146, %v3922_v62  }
0x2ea9   :  { %4147 = vset.pattern.permute.xlu0 %v4698_v2 }
0x2eaa   :  { %3969 = vperm.xlu0 %4147, %v3922_v62  }
0x2eb2   :  { %4149 = vset.pattern.permute.xlu0 %v4694_v18 }
0x2edf   :  { %v3956_v47 = vpop.permute.xlu2 %3955 }
0x2ee0   :  { %v3958_v52 = vmul.f32 %v3956_v47, %v6161_v45 }
0x2ef7   :  { %v3948_v0 = vpop.permute.xlu1 %3947 }
0x2ef8   :  { %v3926_v44 = vpop.permute.xlu0 %3925  ;;  %v3952_v15 = vmul.f32 %v3950_v14, %v3948_v0 }
0x2ef9   :  { %v3928_v19 = vmul.f32 %v3926_v44, %v6150_v28 }
0x2f00   :  { %v3978_v32 = vpop.permute.xlu1 %3977 }
0x2f01   :  { %v3932_v60 = vpop.permute.xlu0 %3931  ;;  %v3982_v28 = vmul.f32 %v3980_v3, %v3978_v32 }
0x2f02   :  { %v3936_v10 = vmul.f32 %v3934_v46, %v3932_v60 }
0x2f04   :  { %v3937_v17 = vadd.f32 %v3936_v10, %v3928_v19 }
0x2f0a   :  { %v3940_v12 = vpop.permute.xlu0 %3939 }
0x2f0b   :  { %v3944_v26 = vmul.f32 %v3942_v4, %v3940_v12 }
0x2f0d   :  { %v3945_v41 = vadd.f32 %v3944_v26, %v3937_v17 }
0x2f0f   :  { %v3953_v7 = vadd.f32 %v3952_v15, %v3945_v41 }
0x2f11   :  { %v3959_v54 = vadd.f32 %v3958_v52, %v3953_v7 }
0x2f13   :  { %v3962_v63 = vpop.permute.xlu0 %3961 }
0x2f14   :  { %v3966_v20 = vmul.f32 %v3964_v6, %v3962_v63 }
0x2f16   :  { %v3967_v1 = vadd.f32 %v3966_v20, %v3959_v54 }
0x2f1c   :  { %v3970_v27 = vpop.permute.xlu0 %3969 }
0x2f1d   :  { %v3974_v39 = vmul.f32 %v3972_v23, %v3970_v27 }
0x2f1f   :  { %v3975_v57 = vadd.f32 %v3974_v39, %v3967_v1 }
0x2f21   :  { %v3983_v50 = vadd.f32 %v3982_v28, %v3975_v57 }
0x2f23   :  { %3985 = vst.msk [vmem:[#allocation14] sm:$0x3] %vm3984_vm5, %v3983_v50 }
0x2f24   :  { %3996 = dma.vmem_to_hbm [thread:$0]  %s3992_s0, 32, %s3994_s9, [#allocation4]  }
0x2f25   :  { %4665 = dma.done.wait [#allocation4], 32  }
0x2f26   :  { %4666 = vsyncadd [#allocation4], 4294967264 }
0x2f27   :  { %4001 = vsyncpa [#allocation3], 1 }
0x2f28   :  { %4002 = vsyncpa [#allocation6], 1 }
0x2f29   :  { %4003 = vsyncpa [#allocation9], 1 }
0x2f2a   :  { %4004 = vsyncpa [#allocation12], 1 }
0x2f2b   :  { %4005 = vsyncpa [#allocation4], 1 }

</bundles_post_ra>
